<compile_context>
chip_gen: v6e
topology: v6e:2x2x1
jax: 0.10.0
libtpu: 0.0.40
codegen_flags: <defaults>
</compile_context>

<pallas_src>
import functools

import jax
import jax.numpy as jnp
from jax.experimental import pallas as pl
from jax.experimental.pallas import tpu as pltpu

MAX_LOGSTD = 10.0
LANE = 128
_VMEM_LIMIT = 32 * 1024 * 1024  # safe on v5e/v6e/v7x


def _round_up(x, m):
    return ((x + m - 1) // m) * m


def _pad2(a, rows, cols):
    r, c = a.shape
    return jnp.pad(a, ((0, rows - r), (0, cols - c)))


# --------------------------- Pallas kernels ---------------------------------

def _fused_gcn_encoder_kernel(a_ref, x_ref, w1_ref, b1_ref, w2_ref, b2_ref, o_ref):
    # h  = relu(A @ (X @ W1) + b1)
    # out = A @ (h @ [Wmu | Wls]) + [bmu | bls]      (single fused kernel)
    xw = jnp.dot(x_ref[...], w1_ref[...], preferred_element_type=jnp.float32)
    h = jnp.dot(a_ref[...], xw, preferred_element_type=jnp.float32) + b1_ref[...]
    h = jnp.maximum(h, 0.0)
    hw = jnp.dot(h, w2_ref[...], preferred_element_type=jnp.float32)
    o_ref[...] = jnp.dot(a_ref[...], hw, preferred_element_type=jnp.float32) + b2_ref[...]


def fused_gcn_encoder(a_pad, xc_pad, w1, b1, w2, b2):
    # TODO(synk): whole-array VMEM residency; for very large N this encoder
    # would need row/col tiling of A with an accumulator grid.
    n_pad = a_pad.shape[0]
    vmem = pl.BlockSpec(memory_space=pltpu.MemorySpace.VMEM)
    return pl.pallas_call(
        _fused_gcn_encoder_kernel,
        out_shape=jax.ShapeDtypeStruct((n_pad, w2.shape[1]), jnp.float32),
        in_specs=[vmem] * 6,
        out_specs=vmem,
        compiler_params=pltpu.CompilerParams(vmem_limit_bytes=_VMEM_LIMIT),
    )(a_pad, xc_pad, w1, b1, w2, b2)


def _gravity_edge_kernel(zi_ref, zj_ref, mass_ref, o_ref, *, gravity_lambda, eps):
    # Gravity-inspired link decoder (normalize=True):
    #   zhat = z_emb / max(||z_emb||, eps)
    #   dist2[i,j] = ||zhat_i - zhat_j||^2 = max(2 - 2 * <zhat_i, zhat_j>, 0)
    #   A_hat[i,j] = sigmoid(m_j - lambda * log(dist2 + eps))
    zi = zi_ref[...]
    zj = zj_ref[...]
    zi = zi * jax.lax.rsqrt(jnp.maximum(jnp.sum(zi * zi, axis=-1, keepdims=True), eps))
    zj = zj * jax.lax.rsqrt(jnp.maximum(jnp.sum(zj * zj, axis=-1, keepdims=True), eps))
    gram = jax.lax.dot_general(zi, zj, (((1,), (1,)), ((), ())),
                               preferred_element_type=jnp.float32)
    dist2 = jnp.maximum(2.0 - 2.0 * gram, 0.0)
    logits = mass_ref[...] - gravity_lambda * jnp.log(dist2 + eps)
    o_ref[...] = jax.nn.sigmoid(logits)


def gravity_edge_decoder(z_emb_pad, mass_row, gravity_lambda=10.0, eps=1e-8):
    n_pad, ze_pad = z_emb_pad.shape
    tile = 256 if n_pad % 256 == 0 else 128
    grid = (n_pad // tile, n_pad // tile)
    return pl.pallas_call(
        functools.partial(_gravity_edge_kernel,
                          gravity_lambda=gravity_lambda, eps=eps),
        out_shape=jax.ShapeDtypeStruct((n_pad, n_pad), jnp.float32),
        grid=grid,
        in_specs=[
            pl.BlockSpec((tile, ze_pad), lambda i, j: (i, 0)),   # row block of z
            pl.BlockSpec((tile, ze_pad), lambda i, j: (j, 0)),   # col block of z
            pl.BlockSpec((1, tile), lambda i, j: (0, j)),        # mass (row vector)
        ],
        out_specs=pl.BlockSpec((tile, tile), lambda i, j: (i, j)),
        compiler_params=pltpu.CompilerParams(
            dimension_semantics=("parallel", "parallel"),
            vmem_limit_bytes=_VMEM_LIMIT),
    )(z_emb_pad, z_emb_pad, mass_row)


def _fc_decoder_kernel(*refs, num_layers):
    # Chained Linear -> BN(eval, folded) -> ReLU -> Dropout(eval=no-op) layers.
    h = refs[0][...]
    for i in range(num_layers):
        w = refs[1 + 2 * i][...]
        b = refs[2 + 2 * i][...]
        h = jnp.dot(h, w, preferred_element_type=jnp.float32) + b
        if i < num_layers - 1:
            h = jnp.maximum(h, 0.0)
    refs[-1][...] = h


def fc_decoder(hz_pad, ws, bs):
    n_pad, d0 = hz_pad.shape
    num_layers = len(ws)
    tile = 256 if n_pad % 256 == 0 else 128
    grid = (n_pad // tile,)

    in_specs = [pl.BlockSpec((tile, d0), lambda i: (i, 0))]
    operands = [hz_pad]
    for w, b in zip(ws, bs):
        in_specs.append(pl.BlockSpec(w.shape, lambda i: (0, 0)))   # VMEM-resident
        in_specs.append(pl.BlockSpec(b.shape, lambda i: (0, 0)))
        operands += [w, b]
    out_dim = ws[-1].shape[1]

    return pl.pallas_call(
        functools.partial(_fc_decoder_kernel, num_layers=num_layers),
        out_shape=jax.ShapeDtypeStruct((n_pad, out_dim), jnp.float32),
        grid=grid,
        in_specs=in_specs,
        out_specs=pl.BlockSpec((tile, out_dim), lambda i: (i, 0)),
        compiler_params=pltpu.CompilerParams(
            dimension_semantics=("parallel",),
            vmem_limit_bytes=_VMEM_LIMIT),
    )(*operands)


# --------------------------- glue (plain JAX) --------------------------------

def build_norm_adj(edge_index, edge_weight, n):
    """Dense GCN-normalized adjacency: D^-1/2 (A + I) D^-1/2 (data-dependent
    scatter, kept in plain JAX)."""
    a = jnp.zeros((n, n), jnp.float32)
    a = a.at[edge_index[0], edge_index[1]].add(edge_weight.astype(jnp.float32))
    a = a + jnp.eye(n, dtype=jnp.float32)
    deg = jnp.sum(a, axis=1)
    d_inv_sqrt = jax.lax.rsqrt(jnp.maximum(deg, 1e-12))
    return a * d_inv_sqrt[:, None] * d_inv_sqrt[None, :]


def init_params(key, feature_dim, hidden_dim, z_dim, cond_dim, fc_layer_sizes):
    """Deterministic parameter init matching the module's layer shapes."""
    def dense(k, fan_in, fan_out):
        return 0.1 * jax.random.normal(k, (fan_in, fan_out), jnp.float32)

    keys = jax.random.split(key, 16)
    p = {}
    enc_in = feature_dim + cond_dim
    p["enc_w1"] = dense(keys[0], enc_in, hidden_dim)
    p["enc_b1"] = jnp.zeros((1, hidden_dim), jnp.float32)
    p["enc_wmu"] = dense(keys[1], hidden_dim, z_dim)
    p["enc_bmu"] = jnp.zeros((1, z_dim), jnp.float32)
    p["enc_wls"] = dense(keys[2], hidden_dim, z_dim)
    p["enc_bls"] = jnp.zeros((1, z_dim), jnp.float32)

    # FC feature decoder: [z+cond] -> fc_layer_sizes... -> feature_dim
    dims = [z_dim + cond_dim] + list(fc_layer_sizes) + [feature_dim]
    bn_eps = 1e-5
    p["dec_ws"], p["dec_bs"] = [], []
    for i in range(len(dims) - 1):
        w = dense(keys[3 + i], dims[i], dims[i + 1])
        b = jnp.zeros((1, dims[i + 1]), jnp.float32)
        if i < len(dims) - 2:
            # Fold eval-mode BatchNorm (gamma=1, beta=0, mean=0, var=1) into the linear.
            scale = 1.0 / jnp.sqrt(1.0 + bn_eps)
            w = w * scale
            b = b * scale
        p["dec_ws"].append(w)
        p["dec_bs"].append(b)
    return p


def velofusion_forward(params, x, edge_index, edge_weight, cond_num, *,
                       cond_dim, gravity_lambda=10.0):
    n, feature_dim = x.shape
    hidden_dim = params["enc_w1"].shape[1]
    z_dim = params["enc_wmu"].shape[1]

    n_pad = _round_up(n, LANE)
    enc_in_pad = _round_up(feature_dim + cond_dim, LANE)
    h_pad = _round_up(hidden_dim, LANE)
    z_pad = _round_up(z_dim, LANE)

    # ---- inputs (padded, lane-dense) ----
    a_norm = build_norm_adj(edge_index, edge_weight, n)
    a_padded = _pad2(a_norm, n_pad, n_pad)

    onehot = jnp.broadcast_to(
        jax.nn.one_hot(cond_num, cond_dim, dtype=jnp.float32)[None, :],
        (n, cond_dim))
    xc = jnp.concatenate([x.astype(jnp.float32), onehot], axis=1)
    xc_pad = _pad2(xc, n_pad, enc_in_pad)

    w1 = _pad2(params["enc_w1"], enc_in_pad, h_pad)
    b1 = _pad2(params["enc_b1"], 1, h_pad)
    # mu / logstd weights concatenated -> single second-stage matmul.
    w2 = jnp.concatenate([_pad2(params["enc_wmu"], h_pad, z_pad),
                          _pad2(params["enc_wls"], h_pad, z_pad)], axis=1)
    b2 = jnp.concatenate([_pad2(params["enc_bmu"], 1, z_pad),
                          _pad2(params["enc_bls"], 1, z_pad)], axis=1)

    # --- GiEncoder (conditional GCN encoder), single fused kernel ---
    enc_out = fused_gcn_encoder(a_padded, xc_pad, w1, b1, w2, b2)
    z_mu = enc_out[:n, :z_dim]
    z_logstd = jnp.minimum(enc_out[:n, z_pad:z_pad + z_dim], MAX_LOGSTD)

    # reparametrize: eval path (z = mu); see TODO(synk) at top for training noise.
    z = z_mu

    # --- GiEdgePredictor.forward_all (gravity decoder over all node pairs) ---
    # z = [embedding | mass]; slice in the wrapper, pad embedding to 128 lanes.
    z_full_pad = enc_out[:, :z_pad]                                    # (n_pad, z_pad)
    z_emb_pad = jnp.pad(z_full_pad[:, :z_dim - 1],
                        ((0, 0), (0, z_pad - (z_dim - 1))))
    mass_row = z_full_pad[:, z_dim - 1:z_dim].T                        # (1, n_pad)
    adj_full = gravity_edge_decoder(z_emb_pad, mass_row,
                                    gravity_lambda=gravity_lambda)
    adj_pred = adj_full[:n, :n]

    # --- FCDecoder (conditional MLP), single fused kernel ---
    hz = jnp.concatenate([z, onehot], axis=1)
    d0_pad = _round_up(z_dim + cond_dim, LANE)
    hz_pad = _pad2(hz, n_pad, d0_pad)
    pdims = [d0_pad] + [_round_up(w.shape[1], LANE) for w in params["dec_ws"]]
    ws = [_pad2(w, pdims[i], pdims[i + 1])
          for i, w in enumerate(params["dec_ws"])]
    bs = [_pad2(b, 1, pdims[i + 1])
          for i, b in enumerate(params["dec_bs"])]
    fc_out = fc_decoder(hz_pad, ws, bs)
    x_pred = fc_out[:n, :feature_dim]

    return x_pred, adj_pred, z_mu, z_logstd


# --------------------------------- main ---------------------------------------

if __name__ == "__main__":
    key = jax.random.PRNGKey(0)
    k_x, k_src, k_dst, k_w, k_p = jax.random.split(key, 5)

    # Small shapes consistent with the module's forward (N nodes, graph features).
    N, FEATURE_DIM, HIDDEN_DIM, Z_DIM, COND_DIM = 8, 32, 16, 8, 4
    FC_LAYER_SIZES = [100, 500, 800]
    E = 16

    x = jax.random.normal(k_x, (N, FEATURE_DIM), jnp.float32)
    edge_index = jnp.stack([
        jax.random.randint(k_src, (E,), 0, N),
        jax.random.randint(k_dst, (E,), 0, N),
    ])
    edge_weight = jax.random.uniform(k_w, (E,), minval=0.1, maxval=1.0)
    cond_num = jnp.int32(2)

    params = init_params(k_p, FEATURE_DIM, HIDDEN_DIM, Z_DIM, COND_DIM,
                         FC_LAYER_SIZES)

    forward = jax.jit(functools.partial(
        velofusion_forward, cond_dim=COND_DIM, gravity_lambda=10.0))

    x_pred, adj_pred, z_mu, z_logstd = forward(
        params, x, edge_index, edge_weight, cond_num)
    jax.block_until_ready((x_pred, adj_pred, z_mu, z_logstd))

    assert x_pred.shape == (N, FEATURE_DIM)
    assert adj_pred.shape == (N, N)
    assert z_mu.shape == (N, Z_DIM) and z_logstd.shape == (N, Z_DIM)
    assert bool(jnp.all(jnp.isfinite(x_pred)))
    assert bool(jnp.all(jnp.isfinite(z_mu))) and bool(jnp.all(jnp.isfinite(z_logstd)))
    assert bool(jnp.all((adj_pred >= 0.0) & (adj_pred <= 1.0)))
    print("KERNEL_OK")
</pallas_src>

<mosaic_0001>
module attributes {stable_mosaic.version = 11 : i64} {
  func.func private @main(%arg0: i32) attributes {dimension_semantics = [#tpu.dimension_semantics<core_parallel>], iteration_bounds = array<i64: 2>, tpu.core_type = #tpu.core_type<sc_scalar_subcore>, window_params = []} {
    return
  }
}

module attributes {stable_mosaic.version = 11 : i64} {
  func.func private @main(%arg0: i32) attributes {dimension_semantics = [#tpu.dimension_semantics<core_parallel>], iteration_bounds = array<i64: 2>, tpu.core_type = #tpu.core_type<sc_scalar_subcore>, window_params = []} {
    return
  }
}

module attributes {stable_mosaic.version = 11 : i64} {
  func.func @_fused_gcn_encoder_kernel(%arg0: memref<128x128xf32, #tpu.memory_space<vmem>>, %arg1: memref<128x128xf32, #tpu.memory_space<vmem>>, %arg2: memref<128x128xf32, #tpu.memory_space<vmem>>, %arg3: memref<1x128xf32, #tpu.memory_space<vmem>>, %arg4: memref<128x256xf32, #tpu.memory_space<vmem>>, %arg5: memref<1x256xf32, #tpu.memory_space<vmem>>, %arg6: memref<128x256xf32, #tpu.memory_space<vmem>>) attributes {dimension_semantics = [], scalar_prefetch = 0 : i64, scratch_operands = 0 : i64, tpu.core_type = #tpu.core_type<tc>} {
    %c0 = arith.constant 0 : index
    %c0_0 = arith.constant 0 : index
    %0 = vector.load %arg1[%c0, %c0_0] : memref<128x128xf32, #tpu.memory_space<vmem>>, vector<128x128xf32>
    %c0_1 = arith.constant 0 : index
    %c0_2 = arith.constant 0 : index
    %1 = vector.load %arg2[%c0_1, %c0_2] : memref<128x128xf32, #tpu.memory_space<vmem>>, vector<128x128xf32>
    %cst = arith.constant dense<0.000000e+00> : vector<128x128xf32>
    %2 = tpu.matmul %0, %1, %cst {dimension_numbers = #tpu.dot_dimension_numbers<[1], [0], [0], [1], [0, 0, 1, 1], [], []>} : vector<128x128xf32>, vector<128x128xf32>, vector<128x128xf32> -> vector<128x128xf32>
    %c0_3 = arith.constant 0 : index
    %c0_4 = arith.constant 0 : index
    %3 = vector.load %arg0[%c0_3, %c0_4] : memref<128x128xf32, #tpu.memory_space<vmem>>, vector<128x128xf32>
    %cst_5 = arith.constant dense<0.000000e+00> : vector<128x128xf32>
    %4 = tpu.matmul %3, %2, %cst_5 {dimension_numbers = #tpu.dot_dimension_numbers<[1], [0], [0], [1], [0, 0, 1, 1], [], []>} : vector<128x128xf32>, vector<128x128xf32>, vector<128x128xf32> -> vector<128x128xf32>
    %c0_6 = arith.constant 0 : index
    %c0_7 = arith.constant 0 : index
    %5 = vector.load %arg3[%c0_6, %c0_7] : memref<1x128xf32, #tpu.memory_space<vmem>>, vector<1x128xf32>
    %6 = vector.broadcast %5 : vector<1x128xf32> to vector<128x128xf32>
    %7 = arith.addf %4, %6 : vector<128x128xf32>
    %cst_8 = arith.constant 0.000000e+00 : f32
    %8 = vector.broadcast %cst_8 : f32 to vector<128x128xf32>
    %9 = arith.maximumf %7, %8 : vector<128x128xf32>
    %c0_9 = arith.constant 0 : index
    %c0_10 = arith.constant 0 : index
    %10 = vector.load %arg4[%c0_9, %c0_10] : memref<128x256xf32, #tpu.memory_space<vmem>>, vector<128x256xf32>
    %cst_11 = arith.constant dense<0.000000e+00> : vector<128x256xf32>
    %11 = tpu.matmul %9, %10, %cst_11 {dimension_numbers = #tpu.dot_dimension_numbers<[1], [0], [0], [1], [0, 0, 1, 1], [], []>} : vector<128x128xf32>, vector<128x256xf32>, vector<128x256xf32> -> vector<128x256xf32>
    %c0_12 = arith.constant 0 : index
    %c0_13 = arith.constant 0 : index
    %12 = vector.load %arg0[%c0_12, %c0_13] : memref<128x128xf32, #tpu.memory_space<vmem>>, vector<128x128xf32>
    %cst_14 = arith.constant dense<0.000000e+00> : vector<128x256xf32>
    %13 = tpu.matmul %12, %11, %cst_14 {dimension_numbers = #tpu.dot_dimension_numbers<[1], [0], [0], [1], [0, 0, 1, 1], [], []>} : vector<128x128xf32>, vector<128x256xf32>, vector<128x256xf32> -> vector<128x256xf32>
    %c0_15 = arith.constant 0 : index
    %c0_16 = arith.constant 0 : index
    %14 = vector.load %arg5[%c0_15, %c0_16] : memref<1x256xf32, #tpu.memory_space<vmem>>, vector<1x256xf32>
    %15 = vector.broadcast %14 : vector<1x256xf32> to vector<128x256xf32>
    %16 = arith.addf %13, %15 : vector<128x256xf32>
    %c0_17 = arith.constant 0 : index
    %c0_18 = arith.constant 0 : index
    %17 = vector.load %arg6[%c0_17, %c0_18] : memref<128x256xf32, #tpu.memory_space<vmem>>, vector<128x256xf32>
    tpu.vector_store %arg6[%c0_17, %c0_18], %16 {strides = array<i32>} : memref<128x256xf32, #tpu.memory_space<vmem>>, vector<128x256xf32>,
    return
  }
}

module attributes {stable_mosaic.version = 11 : i64} {
  func.func @_gravity_edge_kernel(%arg0: i32, %arg1: i32, %arg2: memref<128x128xf32, #tpu.memory_space<vmem>>, %arg3: memref<128x128xf32, #tpu.memory_space<vmem>>, %arg4: memref<1x128xf32, #tpu.memory_space<vmem>>, %arg5: memref<128x128xf32, #tpu.memory_space<vmem>>) attributes {dimension_semantics = [#tpu.dimension_semantics<parallel>, #tpu.dimension_semantics<parallel>], iteration_bounds = array<i64: 1, 1>, scalar_prefetch = 0 : i64, scratch_operands = 0 : i64, tpu.core_type = #tpu.core_type<tc>, window_params = [{transform_indices = @transform_0, window_bounds = array<i64: 128, 128>}, {transform_indices = @transform_1, window_bounds = array<i64: 128, 128>}, {transform_indices = @transform_2, window_bounds = array<i64: 1, 128>}, {transform_indices = @transform_3, window_bounds = array<i64: 128, 128>}]} {
    %c0 = arith.constant 0 : index
    %c0_0 = arith.constant 0 : index
    %0 = vector.load %arg2[%c0, %c0_0] : memref<128x128xf32, #tpu.memory_space<vmem>>, vector<128x128xf32>
    %c0_1 = arith.constant 0 : index
    %c0_2 = arith.constant 0 : index
    %1 = vector.load %arg3[%c0_1, %c0_2] : memref<128x128xf32, #tpu.memory_space<vmem>>, vector<128x128xf32>
    %2 = arith.mulf %0, %0 : vector<128x128xf32>
    %cst = arith.constant dense<0.000000e+00> : vector<128xf32>
    %3 = vector.multi_reduction <add>, %2, %cst [1] : vector<128x128xf32> to vector<128xf32>
    %4 = vector.shape_cast %3 : vector<128xf32> to vector<128x1xf32>
    %cst_3 = arith.constant 9.99999993E-9 : f32
    %5 = vector.broadcast %cst_3 : f32 to vector<128x1xf32>
    %6 = arith.maximumf %4, %5 : vector<128x1xf32>
    %7 = math.rsqrt %6 : vector<128x1xf32>
    %8 = vector.broadcast %7 : vector<128x1xf32> to vector<128x128xf32>
    %9 = arith.mulf %0, %8 : vector<128x128xf32>
    %10 = arith.mulf %1, %1 : vector<128x128xf32>
    %cst_4 = arith.constant dense<0.000000e+00> : vector<128xf32>
    %11 = vector.multi_reduction <add>, %10, %cst_4 [1] : vector<128x128xf32> to vector<128xf32>
    %12 = vector.shape_cast %11 : vector<128xf32> to vector<128x1xf32>
    %cst_5 = arith.constant 9.99999993E-9 : f32
    %13 = vector.broadcast %cst_5 : f32 to vector<128x1xf32>
    %14 = arith.maximumf %12, %13 : vector<128x1xf32>
    %15 = math.rsqrt %14 : vector<128x1xf32>
    %16 = vector.broadcast %15 : vector<128x1xf32> to vector<128x128xf32>
    %17 = arith.mulf %1, %16 : vector<128x128xf32>
    %cst_6 = arith.constant dense<0.000000e+00> : vector<128x128xf32>
    %18 = tpu.matmul %9, %17, %cst_6 {dimension_numbers = #tpu.dot_dimension_numbers<[1], [1], [0], [0], [0, 0, 1, 0], [], []>} : vector<128x128xf32>, vector<128x128xf32>, vector<128x128xf32> -> vector<128x128xf32>
    %cst_7 = arith.constant 2.000000e+00 : f32
    %19 = vector.broadcast %cst_7 : f32 to vector<128x128xf32>
    %20 = arith.mulf %19, %18 : vector<128x128xf32>
    %cst_8 = arith.constant 2.000000e+00 : f32
    %21 = vector.broadcast %cst_8 : f32 to vector<128x128xf32>
    %22 = arith.subf %21, %20 : vector<128x128xf32>
    %cst_9 = arith.constant 0.000000e+00 : f32
    %23 = vector.broadcast %cst_9 : f32 to vector<128x128xf32>
    %24 = arith.maximumf %22, %23 : vector<128x128xf32>
    %c0_10 = arith.constant 0 : index
    %c0_11 = arith.constant 0 : index
    %25 = vector.load %arg4[%c0_10, %c0_11] : memref<1x128xf32, #tpu.memory_space<vmem>>, vector<1x128xf32>
    %cst_12 = arith.constant 9.99999993E-9 : f32
    %26 = vector.broadcast %cst_12 : f32 to vector<128x128xf32>
    %27 = arith.addf %24, %26 : vector<128x128xf32>
    %28 = math.log %27 : vector<128x128xf32>
    %cst_13 = arith.constant 1.000000e+01 : f32
    %29 = vector.broadcast %cst_13 : f32 to vector<128x128xf32>
    %30 = arith.mulf %29, %28 : vector<128x128xf32>
    %31 = vector.broadcast %25 : vector<1x128xf32> to vector<128x128xf32>
    %32 = arith.subf %31, %30 : vector<128x128xf32>
    %33 = arith.negf %32 : vector<128x128xf32>
    %34 = math.exp %33 : vector<128x128xf32>
    %cst_14 = arith.constant 1.000000e+00 : f32
    %35 = vector.broadcast %cst_14 : f32 to vector<128x128xf32>
    %36 = arith.addf %35, %34 : vector<128x128xf32>
    %37 = arith.divf %35, %36 : vector<128x128xf32>
    %c0_15 = arith.constant 0 : index
    %c0_16 = arith.constant 0 : index
    %38 = vector.load %arg5[%c0_15, %c0_16] : memref<128x128xf32, #tpu.memory_space<vmem>>, vector<128x128xf32>
    tpu.vector_store %arg5[%c0_15, %c0_16], %37 {strides = array<i32>} : memref<128x128xf32, #tpu.memory_space<vmem>>, vector<128x128xf32>,
    return
  }
  func.func @transform_0(%arg0: i32, %arg1: i32) -> (i32, i32) {
    %c0_i32 = arith.constant 0 : i32
    %c0_i32_0 = arith.constant 0 : i32
    return %arg0, %c0_i32 : i32, i32
  }
  func.func @transform_1(%arg0: i32, %arg1: i32) -> (i32, i32) {
    %c0_i32 = arith.constant 0 : i32
    %c0_i32_0 = arith.constant 0 : i32
    return %arg1, %c0_i32 : i32, i32
  }
  func.func @transform_2(%arg0: i32, %arg1: i32) -> (i32, i32) {
    %c0_i32 = arith.constant 0 : i32
    %c0_i32_0 = arith.constant 0 : i32
    return %c0_i32, %arg1 : i32, i32
  }
  func.func @transform_3(%arg0: i32, %arg1: i32) -> (i32, i32) {
    %c0_i32 = arith.constant 0 : i32
    return %arg0, %arg1 : i32, i32
  }
}

module attributes {stable_mosaic.version = 11 : i64} {
  func.func @_fc_decoder_kernel(%arg0: i32, %arg1: memref<128x128xf32, #tpu.memory_space<vmem>>, %arg2: memref<128x128xf32, #tpu.memory_space<vmem>>, %arg3: memref<1x128xf32, #tpu.memory_space<vmem>>, %arg4: memref<128x512xf32, #tpu.memory_space<vmem>>, %arg5: memref<1x512xf32, #tpu.memory_space<vmem>>, %arg6: memref<512x896xf32, #tpu.memory_space<vmem>>, %arg7: memref<1x896xf32, #tpu.memory_space<vmem>>, %arg8: memref<896x128xf32, #tpu.memory_space<vmem>>, %arg9: memref<1x128xf32, #tpu.memory_space<vmem>>, %arg10: memref<128x128xf32, #tpu.memory_space<vmem>>) attributes {dimension_semantics = [#tpu.dimension_semantics<parallel>], iteration_bounds = array<i64: 1>, scalar_prefetch = 0 : i64, scratch_operands = 0 : i64, tpu.core_type = #tpu.core_type<tc>, window_params = [{transform_indices = @transform_0, window_bounds = array<i64: 128, 128>}, {pipeline_mode = #tpu.pipeline_mode<synchronous>, transform_indices = @transform_1, window_bounds = array<i64: 128, 128>}, {pipeline_mode = #tpu.pipeline_mode<synchronous>, transform_indices = @transform_2, window_bounds = array<i64: 1, 128>}, {pipeline_mode = #tpu.pipeline_mode<synchronous>, transform_indices = @transform_3, window_bounds = array<i64: 128, 512>}, {pipeline_mode = #tpu.pipeline_mode<synchronous>, transform_indices = @transform_4, window_bounds = array<i64: 1, 512>}, {pipeline_mode = #tpu.pipeline_mode<synchronous>, transform_indices = @transform_5, window_bounds = array<i64: 512, 896>}, {pipeline_mode = #tpu.pipeline_mode<synchronous>, transform_indices = @transform_6, window_bounds = array<i64: 1, 896>}, {pipeline_mode = #tpu.pipeline_mode<synchronous>, transform_indices = @transform_7, window_bounds = array<i64: 896, 128>}, {pipeline_mode = #tpu.pipeline_mode<synchronous>, transform_indices = @transform_8, window_bounds = array<i64: 1, 128>}, {transform_indices = @transform_9, window_bounds = array<i64: 128, 128>}]} {
    %c0 = arith.constant 0 : index
    %c0_0 = arith.constant 0 : index
    %0 = vector.load %arg1[%c0, %c0_0] : memref<128x128xf32, #tpu.memory_space<vmem>>, vector<128x128xf32>
    %c0_1 = arith.constant 0 : index
    %c0_2 = arith.constant 0 : index
    %1 = vector.load %arg2[%c0_1, %c0_2] : memref<128x128xf32, #tpu.memory_space<vmem>>, vector<128x128xf32>
    %c0_3 = arith.constant 0 : index
    %c0_4 = arith.constant 0 : index
    %2 = vector.load %arg3[%c0_3, %c0_4] : memref<1x128xf32, #tpu.memory_space<vmem>>, vector<1x128xf32>
    %cst = arith.constant dense<0.000000e+00> : vector<128x128xf32>
    %3 = tpu.matmul %0, %1, %cst {dimension_numbers = #tpu.dot_dimension_numbers<[1], [0], [0], [1], [0, 0, 1, 1], [], []>} : vector<128x128xf32>, vector<128x128xf32>, vector<128x128xf32> -> vector<128x128xf32>
    %4 = vector.broadcast %2 : vector<1x128xf32> to vector<128x128xf32>
    %5 = arith.addf %3, %4 : vector<128x128xf32>
    %cst_5 = arith.constant 0.000000e+00 : f32
    %6 = vector.broadcast %cst_5 : f32 to vector<128x128xf32>
    %7 = arith.maximumf %5, %6 : vector<128x128xf32>
    %c0_6 = arith.constant 0 : index
    %c0_7 = arith.constant 0 : index
    %8 = vector.load %arg4[%c0_6, %c0_7] : memref<128x512xf32, #tpu.memory_space<vmem>>, vector<128x512xf32>
    %c0_8 = arith.constant 0 : index
    %c0_9 = arith.constant 0 : index
    %9 = vector.load %arg5[%c0_8, %c0_9] : memref<1x512xf32, #tpu.memory_space<vmem>>, vector<1x512xf32>
    %cst_10 = arith.constant dense<0.000000e+00> : vector<128x512xf32>
    %10 = tpu.matmul %7, %8, %cst_10 {dimension_numbers = #tpu.dot_dimension_numbers<[1], [0], [0], [1], [0, 0, 1, 1], [], []>} : vector<128x128xf32>, vector<128x512xf32>, vector<128x512xf32> -> vector<128x512xf32>
    %11 = vector.broadcast %9 : vector<1x512xf32> to vector<128x512xf32>
    %12 = arith.addf %10, %11 : vector<128x512xf32>
    %cst_11 = arith.constant 0.000000e+00 : f32
    %13 = vector.broadcast %cst_11 : f32 to vector<128x512xf32>
    %14 = arith.maximumf %12, %13 : vector<128x512xf32>
    %c0_12 = arith.constant 0 : index
    %c0_13 = arith.constant 0 : index
    %15 = vector.load %arg6[%c0_12, %c0_13] : memref<512x896xf32, #tpu.memory_space<vmem>>, vector<512x896xf32>
    %c0_14 = arith.constant 0 : index
    %c0_15 = arith.constant 0 : index
    %16 = vector.load %arg7[%c0_14, %c0_15] : memref<1x896xf32, #tpu.memory_space<vmem>>, vector<1x896xf32>
    %cst_16 = arith.constant dense<0.000000e+00> : vector<128x896xf32>
    %17 = tpu.matmul %14, %15, %cst_16 {dimension_numbers = #tpu.dot_dimension_numbers<[1], [0], [0], [1], [0, 0, 1, 1], [], []>} : vector<128x512xf32>, vector<512x896xf32>, vector<128x896xf32> -> vector<128x896xf32>
    %18 = vector.broadcast %16 : vector<1x896xf32> to vector<128x896xf32>
    %19 = arith.addf %17, %18 : vector<128x896xf32>
    %cst_17 = arith.constant 0.000000e+00 : f32
    %20 = vector.broadcast %cst_17 : f32 to vector<128x896xf32>
    %21 = arith.maximumf %19, %20 : vector<128x896xf32>
    %c0_18 = arith.constant 0 : index
    %c0_19 = arith.constant 0 : index
    %22 = vector.load %arg8[%c0_18, %c0_19] : memref<896x128xf32, #tpu.memory_space<vmem>>, vector<896x128xf32>
    %c0_20 = arith.constant 0 : index
    %c0_21 = arith.constant 0 : index
    %23 = vector.load %arg9[%c0_20, %c0_21] : memref<1x128xf32, #tpu.memory_space<vmem>>, vector<1x128xf32>
    %cst_22 = arith.constant dense<0.000000e+00> : vector<128x128xf32>
    %24 = tpu.matmul %21, %22, %cst_22 {dimension_numbers = #tpu.dot_dimension_numbers<[1], [0], [0], [1], [0, 0, 1, 1], [], []>} : vector<128x896xf32>, vector<896x128xf32>, vector<128x128xf32> -> vector<128x128xf32>
    %25 = vector.broadcast %23 : vector<1x128xf32> to vector<128x128xf32>
    %26 = arith.addf %24, %25 : vector<128x128xf32>
    %c0_23 = arith.constant 0 : index
    %c0_24 = arith.constant 0 : index
    %27 = vector.load %arg10[%c0_23, %c0_24] : memref<128x128xf32, #tpu.memory_space<vmem>>, vector<128x128xf32>
    tpu.vector_store %arg10[%c0_23, %c0_24], %26 {strides = array<i32>} : memref<128x128xf32, #tpu.memory_space<vmem>>, vector<128x128xf32>,
    return
  }
  func.func @transform_0(%arg0: i32) -> (i32, i32) {
    %c0_i32 = arith.constant 0 : i32
    %c0_i32_0 = arith.constant 0 : i32
    return %arg0, %c0_i32 : i32, i32
  }
  func.func @transform_1(%arg0: i32) -> (i32, i32) {
    %c0_i32 = arith.constant 0 : i32
    %c0_i32_0 = arith.constant 0 : i32
    %c0_i32_1 = arith.constant 0 : i32
    return %c0_i32, %c0_i32_0 : i32, i32
  }
  func.func @transform_2(%arg0: i32) -> (i32, i32) {
    %c0_i32 = arith.constant 0 : i32
    %c0_i32_0 = arith.constant 0 : i32
    %c0_i32_1 = arith.constant 0 : i32
    return %c0_i32, %c0_i32_0 : i32, i32
  }
  func.func @transform_3(%arg0: i32) -> (i32, i32) {
    %c0_i32 = arith.constant 0 : i32
    %c0_i32_0 = arith.constant 0 : i32
    %c0_i32_1 = arith.constant 0 : i32
    return %c0_i32, %c0_i32_0 : i32, i32
  }
  func.func @transform_4(%arg0: i32) -> (i32, i32) {
    %c0_i32 = arith.constant 0 : i32
    %c0_i32_0 = arith.constant 0 : i32
    %c0_i32_1 = arith.constant 0 : i32
    return %c0_i32, %c0_i32_0 : i32, i32
  }
  func.func @transform_5(%arg0: i32) -> (i32, i32) {
    %c0_i32 = arith.constant 0 : i32
    %c0_i32_0 = arith.constant 0 : i32
    %c0_i32_1 = arith.constant 0 : i32
    return %c0_i32, %c0_i32_0 : i32, i32
  }
  func.func @transform_6(%arg0: i32) -> (i32, i32) {
    %c0_i32 = arith.constant 0 : i32
    %c0_i32_0 = arith.constant 0 : i32
    %c0_i32_1 = arith.constant 0 : i32
    return %c0_i32, %c0_i32_0 : i32, i32
  }
  func.func @transform_7(%arg0: i32) -> (i32, i32) {
    %c0_i32 = arith.constant 0 : i32
    %c0_i32_0 = arith.constant 0 : i32
    %c0_i32_1 = arith.constant 0 : i32
    return %c0_i32, %c0_i32_0 : i32, i32
  }
  func.func @transform_8(%arg0: i32) -> (i32, i32) {
    %c0_i32 = arith.constant 0 : i32
    %c0_i32_0 = arith.constant 0 : i32
    %c0_i32_1 = arith.constant 0 : i32
    return %c0_i32, %c0_i32_0 : i32, i32
  }
  func.func @transform_9(%arg0: i32) -> (i32, i32) {
    %c0_i32 = arith.constant 0 : i32
    %c0_i32_0 = arith.constant 0 : i32
    return %arg0, %c0_i32 : i32, i32
  }
}

</mosaic_0001>

<bundles_post_ra>
// kernel: velofusion_forward.4
= control target key start
LH: loop header
LB: loop body
LE: loop exit
PB: predicated region body
PF: predicated region fallthrough
CT: control target
= control target key end

     0   :  { %s1303_s1 = inlined_call_operand.vmem [shape: f32[128,128], index: 1, kind: input, shape index: {}, may-alias: {0,1}]   ;;  %s1304_s0 = inlined_call_operand.vmem [shape: f32[128,128], index: 0, kind: input, shape index: {}, may-alias: {0,1}]   ;;  %s1305_s2 = inlined_call_operand.vmem [shape: f32[1,128], index: 2, kind: input, shape index: {}]   ;;  %s1306_s3 = inlined_call_operand.vmem [shape: f32[128,128], index: 3, kind: output, shape index: {}]  }
   0x1   :  { %v954_v0 = vld [vmem:[%s1303_s1 + $0x78] sm:$0xff]  ;;  %v959_v1 = vld [vmem:[%s1303_s1 + $0x70] sm:$0xff]  ;;  %v964_v2 = vld [vmem:[%s1303_s1 + $0x68] sm:$0xff] }
   0x2   :  { %v157_v3 = vmul.f32 %v954_v0, %v954_v0  ;;  %v155_v4 = vmul.f32 %v964_v2, %v964_v2  ;;  %v973_v5 = vld [vmem:[%s1303_s1 + $0x60] sm:$0xff]  ;;  %v156_v6 = vmul.f32 %v959_v1, %v959_v1  ;;  %v982_v8 = vld [vmem:[%s1303_s1 + $0x58] sm:$0xff]  ;;  %v987_v9 = vld [vmem:[%s1303_s1 + $0x50] sm:$0xff] }
   0x3   :  { %v154_v7 = vmul.f32 %v973_v5, %v973_v5  ;;  %v153_v10 = vmul.f32 %v982_v8, %v982_v8  ;;  %v152_v11 = vmul.f32 %v987_v9, %v987_v9  ;;  %v996_v12 = vld [vmem:[%s1303_s1 + $0x48] sm:$0xff]  ;;  %v1001_v13 = vld [vmem:[%s1303_s1 + $0x40] sm:$0xff]  ;;  %v1010_v16 = vld [vmem:[%s1303_s1 + $0x38] sm:$0xff] }
   0x4   :  { %188 = vadd.xlane.f32.xlu0 %v157_v3  ;;  %184 = vadd.xlane.f32.xlu1 %v155_v4  ;;  %v151_v14 = vmul.f32 %v996_v12, %v996_v12  ;;  %v150_v15 = vmul.f32 %v1001_v13, %v1001_v13  ;;  %v1015_v17 = vld [vmem:[%s1303_s1 + $0x30] sm:$0xff]  ;;  %v149_v18 = vmul.f32 %v1010_v16, %v1010_v16  ;;  %v1024_v20 = vld [vmem:[%s1303_s1 + $0x28] sm:$0xff]  ;;  %v1029_v21 = vld [vmem:[%s1303_s1 + $0x20] sm:$0xff] }
   0x5   :  { %v148_v19 = vmul.f32 %v1015_v17, %v1015_v17  ;;  %v147_v22 = vmul.f32 %v1024_v20, %v1024_v20  ;;  %v146_v23 = vmul.f32 %v1029_v21, %v1029_v21  ;;  %v1038_v24 = vld [vmem:[%s1303_s1 + $0x18] sm:$0xff]  ;;  %v1043_v25 = vld [vmem:[%s1303_s1 + $0x10] sm:$0xff]  ;;  %v1052_v28 = vld [vmem:[%s1303_s1 + $0x8] sm:$0xff] }
   0x6   :  { %v145_v26 = vmul.f32 %v1038_v24, %v1038_v24  ;;  %v144_v27 = vmul.f32 %v1043_v25, %v1043_v25  ;;  %v1057_v29 = vld [vmem:[%s1303_s1] sm:$0xff]  ;;  %v143_v30 = vmul.f32 %v1052_v28, %v1052_v28  ;;  %v1080_v36 = vld [vmem:[%s1304_s0 + $0x48] sm:$0xff]  ;;  %v1094_v40 = vld [vmem:[%s1304_s0 + $0x50] sm:$0xff] }
   0x7   :  { %v142_v31 = vmul.f32 %v1057_v29, %v1057_v29  ;;  %v1066_v32 = vld [vmem:[%s1304_s0 + $0x40] sm:$0xff]  ;;  %v1085_v37 = vld [vmem:[%s1304_s0 + $0x8] sm:$0xff]  ;;  %v55_v38 = vmul.f32 %v1080_v36, %v1080_v36  ;;  %v1099_v41 = vld [vmem:[%s1304_s0 + $0x10] sm:$0xff]  ;;  %v56_v42 = vmul.f32 %v1094_v40, %v1094_v40 }
   0x8   :  { %186 = vadd.xlane.f32.xlu0 %v156_v6  ;;  %182 = vadd.xlane.f32.xlu1 %v154_v7  ;;  %v1071_v33 = vld [vmem:[%s1304_s0] sm:$0xff]  ;;  %v54_v34 = vmul.f32 %v1066_v32, %v1066_v32  ;;  %v47_v39 = vmul.f32 %v1085_v37, %v1085_v37  ;;  %v48_v43 = vmul.f32 %v1099_v41, %v1099_v41  ;;  %v1108_v44 = vld [vmem:[%s1304_s0 + $0x58] sm:$0xff]  ;;  %v1136_v52 = vld [vmem:[%s1304_s0 + $0x68] sm:$0xff] }
   0x9   :  { %v46_v35 = vmul.f32 %v1071_v33, %v1071_v33  ;;  %v1113_v45 = vld [vmem:[%s1304_s0 + $0x18] sm:$0xff]  ;;  %v57_v46 = vmul.f32 %v1108_v44, %v1108_v44  ;;  %v1122_v48 = vld [vmem:[%s1304_s0 + $0x60] sm:$0xff]  ;;  %v1141_v53 = vld [vmem:[%s1304_s0 + $0x28] sm:$0xff]  ;;  %v59_v54 = vmul.f32 %v1136_v52, %v1136_v52 }
   0xa   :  { %v49_v47 = vmul.f32 %v1113_v45, %v1113_v45  ;;  %v1127_v49 = vld [vmem:[%s1304_s0 + $0x20] sm:$0xff]  ;;  %v58_v50 = vmul.f32 %v1122_v48, %v1122_v48  ;;  %v51_v55 = vmul.f32 %v1141_v53, %v1141_v53  ;;  %v1150_v56 = vld [vmem:[%s1304_s0 + $0x70] sm:$0xff]  ;;  %v1164_v60 = vld [vmem:[%s1304_s0 + $0x78] sm:$0xff] }
   0xb   :  { %v50_v51 = vmul.f32 %v1127_v49, %v1127_v49  ;;  %v1155_v57 = vld [vmem:[%s1304_s0 + $0x30] sm:$0xff]  ;;  %v60_v58 = vmul.f32 %v1150_v56, %v1150_v56  ;;  %v1169_v61 = vld [vmem:[%s1304_s0 + $0x38] sm:$0xff]  ;;  %v61_v62 = vmul.f32 %v1164_v60, %v1164_v60 }
   0xc   :  { %180 = vadd.xlane.f32.xlu0 %v153_v10  ;;  %178 = vadd.xlane.f32.xlu1 %v152_v11  ;;  %v52_v59 = vmul.f32 %v1155_v57, %v1155_v57  ;;  %v53_v63 = vmul.f32 %v1169_v61, %v1169_v61 }
  0x10   :  { %176 = vadd.xlane.f32.xlu0 %v151_v14  ;;  %174 = vadd.xlane.f32.xlu1 %v150_v15 }
  0x14   :  { %172 = vadd.xlane.f32.xlu0 %v149_v18  ;;  %170 = vadd.xlane.f32.xlu1 %v148_v19 }
  0x18   :  { %168 = vadd.xlane.f32.xlu0 %v147_v22  ;;  %166 = vadd.xlane.f32.xlu1 %v146_v23 }
  0x1c   :  { %164 = vadd.xlane.f32.xlu0 %v145_v26  ;;  %162 = vadd.xlane.f32.xlu1 %v144_v27 }
  0x20   :  { %160 = vadd.xlane.f32.xlu0 %v143_v30  ;;  %158 = vadd.xlane.f32.xlu1 %v142_v31 }
  0x24   :  { %78 = vadd.xlane.f32.xlu1 %v54_v34  ;;  %62 = vadd.xlane.f32.xlu0 %v46_v35 }
  0x28   :  { %80 = vadd.xlane.f32.xlu1 %v55_v38  ;;  %64 = vadd.xlane.f32.xlu0 %v47_v39 }
  0x2c   :  { %82 = vadd.xlane.f32.xlu1 %v56_v42  ;;  %66 = vadd.xlane.f32.xlu0 %v48_v43 }
  0x30   :  { %84 = vadd.xlane.f32.xlu1 %v57_v46  ;;  %68 = vadd.xlane.f32.xlu0 %v49_v47 }
  0x34   :  { %86 = vadd.xlane.f32.xlu1 %v58_v50  ;;  %70 = vadd.xlane.f32.xlu0 %v50_v51 }
  0x38   :  { %88 = vadd.xlane.f32.xlu1 %v59_v54  ;;  %72 = vadd.xlane.f32.xlu0 %v51_v55 }
  0x3c   :  { %90 = vadd.xlane.f32.xlu1 %v60_v58  ;;  %74 = vadd.xlane.f32.xlu0 %v52_v59 }
  0x40   :  { %92 = vadd.xlane.f32.xlu1 %v61_v62  ;;  %76 = vadd.xlane.f32.xlu0 %v53_v63 }
  0x8d   :  { %v189_v3 = vpop.xlane.xlu0 %188  ;;  %v185_v4 = vpop.xlane.xlu1 %184 }
  0x8e   :  { %v205_v6 = vmax.f32 %v189_v3, 1e-08  ;;  %v203_v7 = vmax.f32 %v185_v4, 1e-08 }
  0x90   :  { %771 = vrsqrt.f32 %v205_v6 }
  0x91   :  { %v187_v10 = vpop.xlane.xlu0 %186  ;;  %v183_v11 = vpop.xlane.xlu1 %182  ;;  %773 = vrsqrt.f32 %v203_v7 }
  0x92   :  { %v204_v14 = vmax.f32 %v187_v10, 1e-08  ;;  %v202_v15 = vmax.f32 %v183_v11, 1e-08 }
  0x94   :  { %775 = vrsqrt.f32 %v204_v14 }
  0x95   :  { %v181_v18 = vpop.xlane.xlu0 %180  ;;  %v179_v19 = vpop.xlane.xlu1 %178  ;;  %777 = vrsqrt.f32 %v202_v15 }
  0x96   :  { %v201_v22 = vmax.f32 %v181_v18, 1e-08  ;;  %v200_v27 = vmax.f32 %v179_v19, 1e-08 }
  0x98   :  { %779 = vrsqrt.f32 %v201_v22 }
  0x99   :  { %v177_v23 = vpop.xlane.xlu0 %176  ;;  %v175_v26 = vpop.xlane.xlu1 %174  ;;  %781 = vrsqrt.f32 %v200_v27 }
  0x9a   :  { %v199_v38 = vmax.f32 %v177_v23, 1e-08  ;;  %v198_v51 = vmax.f32 %v175_v26, 1e-08 }
  0x9c   :  { %783 = vrsqrt.f32 %v199_v38 }
  0x9d   :  { %v772_v30 = vpop.eup %771  ;;  %v173_v31 = vpop.xlane.xlu0 %172  ;;  %785 = vrsqrt.f32 %v198_v51 }
  0x9e   :  { %v171_v34 = vpop.xlane.xlu1 %170  ;;  %v237_v35 = vmul.f32 %v772_v30, %v954_v0  ;;  %v774_v39 = vpop.eup %773  ;;  %v197_v59 = vmax.f32 %v173_v31, 1e-08 }
  0x9f   :  { %v235_v50 = vmul.f32 %v774_v39, %v964_v2  ;;  %v196_v4 = vmax.f32 %v171_v34, 1e-08 }
  0xa0   :  { %683 = vmatprep.subr.mxu0 %v237_v35  ;;  %739 = vmatprep.subr.mxu1 %v237_v35  ;;  %787 = vrsqrt.f32 %v197_v59 }
  0xa1   :  { %v776_v42 = vpop.eup %775  ;;  %684 = vmatpush3.xpose.msra.mxu0 %v237_v35  ;;  %755 = vmatpush3.xpose.msra.mxu1 %v237_v35  ;;  %v169_v43 = vpop.xlane.xlu0 %168  ;;  %789 = vrsqrt.f32 %v196_v4 }
  0xa2   :  { %v167_v46 = vpop.xlane.xlu1 %166  ;;  %v236_v47 = vmul.f32 %v776_v42, %v959_v1  ;;  %v778_v54 = vpop.eup %777  ;;  %v195_v15 = vmax.f32 %v169_v43, 1e-08 }
  0xa3   :  { %v234_v58 = vmul.f32 %v778_v54, %v973_v5 }
  0xa4   :  { %685 = vmatprep.subr.mxu0 %v236_v47  ;;  %740 = vmatprep.subr.mxu1 %v236_v47 }
  0xa5   :  { %686 = vmatpush3.xpose.msra.mxu0 %v236_v47  ;;  %756 = vmatpush3.xpose.msra.mxu1 %v236_v47  ;;  %v165_v0 = vpop.xlane.xlu0 %164  ;;  %v780_v62 = vpop.eup %779 }
  0xa6   :  { %v1178_v55 = vpop.xlane.xlu1 %162  ;;  %687 = vmatprep.subr.mxu0 %v235_v50  ;;  %741 = vmatprep.subr.mxu1 %v235_v50  ;;  %v233_v63 = vmul.f32 %v780_v62, %v982_v8  ;;  %v782_v3 = vpop.eup %781  ;;  %v193_v31 = vmax.f32 %v165_v0, 1e-08 }
  0xa7   :  { %v232_v5 = vmul.f32 %v782_v3, %v987_v9  ;;  %v194_v9 = vmax.f32 %v167_v46, 1e-08  ;;  %v192_v39 = vmax.f32 %v1178_v55, 1e-08 }
  0xa9   :  { %688 = vmatpush3.xpose.msra.mxu0 %v235_v50  ;;  %757 = vmatpush3.xpose.msra.mxu1 %v235_v50  ;;  %v1181_v1 = vpop.xlane.xlu0 %160  ;;  %v784_v14 = vpop.eup %783 }
  0xaa   :  { %v1183_v2 = vpop.xlane.xlu1 %158  ;;  %689 = vmatprep.subr.mxu0 %v234_v58  ;;  %742 = vmatprep.subr.mxu1 %v234_v58  ;;  %v231_v19 = vmul.f32 %v784_v14, %v996_v12  ;;  %v786_v22 = vpop.eup %785  ;;  %v191_v51 = vmax.f32 %v1181_v1, 1e-08 }
  0xab   :  { %v230_v27 = vmul.f32 %v786_v22, %v1001_v13  ;;  %v190_v0 = vmax.f32 %v1183_v2, 1e-08 }
  0xad   :  { %690 = vmatpush3.xpose.msra.mxu0 %v234_v58  ;;  %758 = vmatpush3.xpose.msra.mxu1 %v234_v58  ;;  %v63_v7 = vpop.xlane.xlu0 %62  ;;  %v788_v30 = vpop.eup %787 }
  0xae   :  { %v79_v6 = vpop.xlane.xlu1 %78  ;;  %691 = vmatprep.subr.mxu0 %v233_v63  ;;  %743 = vmatprep.subr.mxu1 %v233_v63  ;;  %v94_v11 = vmax.f32 %v63_v7, 1e-08  ;;  %v229_v35 = vmul.f32 %v788_v30, %v1010_v16  ;;  %v790_v38 = vpop.eup %789 }
  0xaf   :  { %v102_v10 = vmax.f32 %v79_v6, 1e-08  ;;  %v228_v16 = vmul.f32 %v790_v38, %v1015_v17 }
  0xb1   :  { %791 = vrsqrt.f32 %v102_v10  ;;  %692 = vmatpush3.xpose.msra.mxu0 %v233_v63  ;;  %759 = vmatpush3.xpose.msra.mxu1 %v233_v63  ;;  %v1189_v18 = vpop.xlane.xlu0 %64 }
  0xb2   :  { %793 = vrsqrt.f32 %v94_v11  ;;  %v1187_v8 = vpop.xlane.xlu1 %80  ;;  %693 = vmatprep.subr.mxu0 %v232_v5  ;;  %744 = vmatprep.subr.mxu1 %v232_v5  ;;  %v95_v59 = vmax.f32 %v1189_v18, 1e-08 }
  0xb3   :  { %795 = vrsqrt.f32 %v195_v15  ;;  %v103_v17 = vmax.f32 %v1187_v8, 1e-08 }
  0xb4   :  { %797 = vrsqrt.f32 %v194_v9 }
  0xb5   :  { %694 = vmatpush3.xpose.msra.mxu0 %v232_v5  ;;  %760 = vmatpush3.xpose.msra.mxu1 %v232_v5  ;;  %v1194_v26 = vpop.xlane.xlu0 %66  ;;  %799 = vrsqrt.f32 %v193_v31 }
  0xb6   :  { %v1192_v23 = vpop.xlane.xlu1 %82  ;;  %695 = vmatprep.subr.mxu0 %v231_v19  ;;  %745 = vmatprep.subr.mxu1 %v231_v19  ;;  %801 = vrsqrt.f32 %v192_v39 }
  0xb7   :  { %803 = vrsqrt.f32 %v191_v51  ;;  %v104_v63 = vmax.f32 %v1192_v23, 1e-08 }
  0xb8   :  { %805 = vrsqrt.f32 %v190_v0 }
  0xb9   :  { %696 = vmatpush3.xpose.msra.mxu0 %v231_v19  ;;  %761 = vmatpush3.xpose.msra.mxu1 %v231_v19  ;;  %v1199_v12 = vpop.xlane.xlu0 %68  ;;  %807 = vrsqrt.f32 %v103_v17 }
  0xba   :  { %v1197_v34 = vpop.xlane.xlu1 %84  ;;  %697 = vmatprep.subr.mxu0 %v230_v27  ;;  %746 = vmatprep.subr.mxu1 %v230_v27  ;;  %809 = vrsqrt.f32 %v95_v59  ;;  %v97_v6 = vmax.f32 %v1199_v12, 1e-08 }
  0xbb   :  { %v105_v3 = vmax.f32 %v1197_v34, 1e-08  ;;  %811 = vrsqrt.f32 %v104_v63 }
  0xbd   :  { %698 = vmatpush3.xpose.msra.mxu0 %v230_v27  ;;  %762 = vmatpush3.xpose.msra.mxu1 %v230_v27  ;;  %v71_v47 = vpop.xlane.xlu0 %70 }
  0xbe   :  { %v792_v42 = vpop.eup %791  ;;  %699 = vmatprep.subr.mxu0 %v229_v35  ;;  %747 = vmatprep.subr.mxu1 %v229_v35  ;;  %v87_v43 = vpop.xlane.xlu1 %86  ;;  %v98_v10 = vmax.f32 %v71_v47, 1e-08 }
  0xbf   :  { %v794_v13 = vpop.eup %793  ;;  %v134_v46 = vmul.f32 %v792_v42, %v1066_v32  ;;  %v106_v5 = vmax.f32 %v87_v43, 1e-08 }
  0xc0   :  { %v126_v50 = vmul.f32 %v794_v13, %v1071_v33  ;;  %v796_v54 = vpop.eup %795 }
  0xc1   :  { %727 = vmatprep.mubr.f32.mxu1 %v134_v46  ;;  %700 = vmatpush3.xpose.msra.mxu0 %v229_v35  ;;  %v227_v32 = vmul.f32 %v796_v54, %v1024_v20  ;;  %v798_v58 = vpop.eup %797  ;;  %v73_v33 = vpop.xlane.xlu0 %72  ;;  %v96_v20 = vmax.f32 %v1194_v26, 1e-08 }
  0xc2   :  { %763 = vmatpush3.xpose.msra.mxu1 %v229_v35  ;;  %701 = vmatprep.subr.mxu0 %v228_v16  ;;  %v89_v55 = vpop.xlane.xlu1 %88  ;;  %v226_v62 = vmul.f32 %v798_v58, %v1029_v21  ;;  %v800_v1 = vpop.eup %799  ;;  %v99_v22 = vmax.f32 %v73_v33, 1e-08 }
  0xc3   :  { %748 = vmatprep.subr.mxu1 %v228_v16  ;;  %715 = vmatprep.mubr.f32.mxu0 %v126_v50  ;;  %v225_v7 = vmul.f32 %v800_v1, %v1038_v24  ;;  %v802_v21 = vpop.eup %801  ;;  %813 = vrsqrt.f32 %v96_v20  ;;  %v107_v11 = vmax.f32 %v89_v55, 1e-08 }
  0xc4   :  { %815 = vrsqrt.f32 %v105_v3  ;;  %v224_v14 = vmul.f32 %v802_v21, %v1043_v25  ;;  %v804_v18 = vpop.eup %803 }
  0xc5   :  { %702 = vmatpush3.xpose.msra.mxu0 %v228_v16  ;;  %v75_v4 = vpop.xlane.xlu0 %74  ;;  %817 = vrsqrt.f32 %v97_v6  ;;  %v223_v23 = vmul.f32 %v804_v18, %v1052_v28  ;;  %v806_v27 = vpop.eup %805 }
  0xc6   :  { %764 = vmatpush3.xpose.msra.mxu1 %v228_v16  ;;  %703 = vmatprep.subr.mxu0 %v227_v32  ;;  %v91_v2 = vpop.xlane.xlu1 %90  ;;  %819 = vrsqrt.f32 %v106_v5  ;;  %v100_v24 = vmax.f32 %v75_v4, 1e-08  ;;  %v808_v25 = vpop.eup %807  ;;  %v222_v30 = vmul.f32 %v806_v27, %v1057_v29 }
  0xc7   :  { %749 = vmatprep.subr.mxu1 %v227_v32  ;;  %v108_v15 = vmax.f32 %v91_v2, 1e-08  ;;  %821 = vrsqrt.f32 %v98_v10  ;;  %v810_v31 = vpop.eup %809  ;;  %v135_v42 = vmul.f32 %v808_v25, %v1080_v36 }
  0xc8   :  { %823 = vrsqrt.f32 %v107_v11  ;;  %v812_v34 = vpop.eup %811  ;;  %v127_v39 = vmul.f32 %v810_v31, %v1085_v37 }
  0xc9   :  { %704 = vmatpush3.xpose.msra.mxu0 %v227_v32  ;;  %v77_v19 = vpop.xlane.xlu0 %76  ;;  %825 = vrsqrt.f32 %v108_v15  ;;  %v136_v29 = vmul.f32 %v812_v34, %v1094_v40 }
  0xca   :  { %765 = vmatpush3.xpose.msra.mxu1 %v227_v32  ;;  %705 = vmatprep.subr.mxu0 %v226_v62  ;;  %v93_v8 = vpop.xlane.xlu1 %92  ;;  %v101_v26 = vmax.f32 %v77_v19, 1e-08  ;;  %827 = vrsqrt.f32 %v100_v24 }
  0xcb   :  { %750 = vmatprep.subr.mxu1 %v226_v62  ;;  %v109_v9 = vmax.f32 %v93_v8, 1e-08  ;;  %829 = vrsqrt.f32 %v99_v22 }
  0xcd   :  { %706 = vmatpush3.xpose.msra.mxu0 %v226_v62  ;;  %831 = vrsqrt.f32 %v109_v9 }
  0xce   :  { %766 = vmatpush3.xpose.msra.mxu1 %v226_v62  ;;  %707 = vmatprep.subr.mxu0 %v225_v7  ;;  %833 = vrsqrt.f32 %v101_v26 }
  0xcf   :  { %751 = vmatprep.subr.mxu1 %v225_v7 }
  0xd0   :  { %v814_v28 = vpop.eup %813 }
  0xd1   :  { %708 = vmatpush3.xpose.msra.mxu0 %v225_v7  ;;  %v816_v12 = vpop.eup %815  ;;  %v128_v43 = vmul.f32 %v814_v28, %v1099_v41 }
  0xd2   :  { %767 = vmatpush3.xpose.msra.mxu1 %v225_v7  ;;  %709 = vmatprep.subr.mxu0 %v224_v14  ;;  %v818_v35 = vpop.eup %817  ;;  %v137_v16 = vmul.f32 %v816_v12, %v1108_v44 }
  0xd3   :  { %752 = vmatprep.subr.mxu1 %v224_v14  ;;  %v820_v38 = vpop.eup %819  ;;  %v129_v51 = vmul.f32 %v818_v35, %v1113_v45 }
  0xd4   :  { %v822_v13 = vpop.eup %821  ;;  %v138_v36 = vmul.f32 %v820_v38, %v1122_v48 }
  0xd5   :  { %710 = vmatpush3.xpose.msra.mxu0 %v224_v14  ;;  %v824_v46 = vpop.eup %823  ;;  %v130_v37 = vmul.f32 %v822_v13, %v1127_v49 }
  0xd6   :  { %768 = vmatpush3.xpose.msra.mxu1 %v224_v14  ;;  %711 = vmatprep.subr.mxu0 %v223_v23  ;;  %v826_v47 = vpop.eup %825  ;;  %v139_v45 = vmul.f32 %v824_v46, %v1136_v52 }
  0xd7   :  { %753 = vmatprep.subr.mxu1 %v223_v23  ;;  %v828_v50 = vpop.eup %827  ;;  %v140_v32 = vmul.f32 %v826_v47, %v1150_v56 }
  0xd8   :  { %v830_v54 = vpop.eup %829  ;;  %v132_v41 = vmul.f32 %v828_v50, %v1155_v57 }
  0xd9   :  { %712 = vmatpush3.xpose.msra.mxu0 %v223_v23  ;;  %v131_v55 = vmul.f32 %v830_v54, %v1141_v53 }
  0xda   :  { %769 = vmatpush3.xpose.msra.mxu1 %v223_v23  ;;  %713 = vmatprep.subr.mxu0 %v222_v30  ;;  %v832_v0 = vpop.eup %831 }
  0xdb   :  { %754 = vmatprep.subr.mxu1 %v222_v30  ;;  %v834_v40 = vpop.eup %833  ;;  %v141_v48 = vmul.f32 %v832_v0, %v1164_v60 }
  0xdc   :  { %v133_v44 = vmul.f32 %v834_v40, %v1169_v61 }
  0xdd   :  { %714 = vmatpush3.xpose.msra.mxu0 %v222_v30 }
  0xde   :  { %770 = vmatpush3.xpose.msra.mxu1 %v222_v30 }
  0xe0   :  { %716 = vmatmul.mubr.f32.vlgmr.msra.gmra.mxu0 %v127_v39 }
  0xe1   :  { %728 = vmatmul.mubr.f32.vlgmr.msra.gmra.mxu1 %v135_v42  ;;  %718 = vmatprep.mubr.f32.mxu0 %v128_v43 }
  0xe2   :  { %730 = vmatprep.mubr.f32.mxu1 %v136_v29 }
  0xe4   :  { %719 = vmatmul.mubr.f32.gmra.mxu0 %v129_v51 }
  0xe5   :  { %731 = vmatmul.mubr.f32.gmra.mxu1 %v137_v16  ;;  %721 = vmatprep.mubr.f32.mxu0 %v130_v37 }
  0xe6   :  { %733 = vmatprep.mubr.f32.mxu1 %v138_v36 }
  0xe8   :  { %722 = vmatmul.mubr.f32.gmra.mxu0 %v131_v55 }
  0xe9   :  { %734 = vmatmul.mubr.f32.gmra.mxu1 %v139_v45  ;;  %724 = vmatprep.mubr.f32.mxu0 %v132_v41 }
  0xea   :  { %736 = vmatprep.mubr.f32.mxu1 %v140_v32 }
  0xec   :  { %725 = vmatmul.mubr.f32.gmra.mxu0 %v133_v44 }
  0xed   :  { %737 = vmatmul.mubr.f32.gmra.mxu1 %v141_v48 }
 0x1a0   :  { %v717_v49 = vpop.f32.mrf.mxu0 }
 0x1a1   :  { %v729_v58 = vpop.f32.mrf.mxu1  ;;  %v384_v33 = vmul.f32 2.0, %v717_v49 }
 0x1a2   :  { %v392_v57 = vmul.f32 2.0, %v729_v58  ;;  %v304_v17 = vpop.f32.mrf.mxu0 }
 0x1a3   :  { %v344_v56 = vpop.f32.mrf.mxu1  ;;  %v400_v59 = vsub.f32 2.0, %v384_v33  ;;  %v383_v62 = vmul.f32 2.0, %v304_v17 }
 0x1a4   :  { %v408_v53 = vsub.f32 2.0, %v392_v57  ;;  %v391_v52 = vmul.f32 2.0, %v344_v56  ;;  %v720_v1 = vpop.f32.mrf.mxu0 }
 0x1a5   :  { %v732_v63 = vpop.f32.mrf.mxu1  ;;  %v416_v20 = vmax.f32 %v400_v59, 0.0  ;;  %v399_v2 = vsub.f32 2.0, %v383_v62  ;;  %v386_v3 = vmul.f32 2.0, %v720_v1 }
 0x1a6   :  { %v424_v61 = vmax.f32 %v408_v53, 0.0  ;;  %v407_v60 = vsub.f32 2.0, %v391_v52  ;;  %v394_v4 = vmul.f32 2.0, %v732_v63  ;;  %v314_v6 = vpop.f32.mrf.mxu0 }
 0x1a7   :  { %v354_v7 = vpop.f32.mrf.mxu1  ;;  %v433_v21 = vadd.f32 1e-08, %v416_v20  ;;  %v415_v10 = vmax.f32 %v399_v2, 0.0  ;;  %v402_v14 = vsub.f32 2.0, %v386_v3  ;;  %v385_v8 = vmul.f32 2.0, %v314_v6 }
 0x1a8   :  { %v441_v5 = vadd.f32 1e-08, %v424_v61  ;;  %v423_v11 = vmax.f32 %v407_v60, 0.0  ;;  %v410_v15 = vsub.f32 2.0, %v394_v4  ;;  %v393_v18 = vmul.f32 2.0, %v354_v7  ;;  %v723_v24 = vpop.f32.mrf.mxu0 }
 0x1a9   :  { %v735_v19 = vpop.f32.mrf.mxu1  ;;  %835 = vlog2.f32 %v433_v21  ;;  %v432_v22 = vadd.f32 1e-08, %v415_v10  ;;  %v388_v23 = vmul.f32 2.0, %v723_v24  ;;  %v418_v26 = vmax.f32 %v402_v14, 0.0  ;;  %v1237_v6 = vld [vmem:[%s1305_s2] ss:$0 sm:$0xff] }
 0x1aa   :  { %v440_v9 = vadd.f32 1e-08, %v423_v11  ;;  %837 = vlog2.f32 %v441_v5  ;;  %v426_v27 = vmax.f32 %v410_v15, 0.0  ;;  %v401_v25 = vsub.f32 2.0, %v385_v8  ;;  %v324_v30 = vpop.f32.mrf.mxu0 }
 0x1ab   :  { %v364_v31 = vpop.f32.mrf.mxu1  ;;  %839 = vlog2.f32 %v432_v22  ;;  %v409_v34 = vsub.f32 2.0, %v393_v18  ;;  %v404_v28 = vsub.f32 2.0, %v388_v23  ;;  %v396_v12 = vmul.f32 2.0, %v735_v19 }
 0x1ac   :  { %841 = vlog2.f32 %v440_v9  ;;  %v435_v35 = vadd.f32 1e-08, %v418_v26  ;;  %v443_v38 = vadd.f32 1e-08, %v426_v27  ;;  %v417_v39 = vmax.f32 %v401_v25, 0.0  ;;  %v726_v42 = vpop.f32.mrf.mxu0 }
 0x1ad   :  { %v738_v13 = vpop.f32.mrf.mxu1  ;;  %v425_v43 = vmax.f32 %v409_v34, 0.0  ;;  %v420_v29 = vmax.f32 %v404_v28, 0.0  ;;  %v412_v46 = vsub.f32 2.0, %v396_v12  ;;  %v387_v47 = vmul.f32 2.0, %v324_v30 }
 0x1ae   :  { %843 = vlog2.f32 %v435_v35  ;;  %v434_v50 = vadd.f32 1e-08, %v417_v39  ;;  %v395_v51 = vmul.f32 2.0, %v364_v31  ;;  %v390_v16 = vmul.f32 2.0, %v726_v42  ;;  %v334_v54 = vpop.f32.mrf.mxu0 }
 0x1af   :  { %845 = vlog2.f32 %v443_v38  ;;  %v442_v37 = vadd.f32 1e-08, %v425_v43  ;;  %v437_v36 = vadd.f32 1e-08, %v420_v29  ;;  %v428_v0 = vmax.f32 %v412_v46, 0.0  ;;  %v374_v55 = vpop.f32.mrf.mxu1 }
 0x1b0   :  { %847 = vlog2.f32 %v434_v50  ;;  %v403_v40 = vsub.f32 2.0, %v387_v47  ;;  %v411_v41 = vsub.f32 2.0, %v395_v51  ;;  %v406_v32 = vsub.f32 2.0, %v390_v16 }
 0x1b1   :  { %849 = vlog2.f32 %v442_v37  ;;  %v445_v45 = vadd.f32 1e-08, %v428_v0  ;;  %v398_v44 = vmul.f32 2.0, %v738_v13  ;;  %v389_v48 = vmul.f32 2.0, %v334_v54 }
 0x1b2   :  { %851 = vlog2.f32 %v437_v36  ;;  %v419_v49 = vmax.f32 %v403_v40, 0.0  ;;  %v427_v58 = vmax.f32 %v411_v41, 0.0  ;;  %v422_v33 = vmax.f32 %v406_v32, 0.0 }
 0x1b3   :  { %853 = vlog2.f32 %v445_v45  ;;  %v414_v57 = vsub.f32 2.0, %v398_v44  ;;  %v405_v17 = vsub.f32 2.0, %v389_v48  ;;  %v397_v56 = vmul.f32 2.0, %v374_v55 }
 0x1b4   :  { %v436_v59 = vadd.f32 1e-08, %v419_v49  ;;  %v444_v53 = vadd.f32 1e-08, %v427_v58  ;;  %v439_v62 = vadd.f32 1e-08, %v422_v33 }
 0x1b5   :  { %v430_v52 = vmax.f32 %v414_v57, 0.0  ;;  %v421_v1 = vmax.f32 %v405_v17, 0.0  ;;  %v413_v63 = vsub.f32 2.0, %v397_v56 }
 0x1b6   :  { %v836_v20 = vpop.eup %835  ;;  %855 = vlog2.f32 %v436_v59 }
 0x1b7   :  { %v838_v61 = vpop.eup %837  ;;  %v451_v2 = vmul.f32 0.6931472, %v836_v20  ;;  %857 = vlog2.f32 %v444_v53  ;;  %v447_v60 = vadd.f32 1e-08, %v430_v52  ;;  %v438_v3 = vadd.f32 1e-08, %v421_v1 }
 0x1b8   :  { %v840_v4 = vpop.eup %839  ;;  %v467_v7 = vmul.f32 0.6931472, %v838_v61  ;;  %859 = vlog2.f32 %v439_v62  ;;  %v429_v21 = vmax.f32 %v413_v63, 0.0 }
 0x1b9   :  { %v842_v5 = vpop.eup %841  ;;  %v481_v10 = vmul.f32 10.0, %v451_v2  ;;  %v449_v11 = vmul.f32 0.6931472, %v840_v4  ;;  %861 = vlog2.f32 %v447_v60 }
 0x1ba   :  { %v489_v14 = vmul.f32 10.0, %v467_v7  ;;  %v465_v15 = vmul.f32 0.6931472, %v842_v5  ;;  %863 = vlog2.f32 %v438_v3  ;;  %v446_v8 = vadd.f32 1e-08, %v429_v21 }
 0x1bb   :  { %v844_v18 = vpop.eup %843  ;;  %v503_v24 = vsub.f32 %v1237_v6, %v481_v10  ;;  %v480_v19 = vmul.f32 10.0, %v449_v11 }
 0x1bc   :  { %v846_v22 = vpop.eup %845  ;;  %v511_v9 = vsub.f32 %v1237_v6, %v489_v14  ;;  %v488_v23 = vmul.f32 10.0, %v465_v15  ;;  %v455_v26 = vmul.f32 0.6931472, %v844_v18  ;;  %865 = vlog2.f32 %v446_v8 }
 0x1bd   :  { %v848_v27 = vpop.eup %847  ;;  %v636_v25 = vmul.f32 -1.442695, %v503_v24  ;;  %v502_v30 = vsub.f32 %v1237_v6, %v480_v19  ;;  %v471_v31 = vmul.f32 0.6931472, %v846_v22 }
 0x1be   :  { %v850_v34 = vpop.eup %849  ;;  %v644_v28 = vmul.f32 -1.442695, %v511_v9  ;;  %v510_v12 = vsub.f32 %v1237_v6, %v488_v23  ;;  %v483_v35 = vmul.f32 10.0, %v455_v26  ;;  %v453_v38 = vmul.f32 0.6931472, %v848_v27 }
 0x1bf   :  { %v852_v39 = vpop.eup %851  ;;  %867 = vpow2.f32 %v636_v25  ;;  %v635_v42 = vmul.f32 -1.442695, %v502_v30  ;;  %v491_v13 = vmul.f32 10.0, %v471_v31  ;;  %v469_v43 = vmul.f32 0.6931472, %v850_v34 }
 0x1c0   :  { %v854_v29 = vpop.eup %853  ;;  %869 = vpow2.f32 %v644_v28  ;;  %v643_v46 = vmul.f32 -1.442695, %v510_v12  ;;  %v505_v47 = vsub.f32 %v1237_v6, %v483_v35  ;;  %v482_v50 = vmul.f32 10.0, %v453_v38 }
 0x1c1   :  { %871 = vpow2.f32 %v635_v42  ;;  %v513_v51 = vsub.f32 %v1237_v6, %v491_v13  ;;  %v490_v16 = vmul.f32 10.0, %v469_v43  ;;  %v459_v54 = vmul.f32 0.6931472, %v852_v39 }
 0x1c2   :  { %873 = vpow2.f32 %v643_v46  ;;  %v638_v37 = vmul.f32 -1.442695, %v505_v47  ;;  %v504_v36 = vsub.f32 %v1237_v6, %v482_v50  ;;  %v475_v0 = vmul.f32 0.6931472, %v854_v29 }
 0x1c3   :  { %v856_v40 = vpop.eup %855  ;;  %v646_v41 = vmul.f32 -1.442695, %v513_v51  ;;  %v512_v32 = vsub.f32 %v1237_v6, %v490_v16  ;;  %v485_v55 = vmul.f32 10.0, %v459_v54 }
 0x1c4   :  { %v858_v45 = vpop.eup %857  ;;  %875 = vpow2.f32 %v638_v37  ;;  %v637_v44 = vmul.f32 -1.442695, %v504_v36  ;;  %v493_v48 = vmul.f32 10.0, %v475_v0  ;;  %v457_v49 = vmul.f32 0.6931472, %v856_v40 }
 0x1c5   :  { %v860_v58 = vpop.eup %859  ;;  %877 = vpow2.f32 %v646_v41  ;;  %v645_v33 = vmul.f32 -1.442695, %v512_v32  ;;  %v507_v57 = vsub.f32 %v1237_v6, %v485_v55  ;;  %v473_v17 = vmul.f32 0.6931472, %v858_v45 }
 0x1c6   :  { %v862_v56 = vpop.eup %861  ;;  %879 = vpow2.f32 %v637_v44  ;;  %v515_v59 = vsub.f32 %v1237_v6, %v493_v48  ;;  %v484_v53 = vmul.f32 10.0, %v457_v49  ;;  %v463_v62 = vmul.f32 0.6931472, %v860_v58 }
 0x1c7   :  { %v864_v52 = vpop.eup %863  ;;  %881 = vpow2.f32 %v645_v33  ;;  %v640_v1 = vmul.f32 -1.442695, %v507_v57  ;;  %v492_v63 = vmul.f32 10.0, %v473_v17  ;;  %v479_v20 = vmul.f32 0.6931472, %v862_v56 }
 0x1c8   :  { %v648_v61 = vmul.f32 -1.442695, %v515_v59  ;;  %v506_v2 = vsub.f32 %v1237_v6, %v484_v53  ;;  %v487_v60 = vmul.f32 10.0, %v463_v62  ;;  %v461_v3 = vmul.f32 0.6931472, %v864_v52 }
 0x1c9   :  { %v866_v4 = vpop.eup %865  ;;  %883 = vpow2.f32 %v640_v1  ;;  %v514_v7 = vsub.f32 %v1237_v6, %v492_v63  ;;  %v495_v21 = vmul.f32 10.0, %v479_v20 }
 0x1ca   :  { %885 = vpow2.f32 %v648_v61  ;;  %v639_v5 = vmul.f32 -1.442695, %v506_v2  ;;  %v509_v10 = vsub.f32 %v1237_v6, %v487_v60  ;;  %v477_v15 = vmul.f32 0.6931472, %v866_v4 }
 0x1cb   :  { %v647_v11 = vmul.f32 -1.442695, %v514_v7  ;;  %v517_v14 = vsub.f32 %v1237_v6, %v495_v21  ;;  %v486_v24 = vmul.f32 10.0, %v461_v3 }
 0x1cc   :  { %v868_v8 = vpop.eup %867  ;;  %887 = vpow2.f32 %v639_v5  ;;  %v642_v18 = vmul.f32 -1.442695, %v509_v10  ;;  %v494_v30 = vmul.f32 10.0, %v477_v15 }
 0x1cd   :  { %v870_v19 = vpop.eup %869  ;;  %v567_v22 = vadd.f32 1.0, %v868_v8  ;;  %889 = vpow2.f32 %v647_v11  ;;  %v650_v25 = vmul.f32 -1.442695, %v517_v14  ;;  %v508_v34 = vsub.f32 %v1237_v6, %v486_v24 }
 0x1ce   :  { %v872_v9 = vpop.eup %871  ;;  %v575_v23 = vadd.f32 1.0, %v870_v19  ;;  %891 = vpow2.f32 %v642_v18  ;;  %v516_v42 = vsub.f32 %v1237_v6, %v494_v30 }
 0x1cf   :  { %v874_v26 = vpop.eup %873  ;;  %893 = vrcp.f32 %v567_v22  ;;  %v566_v27 = vadd.f32 1.0, %v872_v9  ;;  %v641_v29 = vmul.f32 -1.442695, %v508_v34 }
 0x1d0   :  { %895 = vrcp.f32 %v575_v23  ;;  %v574_v31 = vadd.f32 1.0, %v874_v26  ;;  %v649_v16 = vmul.f32 -1.442695, %v516_v42 }
 0x1d1   :  { %v876_v28 = vpop.eup %875  ;;  %897 = vrcp.f32 %v566_v27 }
 0x1d2   :  { %v878_v12 = vpop.eup %877  ;;  %899 = vrcp.f32 %v574_v31  ;;  %v569_v35 = vadd.f32 1.0, %v876_v28 }
 0x1d3   :  { %v880_v38 = vpop.eup %879  ;;  %v577_v39 = vadd.f32 1.0, %v878_v12  ;;  %901 = vpow2.f32 %v650_v25 }
 0x1d4   :  { %v882_v13 = vpop.eup %881  ;;  %903 = vrcp.f32 %v569_v35  ;;  %v568_v43 = vadd.f32 1.0, %v880_v38 }
 0x1d5   :  { %905 = vrcp.f32 %v577_v39  ;;  %v576_v46 = vadd.f32 1.0, %v882_v13 }
 0x1d6   :  { %v884_v47 = vpop.eup %883  ;;  %907 = vrcp.f32 %v568_v43 }
 0x1d7   :  { %v886_v50 = vpop.eup %885  ;;  %909 = vrcp.f32 %v576_v46  ;;  %v571_v51 = vadd.f32 1.0, %v884_v47 }
 0x1d8   :  { %v579_v54 = vadd.f32 1.0, %v886_v50  ;;  %911 = vpow2.f32 %v641_v29 }
 0x1d9   :  { %v888_v37 = vpop.eup %887  ;;  %913 = vrcp.f32 %v571_v51 }
 0x1da   :  { %v890_v36 = vpop.eup %889  ;;  %915 = vrcp.f32 %v579_v54  ;;  %v570_v0 = vadd.f32 1.0, %v888_v37 }
 0x1db   :  { %v892_v6 = vpop.eup %891  ;;  %v578_v40 = vadd.f32 1.0, %v890_v36  ;;  %917 = vpow2.f32 %v649_v16 }
 0x1dc   :  { %v894_v41 = vpop.eup %893  ;;  %919 = vrcp.f32 %v570_v0  ;;  %v573_v32 = vadd.f32 1.0, %v892_v6 }
 0x1dd   :  { %v896_v55 = vpop.eup %895  ;;  %615 = vst [vmem:[%s1306_s3 + $0x8] sm:$0xff] %v894_v41  ;;  %921 = vrcp.f32 %v578_v40 }
 0x1de   :  { %v898_v45 = vpop.eup %897  ;;  %623 = vst [vmem:[%s1306_s3 + $0x48] sm:$0xff] %v896_v55  ;;  %923 = vrcp.f32 %v573_v32 }
 0x1df   :  { %v900_v44 = vpop.eup %899  ;;  %614 = vst [vmem:[%s1306_s3] sm:$0xff] %v898_v45 }
 0x1e0   :  { %v902_v48 = vpop.eup %901  ;;  %622 = vst [vmem:[%s1306_s3 + $0x40] sm:$0xff] %v900_v44 }
 0x1e1   :  { %v904_v49 = vpop.eup %903  ;;  %v581_v58 = vadd.f32 1.0, %v902_v48 }
 0x1e2   :  { %v906_v33 = vpop.eup %905  ;;  %617 = vst [vmem:[%s1306_s3 + $0x18] sm:$0xff] %v904_v49 }
 0x1e3   :  { %v908_v57 = vpop.eup %907  ;;  %625 = vst [vmem:[%s1306_s3 + $0x58] sm:$0xff] %v906_v33  ;;  %925 = vrcp.f32 %v581_v58 }
 0x1e4   :  { %v910_v17 = vpop.eup %909  ;;  %616 = vst [vmem:[%s1306_s3 + $0x10] sm:$0xff] %v908_v57 }
 0x1e5   :  { %v912_v56 = vpop.eup %911  ;;  %624 = vst [vmem:[%s1306_s3 + $0x50] sm:$0xff] %v910_v17 }
 0x1e6   :  { %v914_v59 = vpop.eup %913  ;;  %v572_v53 = vadd.f32 1.0, %v912_v56 }
 0x1e7   :  { %v916_v62 = vpop.eup %915  ;;  %619 = vst [vmem:[%s1306_s3 + $0x28] sm:$0xff] %v914_v59 }
 0x1e8   :  { %v918_v52 = vpop.eup %917  ;;  %627 = vst [vmem:[%s1306_s3 + $0x68] sm:$0xff] %v916_v62  ;;  %927 = vrcp.f32 %v572_v53 }
 0x1e9   :  { %v920_v1 = vpop.eup %919  ;;  %v580_v63 = vadd.f32 1.0, %v918_v52 }
 0x1ea   :  { %v922_v20 = vpop.eup %921  ;;  %618 = vst [vmem:[%s1306_s3 + $0x20] sm:$0xff] %v920_v1 }
 0x1eb   :  { %v924_v61 = vpop.eup %923  ;;  %626 = vst [vmem:[%s1306_s3 + $0x60] sm:$0xff] %v922_v20  ;;  %929 = vrcp.f32 %v580_v63 }
 0x1ec   :  { %621 = vst [vmem:[%s1306_s3 + $0x38] sm:$0xff] %v924_v61 }
 0x1f0   :  { %v926_v2 = vpop.eup %925 }
 0x1f1   :  { %629 = vst [vmem:[%s1306_s3 + $0x78] sm:$0xff] %v926_v2 }
 0x1f5   :  { %v928_v60 = vpop.eup %927 }
 0x1f6   :  { %620 = vst [vmem:[%s1306_s3 + $0x30] sm:$0xff] %v928_v60 }
 0x1f8   :  { %v930_v3 = vpop.eup %929 }
 0x1f9   :  { %628 = vst [vmem:[%s1306_s3 + $0x70] sm:$0xff] %v930_v3 }

// kernel: velofusion_forward.3
= control target key start
LH: loop header
LB: loop body
LE: loop exit
PB: predicated region body
PF: predicated region fallthrough
CT: control target
= control target key end

     0   :  { %s1492_s2 = inlined_call_operand.vmem [shape: f32[128,128], index: 2, kind: input, shape index: {}]   ;;  %s1493_s1 = inlined_call_operand.vmem [shape: f32[128,128], index: 1, kind: input, shape index: {}]   ;;  %s1494_s0 = inlined_call_operand.vmem [shape: f32[128,128], index: 0, kind: input, shape index: {}]   ;;  %s1495_s4 = inlined_call_operand.vmem [shape: f32[128,256], index: 4, kind: input, shape index: {}]   ;;  %s1496_s3 = inlined_call_operand.vmem [shape: f32[1,128], index: 3, kind: input, shape index: {}]   ;;  %s1497_s5 = inlined_call_operand.vmem [shape: f32[1,256], index: 5, kind: input, shape index: {}]   ;;  %s1498_s6 = inlined_call_operand.vmem [shape: f32[128,256], index: 6, kind: output, shape index: {}]  }
   0x1   :  { %v54_v0 = vld [vmem:[%s1492_s2 + $0x78] sm:$0xff]  ;;  %v53_v1 = vld [vmem:[%s1492_s2 + $0x70] sm:$0xff]  ;;  %v52_v2 = vld [vmem:[%s1492_s2 + $0x68] sm:$0xff] }
   0x2   :  { %851 = vmatprep.subr.mxu0 %v54_v0  ;;  %v51_v3 = vld [vmem:[%s1492_s2 + $0x60] sm:$0xff]  ;;  %v50_v5 = vld [vmem:[%s1492_s2 + $0x58] sm:$0xff]  ;;  %v49_v6 = vld [vmem:[%s1492_s2 + $0x50] sm:$0xff] }
   0x3   :  { %852 = vmatpush3.msra.mxu0 %v54_v0  ;;  %v23_v4 = vld [vmem:[%s1493_s1] sm:$0xff]  ;;  %v48_v7 = vld [vmem:[%s1492_s2 + $0x48] sm:$0xff]  ;;  %v46_v9 = vld [vmem:[%s1492_s2 + $0x38] sm:$0xff] }
   0x4   :  { %853 = vmatprep.subr.mxu0 %v53_v1  ;;  %883 = vmatprep.mubr.f32.mxu0 %v23_v4  ;;  %v47_v8 = vld [vmem:[%s1492_s2 + $0x40] sm:$0xff]  ;;  %v45_v10 = vld [vmem:[%s1492_s2 + $0x30] sm:$0xff]  ;;  %v44_v11 = vld [vmem:[%s1492_s2 + $0x28] sm:$0xff] }
   0x5   :  { %854 = vmatpush3.msra.mxu0 %v53_v1  ;;  %v43_v12 = vld [vmem:[%s1492_s2 + $0x20] sm:$0xff]  ;;  %v42_v13 = vld [vmem:[%s1492_s2 + $0x18] sm:$0xff]  ;;  %v41_v14 = vld [vmem:[%s1492_s2 + $0x10] sm:$0xff] }
   0x6   :  { %855 = vmatprep.subr.mxu0 %v52_v2  ;;  %v40_v15 = vld [vmem:[%s1492_s2 + $0x8] sm:$0xff]  ;;  %v39_v16 = vld [vmem:[%s1492_s2] sm:$0xff]  ;;  %v25_v18 = vld [vmem:[%s1493_s1 + $0x10] sm:$0xff] }
   0x7   :  { %856 = vmatpush3.msra.mxu0 %v52_v2  ;;  %v24_v17 = vld [vmem:[%s1493_s1 + $0x8] sm:$0xff]  ;;  %v26_v19 = vld [vmem:[%s1493_s1 + $0x18] sm:$0xff]  ;;  %v27_v20 = vld [vmem:[%s1493_s1 + $0x20] sm:$0xff] }
   0x8   :  { %857 = vmatprep.subr.mxu0 %v51_v3  ;;  %v28_v21 = vld [vmem:[%s1493_s1 + $0x28] sm:$0xff]  ;;  %v29_v22 = vld [vmem:[%s1493_s1 + $0x30] sm:$0xff]  ;;  %v30_v23 = vld [vmem:[%s1493_s1 + $0x38] sm:$0xff] }
   0x9   :  { %858 = vmatpush3.msra.mxu0 %v51_v3  ;;  %v31_v24 = vld [vmem:[%s1493_s1 + $0x40] sm:$0xff]  ;;  %v32_v25 = vld [vmem:[%s1493_s1 + $0x48] sm:$0xff]  ;;  %v33_v26 = vld [vmem:[%s1493_s1 + $0x50] sm:$0xff] }
   0xa   :  { %859 = vmatprep.subr.mxu0 %v50_v5  ;;  %v34_v27 = vld [vmem:[%s1493_s1 + $0x58] sm:$0xff]  ;;  %v35_v28 = vld [vmem:[%s1493_s1 + $0x60] sm:$0xff]  ;;  %v36_v29 = vld [vmem:[%s1493_s1 + $0x68] sm:$0xff] }
   0xb   :  { %860 = vmatpush3.msra.mxu0 %v50_v5  ;;  %v37_v30 = vld [vmem:[%s1493_s1 + $0x70] sm:$0xff]  ;;  %v38_v31 = vld [vmem:[%s1493_s1 + $0x78] sm:$0xff]  ;;  %v1099_v32 = vld [vmem:[%s1494_s0] sm:$0xff] }
   0xc   :  { %861 = vmatprep.subr.mxu0 %v49_v6  ;;  %939 = vmatprep.mubr.f32.mxu1 %v1099_v32  ;;  %v415_v33 = vld [vmem:[%s1495_s4 + $0xf8] sm:$0xff]  ;;  %v414_v34 = vld [vmem:[%s1495_s4 + $0xf0] sm:$0xff]  ;;  %v413_v35 = vld [vmem:[%s1495_s4 + $0xe8] sm:$0xff] }
   0xd   :  { %862 = vmatpush3.msra.mxu0 %v49_v6  ;;  %v412_v36 = vld [vmem:[%s1495_s4 + $0xe0] sm:$0xff]  ;;  %v411_v37 = vld [vmem:[%s1495_s4 + $0xd8] sm:$0xff]  ;;  %v410_v38 = vld [vmem:[%s1495_s4 + $0xd0] sm:$0xff] }
   0xe   :  { %863 = vmatprep.subr.mxu0 %v48_v7  ;;  %v409_v39 = vld [vmem:[%s1495_s4 + $0xc8] sm:$0xff]  ;;  %v408_v40 = vld [vmem:[%s1495_s4 + $0xc0] sm:$0xff]  ;;  %v407_v41 = vld [vmem:[%s1495_s4 + $0xb8] sm:$0xff] }
   0xf   :  { %864 = vmatpush3.msra.mxu0 %v48_v7  ;;  %v406_v42 = vld [vmem:[%s1495_s4 + $0xb0] sm:$0xff]  ;;  %v405_v43 = vld [vmem:[%s1495_s4 + $0xa8] sm:$0xff]  ;;  %v404_v44 = vld [vmem:[%s1495_s4 + $0xa0] sm:$0xff] }
  0x10   :  { %865 = vmatprep.subr.mxu0 %v47_v8  ;;  %v403_v45 = vld [vmem:[%s1495_s4 + $0x98] sm:$0xff]  ;;  %v402_v46 = vld [vmem:[%s1495_s4 + $0x90] sm:$0xff]  ;;  %v401_v47 = vld [vmem:[%s1495_s4 + $0x88] sm:$0xff] }
  0x11   :  { %866 = vmatpush3.msra.mxu0 %v47_v8  ;;  %v400_v48 = vld [vmem:[%s1495_s4 + $0x80] sm:$0xff]  ;;  %v399_v49 = vld [vmem:[%s1495_s4 + $0x78] sm:$0xff]  ;;  %v398_v50 = vld [vmem:[%s1495_s4 + $0x70] sm:$0xff] }
  0x12   :  { %867 = vmatprep.subr.mxu0 %v46_v9  ;;  %v397_v51 = vld [vmem:[%s1495_s4 + $0x68] sm:$0xff]  ;;  %v396_v52 = vld [vmem:[%s1495_s4 + $0x60] sm:$0xff]  ;;  %v395_v53 = vld [vmem:[%s1495_s4 + $0x58] sm:$0xff] }
  0x13   :  { %868 = vmatpush3.msra.mxu0 %v46_v9  ;;  %v394_v54 = vld [vmem:[%s1495_s4 + $0x50] sm:$0xff]  ;;  %v393_v55 = vld [vmem:[%s1495_s4 + $0x48] sm:$0xff]  ;;  %v392_v56 = vld [vmem:[%s1495_s4 + $0x40] sm:$0xff] }
  0x14   :  { %869 = vmatprep.subr.mxu0 %v45_v10  ;;  %v391_v57 = vld [vmem:[%s1495_s4 + $0x38] sm:$0xff] }
  0x15   :  { %870 = vmatpush3.msra.mxu0 %v45_v10  ;;  %v1180_v10 = vld [vmem:[%s1494_s0 + $0x8] sm:$0xff] }
  0x16   :  { %871 = vmatprep.subr.mxu0 %v44_v11 }
  0x17   :  { %872 = vmatpush3.msra.mxu0 %v44_v11  ;;  %v1185_v11 = vld [vmem:[%s1494_s0 + $0x10] sm:$0xff] }
  0x18   :  { %873 = vmatprep.subr.mxu0 %v43_v12 }
  0x19   :  { %874 = vmatpush3.msra.mxu0 %v43_v12  ;;  %v1192_v12 = vld [vmem:[%s1494_s0 + $0x18] sm:$0xff] }
  0x1a   :  { %875 = vmatprep.subr.mxu0 %v42_v13 }
  0x1b   :  { %876 = vmatpush3.msra.mxu0 %v42_v13  ;;  %v1197_v13 = vld [vmem:[%s1494_s0 + $0x20] sm:$0xff] }
  0x1c   :  { %877 = vmatprep.subr.mxu0 %v41_v14 }
  0x1d   :  { %878 = vmatpush3.msra.mxu0 %v41_v14  ;;  %v1204_v14 = vld [vmem:[%s1494_s0 + $0x28] sm:$0xff] }
  0x1e   :  { %879 = vmatprep.subr.mxu0 %v40_v15 }
  0x1f   :  { %880 = vmatpush3.msra.mxu0 %v40_v15  ;;  %v1209_v15 = vld [vmem:[%s1494_s0 + $0x30] sm:$0xff] }
  0x20   :  { %881 = vmatprep.subr.mxu0 %v39_v16 }
  0x21   :  { %882 = vmatpush3.msra.mxu0 %v39_v16  ;;  %v1216_v16 = vld [vmem:[%s1494_s0 + $0x38] sm:$0xff] }
  0x22   :  { %884 = vmatmul.mubr.f32.vlgmr.msra.gmra.mxu0 %v24_v17  ;;  %416 = vmatprep.subr.mxu0 %v415_v33  ;;  %v1221_v17 = vld [vmem:[%s1494_s0 + $0x40] sm:$0xff]  ;;  %v964_v33 = vmov 0.0  }
  0x23   :  { %886 = vmatprep.mubr.f32.mxu0 %v25_v18  ;;  %417 = vmatpush1.msra.mxu0 %v414_v34  ;;  %v1228_v18 = vld [vmem:[%s1494_s0 + $0x48] sm:$0xff] }
  0x24   :  { %418 = vmatprep.subr.mxu0 %v413_v35  ;;  %v1293_v35 = vld [vmem:[%s1496_s3] ss:$0 sm:$0xff] }
  0x25   :  { %419 = vmatpush1.msra.mxu0 %v412_v36 }
  0x26   :  { %887 = vmatmul.mubr.f32.gmra.mxu0 %v26_v19  ;;  %420 = vmatprep.subr.mxu0 %v411_v37  ;;  %v1233_v19 = vld [vmem:[%s1494_s0 + $0x50] sm:$0xff] }
  0x27   :  { %889 = vmatprep.mubr.f32.mxu0 %v27_v20  ;;  %421 = vmatpush1.msra.mxu0 %v410_v38  ;;  %v1240_v20 = vld [vmem:[%s1494_s0 + $0x58] sm:$0xff] }
  0x28   :  { %422 = vmatprep.subr.mxu0 %v409_v39 }
  0x29   :  { %423 = vmatpush1.msra.mxu0 %v408_v40 }
  0x2a   :  { %890 = vmatmul.mubr.f32.gmra.mxu0 %v28_v21  ;;  %424 = vmatprep.subr.mxu0 %v407_v41  ;;  %v1245_v21 = vld [vmem:[%s1494_s0 + $0x60] sm:$0xff] }
  0x2b   :  { %892 = vmatprep.mubr.f32.mxu0 %v29_v22  ;;  %425 = vmatpush1.msra.mxu0 %v406_v42  ;;  %v1252_v22 = vld [vmem:[%s1494_s0 + $0x68] sm:$0xff] }
  0x2c   :  { %426 = vmatprep.subr.mxu0 %v405_v43 }
  0x2d   :  { %427 = vmatpush1.msra.mxu0 %v404_v44 }
  0x2e   :  { %893 = vmatmul.mubr.f32.gmra.mxu0 %v30_v23  ;;  %428 = vmatprep.subr.mxu0 %v403_v45  ;;  %v1257_v23 = vld [vmem:[%s1494_s0 + $0x70] sm:$0xff] }
  0x2f   :  { %895 = vmatprep.mubr.f32.mxu0 %v31_v24  ;;  %429 = vmatpush1.msra.mxu0 %v402_v46  ;;  %v1264_v24 = vld [vmem:[%s1494_s0 + $0x78] sm:$0xff] }
  0x30   :  { %430 = vmatprep.subr.mxu0 %v401_v47 }
  0x31   :  { %431 = vmatpush1.msra.mxu0 %v400_v48 }
  0x32   :  { %896 = vmatmul.mubr.f32.gmra.mxu0 %v32_v25  ;;  %432 = vmatprep.subr.mxu0 %v399_v49  ;;  %v390_v25 = vld [vmem:[%s1495_s4 + $0x30] sm:$0xff] }
  0x33   :  { %898 = vmatprep.mubr.f32.mxu0 %v33_v26  ;;  %433 = vmatpush1.msra.mxu0 %v398_v50  ;;  %v389_v26 = vld [vmem:[%s1495_s4 + $0x28] sm:$0xff] }
  0x34   :  { %434 = vmatprep.subr.mxu0 %v397_v51 }
  0x35   :  { %435 = vmatpush1.msra.mxu0 %v396_v52 }
  0x36   :  { %899 = vmatmul.mubr.f32.gmra.mxu0 %v34_v27  ;;  %436 = vmatprep.subr.mxu0 %v395_v53  ;;  %v388_v27 = vld [vmem:[%s1495_s4 + $0x20] sm:$0xff] }
  0x37   :  { %901 = vmatprep.mubr.f32.mxu0 %v35_v28  ;;  %437 = vmatpush1.msra.mxu0 %v394_v54  ;;  %v387_v28 = vld [vmem:[%s1495_s4 + $0x18] sm:$0xff] }
  0x38   :  { %438 = vmatprep.subr.mxu0 %v393_v55 }
  0x39   :  { %439 = vmatpush1.msra.mxu0 %v392_v56 }
  0x3a   :  { %902 = vmatmul.mubr.f32.gmra.mxu0 %v36_v29  ;;  %440 = vmatprep.subr.mxu0 %v391_v57  ;;  %v386_v29 = vld [vmem:[%s1495_s4 + $0x10] sm:$0xff] }
  0x3b   :  { %904 = vmatprep.mubr.f32.mxu0 %v37_v30  ;;  %441 = vmatpush1.msra.mxu0 %v390_v25  ;;  %v385_v30 = vld [vmem:[%s1495_s4 + $0x8] sm:$0xff] }
  0x3c   :  { %442 = vmatprep.subr.mxu0 %v389_v26 }
  0x3d   :  { %443 = vmatpush1.msra.mxu0 %v388_v27 }
  0x3e   :  { %905 = vmatmul.mubr.f32.gmra.mxu0 %v38_v31  ;;  %444 = vmatprep.subr.mxu0 %v387_v28  ;;  %v384_v31 = vld [vmem:[%s1495_s4] sm:$0xff] }
  0x3f   :  { %445 = vmatpush1.msra.mxu0 %v386_v29  ;;  %480 = vmatprep.mubr.f32.mxu0 %v964_v33 }
  0x40   :  { %446 = vmatprep.subr.mxu0 %v385_v30 }
  0x41   :  { %447 = vmatpush1.msra.mxu0 %v384_v31 }
  0xe2   :  { %v885_v58 = vpop.f32.mrf.mxu0 }
  0xe4   :  { %v121_v59 = vpop.f32.mrf.mxu0 }
  0xe6   :  { %v888_v60 = vpop.f32.mrf.mxu0 }
  0xe8   :  { %v131_v61 = vpop.f32.mrf.mxu0 }
  0xea   :  { %v891_v62 = vpop.f32.mrf.mxu0 }
  0xec   :  { %v141_v63 = vpop.f32.mrf.mxu0 }
  0xee   :  { %v894_v0 = vpop.f32.mrf.mxu0 }
  0xf0   :  { %v151_v1 = vpop.f32.mrf.mxu0 }
  0xf2   :  { %v897_v2 = vpop.f32.mrf.mxu0 }
  0xf4   :  { %v161_v3 = vpop.f32.mrf.mxu0 }
  0xf6   :  { %v900_v4 = vpop.f32.mrf.mxu0 }
  0xf8   :  { %v171_v5 = vpop.f32.mrf.mxu0 }
  0xfa   :  { %v903_v6 = vpop.f32.mrf.mxu0 }
  0xfc   :  { %v181_v7 = vpop.f32.mrf.mxu0 }
  0xfe   :  { %v906_v8 = vpop.f32.mrf.mxu0 }
  0xff   :  { %907 = vmatprep.subr.mxu1 %v906_v8 }
 0x100   :  { %v191_v9 = vpop.f32.mrf.mxu0  ;;  %908 = vmatpush3.msra.mxu1 %v906_v8 }
 0x101   :  { %909 = vmatprep.subr.mxu1 %v191_v9 }
 0x102   :  { %910 = vmatpush3.msra.mxu1 %v191_v9 }
 0x103   :  { %911 = vmatprep.subr.mxu1 %v903_v6 }
 0x104   :  { %912 = vmatpush3.msra.mxu1 %v903_v6 }
 0x105   :  { %913 = vmatprep.subr.mxu1 %v181_v7 }
 0x106   :  { %914 = vmatpush3.msra.mxu1 %v181_v7 }
 0x107   :  { %915 = vmatprep.subr.mxu1 %v900_v4 }
 0x108   :  { %916 = vmatpush3.msra.mxu1 %v900_v4 }
 0x109   :  { %917 = vmatprep.subr.mxu1 %v171_v5 }
 0x10a   :  { %918 = vmatpush3.msra.mxu1 %v171_v5 }
 0x10b   :  { %919 = vmatprep.subr.mxu1 %v897_v2 }
 0x10c   :  { %920 = vmatpush3.msra.mxu1 %v897_v2 }
 0x10d   :  { %921 = vmatprep.subr.mxu1 %v161_v3 }
 0x10e   :  { %922 = vmatpush3.msra.mxu1 %v161_v3 }
 0x10f   :  { %923 = vmatprep.subr.mxu1 %v894_v0 }
 0x110   :  { %924 = vmatpush3.msra.mxu1 %v894_v0 }
 0x111   :  { %925 = vmatprep.subr.mxu1 %v151_v1 }
 0x112   :  { %926 = vmatpush3.msra.mxu1 %v151_v1 }
 0x113   :  { %927 = vmatprep.subr.mxu1 %v891_v62 }
 0x114   :  { %928 = vmatpush3.msra.mxu1 %v891_v62 }
 0x115   :  { %929 = vmatprep.subr.mxu1 %v141_v63 }
 0x116   :  { %930 = vmatpush3.msra.mxu1 %v141_v63 }
 0x117   :  { %931 = vmatprep.subr.mxu1 %v888_v60 }
 0x118   :  { %932 = vmatpush3.msra.mxu1 %v888_v60 }
 0x119   :  { %933 = vmatprep.subr.mxu1 %v131_v61 }
 0x11a   :  { %934 = vmatpush3.msra.mxu1 %v131_v61 }
 0x11b   :  { %935 = vmatprep.subr.mxu1 %v885_v58 }
 0x11c   :  { %936 = vmatpush3.msra.mxu1 %v885_v58 }
 0x11d   :  { %937 = vmatprep.subr.mxu1 %v121_v59 }
 0x11e   :  { %938 = vmatpush3.msra.mxu1 %v121_v59 }
 0x11f   :  { %940 = vmatmul.mubr.f32.vlgmr.msra.gmra.mxu1 %v1180_v10 }
 0x120   :  { %942 = vmatprep.mubr.f32.mxu1 %v1185_v11 }
 0x123   :  { %943 = vmatmul.mubr.f32.gmra.mxu1 %v1192_v12 }
 0x124   :  { %945 = vmatprep.mubr.f32.mxu1 %v1197_v13 }
 0x127   :  { %946 = vmatmul.mubr.f32.gmra.mxu1 %v1204_v14 }
 0x128   :  { %948 = vmatprep.mubr.f32.mxu1 %v1209_v15 }
 0x12b   :  { %949 = vmatmul.mubr.f32.gmra.mxu1 %v1216_v16 }
 0x12c   :  { %951 = vmatprep.mubr.f32.mxu1 %v1221_v17 }
 0x12f   :  { %952 = vmatmul.mubr.f32.gmra.mxu1 %v1228_v18 }
 0x130   :  { %954 = vmatprep.mubr.f32.mxu1 %v1233_v19 }
 0x133   :  { %955 = vmatmul.mubr.f32.gmra.mxu1 %v1240_v20 }
 0x134   :  { %957 = vmatprep.mubr.f32.mxu1 %v1245_v21 }
 0x137   :  { %958 = vmatmul.mubr.f32.gmra.mxu1 %v1252_v22 }
 0x138   :  { %960 = vmatprep.mubr.f32.mxu1 %v1257_v23 }
 0x13b   :  { %961 = vmatmul.mubr.f32.gmra.mxu1 %v1264_v24 }
 0x13c   :  { %653 = vmatprep.mubr.f32.mxu1 %v964_v33 }
 0x1df   :  { %v941_v34 = vpop.f32.mrf.mxu1 }
 0x1e0   :  { %v295_v39 = vadd.f32 %v941_v34, %v1293_v35 }
 0x1e1   :  { %v289_v36 = vpop.f32.mrf.mxu1 }
 0x1e2   :  { %v290_v37 = vadd.f32 %v1293_v35, %v289_v36  ;;  %v369_v42 = vmax.f32 %v295_v39, 0.0 }
 0x1e3   :  { %v944_v38 = vpop.f32.mrf.mxu1 }
 0x1e4   :  { %v368_v40 = vmax.f32 %v290_v37, 0.0  ;;  %v305_v45 = vadd.f32 %v944_v38, %v1293_v35 }
 0x1e5   :  { %v299_v41 = vpop.f32.mrf.mxu1 }
 0x1e6   :  { %481 = vmatmul.mubr.f32.vlgmr.msra.gmra.mxu0 %v368_v40  ;;  %v300_v43 = vadd.f32 %v1293_v35, %v299_v41  ;;  %v371_v48 = vmax.f32 %v305_v45, 0.0 }
 0x1e7   :  { %486 = vmatprep.mubr.f32.mxu0 %v964_v33  ;;  %v947_v44 = vpop.f32.mrf.mxu1 }
 0x1e8   :  { %v370_v46 = vmax.f32 %v300_v43, 0.0  ;;  %v315_v51 = vadd.f32 %v947_v44, %v1293_v35 }
 0x1e9   :  { %v309_v47 = vpop.f32.mrf.mxu1 }
 0x1ea   :  { %487 = vmatmul.mubr.f32.gmra.mxu0 %v369_v42  ;;  %v310_v49 = vadd.f32 %v1293_v35, %v309_v47  ;;  %v373_v54 = vmax.f32 %v315_v51, 0.0 }
 0x1eb   :  { %492 = vmatprep.mubr.f32.mxu0 %v964_v33  ;;  %v950_v50 = vpop.f32.mrf.mxu1 }
 0x1ec   :  { %v372_v52 = vmax.f32 %v310_v49, 0.0  ;;  %v325_v57 = vadd.f32 %v950_v50, %v1293_v35 }
 0x1ed   :  { %v319_v53 = vpop.f32.mrf.mxu1 }
 0x1ee   :  { %493 = vmatmul.mubr.f32.gmra.mxu0 %v370_v46  ;;  %v320_v55 = vadd.f32 %v1293_v35, %v319_v53  ;;  %v375_v60 = vmax.f32 %v325_v57, 0.0 }
 0x1ef   :  { %498 = vmatprep.mubr.f32.mxu0 %v964_v33  ;;  %v953_v56 = vpop.f32.mrf.mxu1 }
 0x1f0   :  { %v374_v58 = vmax.f32 %v320_v55, 0.0  ;;  %v335_v63 = vadd.f32 %v953_v56, %v1293_v35 }
 0x1f1   :  { %v329_v59 = vpop.f32.mrf.mxu1 }
 0x1f2   :  { %499 = vmatmul.mubr.f32.gmra.mxu0 %v371_v48  ;;  %v330_v61 = vadd.f32 %v1293_v35, %v329_v59  ;;  %v377_v2 = vmax.f32 %v335_v63, 0.0 }
 0x1f3   :  { %504 = vmatprep.mubr.f32.mxu0 %v964_v33  ;;  %v956_v62 = vpop.f32.mrf.mxu1 }
 0x1f4   :  { %v376_v0 = vmax.f32 %v330_v61, 0.0  ;;  %v345_v5 = vadd.f32 %v956_v62, %v1293_v35 }
 0x1f5   :  { %v339_v1 = vpop.f32.mrf.mxu1 }
 0x1f6   :  { %505 = vmatmul.mubr.f32.gmra.mxu0 %v372_v52  ;;  %v340_v3 = vadd.f32 %v1293_v35, %v339_v1  ;;  %v379_v8 = vmax.f32 %v345_v5, 0.0 }
 0x1f7   :  { %510 = vmatprep.mubr.f32.mxu0 %v964_v33  ;;  %v959_v4 = vpop.f32.mrf.mxu1 }
 0x1f8   :  { %v378_v6 = vmax.f32 %v340_v3, 0.0  ;;  %v355_v26 = vadd.f32 %v959_v4, %v1293_v35 }
 0x1f9   :  { %v349_v7 = vpop.f32.mrf.mxu1 }
 0x1fa   :  { %511 = vmatmul.mubr.f32.gmra.mxu0 %v373_v54  ;;  %v350_v9 = vadd.f32 %v1293_v35, %v349_v7  ;;  %v381_v29 = vmax.f32 %v355_v26, 0.0 }
 0x1fb   :  { %516 = vmatprep.mubr.f32.mxu0 %v964_v33  ;;  %v962_v25 = vpop.f32.mrf.mxu1 }
 0x1fc   :  { %v380_v27 = vmax.f32 %v350_v9, 0.0  ;;  %v365_v31 = vadd.f32 %v962_v25, %v1293_v35 }
 0x1fd   :  { %v359_v28 = vpop.f32.mrf.mxu1 }
 0x1fe   :  { %517 = vmatmul.mubr.f32.gmra.mxu0 %v374_v58  ;;  %v360_v30 = vadd.f32 %v1293_v35, %v359_v28  ;;  %v383_v36 = vmax.f32 %v365_v31, 0.0 }
 0x1ff   :  { %522 = vmatprep.mubr.f32.mxu0 %v964_v33 }
 0x200   :  { %v382_v34 = vmax.f32 %v360_v30, 0.0 }
 0x202   :  { %523 = vmatmul.mubr.f32.gmra.mxu0 %v375_v60 }
 0x203   :  { %528 = vmatprep.mubr.f32.mxu0 %v964_v33 }
 0x206   :  { %529 = vmatmul.mubr.f32.gmra.mxu0 %v376_v0 }
 0x207   :  { %534 = vmatprep.mubr.f32.mxu0 %v964_v33 }
 0x20a   :  { %535 = vmatmul.mubr.f32.gmra.mxu0 %v377_v2 }
 0x20b   :  { %540 = vmatprep.mubr.f32.mxu0 %v964_v33 }
 0x20e   :  { %541 = vmatmul.mubr.f32.gmra.mxu0 %v378_v6 }
 0x20f   :  { %546 = vmatprep.mubr.f32.mxu0 %v964_v33 }
 0x212   :  { %547 = vmatmul.mubr.f32.gmra.mxu0 %v379_v8 }
 0x213   :  { %552 = vmatprep.mubr.f32.mxu0 %v964_v33 }
 0x216   :  { %553 = vmatmul.mubr.f32.gmra.mxu0 %v380_v27 }
 0x217   :  { %558 = vmatprep.mubr.f32.mxu0 %v964_v33 }
 0x21a   :  { %559 = vmatmul.mubr.f32.gmra.mxu0 %v381_v29 }
 0x21b   :  { %564 = vmatprep.mubr.f32.mxu0 %v964_v33 }
 0x21e   :  { %565 = vmatmul.mubr.f32.gmra.mxu0 %v382_v34 }
 0x21f   :  { %570 = vmatprep.mubr.f32.mxu0 %v964_v33 }
 0x222   :  { %571 = vmatmul.mubr.f32.gmra.mxu0 %v383_v36 }
 0x2a6   :  { %v482_v37 = vpop.f32.mrf.mxu0 }
 0x2a8   :  { %v484_v38 = vpop.f32.mrf.mxu0 }
 0x2aa   :  { %v488_v39 = vpop.f32.mrf.mxu0 }
 0x2ac   :  { %v490_v40 = vpop.f32.mrf.mxu0 }
 0x2ae   :  { %v494_v41 = vpop.f32.mrf.mxu0 }
 0x2b0   :  { %v496_v42 = vpop.f32.mrf.mxu0 }
 0x2b2   :  { %v500_v43 = vpop.f32.mrf.mxu0 }
 0x2b4   :  { %v502_v44 = vpop.f32.mrf.mxu0 }
 0x2b6   :  { %v506_v45 = vpop.f32.mrf.mxu0 }
 0x2b8   :  { %v508_v46 = vpop.f32.mrf.mxu0 }
 0x2ba   :  { %v512_v47 = vpop.f32.mrf.mxu0 }
 0x2bc   :  { %v514_v48 = vpop.f32.mrf.mxu0 }
 0x2be   :  { %v518_v49 = vpop.f32.mrf.mxu0 }
 0x2c0   :  { %v520_v35 = vpop.f32.mrf.mxu0 }
 0x2c2   :  { %v524_v50 = vpop.f32.mrf.mxu0 }
 0x2c4   :  { %v526_v51 = vpop.f32.mrf.mxu0 }
 0x2c6   :  { %v530_v52 = vpop.f32.mrf.mxu0 }
 0x2c8   :  { %v532_v53 = vpop.f32.mrf.mxu0 }
 0x2ca   :  { %v536_v54 = vpop.f32.mrf.mxu0 }
 0x2cc   :  { %v538_v55 = vpop.f32.mrf.mxu0 }
 0x2ce   :  { %v542_v56 = vpop.f32.mrf.mxu0 }
 0x2d0   :  { %v544_v57 = vpop.f32.mrf.mxu0 }
 0x2d2   :  { %v548_v58 = vpop.f32.mrf.mxu0 }
 0x2d4   :  { %v550_v59 = vpop.f32.mrf.mxu0 }
 0x2d6   :  { %v554_v60 = vpop.f32.mrf.mxu0 }
 0x2d8   :  { %v556_v61 = vpop.f32.mrf.mxu0 }
 0x2da   :  { %v560_v62 = vpop.f32.mrf.mxu0 }
 0x2dc   :  { %v562_v63 = vpop.f32.mrf.mxu0 }
 0x2de   :  { %v566_v0 = vpop.f32.mrf.mxu0 }
 0x2e0   :  { %v568_v1 = vpop.f32.mrf.mxu0 }
 0x2e2   :  { %v572_v2 = vpop.f32.mrf.mxu0 }
 0x2e4   :  { %v574_v3 = vpop.f32.mrf.mxu0 }
 0x2e5   :  { %589 = vmatprep.subr.mxu1 %v574_v3 }
 0x2e6   :  { %590 = vmatpush1.msra.mxu1 %v572_v2 }
 0x2e7   :  { %591 = vmatprep.subr.mxu1 %v568_v1 }
 0x2e8   :  { %592 = vmatpush1.msra.mxu1 %v566_v0 }
 0x2e9   :  { %593 = vmatprep.subr.mxu1 %v562_v63 }
 0x2ea   :  { %594 = vmatpush1.msra.mxu1 %v560_v62 }
 0x2eb   :  { %595 = vmatprep.subr.mxu1 %v556_v61 }
 0x2ec   :  { %596 = vmatpush1.msra.mxu1 %v554_v60 }
 0x2ed   :  { %597 = vmatprep.subr.mxu1 %v550_v59 }
 0x2ee   :  { %598 = vmatpush1.msra.mxu1 %v548_v58 }
 0x2ef   :  { %599 = vmatprep.subr.mxu1 %v544_v57 }
 0x2f0   :  { %600 = vmatpush1.msra.mxu1 %v542_v56 }
 0x2f1   :  { %601 = vmatprep.subr.mxu1 %v538_v55 }
 0x2f2   :  { %602 = vmatpush1.msra.mxu1 %v536_v54 }
 0x2f3   :  { %603 = vmatprep.subr.mxu1 %v532_v53 }
 0x2f4   :  { %604 = vmatpush1.msra.mxu1 %v530_v52 }
 0x2f5   :  { %605 = vmatprep.subr.mxu1 %v526_v51 }
 0x2f6   :  { %606 = vmatpush1.msra.mxu1 %v524_v50 }
 0x2f7   :  { %607 = vmatprep.subr.mxu1 %v520_v35 }
 0x2f8   :  { %608 = vmatpush1.msra.mxu1 %v518_v49 }
 0x2f9   :  { %609 = vmatprep.subr.mxu1 %v514_v48 }
 0x2fa   :  { %610 = vmatpush1.msra.mxu1 %v512_v47 }
 0x2fb   :  { %611 = vmatprep.subr.mxu1 %v508_v46 }
 0x2fc   :  { %612 = vmatpush1.msra.mxu1 %v506_v45 }
 0x2fd   :  { %613 = vmatprep.subr.mxu1 %v502_v44 }
 0x2fe   :  { %614 = vmatpush1.msra.mxu1 %v500_v43 }
 0x2ff   :  { %615 = vmatprep.subr.mxu1 %v496_v42 }
 0x300   :  { %616 = vmatpush1.msra.mxu1 %v494_v41 }
 0x301   :  { %617 = vmatprep.subr.mxu1 %v490_v40 }
 0x302   :  { %618 = vmatpush1.msra.mxu1 %v488_v39 }
 0x303   :  { %619 = vmatprep.subr.mxu1 %v484_v38 }
 0x304   :  { %620 = vmatpush1.msra.mxu1 %v482_v37 }
 0x305   :  { %654 = vmatmul.mubr.f32.vlgmr.msra.gmra.mxu1 %v1099_v32  ;;  %v579_v32 = vlaneseq }
 0x306   :  { %659 = vmatprep.mubr.f32.mxu1 %v964_v33 }
 0x309   :  { %660 = vmatmul.mubr.f32.gmra.mxu1 %v1180_v10  ;;  %v580_v10 = vshrl.u32 %v579_v32, 7 }
 0x30a   :  { %665 = vmatprep.mubr.f32.mxu1 %v964_v33 }
 0x30d   :  { %666 = vmatmul.mubr.f32.gmra.mxu1 %v1185_v11  ;;  %v581_v11 = vsub.s32 0, %v580_v10 }
 0x30e   :  { %671 = vmatprep.mubr.f32.mxu1 %v964_v33 }
 0x311   :  { %672 = vmatmul.mubr.f32.gmra.mxu1 %v1192_v12  ;;  %v577_v12 = vld [vmem:[%s1497_s5] sm:$0x3] }
 0x312   :  { %677 = vmatprep.mubr.f32.mxu1 %v964_v33 }
 0x315   :  { %678 = vmatmul.mubr.f32.gmra.mxu1 %v1197_v13  ;;  %v585_v13 = vsub.s32 1, %v580_v10 }
 0x316   :  { %683 = vmatprep.mubr.f32.mxu1 %v964_v33 }
 0x319   :  { %684 = vmatmul.mubr.f32.gmra.mxu1 %v1204_v14  ;;  %v1360_v14 = vrot.slane %v577_v12, %v581_v11 }
 0x31a   :  { %689 = vmatprep.mubr.f32.mxu1 %v964_v33 }
 0x31d   :  { %690 = vmatmul.mubr.f32.gmra.mxu1 %v1209_v15  ;;  %v1362_v15 = vrot.slane %v577_v12, %v585_v13 }
 0x31e   :  { %695 = vmatprep.mubr.f32.mxu1 %v964_v33 }
 0x321   :  { %696 = vmatmul.mubr.f32.gmra.mxu1 %v1216_v16 }
 0x322   :  { %701 = vmatprep.mubr.f32.mxu1 %v964_v33 }
 0x325   :  { %702 = vmatmul.mubr.f32.gmra.mxu1 %v1221_v17 }
 0x326   :  { %707 = vmatprep.mubr.f32.mxu1 %v964_v33 }
 0x329   :  { %708 = vmatmul.mubr.f32.gmra.mxu1 %v1228_v18 }
 0x32a   :  { %713 = vmatprep.mubr.f32.mxu1 %v964_v33 }
 0x32d   :  { %714 = vmatmul.mubr.f32.gmra.mxu1 %v1233_v19 }
 0x32e   :  { %719 = vmatprep.mubr.f32.mxu1 %v964_v33 }
 0x331   :  { %720 = vmatmul.mubr.f32.gmra.mxu1 %v1240_v20 }
 0x332   :  { %725 = vmatprep.mubr.f32.mxu1 %v964_v33 }
 0x335   :  { %726 = vmatmul.mubr.f32.gmra.mxu1 %v1245_v21 }
 0x336   :  { %731 = vmatprep.mubr.f32.mxu1 %v964_v33 }
 0x339   :  { %732 = vmatmul.mubr.f32.gmra.mxu1 %v1252_v22 }
 0x33a   :  { %737 = vmatprep.mubr.f32.mxu1 %v964_v33 }
 0x33d   :  { %738 = vmatmul.mubr.f32.gmra.mxu1 %v1257_v23 }
 0x33e   :  { %743 = vmatprep.mubr.f32.mxu1 %v964_v33 }
 0x341   :  { %744 = vmatmul.mubr.f32.gmra.mxu1 %v1264_v24 }
 0x3c5   :  { %v655_v16 = vpop.f32.mrf.mxu1 }
 0x3c6   :  { %v656_v17 = vadd.f32 %v655_v16, %v1360_v14 }
 0x3c7   :  { %v657_v18 = vpop.f32.mrf.mxu1 }
 0x3c8   :  { %750 = vst [vmem:[%s1498_s6] sm:$0xff] %v656_v17  ;;  %v658_v19 = vadd.f32 %v657_v18, %v1362_v15 }
 0x3c9   :  { %v661_v20 = vpop.f32.mrf.mxu1 }
 0x3ca   :  { %751 = vst [vmem:[%s1498_s6 + $0x8] sm:$0xff] %v658_v19  ;;  %v662_v21 = vadd.f32 %v661_v20, %v1360_v14 }
 0x3cb   :  { %v663_v22 = vpop.f32.mrf.mxu1 }
 0x3cc   :  { %752 = vst [vmem:[%s1498_s6 + $0x10] sm:$0xff] %v662_v21  ;;  %v664_v23 = vadd.f32 %v663_v22, %v1362_v15 }
 0x3cd   :  { %v667_v24 = vpop.f32.mrf.mxu1 }
 0x3ce   :  { %753 = vst [vmem:[%s1498_s6 + $0x18] sm:$0xff] %v664_v23  ;;  %v668_v33 = vadd.f32 %v667_v24, %v1360_v14 }
 0x3cf   :  { %v669_v4 = vpop.f32.mrf.mxu1 }
 0x3d0   :  { %754 = vst [vmem:[%s1498_s6 + $0x20] sm:$0xff] %v668_v33  ;;  %v670_v5 = vadd.f32 %v669_v4, %v1362_v15 }
 0x3d1   :  { %v673_v6 = vpop.f32.mrf.mxu1 }
 0x3d2   :  { %755 = vst [vmem:[%s1498_s6 + $0x28] sm:$0xff] %v670_v5  ;;  %v674_v7 = vadd.f32 %v673_v6, %v1360_v14 }
 0x3d3   :  { %v675_v8 = vpop.f32.mrf.mxu1 }
 0x3d4   :  { %756 = vst [vmem:[%s1498_s6 + $0x30] sm:$0xff] %v674_v7  ;;  %v676_v9 = vadd.f32 %v675_v8, %v1362_v15 }
 0x3d5   :  { %v679_v25 = vpop.f32.mrf.mxu1 }
 0x3d6   :  { %757 = vst [vmem:[%s1498_s6 + $0x38] sm:$0xff] %v676_v9  ;;  %v680_v26 = vadd.f32 %v679_v25, %v1360_v14 }
 0x3d7   :  { %v681_v27 = vpop.f32.mrf.mxu1 }
 0x3d8   :  { %758 = vst [vmem:[%s1498_s6 + $0x40] sm:$0xff] %v680_v26  ;;  %v682_v28 = vadd.f32 %v681_v27, %v1362_v15 }
 0x3d9   :  { %v685_v29 = vpop.f32.mrf.mxu1 }
 0x3da   :  { %759 = vst [vmem:[%s1498_s6 + $0x48] sm:$0xff] %v682_v28  ;;  %v686_v30 = vadd.f32 %v685_v29, %v1360_v14 }
 0x3db   :  { %v687_v31 = vpop.f32.mrf.mxu1 }
 0x3dc   :  { %760 = vst [vmem:[%s1498_s6 + $0x50] sm:$0xff] %v686_v30  ;;  %v688_v34 = vadd.f32 %v687_v31, %v1362_v15 }
 0x3dd   :  { %v691_v36 = vpop.f32.mrf.mxu1 }
 0x3de   :  { %761 = vst [vmem:[%s1498_s6 + $0x58] sm:$0xff] %v688_v34  ;;  %v692_v37 = vadd.f32 %v691_v36, %v1360_v14 }
 0x3df   :  { %v693_v38 = vpop.f32.mrf.mxu1 }
 0x3e0   :  { %762 = vst [vmem:[%s1498_s6 + $0x60] sm:$0xff] %v692_v37  ;;  %v694_v39 = vadd.f32 %v693_v38, %v1362_v15 }
 0x3e1   :  { %v697_v40 = vpop.f32.mrf.mxu1 }
 0x3e2   :  { %763 = vst [vmem:[%s1498_s6 + $0x68] sm:$0xff] %v694_v39  ;;  %v698_v41 = vadd.f32 %v697_v40, %v1360_v14 }
 0x3e3   :  { %v699_v42 = vpop.f32.mrf.mxu1 }
 0x3e4   :  { %764 = vst [vmem:[%s1498_s6 + $0x70] sm:$0xff] %v698_v41  ;;  %v700_v43 = vadd.f32 %v699_v42, %v1362_v15 }
 0x3e5   :  { %v703_v44 = vpop.f32.mrf.mxu1 }
 0x3e6   :  { %765 = vst [vmem:[%s1498_s6 + $0x78] sm:$0xff] %v700_v43  ;;  %v704_v45 = vadd.f32 %v703_v44, %v1360_v14 }
 0x3e7   :  { %v705_v46 = vpop.f32.mrf.mxu1 }
 0x3e8   :  { %766 = vst [vmem:[%s1498_s6 + $0x80] sm:$0xff] %v704_v45  ;;  %v706_v47 = vadd.f32 %v705_v46, %v1362_v15 }
 0x3e9   :  { %v709_v48 = vpop.f32.mrf.mxu1 }
 0x3ea   :  { %767 = vst [vmem:[%s1498_s6 + $0x88] sm:$0xff] %v706_v47  ;;  %v710_v49 = vadd.f32 %v709_v48, %v1360_v14 }
 0x3eb   :  { %v711_v35 = vpop.f32.mrf.mxu1 }
 0x3ec   :  { %768 = vst [vmem:[%s1498_s6 + $0x90] sm:$0xff] %v710_v49  ;;  %v712_v50 = vadd.f32 %v711_v35, %v1362_v15 }
 0x3ed   :  { %v715_v51 = vpop.f32.mrf.mxu1 }
 0x3ee   :  { %769 = vst [vmem:[%s1498_s6 + $0x98] sm:$0xff] %v712_v50  ;;  %v716_v52 = vadd.f32 %v715_v51, %v1360_v14 }
 0x3ef   :  { %v717_v53 = vpop.f32.mrf.mxu1 }
 0x3f0   :  { %770 = vst [vmem:[%s1498_s6 + $0xa0] sm:$0xff] %v716_v52  ;;  %v718_v54 = vadd.f32 %v717_v53, %v1362_v15 }
 0x3f1   :  { %v721_v55 = vpop.f32.mrf.mxu1 }
 0x3f2   :  { %771 = vst [vmem:[%s1498_s6 + $0xa8] sm:$0xff] %v718_v54  ;;  %v722_v56 = vadd.f32 %v721_v55, %v1360_v14 }
 0x3f3   :  { %v723_v57 = vpop.f32.mrf.mxu1 }
 0x3f4   :  { %772 = vst [vmem:[%s1498_s6 + $0xb0] sm:$0xff] %v722_v56  ;;  %v724_v58 = vadd.f32 %v723_v57, %v1362_v15 }
 0x3f5   :  { %v727_v59 = vpop.f32.mrf.mxu1 }
 0x3f6   :  { %773 = vst [vmem:[%s1498_s6 + $0xb8] sm:$0xff] %v724_v58  ;;  %v728_v60 = vadd.f32 %v727_v59, %v1360_v14 }
 0x3f7   :  { %v729_v61 = vpop.f32.mrf.mxu1 }
 0x3f8   :  { %774 = vst [vmem:[%s1498_s6 + $0xc0] sm:$0xff] %v728_v60  ;;  %v730_v62 = vadd.f32 %v729_v61, %v1362_v15 }
 0x3f9   :  { %v733_v63 = vpop.f32.mrf.mxu1 }
 0x3fa   :  { %775 = vst [vmem:[%s1498_s6 + $0xc8] sm:$0xff] %v730_v62  ;;  %v734_v0 = vadd.f32 %v733_v63, %v1360_v14 }
 0x3fb   :  { %v735_v1 = vpop.f32.mrf.mxu1 }
 0x3fc   :  { %776 = vst [vmem:[%s1498_s6 + $0xd0] sm:$0xff] %v734_v0  ;;  %v736_v2 = vadd.f32 %v735_v1, %v1362_v15 }
 0x3fd   :  { %v739_v3 = vpop.f32.mrf.mxu1 }
 0x3fe   :  { %777 = vst [vmem:[%s1498_s6 + $0xd8] sm:$0xff] %v736_v2  ;;  %v740_v32 = vadd.f32 %v739_v3, %v1360_v14 }
 0x3ff   :  { %v741_v10 = vpop.f32.mrf.mxu1 }
 0x400   :  { %778 = vst [vmem:[%s1498_s6 + $0xe0] sm:$0xff] %v740_v32  ;;  %v742_v11 = vadd.f32 %v741_v10, %v1362_v15 }
 0x401   :  { %v745_v12 = vpop.f32.mrf.mxu1 }
 0x402   :  { %779 = vst [vmem:[%s1498_s6 + $0xe8] sm:$0xff] %v742_v11  ;;  %v746_v13 = vadd.f32 %v745_v12, %v1360_v14 }
 0x403   :  { %v747_v16 = vpop.f32.mrf.mxu1 }
 0x404   :  { %780 = vst [vmem:[%s1498_s6 + $0xf0] sm:$0xff] %v746_v13  ;;  %v748_v17 = vadd.f32 %v747_v16, %v1362_v15 }
 0x406   :  { %781 = vst [vmem:[%s1498_s6 + $0xf8] sm:$0xff] %v748_v17 }

// kernel: velofusion_forward.5
= control target key start
LH: loop header
LB: loop body
LE: loop exit
PB: predicated region body
PF: predicated region fallthrough
CT: control target
= control target key end

     0   :  { %s7098_s1 = inlined_call_operand.vmem [shape: f32[128,128], index: 1, kind: input, shape index: {}]   ;;  %s7099_s0 = inlined_call_operand.vmem [shape: f32[128,128], index: 0, kind: input, shape index: {}]   ;;  %s7100_s3 = inlined_call_operand.vmem [shape: f32[128,512], index: 3, kind: input, shape index: {}]   ;;  %s7101_s5 = inlined_call_operand.vmem [shape: f32[512,896], index: 5, kind: input, shape index: {}]   ;;  %s7102_s2 = inlined_call_operand.vmem [shape: f32[1,128], index: 2, kind: input, shape index: {}]   ;;  %s7103_s4 = inlined_call_operand.vmem [shape: f32[1,512], index: 4, kind: input, shape index: {}]   ;;  %s7104_s6 = inlined_call_operand.vmem [shape: f32[1,896], index: 6, kind: input, shape index: {}]   ;;  %s7105_s7 = inlined_call_operand.vmem [shape: f32[896,128], index: 7, kind: input, shape index: {}]   ;;  %s7106_s8 = inlined_call_operand.vmem [shape: f32[1,128], index: 8, kind: input, shape index: {}]   ;;  %s7107_s9 = inlined_call_operand.vmem [shape: f32[128,128], index: 9, kind: output, shape index: {}]  }
   0x1   :  { %v63_v0 = vld [vmem:[%s7098_s1 + $0x78] sm:$0xff]  ;;  %v62_v1 = vld [vmem:[%s7098_s1 + $0x70] sm:$0xff]  ;;  %v61_v2 = vld [vmem:[%s7098_s1 + $0x68] sm:$0xff] }
   0x2   :  { %3742 = vmatprep.subr.mxu0 %v63_v0  ;;  %v60_v3 = vld [vmem:[%s7098_s1 + $0x60] sm:$0xff]  ;;  %v59_v5 = vld [vmem:[%s7098_s1 + $0x58] sm:$0xff]  ;;  %v58_v6 = vld [vmem:[%s7098_s1 + $0x50] sm:$0xff] }
   0x3   :  { %3743 = vmatpush3.msra.mxu0 %v63_v0  ;;  %v32_v4 = vld [vmem:[%s7099_s0] sm:$0xff]  ;;  %v57_v7 = vld [vmem:[%s7098_s1 + $0x48] sm:$0xff]  ;;  %v55_v14 = vld [vmem:[%s7098_s1 + $0x38] sm:$0xff] }
   0x4   :  { %3744 = vmatprep.subr.mxu0 %v62_v1  ;;  %3774 = vmatprep.mubr.f32.mxu0 %v32_v4  ;;  %v293_v8 = vld [vmem:[%s7100_s3 + $0x1e8] sm:$0xff]  ;;  %v292_v9 = vld [vmem:[%s7100_s3 + $0x1e0] sm:$0xff]  ;;  %v54_v18 = vld [vmem:[%s7098_s1 + $0x30] sm:$0xff] }
   0x5   :  { %3745 = vmatpush3.msra.mxu0 %v62_v1  ;;  %318 = vmatprep.subr.mxu1 %v293_v8  ;;  %v56_v10 = vld [vmem:[%s7098_s1 + $0x40] sm:$0xff]  ;;  %v289_v11 = vld [vmem:[%s7100_s3 + $0x1c8] sm:$0xff]  ;;  %v51_v27 = vld [vmem:[%s7098_s1 + $0x18] sm:$0xff] }
   0x6   :  { %3746 = vmatprep.subr.mxu0 %v61_v2  ;;  %319 = vmatpush1.msra.mxu1 %v292_v9  ;;  %v288_v12 = vld [vmem:[%s7100_s3 + $0x1c0] sm:$0xff]  ;;  %v285_v13 = vld [vmem:[%s7100_s3 + $0x1a8] sm:$0xff]  ;;  %v50_v30 = vld [vmem:[%s7098_s1 + $0x10] sm:$0xff] }
   0x7   :  { %3747 = vmatpush3.msra.mxu0 %v61_v2  ;;  %320 = vmatprep.subr.mxu1 %v289_v11  ;;  %v284_v15 = vld [vmem:[%s7100_s3 + $0x1a0] sm:$0xff]  ;;  %v281_v16 = vld [vmem:[%s7100_s3 + $0x188] sm:$0xff]  ;;  %v295_v40 = vld [vmem:[%s7100_s3 + $0x1f8] sm:$0xff] }
   0x8   :  { %3748 = vmatprep.subr.mxu0 %v60_v3  ;;  %321 = vmatpush1.msra.mxu1 %v288_v12  ;;  %v280_v17 = vld [vmem:[%s7100_s3 + $0x180] sm:$0xff]  ;;  %v277_v19 = vld [vmem:[%s7100_s3 + $0x168] sm:$0xff]  ;;  %v34_v41 = vld [vmem:[%s7099_s0 + $0x10] sm:$0xff] }
   0x9   :  { %3749 = vmatpush3.msra.mxu0 %v60_v3  ;;  %322 = vmatprep.subr.mxu1 %v285_v13  ;;  %v276_v20 = vld [vmem:[%s7100_s3 + $0x160] sm:$0xff]  ;;  %v53_v21 = vld [vmem:[%s7098_s1 + $0x28] sm:$0xff]  ;;  %v294_v42 = vld [vmem:[%s7100_s3 + $0x1f0] sm:$0xff] }
   0xa   :  { %3750 = vmatprep.subr.mxu0 %v59_v5  ;;  %323 = vmatpush1.msra.mxu1 %v284_v15  ;;  %v273_v22 = vld [vmem:[%s7100_s3 + $0x148] sm:$0xff]  ;;  %v272_v23 = vld [vmem:[%s7100_s3 + $0x140] sm:$0xff]  ;;  %v291_v43 = vld [vmem:[%s7100_s3 + $0x1d8] sm:$0xff] }
   0xb   :  { %3751 = vmatpush3.msra.mxu0 %v59_v5  ;;  %324 = vmatprep.subr.mxu1 %v281_v16  ;;  %v52_v24 = vld [vmem:[%s7098_s1 + $0x20] sm:$0xff]  ;;  %v269_v25 = vld [vmem:[%s7100_s3 + $0x128] sm:$0xff]  ;;  %v290_v45 = vld [vmem:[%s7100_s3 + $0x1d0] sm:$0xff] }
   0xc   :  { %3752 = vmatprep.subr.mxu0 %v58_v6  ;;  %325 = vmatpush1.msra.mxu1 %v280_v17  ;;  %v268_v26 = vld [vmem:[%s7100_s3 + $0x120] sm:$0xff]  ;;  %v265_v28 = vld [vmem:[%s7100_s3 + $0x108] sm:$0xff]  ;;  %v35_v47 = vld [vmem:[%s7099_s0 + $0x18] sm:$0xff] }
   0xd   :  { %3753 = vmatpush3.msra.mxu0 %v58_v6  ;;  %326 = vmatprep.subr.mxu1 %v277_v19  ;;  %v264_v29 = vld [vmem:[%s7100_s3 + $0x100] sm:$0xff]  ;;  %v261_v31 = vld [vmem:[%s7100_s3 + $0xe8] sm:$0xff]  ;;  %v287_v48 = vld [vmem:[%s7100_s3 + $0x1b8] sm:$0xff] }
   0xe   :  { %3754 = vmatprep.subr.mxu0 %v57_v7  ;;  %327 = vmatpush1.msra.mxu1 %v276_v20  ;;  %v260_v32 = vld [vmem:[%s7100_s3 + $0xe0] sm:$0xff]  ;;  %v49_v33 = vld [vmem:[%s7098_s1 + $0x8] sm:$0xff]  ;;  %v286_v50 = vld [vmem:[%s7100_s3 + $0x1b0] sm:$0xff] }
   0xf   :  { %3755 = vmatpush3.msra.mxu0 %v57_v7  ;;  %328 = vmatprep.subr.mxu1 %v273_v22  ;;  %v257_v34 = vld [vmem:[%s7100_s3 + $0xc8] sm:$0xff]  ;;  %v256_v35 = vld [vmem:[%s7100_s3 + $0xc0] sm:$0xff]  ;;  %v283_v51 = vld [vmem:[%s7100_s3 + $0x198] sm:$0xff] }
  0x10   :  { %3756 = vmatprep.subr.mxu0 %v56_v10  ;;  %329 = vmatpush1.msra.mxu1 %v272_v23  ;;  %v48_v36 = vld [vmem:[%s7098_s1] sm:$0xff]  ;;  %v253_v37 = vld [vmem:[%s7100_s3 + $0xa8] sm:$0xff]  ;;  %v282_v53 = vld [vmem:[%s7100_s3 + $0x190] sm:$0xff] }
  0x11   :  { %3757 = vmatpush3.msra.mxu0 %v56_v10  ;;  %330 = vmatprep.subr.mxu1 %v269_v25  ;;  %v252_v38 = vld [vmem:[%s7100_s3 + $0xa0] sm:$0xff]  ;;  %v33_v39 = vld [vmem:[%s7099_s0 + $0x8] sm:$0xff]  ;;  %v279_v55 = vld [vmem:[%s7100_s3 + $0x178] sm:$0xff] }
  0x12   :  { %3758 = vmatprep.subr.mxu0 %v55_v14  ;;  %331 = vmatpush1.msra.mxu1 %v268_v26  ;;  %v249_v44 = vld [vmem:[%s7100_s3 + $0x88] sm:$0xff]  ;;  %v248_v46 = vld [vmem:[%s7100_s3 + $0x80] sm:$0xff]  ;;  %v38_v56 = vld [vmem:[%s7099_s0 + $0x30] sm:$0xff] }
  0x13   :  { %3759 = vmatpush3.msra.mxu0 %v55_v14  ;;  %332 = vmatprep.subr.mxu1 %v265_v28  ;;  %v36_v49 = vld [vmem:[%s7099_s0 + $0x20] sm:$0xff]  ;;  %v245_v52 = vld [vmem:[%s7100_s3 + $0x68] sm:$0xff]  ;;  %v278_v57 = vld [vmem:[%s7100_s3 + $0x170] sm:$0xff] }
  0x14   :  { %3760 = vmatprep.subr.mxu0 %v54_v18  ;;  %333 = vmatpush1.msra.mxu1 %v264_v29  ;;  %v37_v54 = vld [vmem:[%s7099_s0 + $0x28] sm:$0xff]  ;;  %v275_v58 = vld [vmem:[%s7100_s3 + $0x158] sm:$0xff]  ;;  %v274_v59 = vld [vmem:[%s7100_s3 + $0x150] sm:$0xff] }
  0x15   :  { %3761 = vmatpush3.msra.mxu0 %v54_v18  ;;  %334 = vmatprep.subr.mxu1 %v261_v31  ;;  %v39_v60 = vld [vmem:[%s7099_s0 + $0x38] sm:$0xff]  ;;  %v40_v62 = vld [vmem:[%s7099_s0 + $0x40] sm:$0xff]  ;;  %v270_v63 = vld [vmem:[%s7100_s3 + $0x130] sm:$0xff] }
  0x16   :  { %3762 = vmatprep.subr.mxu0 %v53_v21  ;;  %335 = vmatpush1.msra.mxu1 %v260_v32  ;;  %v271_v61 = vld [vmem:[%s7100_s3 + $0x138] sm:$0xff]  ;;  %v266_v1 = vld [vmem:[%s7100_s3 + $0x110] sm:$0xff]  ;;  %v41_v2 = vld [vmem:[%s7099_s0 + $0x48] sm:$0xff]  ;;  %v3856_v32 = vmov 0.0  }
  0x17   :  { %3763 = vmatpush3.msra.mxu0 %v53_v21  ;;  %336 = vmatprep.subr.mxu1 %v257_v34  ;;  %v267_v0 = vld [vmem:[%s7100_s3 + $0x118] sm:$0xff]  ;;  %v42_v4 = vld [vmem:[%s7099_s0 + $0x50] sm:$0xff]  ;;  %v44_v10 = vld [vmem:[%s7099_s0 + $0x60] sm:$0xff] }
  0x18   :  { %3764 = vmatprep.subr.mxu0 %v52_v24  ;;  %337 = vmatpush1.msra.mxu1 %v256_v35  ;;  %v263_v3 = vld [vmem:[%s7100_s3 + $0xf8] sm:$0xff]  ;;  %v262_v5 = vld [vmem:[%s7100_s3 + $0xf0] sm:$0xff]  ;;  %v45_v14 = vld [vmem:[%s7099_s0 + $0x68] sm:$0xff] }
  0x19   :  { %3765 = vmatpush3.msra.mxu0 %v52_v24  ;;  %338 = vmatprep.subr.mxu1 %v253_v37  ;;  %v259_v6 = vld [vmem:[%s7100_s3 + $0xd8] sm:$0xff]  ;;  %v258_v7 = vld [vmem:[%s7100_s3 + $0xd0] sm:$0xff]  ;;  %v244_v18 = vld [vmem:[%s7100_s3 + $0x60] sm:$0xff] }
  0x1a   :  { %3766 = vmatprep.subr.mxu0 %v51_v27  ;;  %339 = vmatpush1.msra.mxu1 %v252_v38  ;;  %v43_v8 = vld [vmem:[%s7099_s0 + $0x58] sm:$0xff]  ;;  %v254_v11 = vld [vmem:[%s7100_s3 + $0xb0] sm:$0xff]  ;;  %v241_v20 = vld [vmem:[%s7100_s3 + $0x48] sm:$0xff] }
  0x1b   :  { %3767 = vmatpush3.msra.mxu0 %v51_v27  ;;  %340 = vmatprep.subr.mxu1 %v249_v44  ;;  %v255_v9 = vld [vmem:[%s7100_s3 + $0xb8] sm:$0xff]  ;;  %v250_v13 = vld [vmem:[%s7100_s3 + $0x90] sm:$0xff]  ;;  %v240_v22 = vld [vmem:[%s7100_s3 + $0x40] sm:$0xff] }
  0x1c   :  { %3768 = vmatprep.subr.mxu0 %v50_v30  ;;  %341 = vmatpush1.msra.mxu1 %v248_v46  ;;  %v251_v12 = vld [vmem:[%s7100_s3 + $0x98] sm:$0xff]  ;;  %v46_v16 = vld [vmem:[%s7099_s0 + $0x70] sm:$0xff]  ;;  %v237_v24 = vld [vmem:[%s7100_s3 + $0x28] sm:$0xff] }
  0x1d   :  { %3769 = vmatpush3.msra.mxu0 %v50_v30  ;;  %342 = vmatprep.subr.mxu1 %v245_v52  ;;  %v247_v15 = vld [vmem:[%s7100_s3 + $0x78] sm:$0xff]  ;;  %v246_v19 = vld [vmem:[%s7100_s3 + $0x70] sm:$0xff]  ;;  %v236_v26 = vld [vmem:[%s7100_s3 + $0x20] sm:$0xff] }
  0x1e   :  { %3770 = vmatprep.subr.mxu0 %v49_v33  ;;  %v47_v17 = vld [vmem:[%s7099_s0 + $0x78] sm:$0xff]  ;;  %343 = vmatpush1.msra.mxu1 %v244_v18  ;;  %v242_v23 = vld [vmem:[%s7100_s3 + $0x50] sm:$0xff]  ;;  %v233_v28 = vld [vmem:[%s7100_s3 + $0x8] sm:$0xff] }
  0x1f   :  { %3771 = vmatpush3.msra.mxu0 %v49_v33  ;;  %v243_v21 = vld [vmem:[%s7100_s3 + $0x58] sm:$0xff]  ;;  %344 = vmatprep.subr.mxu1 %v241_v20  ;;  %v238_v27 = vld [vmem:[%s7100_s3 + $0x30] sm:$0xff]  ;;  %v232_v30 = vld [vmem:[%s7100_s3] sm:$0xff] }
  0x20   :  { %3772 = vmatprep.subr.mxu0 %v48_v36  ;;  %345 = vmatpush1.msra.mxu1 %v240_v22  ;;  %v239_v25 = vld [vmem:[%s7100_s3 + $0x38] sm:$0xff]  ;;  %v234_v31 = vld [vmem:[%s7100_s3 + $0x10] sm:$0xff]  ;;  %v1033_v44 = vld [vmem:[%s7101_s5 + $0xa48] sm:$0xff] }
  0x21   :  { %3773 = vmatpush3.msra.mxu0 %v48_v36  ;;  %346 = vmatprep.subr.mxu1 %v237_v24  ;;  %v235_v29 = vld [vmem:[%s7100_s3 + $0x18] sm:$0xff]  ;;  %v810_v33 = vld [vmem:[%s7101_s5 + $0x350] sm:$0xff]  ;;  %v4206_v36 = vld [vmem:[%s7102_s2] ss:$0 sm:$0xff] }
  0x22   :  { %3775 = vmatmul.mubr.f32.vlgmr.msra.gmra.mxu0 %v33_v39  ;;  %479 = vmatprep.subr.mxu0 %v295_v40  ;;  %v1034_v34 = vld [vmem:[%s7101_s5 + $0xa50] sm:$0xff]  ;;  %v1027_v46 = vld [vmem:[%s7101_s5 + $0xa18] sm:$0xff]  ;;  %v796_v52 = vld [vmem:[%s7101_s5 + $0x2e0] sm:$0xff] }
  0x23   :  { %3777 = vmatprep.mubr.f32.mxu0 %v34_v41  ;;  %480 = vmatpush1.msra.mxu0 %v294_v42  ;;  %v991_v22 = vld [vmem:[%s7101_s5 + $0x8f8] sm:$0xff]  ;;  %v985_v24 = vld [vmem:[%s7101_s5 + $0x8c8] sm:$0xff] }
  0x24   :  { %481 = vmatprep.subr.mxu0 %v291_v43  ;;  %347 = vmatpush1.msra.mxu1 %v236_v26  ;;  %v809_v43 = vld [vmem:[%s7101_s5 + $0x348] sm:$0xff] }
  0x25   :  { %482 = vmatpush1.msra.mxu0 %v290_v45  ;;  %348 = vmatprep.subr.mxu1 %v233_v28  ;;  %v803_v45 = vld [vmem:[%s7101_s5 + $0x318] sm:$0xff]  ;;  %v760_v28 = vld [vmem:[%s7101_s5 + $0x1c0] sm:$0xff] }
  0x26   :  { %3778 = vmatmul.mubr.f32.gmra.mxu0 %v35_v47  ;;  %483 = vmatprep.subr.mxu0 %v287_v48 }
  0x27   :  { %3780 = vmatprep.mubr.f32.mxu0 %v36_v49  ;;  %484 = vmatpush1.msra.mxu0 %v286_v50  ;;  %v802_v50 = vld [vmem:[%s7101_s5 + $0x310] sm:$0xff] }
  0x28   :  { %485 = vmatprep.subr.mxu0 %v283_v51  ;;  %349 = vmatpush1.msra.mxu1 %v232_v30  ;;  %v1026_v51 = vld [vmem:[%s7101_s5 + $0xa10] sm:$0xff] }
  0x29   :  { %486 = vmatpush1.msra.mxu0 %v282_v53  ;;  %382 = vmatprep.mubr.f32.mxu1 %v3856_v32  ;;  %v1020_v53 = vld [vmem:[%s7101_s5 + $0x9e0] sm:$0xff]  ;;  %v754_v30 = vld [vmem:[%s7101_s5 + $0x190] sm:$0xff] }
  0x2a   :  { %3781 = vmatmul.mubr.f32.gmra.mxu0 %v37_v54  ;;  %487 = vmatprep.subr.mxu0 %v279_v55 }
  0x2b   :  { %3783 = vmatprep.mubr.f32.mxu0 %v38_v56  ;;  %488 = vmatpush1.msra.mxu0 %v278_v57  ;;  %v795_v57 = vld [vmem:[%s7101_s5 + $0x2d8] sm:$0xff] }
  0x2c   :  { %489 = vmatprep.subr.mxu0 %v275_v58  ;;  %1189 = vmatprep.subr.mxu1 %v810_v33  ;;  %v1019_v58 = vld [vmem:[%s7101_s5 + $0x9d8] sm:$0xff] }
  0x2d   :  { %490 = vmatpush1.msra.mxu0 %v274_v59  ;;  %v789_v59 = vld [vmem:[%s7101_s5 + $0x2a8] sm:$0xff] }
  0x2e   :  { %3784 = vmatmul.mubr.f32.gmra.mxu0 %v39_v60  ;;  %491 = vmatprep.subr.mxu0 %v271_v61  ;;  %v1013_v60 = vld [vmem:[%s7101_s5 + $0x9a8] sm:$0xff] }
  0x2f   :  { %3786 = vmatprep.mubr.f32.mxu0 %v40_v62  ;;  %492 = vmatpush1.msra.mxu0 %v270_v63 }
  0x30   :  { %493 = vmatprep.subr.mxu0 %v267_v0  ;;  %v788_v0 = vld [vmem:[%s7101_s5 + $0x2a0] sm:$0xff] }
  0x31   :  { %494 = vmatpush1.msra.mxu0 %v266_v1  ;;  %v1012_v1 = vld [vmem:[%s7101_s5 + $0x9a0] sm:$0xff] }
  0x32   :  { %3787 = vmatmul.mubr.f32.gmra.mxu0 %v41_v2  ;;  %495 = vmatprep.subr.mxu0 %v263_v3  ;;  %v782_v2 = vld [vmem:[%s7101_s5 + $0x270] sm:$0xff] }
  0x33   :  { %3789 = vmatprep.mubr.f32.mxu0 %v42_v4  ;;  %496 = vmatpush1.msra.mxu0 %v262_v5  ;;  %v1006_v3 = vld [vmem:[%s7101_s5 + $0x970] sm:$0xff] }
  0x34   :  { %497 = vmatprep.subr.mxu0 %v259_v6 }
  0x35   :  { %498 = vmatpush1.msra.mxu0 %v258_v7  ;;  %v781_v7 = vld [vmem:[%s7101_s5 + $0x268] sm:$0xff] }
  0x36   :  { %3790 = vmatmul.mubr.f32.gmra.mxu0 %v43_v8  ;;  %499 = vmatprep.subr.mxu0 %v255_v9  ;;  %v1005_v8 = vld [vmem:[%s7101_s5 + $0x968] sm:$0xff]  ;;  %v775_v9 = vld [vmem:[%s7101_s5 + $0x238] sm:$0xff] }
  0x37   :  { %3792 = vmatprep.mubr.f32.mxu0 %v44_v10  ;;  %500 = vmatpush1.msra.mxu0 %v254_v11  ;;  %v999_v10 = vld [vmem:[%s7101_s5 + $0x938] sm:$0xff] }
  0x38   :  { %501 = vmatprep.subr.mxu0 %v251_v12 }
  0x39   :  { %502 = vmatpush1.msra.mxu0 %v250_v13 }
  0x3a   :  { %3793 = vmatmul.mubr.f32.gmra.mxu0 %v45_v14  ;;  %503 = vmatprep.subr.mxu0 %v247_v15  ;;  %v774_v14 = vld [vmem:[%s7101_s5 + $0x230] sm:$0xff] }
  0x3b   :  { %3795 = vmatprep.mubr.f32.mxu0 %v46_v16  ;;  %504 = vmatpush1.msra.mxu0 %v246_v19  ;;  %v998_v15 = vld [vmem:[%s7101_s5 + $0x930] sm:$0xff]  ;;  %v768_v16 = vld [vmem:[%s7101_s5 + $0x200] sm:$0xff] }
  0x3c   :  { %505 = vmatprep.subr.mxu0 %v243_v21  ;;  %v767_v21 = vld [vmem:[%s7101_s5 + $0x1f8] sm:$0xff] }
  0x3d   :  { %506 = vmatpush1.msra.mxu0 %v242_v23  ;;  %v761_v23 = vld [vmem:[%s7101_s5 + $0x1c8] sm:$0xff] }
  0x3e   :  { %3796 = vmatmul.mubr.f32.gmra.mxu0 %v47_v17  ;;  %507 = vmatprep.subr.mxu0 %v239_v25  ;;  %v992_v17 = vld [vmem:[%s7101_s5 + $0x900] sm:$0xff] }
  0x3f   :  { %508 = vmatpush1.msra.mxu0 %v238_v27  ;;  %543 = vmatprep.mubr.f32.mxu0 %v3856_v32 }
  0x40   :  { %509 = vmatprep.subr.mxu0 %v235_v29  ;;  %v984_v29 = vld [vmem:[%s7101_s5 + $0x8c0] sm:$0xff] }
  0x41   :  { %510 = vmatpush1.msra.mxu0 %v234_v31  ;;  %v978_v31 = vld [vmem:[%s7101_s5 + $0x890] sm:$0xff] }
  0x42   :  { %1350 = vmatprep.subr.mxu0 %v1034_v34 }
  0xe2   :  { %v3776_v35 = vpop.f32.mrf.mxu0 }
  0xe3   :  { %v143_v40 = vadd.f32 %v3776_v35, %v4206_v36 }
  0xe4   :  { %v137_v37 = vpop.f32.mrf.mxu0 }
  0xe5   :  { %v138_v38 = vadd.f32 %v4206_v36, %v137_v37  ;;  %v217_v47 = vmax.f32 %v143_v40, 0.0  ;;  %v753_v37 = vld [vmem:[%s7101_s5 + $0x188] sm:$0xff]  ;;  %v971_v40 = vld [vmem:[%s7101_s5 + $0x858] sm:$0xff] }
  0xe6   :  { %v3779_v39 = vpop.f32.mrf.mxu0 }
  0xe7   :  { %v216_v41 = vmax.f32 %v138_v38, 0.0  ;;  %v153_v54 = vadd.f32 %v3779_v39, %v4206_v36  ;;  %v977_v38 = vld [vmem:[%s7101_s5 + $0x888] sm:$0xff]  ;;  %v747_v39 = vld [vmem:[%s7101_s5 + $0x158] sm:$0xff] }
  0xe8   :  { %v147_v42 = vpop.f32.mrf.mxu0 }
  0xe9   :  { %383 = vmatmul.mubr.f32.vlgmr.msra.gmra.mxu1 %v216_v41  ;;  %544 = vmatmul.mubr.f32.vlgmr.msra.gmra.mxu0 %v216_v41  ;;  %v148_v48 = vadd.f32 %v4206_v36, %v147_v42  ;;  %v219_v61 = vmax.f32 %v153_v54, 0.0  ;;  %v957_v54 = vld [vmem:[%s7101_s5 + $0x7e8] sm:$0xff] }
  0xea   :  { %388 = vmatprep.mubr.f32.mxu1 %v3856_v32  ;;  %549 = vmatprep.mubr.f32.mxu0 %v3856_v32  ;;  %v3782_v49 = vpop.f32.mrf.mxu0 }
  0xeb   :  { %1190 = vmatpush1.msra.mxu1 %v809_v43  ;;  %1351 = vmatpush1.msra.mxu0 %v1033_v44  ;;  %v218_v55 = vmax.f32 %v148_v48, 0.0  ;;  %v163_v4 = vadd.f32 %v3782_v49, %v4206_v36  ;;  %v746_v44 = vld [vmem:[%s7101_s5 + $0x150] sm:$0xff] }
  0xec   :  { %1191 = vmatprep.subr.mxu1 %v803_v45  ;;  %1352 = vmatprep.subr.mxu0 %v1027_v46  ;;  %v157_v56 = vpop.f32.mrf.mxu0  ;;  %v970_v45 = vld [vmem:[%s7101_s5 + $0x850] sm:$0xff]  ;;  %v740_v46 = vld [vmem:[%s7101_s5 + $0x120] sm:$0xff] }
  0xed   :  { %389 = vmatmul.mubr.f32.gmra.mxu1 %v217_v47  ;;  %550 = vmatmul.mubr.f32.gmra.mxu0 %v217_v47  ;;  %v158_v62 = vadd.f32 %v4206_v36, %v157_v56  ;;  %v221_v11 = vmax.f32 %v163_v4, 0.0  ;;  %v964_v47 = vld [vmem:[%s7101_s5 + $0x820] sm:$0xff]  ;;  %v943_v4 = vld [vmem:[%s7101_s5 + $0x778] sm:$0xff] }
  0xee   :  { %394 = vmatprep.mubr.f32.mxu1 %v3856_v32  ;;  %555 = vmatprep.mubr.f32.mxu0 %v3856_v32  ;;  %v3785_v63 = vpop.f32.mrf.mxu0 }
  0xef   :  { %1192 = vmatpush1.msra.mxu1 %v802_v50  ;;  %1353 = vmatpush1.msra.mxu0 %v1026_v51  ;;  %v220_v5 = vmax.f32 %v158_v62, 0.0  ;;  %v173_v18 = vadd.f32 %v3785_v63, %v4206_v36  ;;  %v739_v51 = vld [vmem:[%s7101_s5 + $0x118] sm:$0xff] }
  0xf0   :  { %1193 = vmatprep.subr.mxu1 %v796_v52  ;;  %1354 = vmatprep.subr.mxu0 %v1020_v53  ;;  %v167_v6 = vpop.f32.mrf.mxu0  ;;  %v963_v52 = vld [vmem:[%s7101_s5 + $0x818] sm:$0xff]  ;;  %v733_v53 = vld [vmem:[%s7101_s5 + $0xe8] sm:$0xff] }
  0xf1   :  { %395 = vmatmul.mubr.f32.gmra.mxu1 %v218_v55  ;;  %556 = vmatmul.mubr.f32.gmra.mxu0 %v218_v55  ;;  %v168_v12 = vadd.f32 %v4206_v36, %v167_v6  ;;  %v223_v25 = vmax.f32 %v173_v18, 0.0  ;;  %v928_v18 = vld [vmem:[%s7101_s5 + $0x700] sm:$0xff] }
  0xf2   :  { %400 = vmatprep.mubr.f32.mxu1 %v3856_v32  ;;  %561 = vmatprep.mubr.f32.mxu0 %v3856_v32  ;;  %v3788_v13 = vpop.f32.mrf.mxu0 }
  0xf3   :  { %1194 = vmatpush1.msra.mxu1 %v795_v57  ;;  %1355 = vmatpush1.msra.mxu0 %v1019_v58  ;;  %v222_v19 = vmax.f32 %v168_v12, 0.0  ;;  %v183_v33 = vadd.f32 %v3788_v13, %v4206_v36  ;;  %v732_v58 = vld [vmem:[%s7101_s5 + $0xe0] sm:$0xff]  ;;  %v711_v13 = vld [vmem:[%s7101_s5 + $0x38] sm:$0xff] }
  0xf4   :  { %1195 = vmatprep.subr.mxu1 %v789_v59  ;;  %1356 = vmatprep.subr.mxu0 %v1013_v60  ;;  %v177_v20 = vpop.f32.mrf.mxu0  ;;  %v956_v59 = vld [vmem:[%s7101_s5 + $0x7e0] sm:$0xff]  ;;  %v726_v60 = vld [vmem:[%s7101_s5 + $0xb0] sm:$0xff] }
  0xf5   :  { %401 = vmatmul.mubr.f32.gmra.mxu1 %v219_v61  ;;  %562 = vmatmul.mubr.f32.gmra.mxu0 %v219_v61  ;;  %v178_v26 = vadd.f32 %v4206_v36, %v177_v20  ;;  %v225_v41 = vmax.f32 %v183_v33, 0.0  ;;  %v950_v61 = vld [vmem:[%s7101_s5 + $0x7b0] sm:$0xff]  ;;  %v921_v20 = vld [vmem:[%s7101_s5 + $0x6c8] sm:$0xff]  ;;  %v900_v33 = vld [vmem:[%s7101_s5 + $0x620] sm:$0xff] }
  0xf6   :  { %406 = vmatprep.mubr.f32.mxu1 %v3856_v32  ;;  %567 = vmatprep.mubr.f32.mxu0 %v3856_v32  ;;  %v3791_v27 = vpop.f32.mrf.mxu0 }
  0xf7   :  { %1196 = vmatpush1.msra.mxu1 %v788_v0  ;;  %1357 = vmatpush1.msra.mxu0 %v1012_v1  ;;  %v224_v34 = vmax.f32 %v178_v26, 0.0  ;;  %v193_v48 = vadd.f32 %v3791_v27, %v4206_v36  ;;  %v725_v1 = vld [vmem:[%s7101_s5 + $0xa8] sm:$0xff]  ;;  %v908_v26 = vld [vmem:[%s7101_s5 + $0x660] sm:$0xff] }
  0xf8   :  { %1197 = vmatprep.subr.mxu1 %v782_v2  ;;  %1358 = vmatprep.subr.mxu0 %v1006_v3  ;;  %v187_v35 = vpop.f32.mrf.mxu0  ;;  %v949_v2 = vld [vmem:[%s7101_s5 + $0x7a8] sm:$0xff]  ;;  %v719_v3 = vld [vmem:[%s7101_s5 + $0x78] sm:$0xff]  ;;  %v1132_v27 = vld [vmem:[%s7101_s5 + $0xd60] sm:$0xff] }
  0xf9   :  { %407 = vmatmul.mubr.f32.gmra.mxu1 %v220_v5  ;;  %568 = vmatmul.mubr.f32.gmra.mxu0 %v220_v5  ;;  %v188_v42 = vadd.f32 %v4206_v36, %v187_v35  ;;  %v227_v55 = vmax.f32 %v193_v48, 0.0  ;;  %v894_v35 = vld [vmem:[%s7101_s5 + $0x5f0] sm:$0xff]  ;;  %v873_v48 = vld [vmem:[%s7101_s5 + $0x548] sm:$0xff] }
  0xfa   :  { %412 = vmatprep.mubr.f32.mxu1 %v3856_v32  ;;  %573 = vmatprep.mubr.f32.mxu0 %v3856_v32  ;;  %v3794_v43 = vpop.f32.mrf.mxu0 }
  0xfb   :  { %1198 = vmatpush1.msra.mxu1 %v781_v7  ;;  %1359 = vmatpush1.msra.mxu0 %v1005_v8  ;;  %v226_v49 = vmax.f32 %v188_v42, 0.0  ;;  %v203_v62 = vadd.f32 %v3794_v43, %v4206_v36  ;;  %v718_v7 = vld [vmem:[%s7101_s5 + $0x70] sm:$0xff] }
  0xfc   :  { %1199 = vmatprep.subr.mxu1 %v775_v9  ;;  %1360 = vmatprep.subr.mxu0 %v999_v10  ;;  %v197_v50 = vpop.f32.mrf.mxu0  ;;  %v942_v8 = vld [vmem:[%s7101_s5 + $0x770] sm:$0xff]  ;;  %v712_v9 = vld [vmem:[%s7101_s5 + $0x40] sm:$0xff] }
  0xfd   :  { %413 = vmatmul.mubr.f32.gmra.mxu1 %v221_v11  ;;  %574 = vmatmul.mubr.f32.gmra.mxu0 %v221_v11  ;;  %v198_v56 = vadd.f32 %v4206_v36, %v197_v50  ;;  %v229_v5 = vmax.f32 %v203_v62, 0.0  ;;  %v936_v10 = vld [vmem:[%s7101_s5 + $0x740] sm:$0xff]  ;;  %v886_v42 = vld [vmem:[%s7101_s5 + $0x5b0] sm:$0xff]  ;;  %v851_v62 = vld [vmem:[%s7101_s5 + $0x498] sm:$0xff] }
  0xfe   :  { %418 = vmatprep.mubr.f32.mxu1 %v3856_v32  ;;  %579 = vmatprep.mubr.f32.mxu0 %v3856_v32  ;;  %v3797_v57 = vpop.f32.mrf.mxu0  ;;  %v1110_v43 = vld [vmem:[%s7101_s5 + $0xcb0] sm:$0xff]  ;;  %v872_v50 = vld [vmem:[%s7101_s5 + $0x540] sm:$0xff] }
  0xff   :  { %1200 = vmatpush1.msra.mxu1 %v774_v14  ;;  %1361 = vmatpush1.msra.mxu0 %v998_v15  ;;  %v228_v63 = vmax.f32 %v198_v56, 0.0  ;;  %v213_v11 = vadd.f32 %v3797_v57, %v4206_v36  ;;  %v935_v14 = vld [vmem:[%s7101_s5 + $0x738] sm:$0xff]  ;;  %v705_v15 = vld [vmem:[%s7101_s5 + $0x8] sm:$0xff] }
 0x100   :  { %1201 = vmatprep.subr.mxu1 %v768_v16  ;;  %1362 = vmatprep.subr.mxu0 %v992_v17  ;;  %v207_v0 = vpop.f32.mrf.mxu0  ;;  %v704_v17 = vld [vmem:[%s7101_s5] sm:$0xff]  ;;  %v859_v56 = vld [vmem:[%s7101_s5 + $0x4d8] sm:$0xff] }
 0x101   :  { %419 = vmatmul.mubr.f32.gmra.mxu1 %v222_v19  ;;  %580 = vmatmul.mubr.f32.gmra.mxu0 %v222_v19  ;;  %v208_v6 = vadd.f32 %v4206_v36, %v207_v0  ;;  %v929_v36 = vld [vmem:[%s7101_s5 + $0x708] sm:$0xff]  ;;  %v231_v16 = vmax.f32 %v213_v11, 0.0  ;;  %v922_v19 = vld [vmem:[%s7101_s5 + $0x6d0] sm:$0xff]  ;;  %v1083_v57 = vld [vmem:[%s7101_s5 + $0xbd8] sm:$0xff] }
 0x102   :  { %424 = vmatprep.mubr.f32.mxu1 %v3856_v32  ;;  %585 = vmatprep.mubr.f32.mxu0 %v3856_v32  ;;  %v845_v0 = vld [vmem:[%s7101_s5 + $0x468] sm:$0xff]  ;;  %v1054_v11 = vld [vmem:[%s7101_s5 + $0xaf0] sm:$0xff] }
 0x103   :  { %1202 = vmatpush1.msra.mxu1 %v767_v21  ;;  %1363 = vmatpush1.msra.mxu0 %v991_v22  ;;  %v230_v12 = vmax.f32 %v208_v6, 0.0  ;;  %v1145_v21 = vld [vmem:[%s7101_s5 + $0xdc8] sm:$0xff]  ;;  %v915_v22 = vld [vmem:[%s7101_s5 + $0x698] sm:$0xff] }
 0x104   :  { %1203 = vmatprep.subr.mxu1 %v761_v23  ;;  %1364 = vmatprep.subr.mxu0 %v985_v24  ;;  %v1139_v23 = vld [vmem:[%s7101_s5 + $0xd98] sm:$0xff]  ;;  %v914_v24 = vld [vmem:[%s7101_s5 + $0x690] sm:$0xff]  ;;  %v837_v6 = vld [vmem:[%s7101_s5 + $0x428] sm:$0xff] }
 0x105   :  { %425 = vmatmul.mubr.f32.gmra.mxu1 %v223_v25  ;;  %586 = vmatmul.mubr.f32.gmra.mxu0 %v223_v25  ;;  %v1138_v25 = vld [vmem:[%s7101_s5 + $0xd90] sm:$0xff] }
 0x106   :  { %430 = vmatprep.mubr.f32.mxu1 %v3856_v32  ;;  %591 = vmatprep.mubr.f32.mxu0 %v3856_v32 }
 0x107   :  { %1204 = vmatpush1.msra.mxu1 %v760_v28  ;;  %1365 = vmatpush1.msra.mxu0 %v984_v29  ;;  %v907_v28 = vld [vmem:[%s7101_s5 + $0x658] sm:$0xff] }
 0x108   :  { %1205 = vmatprep.subr.mxu1 %v754_v30  ;;  %1366 = vmatprep.subr.mxu0 %v978_v31  ;;  %v1131_v29 = vld [vmem:[%s7101_s5 + $0xd58] sm:$0xff]  ;;  %v901_v30 = vld [vmem:[%s7101_s5 + $0x628] sm:$0xff] }
 0x109   :  { %431 = vmatmul.mubr.f32.gmra.mxu1 %v224_v34  ;;  %592 = vmatmul.mubr.f32.gmra.mxu0 %v224_v34  ;;  %v1125_v31 = vld [vmem:[%s7101_s5 + $0xd28] sm:$0xff]  ;;  %v1124_v34 = vld [vmem:[%s7101_s5 + $0xd20] sm:$0xff] }
 0x10a   :  { %436 = vmatprep.mubr.f32.mxu1 %v3856_v32  ;;  %597 = vmatprep.mubr.f32.mxu0 %v3856_v32 }
 0x10b   :  { %1206 = vmatpush1.msra.mxu1 %v753_v37  ;;  %1367 = vmatpush1.msra.mxu0 %v977_v38  ;;  %v1118_v37 = vld [vmem:[%s7101_s5 + $0xcf0] sm:$0xff]  ;;  %v893_v38 = vld [vmem:[%s7101_s5 + $0x5e8] sm:$0xff] }
 0x10c   :  { %1207 = vmatprep.subr.mxu1 %v747_v39  ;;  %1368 = vmatprep.subr.mxu0 %v971_v40  ;;  %v1117_v39 = vld [vmem:[%s7101_s5 + $0xce8] sm:$0xff]  ;;  %v887_v40 = vld [vmem:[%s7101_s5 + $0x5b8] sm:$0xff] }
 0x10d   :  { %437 = vmatmul.mubr.f32.gmra.mxu1 %v225_v41  ;;  %598 = vmatmul.mubr.f32.gmra.mxu0 %v225_v41  ;;  %v1111_v41 = vld [vmem:[%s7101_s5 + $0xcb8] sm:$0xff] }
 0x10e   :  { %442 = vmatprep.mubr.f32.mxu1 %v3856_v32  ;;  %603 = vmatprep.mubr.f32.mxu0 %v3856_v32 }
 0x10f   :  { %1208 = vmatpush1.msra.mxu1 %v746_v44  ;;  %1369 = vmatpush1.msra.mxu0 %v970_v45  ;;  %v880_v44 = vld [vmem:[%s7101_s5 + $0x580] sm:$0xff] }
 0x110   :  { %1209 = vmatprep.subr.mxu1 %v740_v46  ;;  %1370 = vmatprep.subr.mxu0 %v964_v47  ;;  %v1104_v45 = vld [vmem:[%s7101_s5 + $0xc80] sm:$0xff]  ;;  %v879_v46 = vld [vmem:[%s7101_s5 + $0x578] sm:$0xff] }
 0x111   :  { %443 = vmatmul.mubr.f32.gmra.mxu1 %v226_v49  ;;  %604 = vmatmul.mubr.f32.gmra.mxu0 %v226_v49  ;;  %v1103_v47 = vld [vmem:[%s7101_s5 + $0xc78] sm:$0xff]  ;;  %v1097_v49 = vld [vmem:[%s7101_s5 + $0xc48] sm:$0xff] }
 0x112   :  { %448 = vmatprep.mubr.f32.mxu1 %v3856_v32  ;;  %609 = vmatprep.mubr.f32.mxu0 %v3856_v32 }
 0x113   :  { %1210 = vmatpush1.msra.mxu1 %v739_v51  ;;  %1371 = vmatpush1.msra.mxu0 %v963_v52  ;;  %v1096_v51 = vld [vmem:[%s7101_s5 + $0xc40] sm:$0xff]  ;;  %v866_v52 = vld [vmem:[%s7101_s5 + $0x510] sm:$0xff] }
 0x114   :  { %1211 = vmatprep.subr.mxu1 %v733_v53  ;;  %1372 = vmatprep.subr.mxu0 %v957_v54  ;;  %v1090_v53 = vld [vmem:[%s7101_s5 + $0xc10] sm:$0xff]  ;;  %v865_v54 = vld [vmem:[%s7101_s5 + $0x508] sm:$0xff] }
 0x115   :  { %449 = vmatmul.mubr.f32.gmra.mxu1 %v227_v55  ;;  %610 = vmatmul.mubr.f32.gmra.mxu0 %v227_v55  ;;  %v1089_v55 = vld [vmem:[%s7101_s5 + $0xc08] sm:$0xff] }
 0x116   :  { %454 = vmatprep.mubr.f32.mxu1 %v3856_v32  ;;  %615 = vmatprep.mubr.f32.mxu0 %v3856_v32 }
 0x117   :  { %1212 = vmatpush1.msra.mxu1 %v732_v58  ;;  %1373 = vmatpush1.msra.mxu0 %v956_v59  ;;  %v858_v58 = vld [vmem:[%s7101_s5 + $0x4d0] sm:$0xff] }
 0x118   :  { %1213 = vmatprep.subr.mxu1 %v726_v60  ;;  %1374 = vmatprep.subr.mxu0 %v950_v61  ;;  %v1082_v59 = vld [vmem:[%s7101_s5 + $0xbd0] sm:$0xff]  ;;  %v852_v60 = vld [vmem:[%s7101_s5 + $0x4a0] sm:$0xff] }
 0x119   :  { %455 = vmatmul.mubr.f32.gmra.mxu1 %v228_v63  ;;  %616 = vmatmul.mubr.f32.gmra.mxu0 %v228_v63  ;;  %v1076_v61 = vld [vmem:[%s7101_s5 + $0xba0] sm:$0xff]  ;;  %v1075_v63 = vld [vmem:[%s7101_s5 + $0xb98] sm:$0xff] }
 0x11a   :  { %460 = vmatprep.mubr.f32.mxu1 %v3856_v32  ;;  %621 = vmatprep.mubr.f32.mxu0 %v3856_v32 }
 0x11b   :  { %1214 = vmatpush1.msra.mxu1 %v725_v1  ;;  %1375 = vmatpush1.msra.mxu0 %v949_v2  ;;  %v1069_v1 = vld [vmem:[%s7101_s5 + $0xb68] sm:$0xff]  ;;  %v844_v2 = vld [vmem:[%s7101_s5 + $0x460] sm:$0xff] }
 0x11c   :  { %1215 = vmatprep.subr.mxu1 %v719_v3  ;;  %1376 = vmatprep.subr.mxu0 %v943_v4  ;;  %v1068_v3 = vld [vmem:[%s7101_s5 + $0xb60] sm:$0xff]  ;;  %v838_v4 = vld [vmem:[%s7101_s5 + $0x430] sm:$0xff] }
 0x11d   :  { %461 = vmatmul.mubr.f32.gmra.mxu1 %v229_v5  ;;  %622 = vmatmul.mubr.f32.gmra.mxu0 %v229_v5  ;;  %v1062_v5 = vld [vmem:[%s7101_s5 + $0xb30] sm:$0xff] }
 0x11e   :  { %466 = vmatprep.mubr.f32.mxu1 %v3856_v32  ;;  %627 = vmatprep.mubr.f32.mxu0 %v3856_v32 }
 0x11f   :  { %1216 = vmatpush1.msra.mxu1 %v718_v7  ;;  %1377 = vmatpush1.msra.mxu0 %v942_v8  ;;  %v1061_v7 = vld [vmem:[%s7101_s5 + $0xb28] sm:$0xff]  ;;  %v831_v8 = vld [vmem:[%s7101_s5 + $0x3f8] sm:$0xff] }
 0x120   :  { %1217 = vmatprep.subr.mxu1 %v712_v9  ;;  %1378 = vmatprep.subr.mxu0 %v936_v10  ;;  %v1055_v9 = vld [vmem:[%s7101_s5 + $0xaf8] sm:$0xff]  ;;  %v830_v10 = vld [vmem:[%s7101_s5 + $0x3f0] sm:$0xff] }
 0x121   :  { %467 = vmatmul.mubr.f32.gmra.mxu1 %v230_v12  ;;  %628 = vmatmul.mubr.f32.gmra.mxu0 %v230_v12  ;;  %v824_v12 = vld [vmem:[%s7101_s5 + $0x3c0] sm:$0xff] }
 0x122   :  { %472 = vmatprep.mubr.f32.mxu1 %v3856_v32  ;;  %633 = vmatprep.mubr.f32.mxu0 %v3856_v32  ;;  %v1146_v32 = vld [vmem:[%s7101_s5 + $0xdd0] sm:$0xff] }
 0x123   :  { %1218 = vmatpush1.msra.mxu1 %v711_v13  ;;  %1379 = vmatpush1.msra.mxu0 %v935_v14  ;;  %v1048_v13 = vld [vmem:[%s7101_s5 + $0xac0] sm:$0xff]  ;;  %v823_v14 = vld [vmem:[%s7101_s5 + $0x3b8] sm:$0xff] }
 0x124   :  { %1219 = vmatprep.subr.mxu1 %v705_v15  ;;  %1380 = vmatprep.subr.mxu0 %v929_v36  ;;  %v1047_v15 = vld [vmem:[%s7101_s5 + $0xab8] sm:$0xff]  ;;  %v817_v36 = vld [vmem:[%s7101_s5 + $0x388] sm:$0xff] }
 0x125   :  { %473 = vmatmul.mubr.f32.gmra.mxu1 %v231_v16  ;;  %634 = vmatmul.mubr.f32.gmra.mxu0 %v231_v16  ;;  %v1041_v16 = vld [vmem:[%s7101_s5 + $0xa88] sm:$0xff] }
 0x126   :  { %1220 = vmatpush1.msra.mxu1 %v704_v17  ;;  %1381 = vmatpush1.msra.mxu0 %v928_v18  ;;  %v816_v17 = vld [vmem:[%s7101_s5 + $0x380] sm:$0xff] }
 0x127   :  { %1221 = vmatprep.subr.mxu1 %v922_v19  ;;  %1382 = vmatprep.subr.mxu0 %v1146_v32  ;;  %v1040_v18 = vld [vmem:[%s7101_s5 + $0xa80] sm:$0xff] }
 0x128   :  { %1222 = vmatpush2.msra.mxu1 %v921_v20  ;;  %1383 = vmatpush2.msra.mxu0 %v1145_v21  ;;  %v812_v19 = vld [vmem:[%s7101_s5 + $0x360] sm:$0xff]  ;;  %v298_v20 = vlaneseq }
 0x129   :  { %1223 = vmatprep.subr.mxu1 %v915_v22  ;;  %1384 = vmatprep.subr.mxu0 %v1139_v23  ;;  %v1036_v32 = vld [vmem:[%s7101_s5 + $0xa60] sm:$0xff] }
 0x12a   :  { %1224 = vmatpush2.msra.mxu1 %v914_v24  ;;  %1385 = vmatpush2.msra.mxu0 %v1138_v25  ;;  %v4638_v21 = vshrl.u32 %v298_v20, 7  ;;  %v296_v24 = vld [vmem:[%s7103_s4] sm:$0xf] }
 0x12b   :  { %1225 = vmatprep.subr.mxu1 %v908_v26  ;;  %1386 = vmatprep.subr.mxu0 %v1132_v27 }
 0x12c   :  { %1226 = vmatpush2.msra.mxu1 %v907_v28  ;;  %1387 = vmatpush2.msra.mxu0 %v1131_v29  ;;  %7159 = vst [vmem:[#allocation2_spill] sm:$0xff] %v4638_v21  ;;  %v7111_v22 = vsub.s32 0, %v4638_v21  ;;  %v7108_v23 = vsub.s32 2, %v4638_v21  ;;  %v7110_v25 = vsub.s32 1, %v4638_v21  ;;  %v7109_v26 = vsub.s32 3, %v4638_v21 }
 0x12d   :  { %1227 = vmatprep.subr.mxu1 %v901_v30  ;;  %1388 = vmatprep.subr.mxu0 %v1125_v31 }
 0x12e   :  { %1228 = vmatpush2.msra.mxu1 %v900_v33  ;;  %1389 = vmatpush2.msra.mxu0 %v1124_v34  ;;  %v4649_v27 = vrot.slane %v296_v24, %v7111_v22  ;;  %v4653_v28 = vrot.slane %v296_v24, %v7108_v23  ;;  %v4657_v29 = vrot.slane %v296_v24, %v7110_v25  ;;  %v1140_v22 = vld [vmem:[%s7101_s5 + $0xda0] sm:$0xff] }
 0x12f   :  { %1229 = vmatprep.subr.mxu1 %v894_v35  ;;  %1390 = vmatprep.subr.mxu0 %v1118_v37  ;;  %v4661_v30 = vrot.slane %v296_v24, %v7109_v26  ;;  %v1014_v24 = vld [vmem:[%s7101_s5 + $0x9b0] sm:$0xff] }
 0x130   :  { %1230 = vmatpush2.msra.mxu1 %v893_v38  ;;  %1391 = vmatpush2.msra.mxu0 %v1117_v39 }
 0x131   :  { %1231 = vmatprep.subr.mxu1 %v887_v40  ;;  %1392 = vmatprep.subr.mxu0 %v1111_v41 }
 0x132   :  { %1232 = vmatpush2.msra.mxu1 %v886_v42  ;;  %1393 = vmatpush2.msra.mxu0 %v1110_v43 }
 0x133   :  { %1233 = vmatprep.subr.mxu1 %v880_v44  ;;  %1394 = vmatprep.subr.mxu0 %v1104_v45 }
 0x134   :  { %1234 = vmatpush2.msra.mxu1 %v879_v46  ;;  %1395 = vmatpush2.msra.mxu0 %v1103_v47 }
 0x135   :  { %1235 = vmatprep.subr.mxu1 %v873_v48  ;;  %1396 = vmatprep.subr.mxu0 %v1097_v49  ;;  %v811_v49 = vld [vmem:[%s7101_s5 + $0x358] sm:$0xff] }
 0x136   :  { %1236 = vmatpush2.msra.mxu1 %v872_v50  ;;  %1397 = vmatpush2.msra.mxu0 %v1096_v51  ;;  %v1035_v50 = vld [vmem:[%s7101_s5 + $0xa58] sm:$0xff] }
 0x137   :  { %1237 = vmatprep.subr.mxu1 %v866_v52  ;;  %1398 = vmatprep.subr.mxu0 %v1090_v53 }
 0x138   :  { %1238 = vmatpush2.msra.mxu1 %v865_v54  ;;  %1399 = vmatpush2.msra.mxu0 %v1089_v55  ;;  %v805_v54 = vld [vmem:[%s7101_s5 + $0x328] sm:$0xff] }
 0x139   :  { %1239 = vmatprep.subr.mxu1 %v859_v56  ;;  %1400 = vmatprep.subr.mxu0 %v1083_v57  ;;  %v1029_v55 = vld [vmem:[%s7101_s5 + $0xa28] sm:$0xff] }
 0x13a   :  { %1240 = vmatpush2.msra.mxu1 %v858_v58  ;;  %1401 = vmatpush2.msra.mxu0 %v1082_v59  ;;  %v804_v59 = vld [vmem:[%s7101_s5 + $0x320] sm:$0xff] }
 0x13b   :  { %1241 = vmatprep.subr.mxu1 %v852_v60  ;;  %1402 = vmatprep.subr.mxu0 %v1076_v61 }
 0x13c   :  { %1242 = vmatpush2.msra.mxu1 %v851_v62  ;;  %1403 = vmatpush2.msra.mxu0 %v1075_v63  ;;  %v798_v62 = vld [vmem:[%s7101_s5 + $0x2f0] sm:$0xff] }
 0x13d   :  { %1243 = vmatprep.subr.mxu1 %v845_v0  ;;  %1404 = vmatprep.subr.mxu0 %v1069_v1  ;;  %v1028_v1 = vld [vmem:[%s7101_s5 + $0xa20] sm:$0xff] }
 0x13e   :  { %1244 = vmatpush2.msra.mxu1 %v844_v2  ;;  %1405 = vmatpush2.msra.mxu0 %v1068_v3 }
 0x13f   :  { %1245 = vmatprep.subr.mxu1 %v838_v4  ;;  %1406 = vmatprep.subr.mxu0 %v1062_v5  ;;  %v797_v5 = vld [vmem:[%s7101_s5 + $0x2e8] sm:$0xff] }
 0x140   :  { %1246 = vmatpush2.msra.mxu1 %v837_v6  ;;  %1407 = vmatpush2.msra.mxu0 %v1061_v7 }
 0x141   :  { %1247 = vmatprep.subr.mxu1 %v831_v8  ;;  %1408 = vmatprep.subr.mxu0 %v1055_v9  ;;  %v1022_v9 = vld [vmem:[%s7101_s5 + $0x9f0] sm:$0xff] }
 0x142   :  { %1248 = vmatpush2.msra.mxu1 %v830_v10  ;;  %1409 = vmatpush2.msra.mxu0 %v1054_v11  ;;  %v791_v10 = vld [vmem:[%s7101_s5 + $0x2b8] sm:$0xff] }
 0x143   :  { %1249 = vmatprep.subr.mxu1 %v824_v12  ;;  %1410 = vmatprep.subr.mxu0 %v1048_v13  ;;  %v1021_v13 = vld [vmem:[%s7101_s5 + $0x9e8] sm:$0xff] }
 0x144   :  { %1250 = vmatpush2.msra.mxu1 %v823_v14  ;;  %1411 = vmatpush2.msra.mxu0 %v1047_v15  ;;  %v790_v14 = vld [vmem:[%s7101_s5 + $0x2b0] sm:$0xff] }
 0x145   :  { %1251 = vmatprep.subr.mxu1 %v817_v36  ;;  %1412 = vmatprep.subr.mxu0 %v1041_v16 }
 0x146   :  { %1252 = vmatpush2.msra.mxu1 %v816_v17  ;;  %1413 = vmatpush2.msra.mxu0 %v1040_v18  ;;  %v1015_v18 = vld [vmem:[%s7101_s5 + $0x9b8] sm:$0xff] }
 0x147   :  { %1511 = vmatprep.subr.mxu1 %v812_v19  ;;  %1672 = vmatprep.subr.mxu0 %v1036_v32  ;;  %v784_v32 = vld [vmem:[%s7101_s5 + $0x280] sm:$0xff] }
 0x1a9   :  { %v384_v31 = vpop.f32.mrf.mxu1  ;;  %v545_v33 = vpop.f32.mrf.mxu0 }
 0x1aa   :  { %v385_v34 = vadd.f32 %v384_v31, %v4649_v27  ;;  %v546_v35 = vadd.f32 %v545_v33, %v4653_v28 }
 0x1ab   :  { %v386_v37 = vpop.f32.mrf.mxu1  ;;  %v547_v38 = vpop.f32.mrf.mxu0 }
 0x1ac   :  { %v387_v39 = vadd.f32 %v386_v37, %v4657_v29  ;;  %v548_v40 = vadd.f32 %v547_v38, %v4661_v30  ;;  %v4671_v45 = vmax.f32 %v385_v34, 0.0  ;;  %v4673_v46 = vmax.f32 %v546_v35, 0.0  ;;  %v783_v35 = vld [vmem:[%s7101_s5 + $0x278] sm:$0xff]  ;;  %v1008_v38 = vld [vmem:[%s7101_s5 + $0x980] sm:$0xff] }
 0x1ad   :  { %v390_v41 = vpop.f32.mrf.mxu1  ;;  %v551_v42 = vpop.f32.mrf.mxu0 }
 0x1ae   :  { %v4667_v43 = vmax.f32 %v387_v39, 0.0  ;;  %v4669_v44 = vmax.f32 %v548_v40, 0.0  ;;  %7160 = vst [vmem:[#allocation3_spill] sm:$0xff] %v4673_v46  ;;  %v391_v51 = vadd.f32 %v390_v41, %v4649_v27  ;;  %v552_v56 = vadd.f32 %v551_v42, %v4653_v28  ;;  %v777_v39 = vld [vmem:[%s7101_s5 + $0x248] sm:$0xff] }
 0x1af   :  { %v392_v47 = vpop.f32.mrf.mxu1  ;;  %v553_v48 = vpop.f32.mrf.mxu0 }
 0x1b0   :  { %v393_v52 = vadd.f32 %v392_v47, %v4657_v29  ;;  %v554_v53 = vadd.f32 %v553_v48, %v4661_v30  ;;  %1253 = vmatprep.mubr.f32.mxu1 %v4667_v43  ;;  %1414 = vmatprep.mubr.f32.mxu0 %v4669_v44  ;;  %v4708_v2 = vmax.f32 %v391_v51, 0.0  ;;  %v4716_v6 = vmax.f32 %v552_v56, 0.0  ;;  %v1007_v48 = vld [vmem:[%s7101_s5 + $0x978] sm:$0xff]  ;;  %v770_v56 = vld [vmem:[%s7101_s5 + $0x210] sm:$0xff] }
 0x1b1   :  { %v396_v57 = vpop.f32.mrf.mxu1  ;;  %v557_v58 = vpop.f32.mrf.mxu0  ;;  %1254 = vmatmul.mubr.f32.vlgmr.msra.gmra.mxu1 %v4671_v45  ;;  %1415 = vmatmul.mubr.f32.vlgmr.msra.gmra.mxu0 %v4673_v46 }
 0x1b2   :  { %v4698_v60 = vmax.f32 %v393_v52, 0.0  ;;  %v4700_v61 = vmax.f32 %v554_v53, 0.0  ;;  %1512 = vmatpush1.msra.mxu1 %v811_v49  ;;  %1673 = vmatpush1.msra.mxu0 %v1035_v50  ;;  %v397_v11 = vadd.f32 %v396_v57, %v4649_v27  ;;  %v558_v15 = vadd.f32 %v557_v58, %v4653_v28  ;;  %v776_v49 = vld [vmem:[%s7101_s5 + $0x240] sm:$0xff]  ;;  %v1001_v52 = vld [vmem:[%s7101_s5 + $0x948] sm:$0xff] }
 0x1b3   :  { %1513 = vmatprep.subr.mxu1 %v805_v54  ;;  %v398_v63 = vpop.f32.mrf.mxu1  ;;  %v559_v0 = vpop.f32.mrf.mxu0  ;;  %1674 = vmatprep.subr.mxu0 %v1029_v55  ;;  %v1000_v58 = vld [vmem:[%s7101_s5 + $0x940] sm:$0xff] }
 0x1b4   :  { %7161 = vst [vmem:[#allocation4_spill] sm:$0xff] %v4698_v60  ;;  %7162 = vst [vmem:[#allocation5_spill] sm:$0xff] %v4700_v61  ;;  %v399_v3 = vadd.f32 %v398_v63, %v4657_v29  ;;  %v560_v4 = vadd.f32 %v559_v0, %v4661_v30  ;;  %1514 = vmatpush1.msra.mxu1 %v804_v59  ;;  %1259 = vmatprep.mubr.f32.mxu1 %v4698_v60  ;;  %v4750_v34 = vmax.f32 %v397_v11, 0.0  ;;  %v769_v0 = vld [vmem:[%s7101_s5 + $0x208] sm:$0xff]  ;;  %v762_v11 = vld [vmem:[%s7101_s5 + $0x1d0] sm:$0xff] }
 0x1b5   :  { %1420 = vmatprep.mubr.f32.mxu0 %v4700_v61  ;;  %1515 = vmatprep.subr.mxu1 %v798_v62  ;;  %v402_v7 = vpop.f32.mrf.mxu1  ;;  %v563_v8 = vpop.f32.mrf.mxu0  ;;  %v4756_v37 = vmax.f32 %v558_v15, 0.0  ;;  %v987_v15 = vld [vmem:[%s7101_s5 + $0x8d8] sm:$0xff] }
 0x1b6   :  { %v4726_v12 = vmax.f32 %v399_v3, 0.0  ;;  %1675 = vmatpush1.msra.mxu0 %v1028_v1  ;;  %1260 = vmatmul.mubr.f32.gmra.mxu1 %v4708_v2  ;;  %v4736_v36 = vmax.f32 %v560_v4, 0.0  ;;  %v403_v42 = vadd.f32 %v402_v7, %v4649_v27  ;;  %v564_v50 = vadd.f32 %v563_v8, %v4653_v28  ;;  %v994_v3 = vld [vmem:[%s7101_s5 + $0x910] sm:$0xff]  ;;  %v763_v4 = vld [vmem:[%s7101_s5 + $0x1d8] sm:$0xff] }
 0x1b7   :  { %1421 = vmatmul.mubr.f32.gmra.mxu0 %v4716_v6  ;;  %1516 = vmatpush1.msra.mxu1 %v797_v5  ;;  %v404_v16 = vpop.f32.mrf.mxu1  ;;  %v565_v17 = vpop.f32.mrf.mxu0 }
 0x1b8   :  { %1676 = vmatprep.subr.mxu0 %v1022_v9  ;;  %1517 = vmatprep.subr.mxu1 %v791_v10  ;;  %v405_v19 = vadd.f32 %v404_v16, %v4657_v29  ;;  %v566_v20 = vadd.f32 %v565_v17, %v4661_v30  ;;  %v4790_v63 = vmax.f32 %v403_v42, 0.0  ;;  %v4796_v1 = vmax.f32 %v564_v50, 0.0  ;;  %v993_v10 = vld [vmem:[%s7101_s5 + $0x908] sm:$0xff]  ;;  %v979_v50 = vld [vmem:[%s7101_s5 + $0x898] sm:$0xff] }
 0x1b9   :  { %1677 = vmatpush1.msra.mxu0 %v1021_v13  ;;  %1518 = vmatpush1.msra.mxu1 %v790_v14  ;;  %v408_v31 = vpop.f32.mrf.mxu1  ;;  %v569_v33 = vpop.f32.mrf.mxu0 }
 0x1ba   :  { %1678 = vmatprep.subr.mxu0 %v1015_v18  ;;  %1265 = vmatprep.mubr.f32.mxu1 %v4726_v12  ;;  %v4766_v47 = vmax.f32 %v405_v19, 0.0  ;;  %v4776_v51 = vmax.f32 %v566_v20, 0.0  ;;  %v409_v8 = vadd.f32 %v408_v31, %v4649_v27  ;;  %v570_v13 = vadd.f32 %v569_v33, %v4653_v28  ;;  %v756_v19 = vld [vmem:[%s7101_s5 + $0x1a0] sm:$0xff]  ;;  %v986_v20 = vld [vmem:[%s7101_s5 + $0x8d0] sm:$0xff] }
 0x1bb   :  { %1426 = vmatprep.mubr.f32.mxu0 %v4736_v36  ;;  %1519 = vmatprep.subr.mxu1 %v784_v32  ;;  %v410_v40 = vpop.f32.mrf.mxu1  ;;  %v571_v41 = vpop.f32.mrf.mxu0 }
 0x1bc   :  { %1679 = vmatpush1.msra.mxu0 %v1014_v24  ;;  %1266 = vmatmul.mubr.f32.gmra.mxu1 %v4750_v34  ;;  %v411_v55 = vadd.f32 %v410_v40, %v4657_v29  ;;  %v572_v57 = vadd.f32 %v571_v41, %v4661_v30  ;;  %v4838_v33 = vmax.f32 %v409_v8, 0.0  ;;  %v749_v40 = vld [vmem:[%s7101_s5 + $0x168] sm:$0xff] }
 0x1bd   :  { %1427 = vmatmul.mubr.f32.gmra.mxu0 %v4756_v37  ;;  %1520 = vmatpush1.msra.mxu1 %v783_v35  ;;  %v414_v53 = vpop.f32.mrf.mxu1  ;;  %v575_v54 = vpop.f32.mrf.mxu0  ;;  %v755_v35 = vld [vmem:[%s7101_s5 + $0x198] sm:$0xff] }
 0x1be   :  { %1680 = vmatprep.subr.mxu0 %v1008_v38  ;;  %1521 = vmatprep.subr.mxu1 %v777_v39  ;;  %v4810_v9 = vmax.f32 %v411_v55, 0.0  ;;  %v4820_v14 = vmax.f32 %v572_v57, 0.0  ;;  %v4844_v38 = vmax.f32 %v570_v13, 0.0  ;;  %v980_v39 = vld [vmem:[%s7101_s5 + $0x8a0] sm:$0xff]  ;;  %v576_v55 = vadd.f32 %v575_v54, %v4653_v28  ;;  %v742_v54 = vld [vmem:[%s7101_s5 + $0x130] sm:$0xff] }
 0x1bf   :  { %1681 = vmatpush1.msra.mxu0 %v1007_v48  ;;  %1522 = vmatpush1.msra.mxu1 %v776_v49  ;;  %v416_v59 = vpop.f32.mrf.mxu1  ;;  %v577_v62 = vpop.f32.mrf.mxu0  ;;  %v415_v48 = vadd.f32 %v414_v53, %v4649_v27  ;;  %v973_v53 = vld [vmem:[%s7101_s5 + $0x868] sm:$0xff]  ;;  %v966_v13 = vld [vmem:[%s7101_s5 + $0x830] sm:$0xff] }
 0x1c0   :  { %1682 = vmatprep.subr.mxu0 %v1001_v52  ;;  %1271 = vmatprep.mubr.f32.mxu1 %v4766_v47  ;;  %v417_v18 = vadd.f32 %v416_v59, %v4657_v29  ;;  %v578_v32 = vadd.f32 %v577_v62, %v4661_v30  ;;  %v748_v52 = vld [vmem:[%s7101_s5 + $0x160] sm:$0xff] }
 0x1c1   :  { %1432 = vmatprep.mubr.f32.mxu0 %v4776_v51  ;;  %1523 = vmatprep.subr.mxu1 %v770_v56  ;;  %v4805_v5 = vpop.f32.mrf.mxu1  ;;  %v4807_v7 = vpop.f32.mrf.mxu0  ;;  %v4882_v8 = vmax.f32 %v415_v48, 0.0 }
 0x1c2   :  { %1683 = vmatpush1.msra.mxu0 %v1000_v58  ;;  %1272 = vmatmul.mubr.f32.gmra.mxu1 %v4790_v63  ;;  %v4854_v49 = vmax.f32 %v417_v18, 0.0  ;;  %v4864_v56 = vmax.f32 %v578_v32, 0.0  ;;  %v421_v18 = vadd.f32 %v4805_v5, %v4649_v27  ;;  %v965_v32 = vld [vmem:[%s7101_s5 + $0x828] sm:$0xff]  ;;  %v959_v5 = vld [vmem:[%s7101_s5 + $0x7f8] sm:$0xff] }
 0x1c3   :  { %1433 = vmatmul.mubr.f32.gmra.mxu0 %v4796_v1  ;;  %1524 = vmatpush1.msra.mxu1 %v769_v0  ;;  %v422_v16 = vpop.f32.mrf.mxu1  ;;  %v583_v17 = vpop.f32.mrf.mxu0  ;;  %v972_v0 = vld [vmem:[%s7101_s5 + $0x860] sm:$0xff] }
 0x1c4   :  { %1684 = vmatprep.subr.mxu0 %v994_v3  ;;  %1525 = vmatprep.subr.mxu1 %v763_v4  ;;  %v423_v59 = vadd.f32 %v422_v16, %v4657_v29  ;;  %v584_v62 = vadd.f32 %v583_v17, %v4661_v30 }
 0x1c5   :  { %1685 = vmatpush1.msra.mxu0 %v993_v10  ;;  %1526 = vmatpush1.msra.mxu1 %v762_v11  ;;  %v4834_v24 = vpop.f32.mrf.mxu1  ;;  %v4836_v31 = vpop.f32.mrf.mxu0  ;;  %v741_v10 = vld [vmem:[%s7101_s5 + $0x128] sm:$0xff]  ;;  %v4888_v11 = vmax.f32 %v576_v55, 0.0  ;;  %v958_v55 = vld [vmem:[%s7101_s5 + $0x7f0] sm:$0xff] }
 0x1c6   :  { %1686 = vmatprep.subr.mxu0 %v987_v15  ;;  %1277 = vmatprep.mubr.f32.mxu1 %v4810_v9  ;;  %v735_v15 = vld [vmem:[%s7101_s5 + $0xf8] sm:$0xff] }
 0x1c7   :  { %1438 = vmatprep.mubr.f32.mxu0 %v4820_v14  ;;  %1527 = vmatprep.subr.mxu1 %v756_v19  ;;  %v428_v41 = vpop.f32.mrf.mxu1  ;;  %v589_v42 = vpop.f32.mrf.mxu0  ;;  %v4903_v19 = vmax.f32 %v423_v59, 0.0  ;;  %v4934_v59 = vmax.f32 %v421_v18, 0.0  ;;  %v720_v18 = vld [vmem:[%s7101_s5 + $0x80] sm:$0xff] }
 0x1c8   :  { %1687 = vmatpush1.msra.mxu0 %v986_v20  ;;  %1278 = vmatmul.mubr.f32.gmra.mxu1 %v4838_v33  ;;  %v734_v20 = vld [vmem:[%s7101_s5 + $0xf0] sm:$0xff] }
 0x1c9   :  { %1439 = vmatmul.mubr.f32.gmra.mxu0 %v4844_v38  ;;  %1528 = vmatpush1.msra.mxu1 %v755_v35  ;;  %v4870_v57 = vpop.f32.mrf.mxu1  ;;  %v4872_v58 = vpop.f32.mrf.mxu0  ;;  %v582_v35 = vadd.f32 %v4807_v7, %v4653_v28  ;;  %v728_v7 = vld [vmem:[%s7101_s5 + $0xc0] sm:$0xff] }
 0x1ca   :  { %1688 = vmatprep.subr.mxu0 %v980_v39  ;;  %1529 = vmatprep.subr.mxu1 %v749_v40  ;;  %v4914_v39 = vmax.f32 %v584_v62, 0.0 }
 0x1cb   :  { %1689 = vmatpush1.msra.mxu0 %v979_v50  ;;  %1530 = vmatpush1.msra.mxu1 %v748_v52  ;;  %v434_v3 = vpop.f32.mrf.mxu1  ;;  %v595_v4 = vpop.f32.mrf.mxu0  ;;  %v429_v50 = vadd.f32 %v428_v41, %v4657_v29  ;;  %v590_v52 = vadd.f32 %v589_v42, %v4661_v30  ;;  %v727_v41 = vld [vmem:[%s7101_s5 + $0xb8] sm:$0xff]  ;;  %v4942_v62 = vmax.f32 %v582_v35, 0.0  ;;  %v952_v42 = vld [vmem:[%s7101_s5 + $0x7c0] sm:$0xff] }
 0x1cc   :  { %1690 = vmatprep.subr.mxu0 %v973_v53  ;;  %1283 = vmatprep.mubr.f32.mxu1 %v4854_v49 }
 0x1cd   :  { %1444 = vmatprep.mubr.f32.mxu0 %v4864_v56  ;;  %1531 = vmatprep.subr.mxu1 %v742_v54  ;;  %v4897_v16 = vpop.f32.mrf.mxu1  ;;  %v4899_v17 = vpop.f32.mrf.mxu0 }
 0x1ce   :  { %1691 = vmatpush1.msra.mxu0 %v972_v0  ;;  %1284 = vmatmul.mubr.f32.gmra.mxu1 %v4882_v8  ;;  %v721_v0 = vld [vmem:[%s7101_s5 + $0x88] sm:$0xff] }
 0x1cf   :  { %1445 = vmatmul.mubr.f32.gmra.mxu0 %v4888_v11  ;;  %1532 = vmatpush1.msra.mxu1 %v741_v10  ;;  %v4920_v40 = vpop.f32.mrf.mxu1  ;;  %v4922_v48 = vpop.f32.mrf.mxu0  ;;  %v427_v10 = vadd.f32 %v4834_v24, %v4649_v27  ;;  %v945_v24 = vld [vmem:[%s7101_s5 + $0x788] sm:$0xff] }
 0x1d0   :  { %1692 = vmatprep.subr.mxu0 %v966_v13  ;;  %1533 = vmatprep.subr.mxu1 %v735_v15  ;;  %v4953_v13 = vmax.f32 %v429_v50, 0.0  ;;  %v951_v15 = vld [vmem:[%s7101_s5 + $0x7b8] sm:$0xff]  ;;  %v714_v50 = vld [vmem:[%s7101_s5 + $0x50] sm:$0xff] }
 0x1d1   :  { %1693 = vmatpush1.msra.mxu0 %v965_v32  ;;  %1534 = vmatpush1.msra.mxu1 %v734_v20  ;;  %v4932_v53 = vpop.f32.mrf.mxu1  ;;  %v4940_v54 = vpop.f32.mrf.mxu0  ;;  %v588_v32 = vadd.f32 %v4836_v31, %v4653_v28  ;;  %v4964_v20 = vmax.f32 %v590_v52, 0.0  ;;  %v944_v52 = vld [vmem:[%s7101_s5 + $0x780] sm:$0xff] }
 0x1d2   :  { %1694 = vmatprep.subr.mxu0 %v959_v5  ;;  %1289 = vmatprep.mubr.f32.mxu1 %v4903_v19  ;;  %v435_v5 = vadd.f32 %v434_v3, %v4657_v29  ;;  %v713_v3 = vld [vmem:[%s7101_s5 + $0x48] sm:$0xff] }
 0x1d3   :  { %1450 = vmatprep.mubr.f32.mxu0 %v4914_v39  ;;  %1535 = vmatprep.subr.mxu1 %v728_v7  ;;  %v4970_v35 = vpop.f32.mrf.mxu1  ;;  %v4976_v31 = vpop.f32.mrf.mxu0  ;;  %v596_v7 = vadd.f32 %v595_v4, %v4661_v30  ;;  %v938_v4 = vld [vmem:[%s7101_s5 + $0x750] sm:$0xff] }
 0x1d4   :  { %1695 = vmatpush1.msra.mxu0 %v958_v55  ;;  %1290 = vmatmul.mubr.f32.gmra.mxu1 %v4934_v59  ;;  %v4982_v55 = vmax.f32 %v427_v10, 0.0  ;;  %v433_v10 = vadd.f32 %v4870_v57, %v4649_v27  ;;  %v931_v57 = vld [vmem:[%s7101_s5 + $0x718] sm:$0xff] }
 0x1d5   :  { %1451 = vmatmul.mubr.f32.gmra.mxu0 %v4942_v62  ;;  %1536 = vmatpush1.msra.mxu1 %v727_v41  ;;  %v4988_v41 = vmax.f32 %v588_v32, 0.0  ;;  %v706_v32 = vld [vmem:[%s7101_s5 + $0x10] sm:$0xff]  ;;  %v5014_v23 = vmax.f32 %v596_v7, 0.0 }
 0x1d6   :  { %1696 = vmatprep.subr.mxu0 %v952_v42  ;;  %1537 = vmatprep.subr.mxu1 %v721_v0  ;;  %v707_v42 = vld [vmem:[%s7101_s5 + $0x18] sm:$0xff]  ;;  %v4997_v0 = vpop.f32.mrf.mxu1  ;;  %v930_v7 = vld [vmem:[%s7101_s5 + $0x710] sm:$0xff]  ;;  %v5030_v26 = vmax.f32 %v433_v10, 0.0  ;;  %v917_v10 = vld [vmem:[%s7101_s5 + $0x6a8] sm:$0xff] }
 0x1d7   :  { %1697 = vmatpush1.msra.mxu0 %v951_v15  ;;  %1538 = vmatpush1.msra.mxu1 %v720_v18  ;;  %v5001_v15 = vmax.f32 %v435_v5, 0.0  ;;  %v937_v18 = vld [vmem:[%s7101_s5 + $0x748] sm:$0xff]  ;;  %v441_v5 = vadd.f32 %v4920_v40, %v4657_v29  ;;  %v923_v40 = vld [vmem:[%s7101_s5 + $0x6d8] sm:$0xff] }
 0x1d8   :  { %1698 = vmatprep.subr.mxu0 %v945_v24  ;;  %1295 = vmatprep.mubr.f32.mxu1 %v4953_v13  ;;  %v5010_v24 = vpop.f32.mrf.mxu0 }
 0x1d9   :  { %1456 = vmatprep.mubr.f32.mxu0 %v4964_v20  ;;  %1539 = vmatprep.subr.mxu1 %v714_v50  ;;  %v594_v50 = vadd.f32 %v4872_v58, %v4653_v28  ;;  %v602_v58 = vadd.f32 %v4922_v48, %v4661_v30  ;;  %v1148_v48 = vld [vmem:[%s7101_s5 + $0xde0] sm:$0xff] }
 0x1da   :  { %1699 = vmatpush1.msra.mxu0 %v944_v52  ;;  %1296 = vmatmul.mubr.f32.gmra.mxu1 %v4982_v55  ;;  %v924_v52 = vld [vmem:[%s7101_s5 + $0x6e0] sm:$0xff] }
 0x1db   :  { %1457 = vmatmul.mubr.f32.gmra.mxu0 %v4988_v41  ;;  %1540 = vmatpush1.msra.mxu1 %v713_v3  ;;  %v452_v3 = vpop.f32.mrf.mxu1  ;;  %v5058_v25 = vmax.f32 %v602_v58, 0.0 }
 0x1dc   :  { %1700 = vmatprep.subr.mxu0 %v938_v4  ;;  %1541 = vmatprep.subr.mxu1 %v707_v42  ;;  %v613_v4 = vpop.f32.mrf.mxu0  ;;  %v5036_v42 = vmax.f32 %v594_v50, 0.0  ;;  %v1147_v50 = vld [vmem:[%s7101_s5 + $0xdd8] sm:$0xff] }
 0x1dd   :  { %1701 = vmatpush1.msra.mxu0 %v937_v18  ;;  %1542 = vmatpush1.msra.mxu1 %v706_v32  ;;  %v439_v18 = vadd.f32 %v4897_v16, %v4649_v27  ;;  %v5047_v32 = vmax.f32 %v441_v5, 0.0  ;;  %7164 = vst [vmem:[#allocation7_spill] sm:$0xff] %v5058_v25  ;;  %v1141_v16 = vld [vmem:[%s7101_s5 + $0xda8] sm:$0xff]  ;;  %v5064_v5 = vpop.f32.mrf.mxu1 }
 0x1de   :  { %1702 = vmatprep.subr.mxu0 %v931_v57  ;;  %1301 = vmatprep.mubr.f32.mxu1 %v5001_v15  ;;  %v916_v57 = vld [vmem:[%s7101_s5 + $0x6a0] sm:$0xff]  ;;  %v5071_v58 = vpop.f32.mrf.mxu0 }
 0x1df   :  { %1462 = vmatprep.mubr.f32.mxu0 %v5014_v23  ;;  %1543 = vmatprep.subr.mxu1 %v924_v52  ;;  %7163 = vst [vmem:[#allocation6_spill] sm:$0xff] %v5047_v32  ;;  %v600_v52 = vadd.f32 %v4899_v17, %v4653_v28  ;;  %v910_v17 = vld [vmem:[%s7101_s5 + $0x670] sm:$0xff] }
 0x1e0   :  { %1703 = vmatpush1.msra.mxu0 %v930_v7  ;;  %1302 = vmatmul.mubr.f32.gmra.mxu1 %v5030_v26  ;;  %v447_v7 = vadd.f32 %v4970_v35, %v4657_v29  ;;  %v909_v35 = vld [vmem:[%s7101_s5 + $0x668] sm:$0xff]  ;;  %v619_v21 = vpop.f32.mrf.mxu0 }
 0x1e1   :  { %1463 = vmatmul.mubr.f32.gmra.mxu0 %v5036_v42  ;;  %1544 = vmatpush2.msra.mxu1 %v923_v40  ;;  %v608_v40 = vadd.f32 %v4976_v31, %v4661_v30  ;;  %v1134_v31 = vld [vmem:[%s7101_s5 + $0xd70] sm:$0xff] }
 0x1e2   :  { %1704 = vmatprep.subr.mxu0 %v1148_v48  ;;  %1545 = vmatprep.subr.mxu1 %v917_v10  ;;  %v5078_v48 = vmax.f32 %v439_v18, 0.0  ;;  %v5084_v10 = vmax.f32 %v600_v52, 0.0  ;;  %v903_v18 = vld [vmem:[%s7101_s5 + $0x638] sm:$0xff]  ;;  %v1133_v52 = vld [vmem:[%s7101_s5 + $0xd68] sm:$0xff] }
 0x1e3   :  { %1705 = vmatpush2.msra.mxu0 %v1147_v50  ;;  %1546 = vmatpush2.msra.mxu1 %v916_v57  ;;  %v458_v50 = vpop.f32.mrf.mxu1  ;;  %v445_v57 = vadd.f32 %v4932_v53, %v4649_v27  ;;  %v453_v53 = vadd.f32 %v452_v3, %v4657_v29  ;;  %v895_v3 = vld [vmem:[%s7101_s5 + $0x5f8] sm:$0xff] }
 0x1e4   :  { %1706 = vmatprep.subr.mxu0 %v1141_v16  ;;  %1307 = vmatprep.mubr.f32.mxu1 %v5047_v32  ;;  %7165 = vst [vmem:[#allocation8_spill] sm:$0xff] %v5084_v10  ;;  %v5095_v16 = vmax.f32 %v447_v7, 0.0  ;;  %v5106_v32 = vmax.f32 %v608_v40, 0.0  ;;  %v896_v7 = vld [vmem:[%s7101_s5 + $0x600] sm:$0xff]  ;;  %v1126_v40 = vld [vmem:[%s7101_s5 + $0xd30] sm:$0xff] }
 0x1e5   :  { %1468 = vmatprep.mubr.f32.mxu0 %v5058_v25  ;;  %1547 = vmatprep.subr.mxu1 %v910_v17  ;;  %v902_v17 = vld [vmem:[%s7101_s5 + $0x630] sm:$0xff]  ;;  %v606_v25 = vadd.f32 %v4940_v54, %v4653_v28  ;;  %v614_v54 = vadd.f32 %v613_v4, %v4661_v30  ;;  %v1120_v4 = vld [vmem:[%s7101_s5 + $0xd00] sm:$0xff] }
 0x1e6   :  { %7166 = vst [vmem:[#allocation9_spill] sm:$0xff] %v5095_v16  ;;  %1707 = vmatpush2.msra.mxu0 %v1140_v22  ;;  %1308 = vmatmul.mubr.f32.gmra.mxu1 %v5078_v48  ;;  %7167 = vst [vmem:[#allocation10_spill] sm:$0xff] %v5106_v32  ;;  %v1127_v22 = vld [vmem:[%s7101_s5 + $0xd38] sm:$0xff] }
 0x1e7   :  { %1469 = vmatmul.mubr.f32.gmra.mxu0 %v5084_v10  ;;  %1548 = vmatpush2.msra.mxu1 %v909_v35  ;;  %v5120_v35 = vpop.f32.mrf.mxu1  ;;  %v5122_v10 = vmax.f32 %v445_v57, 0.0  ;;  %v889_v57 = vld [vmem:[%s7101_s5 + $0x5c8] sm:$0xff] }
 0x1e8   :  { %1708 = vmatprep.subr.mxu0 %v1134_v31  ;;  %1549 = vmatprep.subr.mxu1 %v903_v18  ;;  %v5128_v31 = vpop.f32.mrf.mxu0  ;;  %v5130_v18 = vmax.f32 %v606_v25, 0.0  ;;  %v1119_v25 = vld [vmem:[%s7101_s5 + $0xcf8] sm:$0xff] }
 0x1e9   :  { %1709 = vmatpush2.msra.mxu0 %v1133_v52  ;;  %1550 = vmatpush2.msra.mxu1 %v902_v17  ;;  %7168 = vst [vmem:[#allocation11_spill] sm:$0xff] %v5122_v10  ;;  %v451_v52 = vadd.f32 %v4997_v0, %v4649_v27  ;;  %v5141_v17 = vmax.f32 %v453_v53, 0.0  ;;  %v1113_v0 = vld [vmem:[%s7101_s5 + $0xcc8] sm:$0xff]  ;;  %v464_v53 = vpop.f32.mrf.mxu1 }
 0x1ea   :  { %1710 = vmatprep.subr.mxu0 %v1127_v22  ;;  %1313 = vmatprep.mubr.f32.mxu1 %v5095_v16  ;;  %7169 = vst [vmem:[#allocation12_spill] sm:$0xff] %v5130_v18  ;;  %v888_v22 = vld [vmem:[%s7101_s5 + $0x5c0] sm:$0xff]  ;;  %v625_v16 = vpop.f32.mrf.mxu0 }
 0x1eb   :  { %1474 = vmatprep.mubr.f32.mxu0 %v5106_v32  ;;  %1551 = vmatprep.subr.mxu1 %v896_v7  ;;  %7170 = vst [vmem:[#allocation13_spill] sm:$0xff] %v5141_v17  ;;  %v612_v7 = vadd.f32 %v5010_v24, %v4653_v28  ;;  %v5152_v32 = vmax.f32 %v614_v54, 0.0  ;;  %v620_v24 = vadd.f32 %v619_v21, %v4661_v30  ;;  %v1112_v54 = vld [vmem:[%s7101_s5 + $0xcc0] sm:$0xff]  ;;  %v1106_v21 = vld [vmem:[%s7101_s5 + $0xc90] sm:$0xff] }
 0x1ec   :  { %1711 = vmatpush2.msra.mxu0 %v1126_v40  ;;  %1314 = vmatmul.mubr.f32.gmra.mxu1 %v5122_v10  ;;  %v459_v40 = vadd.f32 %v458_v50, %v4657_v29  ;;  %v882_v10 = vld [vmem:[%s7101_s5 + $0x590] sm:$0xff]  ;;  %v881_v50 = vld [vmem:[%s7101_s5 + $0x588] sm:$0xff] }
 0x1ed   :  { %7171 = vst [vmem:[#allocation14_spill] sm:$0xff] %v5152_v32  ;;  %1475 = vmatmul.mubr.f32.gmra.mxu0 %v5130_v18  ;;  %1552 = vmatpush2.msra.mxu1 %v895_v3  ;;  %v5166_v3 = vmax.f32 %v451_v52, 0.0  ;;  %v5181_v52 = vpop.f32.mrf.mxu1 }
 0x1ee   :  { %1712 = vmatprep.subr.mxu0 %v1120_v4  ;;  %1553 = vmatprep.subr.mxu1 %v889_v57  ;;  %v5172_v4 = vmax.f32 %v612_v7, 0.0  ;;  %v875_v57 = vld [vmem:[%s7101_s5 + $0x558] sm:$0xff]  ;;  %v874_v7 = vld [vmem:[%s7101_s5 + $0x550] sm:$0xff] }
 0x1ef   :  { %1713 = vmatpush2.msra.mxu0 %v1119_v25  ;;  %1554 = vmatpush2.msra.mxu1 %v888_v22  ;;  %7172 = vst [vmem:[#allocation15_spill] sm:$0xff] %v5166_v3  ;;  %v457_v25 = vadd.f32 %v5064_v5, %v4649_v27  ;;  %v5185_v22 = vmax.f32 %v459_v40, 0.0  ;;  %v1099_v5 = vld [vmem:[%s7101_s5 + $0xc58] sm:$0xff]  ;;  %v465_v40 = vadd.f32 %v464_v53, %v4657_v29 }
 0x1f0   :  { %1714 = vmatprep.subr.mxu0 %v1113_v0  ;;  %1319 = vmatprep.mubr.f32.mxu1 %v5141_v17  ;;  %7173 = vst [vmem:[#allocation16_spill] sm:$0xff] %v5172_v4  ;;  %v5194_v0 = vpop.f32.mrf.mxu0  ;;  %v5198_v17 = vmax.f32 %v620_v24, 0.0  ;;  %v1098_v24 = vld [vmem:[%s7101_s5 + $0xc50] sm:$0xff]  ;;  %v867_v53 = vld [vmem:[%s7101_s5 + $0x518] sm:$0xff] }
 0x1f1   :  { %1480 = vmatprep.mubr.f32.mxu0 %v5152_v32  ;;  %1555 = vmatprep.subr.mxu1 %v882_v10  ;;  %7174 = vst [vmem:[#allocation17_spill] sm:$0xff] %v5185_v22  ;;  %v1105_v10 = vld [vmem:[%s7101_s5 + $0xc88] sm:$0xff]  ;;  %v618_v32 = vadd.f32 %v5071_v58, %v4653_v28  ;;  %v626_v58 = vadd.f32 %v625_v16, %v4661_v30  ;;  %v1092_v16 = vld [vmem:[%s7101_s5 + $0xc20] sm:$0xff] }
 0x1f2   :  { %1715 = vmatpush2.msra.mxu0 %v1112_v54  ;;  %1320 = vmatmul.mubr.f32.gmra.mxu1 %v5166_v3  ;;  %7175 = vst [vmem:[#allocation18_spill] sm:$0xff] %v5198_v17  ;;  %v868_v54 = vld [vmem:[%s7101_s5 + $0x520] sm:$0xff] }
 0x1f3   :  { %1481 = vmatmul.mubr.f32.gmra.mxu0 %v5172_v4  ;;  %1556 = vmatpush2.msra.mxu1 %v881_v50  ;;  %v470_v50 = vpop.f32.mrf.mxu1  ;;  %v5212_v4 = vmax.f32 %v457_v25, 0.0  ;;  %v861_v25 = vld [vmem:[%s7101_s5 + $0x4e8] sm:$0xff] }
 0x1f4   :  { %1716 = vmatprep.subr.mxu0 %v1106_v21  ;;  %1557 = vmatprep.subr.mxu1 %v875_v57  ;;  %v631_v21 = vpop.f32.mrf.mxu0  ;;  %v5218_v57 = vmax.f32 %v618_v32, 0.0  ;;  %v1091_v32 = vld [vmem:[%s7101_s5 + $0xc18] sm:$0xff] }
 0x1f5   :  { %1717 = vmatpush2.msra.mxu0 %v1105_v10  ;;  %1558 = vmatpush2.msra.mxu1 %v874_v7  ;;  %7176 = vst [vmem:[#allocation19_spill] sm:$0xff] %v5212_v4  ;;  %v463_v10 = vadd.f32 %v5120_v35, %v4649_v27  ;;  %v5229_v7 = vmax.f32 %v465_v40, 0.0  ;;  %v1085_v35 = vld [vmem:[%s7101_s5 + $0xbe8] sm:$0xff]  ;;  %v474_v40 = vpop.f32.mrf.mxu1 }
 0x1f6   :  { %1718 = vmatprep.subr.mxu0 %v1099_v5  ;;  %1325 = vmatprep.mubr.f32.mxu1 %v5185_v22  ;;  %7177 = vst [vmem:[#allocation20_spill] sm:$0xff] %v5218_v57  ;;  %v860_v5 = vld [vmem:[%s7101_s5 + $0x4e0] sm:$0xff]  ;;  %v635_v22 = vpop.f32.mrf.mxu0 }
 0x1f7   :  { %1486 = vmatprep.mubr.f32.mxu0 %v5198_v17  ;;  %1559 = vmatprep.subr.mxu1 %v868_v54  ;;  %7178 = vst [vmem:[#allocation21_spill] sm:$0xff] %v5229_v7  ;;  %v624_v54 = vadd.f32 %v5128_v31, %v4653_v28  ;;  %v5240_v17 = vmax.f32 %v626_v58, 0.0  ;;  %v632_v31 = vadd.f32 %v631_v21, %v4661_v30  ;;  %v1084_v58 = vld [vmem:[%s7101_s5 + $0xbe0] sm:$0xff]  ;;  %v1078_v21 = vld [vmem:[%s7101_s5 + $0xbb0] sm:$0xff] }
 0x1f8   :  { %1719 = vmatpush2.msra.mxu0 %v1098_v24  ;;  %1326 = vmatmul.mubr.f32.gmra.mxu1 %v5212_v4  ;;  %v471_v24 = vadd.f32 %v470_v50, %v4657_v29  ;;  %v854_v4 = vld [vmem:[%s7101_s5 + $0x4b0] sm:$0xff]  ;;  %v853_v50 = vld [vmem:[%s7101_s5 + $0x4a8] sm:$0xff] }
 0x1f9   :  { %7179 = vst [vmem:[#allocation22_spill] sm:$0xff] %v5240_v17  ;;  %1487 = vmatmul.mubr.f32.gmra.mxu0 %v5218_v57  ;;  %1560 = vmatpush2.msra.mxu1 %v867_v53  ;;  %v5254_v53 = vmax.f32 %v463_v10, 0.0  ;;  %v476_v10 = vpop.f32.mrf.mxu1 }
 0x1fa   :  { %1720 = vmatprep.subr.mxu0 %v1092_v16  ;;  %1561 = vmatprep.subr.mxu1 %v861_v25  ;;  %v5260_v16 = vmax.f32 %v624_v54, 0.0  ;;  %v847_v25 = vld [vmem:[%s7101_s5 + $0x478] sm:$0xff]  ;;  %v637_v54 = vpop.f32.mrf.mxu0 }
 0x1fb   :  { %1721 = vmatpush2.msra.mxu0 %v1091_v32  ;;  %1562 = vmatpush2.msra.mxu1 %v860_v5  ;;  %v469_v32 = vadd.f32 %v5181_v52, %v4649_v27  ;;  %v5271_v5 = vmax.f32 %v471_v24, 0.0  ;;  %v1071_v52 = vld [vmem:[%s7101_s5 + $0xb78] sm:$0xff]  ;;  %v477_v24 = vadd.f32 %v476_v10, %v4657_v29  ;;  %v475_v10 = vadd.f32 %v474_v40, %v4649_v27  ;;  %v1057_v27 = vld [vmem:[%s7101_s5 + $0xb08] sm:$0xff]  ;;  %v826_v40 = vld [vmem:[%s7101_s5 + $0x3d0] sm:$0xff] }
 0x1fc   :  { %1722 = vmatprep.subr.mxu0 %v1085_v35  ;;  %1331 = vmatprep.mubr.f32.mxu1 %v5229_v7  ;;  %v846_v35 = vld [vmem:[%s7101_s5 + $0x470] sm:$0xff]  ;;  %v5282_v7 = vmax.f32 %v632_v31, 0.0  ;;  %v839_v29 = vld [vmem:[%s7101_s5 + $0x438] sm:$0xff] }
 0x1fd   :  { %1492 = vmatprep.mubr.f32.mxu0 %v5240_v17  ;;  %1563 = vmatprep.subr.mxu1 %v854_v4  ;;  %v1077_v4 = vld [vmem:[%s7101_s5 + $0xba8] sm:$0xff]  ;;  %v630_v17 = vadd.f32 %v5194_v0, %v4653_v28  ;;  %v638_v0 = vadd.f32 %v637_v54, %v4661_v30  ;;  %v1070_v31 = vld [vmem:[%s7101_s5 + $0xb70] sm:$0xff]  ;;  %v1064_v30 = vld [vmem:[%s7101_s5 + $0xb40] sm:$0xff]  ;;  %v636_v54 = vadd.f32 %v635_v22, %v4653_v28  ;;  %v5334_v22 = vmax.f32 %v475_v10, 0.0 }
 0x1fe   :  { %1723 = vmatpush2.msra.mxu0 %v1084_v58  ;;  %1332 = vmatmul.mubr.f32.gmra.mxu1 %v5254_v53  ;;  %v840_v58 = vld [vmem:[%s7101_s5 + $0x440] sm:$0xff]  ;;  %v1042_v10 = vld [vmem:[%s7101_s5 + $0xa90] sm:$0xff] }
 0x1ff   :  { %1493 = vmatmul.mubr.f32.gmra.mxu0 %v5260_v16  ;;  %1564 = vmatpush2.msra.mxu1 %v853_v50  ;;  %v5296_v50 = vmax.f32 %v469_v32, 0.0  ;;  %v5312_v32 = vmax.f32 %v477_v24, 0.0  ;;  %v1056_v28 = vld [vmem:[%s7101_s5 + $0xb00] sm:$0xff]  ;;  %7180 = vst [vmem:[#allocation23_spill] sm:$0xff] %v5334_v22  ;;  %v5340_v24 = vmax.f32 %v636_v54, 0.0  ;;  %v807_v54 = vld [vmem:[%s7101_s5 + $0x338] sm:$0xff] }
 0x200   :  { %1724 = vmatprep.subr.mxu0 %v1078_v21  ;;  %1565 = vmatprep.subr.mxu1 %v847_v25  ;;  %v5302_v21 = vmax.f32 %v630_v17, 0.0  ;;  %v833_v25 = vld [vmem:[%s7101_s5 + $0x408] sm:$0xff]  ;;  %v1063_v17 = vld [vmem:[%s7101_s5 + $0xb38] sm:$0xff] }
 0x201   :  { %1725 = vmatpush2.msra.mxu0 %v1077_v4  ;;  %1566 = vmatpush2.msra.mxu1 %v846_v35  ;;  %v832_v4 = vld [vmem:[%s7101_s5 + $0x400] sm:$0xff]  ;;  %v5322_v35 = vmax.f32 %v638_v0, 0.0  ;;  %7181 = vst [vmem:[#allocation24_spill] sm:$0xff] %v5340_v24  ;;  %v819_v0 = vld [vmem:[%s7101_s5 + $0x398] sm:$0xff] }
 0x202   :  { %1726 = vmatprep.subr.mxu0 %v1071_v52  ;;  %1337 = vmatprep.mubr.f32.mxu1 %v5271_v5  ;;  %v825_v52 = vld [vmem:[%s7101_s5 + $0x3c8] sm:$0xff] }
 0x203   :  { %1498 = vmatprep.mubr.f32.mxu0 %v5282_v7  ;;  %1567 = vmatprep.subr.mxu1 %v840_v58  ;;  %v1050_v58 = vld [vmem:[%s7101_s5 + $0xad0] sm:$0xff] }
 0x204   :  { %1727 = vmatpush2.msra.mxu0 %v1070_v31  ;;  %1338 = vmatmul.mubr.f32.gmra.mxu1 %v5296_v50  ;;  %v1049_v31 = vld [vmem:[%s7101_s5 + $0xac8] sm:$0xff] }
 0x205   :  { %1499 = vmatmul.mubr.f32.gmra.mxu0 %v5302_v21  ;;  %1568 = vmatpush2.msra.mxu1 %v839_v29  ;;  %v818_v29 = vld [vmem:[%s7101_s5 + $0x390] sm:$0xff] }
 0x206   :  { %1728 = vmatprep.subr.mxu0 %v1064_v30  ;;  %1569 = vmatprep.subr.mxu1 %v833_v25  ;;  %v1043_v30 = vld [vmem:[%s7101_s5 + $0xa98] sm:$0xff]  ;;  %v814_v25 = vld [vmem:[%s7101_s5 + $0x370] sm:$0xff] }
 0x207   :  { %1729 = vmatpush2.msra.mxu0 %v1063_v17  ;;  %1570 = vmatpush2.msra.mxu1 %v832_v4  ;;  %v813_v17 = vld [vmem:[%s7101_s5 + $0x368] sm:$0xff]  ;;  %v1038_v4 = vld [vmem:[%s7101_s5 + $0xa70] sm:$0xff] }
 0x208   :  { %1730 = vmatprep.subr.mxu0 %v1057_v27  ;;  %1343 = vmatprep.mubr.f32.mxu1 %v5312_v32  ;;  %v1037_v27 = vld [vmem:[%s7101_s5 + $0xa68] sm:$0xff] }
 0x209   :  { %1504 = vmatprep.mubr.f32.mxu0 %v5322_v35  ;;  %1571 = vmatprep.subr.mxu1 %v826_v40  ;;  %v806_v40 = vld [vmem:[%s7101_s5 + $0x330] sm:$0xff] }
 0x20a   :  { %1731 = vmatpush2.msra.mxu0 %v1056_v28  ;;  %1344 = vmatmul.mubr.f32.gmra.mxu1 %v5334_v22  ;;  %v1031_v28 = vld [vmem:[%s7101_s5 + $0xa38] sm:$0xff] }
 0x20b   :  { %1505 = vmatmul.mubr.f32.gmra.mxu0 %v5340_v24  ;;  %1572 = vmatpush2.msra.mxu1 %v825_v52  ;;  %v800_v52 = vld [vmem:[%s7101_s5 + $0x300] sm:$0xff] }
 0x20c   :  { %1732 = vmatprep.subr.mxu0 %v1050_v58  ;;  %1573 = vmatprep.subr.mxu1 %v819_v0  ;;  %v1030_v58 = vld [vmem:[%s7101_s5 + $0xa30] sm:$0xff]  ;;  %v799_v0 = vld [vmem:[%s7101_s5 + $0x2f8] sm:$0xff] }
 0x20d   :  { %1575 = vmatprep.mubr.f32.mxu1 %v4667_v43  ;;  %1733 = vmatpush2.msra.mxu0 %v1049_v31  ;;  %v1024_v31 = vld [vmem:[%s7101_s5 + $0xa00] sm:$0xff] }
 0x20e   :  { %1736 = vmatprep.mubr.f32.mxu0 %v4669_v44  ;;  %1574 = vmatpush2.msra.mxu1 %v818_v29  ;;  %v793_v29 = vld [vmem:[%s7101_s5 + $0x2c8] sm:$0xff] }
 0x20f   :  { %1734 = vmatprep.subr.mxu0 %v1043_v30  ;;  %1833 = vmatprep.subr.mxu1 %v814_v25  ;;  %v1023_v30 = vld [vmem:[%s7101_s5 + $0x9f8] sm:$0xff]  ;;  %v792_v25 = vld [vmem:[%s7101_s5 + $0x2c0] sm:$0xff] }
 0x210   :  { %1735 = vmatpush2.msra.mxu0 %v1042_v10  ;;  %1576 = vmatmul.mubr.f32.vlgmr.msra.gmra.mxu1 %v4671_v45  ;;  %v1017_v10 = vld [vmem:[%s7101_s5 + $0x9c8] sm:$0xff] }
 0x211   :  { %1737 = vmatmul.mubr.f32.vlgmr.msra.gmra.mxu0 %v4673_v46  ;;  %1834 = vmatpush1.msra.mxu1 %v813_v17  ;;  %v786_v17 = vld [vmem:[%s7101_s5 + $0x290] sm:$0xff] }
 0x212   :  { %1994 = vmatprep.subr.mxu0 %v1038_v4  ;;  %1581 = vmatprep.mubr.f32.mxu1 %v4698_v60  ;;  %v1016_v4 = vld [vmem:[%s7101_s5 + $0x9c0] sm:$0xff] }
 0x213   :  { %1742 = vmatprep.mubr.f32.mxu0 %v4700_v61  ;;  %1835 = vmatprep.subr.mxu1 %v807_v54  ;;  %v785_v54 = vld [vmem:[%s7101_s5 + $0x288] sm:$0xff] }
 0x214   :  { %1995 = vmatpush1.msra.mxu0 %v1037_v27  ;;  %1836 = vmatpush1.msra.mxu1 %v806_v40  ;;  %v1010_v27 = vld [vmem:[%s7101_s5 + $0x990] sm:$0xff]  ;;  %v779_v40 = vld [vmem:[%s7101_s5 + $0x258] sm:$0xff] }
 0x215   :  { %1996 = vmatprep.subr.mxu0 %v1031_v28  ;;  %1837 = vmatprep.subr.mxu1 %v800_v52  ;;  %v1009_v28 = vld [vmem:[%s7101_s5 + $0x988] sm:$0xff]  ;;  %v778_v52 = vld [vmem:[%s7101_s5 + $0x250] sm:$0xff] }
 0x216   :  { %1997 = vmatpush1.msra.mxu0 %v1030_v58  ;;  %1582 = vmatmul.mubr.f32.gmra.mxu1 %v4708_v2  ;;  %v1003_v58 = vld [vmem:[%s7101_s5 + $0x958] sm:$0xff] }
 0x217   :  { %1743 = vmatmul.mubr.f32.gmra.mxu0 %v4716_v6  ;;  %1838 = vmatpush1.msra.mxu1 %v799_v0  ;;  %v772_v0 = vld [vmem:[%s7101_s5 + $0x220] sm:$0xff] }
 0x218   :  { %1998 = vmatprep.subr.mxu0 %v1024_v31  ;;  %1587 = vmatprep.mubr.f32.mxu1 %v4726_v12  ;;  %v1002_v31 = vld [vmem:[%s7101_s5 + $0x950] sm:$0xff] }
 0x219   :  { %1748 = vmatprep.mubr.f32.mxu0 %v4736_v36  ;;  %1839 = vmatprep.subr.mxu1 %v793_v29  ;;  %v771_v29 = vld [vmem:[%s7101_s5 + $0x218] sm:$0xff] }
 0x21a   :  { %1999 = vmatpush1.msra.mxu0 %v1023_v30  ;;  %1840 = vmatpush1.msra.mxu1 %v792_v25  ;;  %v996_v30 = vld [vmem:[%s7101_s5 + $0x920] sm:$0xff]  ;;  %v765_v25 = vld [vmem:[%s7101_s5 + $0x1e8] sm:$0xff] }
 0x21b   :  { %2000 = vmatprep.subr.mxu0 %v1017_v10  ;;  %1841 = vmatprep.subr.mxu1 %v786_v17  ;;  %v995_v10 = vld [vmem:[%s7101_s5 + $0x918] sm:$0xff]  ;;  %v764_v17 = vld [vmem:[%s7101_s5 + $0x1e0] sm:$0xff] }
 0x21c   :  { %2001 = vmatpush1.msra.mxu0 %v1016_v4  ;;  %1588 = vmatmul.mubr.f32.gmra.mxu1 %v4750_v34  ;;  %v989_v4 = vld [vmem:[%s7101_s5 + $0x8e8] sm:$0xff] }
 0x21d   :  { %1749 = vmatmul.mubr.f32.gmra.mxu0 %v4756_v37  ;;  %1842 = vmatpush1.msra.mxu1 %v785_v54  ;;  %v758_v54 = vld [vmem:[%s7101_s5 + $0x1b0] sm:$0xff] }
 0x21e   :  { %2002 = vmatprep.subr.mxu0 %v1010_v27  ;;  %1593 = vmatprep.mubr.f32.mxu1 %v4766_v47  ;;  %v988_v27 = vld [vmem:[%s7101_s5 + $0x8e0] sm:$0xff] }
 0x21f   :  { %1754 = vmatprep.mubr.f32.mxu0 %v4776_v51  ;;  %1843 = vmatprep.subr.mxu1 %v779_v40  ;;  %v757_v40 = vld [vmem:[%s7101_s5 + $0x1a8] sm:$0xff] }
 0x220   :  { %2003 = vmatpush1.msra.mxu0 %v1009_v28  ;;  %1844 = vmatpush1.msra.mxu1 %v778_v52  ;;  %v982_v28 = vld [vmem:[%s7101_s5 + $0x8b0] sm:$0xff]  ;;  %v751_v52 = vld [vmem:[%s7101_s5 + $0x178] sm:$0xff] }
 0x221   :  { %2004 = vmatprep.subr.mxu0 %v1003_v58  ;;  %1845 = vmatprep.subr.mxu1 %v772_v0  ;;  %v981_v58 = vld [vmem:[%s7101_s5 + $0x8a8] sm:$0xff]  ;;  %v750_v0 = vld [vmem:[%s7101_s5 + $0x170] sm:$0xff] }
 0x222   :  { %2005 = vmatpush1.msra.mxu0 %v1002_v31  ;;  %1594 = vmatmul.mubr.f32.gmra.mxu1 %v4790_v63  ;;  %v975_v31 = vld [vmem:[%s7101_s5 + $0x878] sm:$0xff] }
 0x223   :  { %1755 = vmatmul.mubr.f32.gmra.mxu0 %v4796_v1  ;;  %1846 = vmatpush1.msra.mxu1 %v771_v29  ;;  %v744_v29 = vld [vmem:[%s7101_s5 + $0x140] sm:$0xff] }
 0x224   :  { %2006 = vmatprep.subr.mxu0 %v996_v30  ;;  %1599 = vmatprep.mubr.f32.mxu1 %v4810_v9  ;;  %v974_v30 = vld [vmem:[%s7101_s5 + $0x870] sm:$0xff] }
 0x225   :  { %1760 = vmatprep.mubr.f32.mxu0 %v4820_v14  ;;  %1847 = vmatprep.subr.mxu1 %v765_v25  ;;  %v743_v25 = vld [vmem:[%s7101_s5 + $0x138] sm:$0xff] }
 0x226   :  { %2007 = vmatpush1.msra.mxu0 %v995_v10  ;;  %1848 = vmatpush1.msra.mxu1 %v764_v17  ;;  %v968_v10 = vld [vmem:[%s7101_s5 + $0x840] sm:$0xff]  ;;  %v737_v17 = vld [vmem:[%s7101_s5 + $0x108] sm:$0xff] }
 0x227   :  { %2008 = vmatprep.subr.mxu0 %v989_v4  ;;  %1849 = vmatprep.subr.mxu1 %v758_v54  ;;  %v967_v4 = vld [vmem:[%s7101_s5 + $0x838] sm:$0xff]  ;;  %v736_v54 = vld [vmem:[%s7101_s5 + $0x100] sm:$0xff] }
 0x228   :  { %2009 = vmatpush1.msra.mxu0 %v988_v27  ;;  %1600 = vmatmul.mubr.f32.gmra.mxu1 %v4838_v33  ;;  %v961_v27 = vld [vmem:[%s7101_s5 + $0x808] sm:$0xff] }
 0x229   :  { %1761 = vmatmul.mubr.f32.gmra.mxu0 %v4844_v38  ;;  %1850 = vmatpush1.msra.mxu1 %v757_v40  ;;  %v730_v40 = vld [vmem:[%s7101_s5 + $0xd0] sm:$0xff] }
 0x22a   :  { %2010 = vmatprep.subr.mxu0 %v982_v28  ;;  %1605 = vmatprep.mubr.f32.mxu1 %v4854_v49  ;;  %v960_v28 = vld [vmem:[%s7101_s5 + $0x800] sm:$0xff] }
 0x22b   :  { %1766 = vmatprep.mubr.f32.mxu0 %v4864_v56  ;;  %1851 = vmatprep.subr.mxu1 %v751_v52  ;;  %v729_v52 = vld [vmem:[%s7101_s5 + $0xc8] sm:$0xff] }
 0x22c   :  { %2011 = vmatpush1.msra.mxu0 %v981_v58  ;;  %1852 = vmatpush1.msra.mxu1 %v750_v0  ;;  %v954_v58 = vld [vmem:[%s7101_s5 + $0x7d0] sm:$0xff]  ;;  %v723_v0 = vld [vmem:[%s7101_s5 + $0x98] sm:$0xff] }
 0x22d   :  { %2012 = vmatprep.subr.mxu0 %v975_v31  ;;  %1853 = vmatprep.subr.mxu1 %v744_v29  ;;  %v953_v31 = vld [vmem:[%s7101_s5 + $0x7c8] sm:$0xff]  ;;  %v722_v29 = vld [vmem:[%s7101_s5 + $0x90] sm:$0xff] }
 0x22e   :  { %2013 = vmatpush1.msra.mxu0 %v974_v30  ;;  %1606 = vmatmul.mubr.f32.gmra.mxu1 %v4882_v8  ;;  %v947_v30 = vld [vmem:[%s7101_s5 + $0x798] sm:$0xff] }
 0x22f   :  { %1767 = vmatmul.mubr.f32.gmra.mxu0 %v4888_v11  ;;  %1854 = vmatpush1.msra.mxu1 %v743_v25  ;;  %v716_v25 = vld [vmem:[%s7101_s5 + $0x60] sm:$0xff] }
 0x230   :  { %2014 = vmatprep.subr.mxu0 %v968_v10  ;;  %1611 = vmatprep.mubr.f32.mxu1 %v4903_v19  ;;  %v946_v10 = vld [vmem:[%s7101_s5 + $0x790] sm:$0xff] }
 0x231   :  { %1772 = vmatprep.mubr.f32.mxu0 %v4914_v39  ;;  %1855 = vmatprep.subr.mxu1 %v737_v17  ;;  %v715_v17 = vld [vmem:[%s7101_s5 + $0x58] sm:$0xff] }
 0x232   :  { %2015 = vmatpush1.msra.mxu0 %v967_v4  ;;  %1856 = vmatpush1.msra.mxu1 %v736_v54  ;;  %v940_v4 = vld [vmem:[%s7101_s5 + $0x760] sm:$0xff]  ;;  %v709_v54 = vld [vmem:[%s7101_s5 + $0x28] sm:$0xff] }
 0x233   :  { %2016 = vmatprep.subr.mxu0 %v961_v27  ;;  %1857 = vmatprep.subr.mxu1 %v730_v40  ;;  %v939_v27 = vld [vmem:[%s7101_s5 + $0x758] sm:$0xff]  ;;  %v708_v40 = vld [vmem:[%s7101_s5 + $0x20] sm:$0xff] }
 0x234   :  { %2017 = vmatpush1.msra.mxu0 %v960_v28  ;;  %1612 = vmatmul.mubr.f32.gmra.mxu1 %v4934_v59  ;;  %v933_v28 = vld [vmem:[%s7101_s5 + $0x728] sm:$0xff] }
 0x235   :  { %1773 = vmatmul.mubr.f32.gmra.mxu0 %v4942_v62  ;;  %1858 = vmatpush1.msra.mxu1 %v729_v52  ;;  %v926_v52 = vld [vmem:[%s7101_s5 + $0x6f0] sm:$0xff] }
 0x236   :  { %2018 = vmatprep.subr.mxu0 %v954_v58  ;;  %1617 = vmatprep.mubr.f32.mxu1 %v4953_v13  ;;  %v932_v58 = vld [vmem:[%s7101_s5 + $0x720] sm:$0xff] }
 0x237   :  { %1778 = vmatprep.mubr.f32.mxu0 %v4964_v20  ;;  %1859 = vmatprep.subr.mxu1 %v723_v0  ;;  %v925_v0 = vld [vmem:[%s7101_s5 + $0x6e8] sm:$0xff] }
 0x238   :  { %2019 = vmatpush1.msra.mxu0 %v953_v31  ;;  %1860 = vmatpush1.msra.mxu1 %v722_v29  ;;  %v1150_v31 = vld [vmem:[%s7101_s5 + $0xdf0] sm:$0xff]  ;;  %v919_v29 = vld [vmem:[%s7101_s5 + $0x6b8] sm:$0xff] }
 0x239   :  { %2020 = vmatprep.subr.mxu0 %v947_v30  ;;  %1861 = vmatprep.subr.mxu1 %v716_v25  ;;  %v1149_v30 = vld [vmem:[%s7101_s5 + $0xde8] sm:$0xff]  ;;  %v918_v25 = vld [vmem:[%s7101_s5 + $0x6b0] sm:$0xff] }
 0x23a   :  { %2021 = vmatpush1.msra.mxu0 %v946_v10  ;;  %1618 = vmatmul.mubr.f32.gmra.mxu1 %v4982_v55  ;;  %v7182_v10 = vld [vmem:[#allocation6_spill] sm:$0xff] }
 0x23b   :  { %1779 = vmatmul.mubr.f32.gmra.mxu0 %v4988_v41  ;;  %1862 = vmatpush1.msra.mxu1 %v715_v17  ;;  %v1143_v17 = vld [vmem:[%s7101_s5 + $0xdb8] sm:$0xff] }
 0x23c   :  { %2022 = vmatprep.subr.mxu0 %v940_v4  ;;  %1623 = vmatprep.mubr.f32.mxu1 %v5001_v15  ;;  %v912_v4 = vld [vmem:[%s7101_s5 + $0x680] sm:$0xff] }
 0x23d   :  { %1784 = vmatprep.mubr.f32.mxu0 %v5014_v23  ;;  %1863 = vmatprep.subr.mxu1 %v709_v54  ;;  %v7183_v54 = vld [vmem:[#allocation7_spill] sm:$0xff] }
 0x23e   :  { %2023 = vmatpush1.msra.mxu0 %v939_v27  ;;  %1864 = vmatpush1.msra.mxu1 %v708_v40  ;;  %v1142_v27 = vld [vmem:[%s7101_s5 + $0xdb0] sm:$0xff]  ;;  %v911_v40 = vld [vmem:[%s7101_s5 + $0x678] sm:$0xff] }
 0x23f   :  { %2024 = vmatprep.subr.mxu0 %v933_v28  ;;  %1865 = vmatprep.subr.mxu1 %v926_v52  ;;  %v1136_v28 = vld [vmem:[%s7101_s5 + $0xd80] sm:$0xff]  ;;  %v905_v52 = vld [vmem:[%s7101_s5 + $0x648] sm:$0xff] }
 0x240   :  { %2025 = vmatpush1.msra.mxu0 %v932_v58  ;;  %1624 = vmatmul.mubr.f32.gmra.mxu1 %v5030_v26  ;;  %v7184_v58 = vld [vmem:[#allocation8_spill] sm:$0xff] }
 0x241   :  { %1785 = vmatmul.mubr.f32.gmra.mxu0 %v5036_v42  ;;  %1866 = vmatpush2.msra.mxu1 %v925_v0  ;;  %v1135_v0 = vld [vmem:[%s7101_s5 + $0xd78] sm:$0xff] }
 0x242   :  { %2026 = vmatprep.subr.mxu0 %v1150_v31  ;;  %1629 = vmatprep.mubr.f32.mxu1 %v7182_v10  ;;  %v904_v31 = vld [vmem:[%s7101_s5 + $0x640] sm:$0xff] }
 0x243   :  { %1790 = vmatprep.mubr.f32.mxu0 %v7183_v54  ;;  %1867 = vmatprep.subr.mxu1 %v919_v29  ;;  %v7185_v29 = vld [vmem:[#allocation9_spill] sm:$0xff] }
 0x244   :  { %2027 = vmatpush2.msra.mxu0 %v1149_v30  ;;  %1868 = vmatpush2.msra.mxu1 %v918_v25  ;;  %v1129_v30 = vld [vmem:[%s7101_s5 + $0xd48] sm:$0xff]  ;;  %v898_v25 = vld [vmem:[%s7101_s5 + $0x610] sm:$0xff] }
 0x245   :  { %2028 = vmatprep.subr.mxu0 %v1143_v17  ;;  %1869 = vmatprep.subr.mxu1 %v912_v4  ;;  %v7186_v17 = vld [vmem:[#allocation10_spill] sm:$0xff] }
 0x246   :  { %2029 = vmatpush2.msra.mxu0 %v1142_v27  ;;  %1630 = vmatmul.mubr.f32.gmra.mxu1 %v5078_v48  ;;  %v1128_v4 = vld [vmem:[%s7101_s5 + $0xd40] sm:$0xff]  ;;  %v897_v27 = vld [vmem:[%s7101_s5 + $0x608] sm:$0xff] }
 0x247   :  { %1791 = vmatmul.mubr.f32.gmra.mxu0 %v7184_v58  ;;  %1870 = vmatpush2.msra.mxu1 %v911_v40  ;;  %v1122_v40 = vld [vmem:[%s7101_s5 + $0xd10] sm:$0xff] }
 0x248   :  { %2030 = vmatprep.subr.mxu0 %v1136_v28  ;;  %1635 = vmatprep.mubr.f32.mxu1 %v7185_v29  ;;  %v7187_v28 = vld [vmem:[#allocation11_spill] sm:$0xff] }
 0x249   :  { %1796 = vmatprep.mubr.f32.mxu0 %v7186_v17  ;;  %1871 = vmatprep.subr.mxu1 %v905_v52  ;;  %v891_v52 = vld [vmem:[%s7101_s5 + $0x5d8] sm:$0xff] }
 0x24a   :  { %2031 = vmatpush2.msra.mxu0 %v1135_v0  ;;  %1872 = vmatpush2.msra.mxu1 %v904_v31  ;;  %v1121_v0 = vld [vmem:[%s7101_s5 + $0xd08] sm:$0xff]  ;;  %v890_v31 = vld [vmem:[%s7101_s5 + $0x5d0] sm:$0xff] }
 0x24b   :  { %2032 = vmatprep.subr.mxu0 %v1129_v30  ;;  %1873 = vmatprep.subr.mxu1 %v898_v25  ;;  %v7188_v30 = vld [vmem:[#allocation13_spill] sm:$0xff] }
 0x24c   :  { %2033 = vmatpush2.msra.mxu0 %v1128_v4  ;;  %1636 = vmatmul.mubr.f32.gmra.mxu1 %v7187_v28  ;;  %v1115_v25 = vld [vmem:[%s7101_s5 + $0xcd8] sm:$0xff]  ;;  %v884_v4 = vld [vmem:[%s7101_s5 + $0x5a0] sm:$0xff] }
 0x24d   :  { %1797 = vmatmul.mubr.f32.gmra.mxu0 %v5130_v18  ;;  %1874 = vmatpush2.msra.mxu1 %v897_v27  ;;  %v7189_v27 = vld [vmem:[#allocation14_spill] sm:$0xff]  ;;  %v1114_v18 = vld [vmem:[%s7101_s5 + $0xcd0] sm:$0xff] }
 0x24e   :  { %2034 = vmatprep.subr.mxu0 %v1122_v40  ;;  %1641 = vmatprep.mubr.f32.mxu1 %v7188_v30  ;;  %v883_v40 = vld [vmem:[%s7101_s5 + $0x598] sm:$0xff]  ;;  %v1108_v30 = vld [vmem:[%s7101_s5 + $0xca0] sm:$0xff] }
 0x24f   :  { %1802 = vmatprep.mubr.f32.mxu0 %v7189_v27  ;;  %1875 = vmatprep.subr.mxu1 %v891_v52  ;;  %v877_v52 = vld [vmem:[%s7101_s5 + $0x568] sm:$0xff]  ;;  %v7190_v27 = vld [vmem:[#allocation16_spill] sm:$0xff] }
 0x250   :  { %2035 = vmatpush2.msra.mxu0 %v1121_v0  ;;  %1876 = vmatpush2.msra.mxu1 %v890_v31  ;;  %v1107_v0 = vld [vmem:[%s7101_s5 + $0xc98] sm:$0xff]  ;;  %v876_v31 = vld [vmem:[%s7101_s5 + $0x560] sm:$0xff] }
 0x251   :  { %2036 = vmatprep.subr.mxu0 %v1115_v25  ;;  %1877 = vmatprep.subr.mxu1 %v884_v4  ;;  %v7191_v25 = vld [vmem:[#allocation17_spill] sm:$0xff]  ;;  %v870_v4 = vld [vmem:[%s7101_s5 + $0x530] sm:$0xff] }
 0x252   :  { %2037 = vmatpush2.msra.mxu0 %v1114_v18  ;;  %1642 = vmatmul.mubr.f32.gmra.mxu1 %v5166_v3  ;;  %v1101_v18 = vld [vmem:[%s7101_s5 + $0xc68] sm:$0xff] }
 0x253   :  { %1803 = vmatmul.mubr.f32.gmra.mxu0 %v7190_v27  ;;  %1878 = vmatpush2.msra.mxu1 %v883_v40  ;;  %v7192_v40 = vld [vmem:[#allocation18_spill] sm:$0xff]  ;;  %v7193_v3 = vld [vmem:[#allocation19_spill] sm:$0xff] }
 0x254   :  { %2038 = vmatprep.subr.mxu0 %v1108_v30  ;;  %1647 = vmatprep.mubr.f32.mxu1 %v7191_v25  ;;  %v1100_v27 = vld [vmem:[%s7101_s5 + $0xc60] sm:$0xff]  ;;  %v869_v30 = vld [vmem:[%s7101_s5 + $0x528] sm:$0xff]  ;;  %v1094_v25 = vld [vmem:[%s7101_s5 + $0xc30] sm:$0xff] }
 0x255   :  { %1808 = vmatprep.mubr.f32.mxu0 %v7192_v40  ;;  %1879 = vmatprep.subr.mxu1 %v877_v52  ;;  %v863_v52 = vld [vmem:[%s7101_s5 + $0x4f8] sm:$0xff] }
 0x256   :  { %2039 = vmatpush2.msra.mxu0 %v1107_v0  ;;  %1880 = vmatpush2.msra.mxu1 %v876_v31  ;;  %v1093_v0 = vld [vmem:[%s7101_s5 + $0xc28] sm:$0xff]  ;;  %v862_v31 = vld [vmem:[%s7101_s5 + $0x4f0] sm:$0xff] }
 0x257   :  { %2040 = vmatprep.subr.mxu0 %v1101_v18  ;;  %1881 = vmatprep.subr.mxu1 %v870_v4  ;;  %v7194_v18 = vld [vmem:[#allocation21_spill] sm:$0xff]  ;;  %v856_v4 = vld [vmem:[%s7101_s5 + $0x4c0] sm:$0xff] }
 0x258   :  { %2041 = vmatpush2.msra.mxu0 %v1100_v27  ;;  %1648 = vmatmul.mubr.f32.gmra.mxu1 %v7193_v3  ;;  %v1087_v27 = vld [vmem:[%s7101_s5 + $0xbf8] sm:$0xff] }
 0x259   :  { %1809 = vmatmul.mubr.f32.gmra.mxu0 %v5218_v57  ;;  %1882 = vmatpush2.msra.mxu1 %v869_v30  ;;  %v7195_v30 = vld [vmem:[#allocation22_spill] sm:$0xff]  ;;  %v1086_v57 = vld [vmem:[%s7101_s5 + $0xbf0] sm:$0xff] }
 0x25a   :  { %2042 = vmatprep.subr.mxu0 %v1094_v25  ;;  %1653 = vmatprep.mubr.f32.mxu1 %v7194_v18  ;;  %v855_v25 = vld [vmem:[%s7101_s5 + $0x4b8] sm:$0xff]  ;;  %v1080_v18 = vld [vmem:[%s7101_s5 + $0xbc0] sm:$0xff] }
 0x25b   :  { %1814 = vmatprep.mubr.f32.mxu0 %v7195_v30  ;;  %1883 = vmatprep.subr.mxu1 %v863_v52  ;;  %v849_v52 = vld [vmem:[%s7101_s5 + $0x488] sm:$0xff] }
 0x25c   :  { %2043 = vmatpush2.msra.mxu0 %v1093_v0  ;;  %1884 = vmatpush2.msra.mxu1 %v862_v31  ;;  %v1079_v0 = vld [vmem:[%s7101_s5 + $0xbb8] sm:$0xff]  ;;  %v848_v31 = vld [vmem:[%s7101_s5 + $0x480] sm:$0xff] }
 0x25d   :  { %2044 = vmatprep.subr.mxu0 %v1087_v27  ;;  %1885 = vmatprep.subr.mxu1 %v856_v4  ;;  %v842_v27 = vld [vmem:[%s7101_s5 + $0x450] sm:$0xff]  ;;  %v1072_v4 = vld [vmem:[%s7101_s5 + $0xb80] sm:$0xff] }
 0x25e   :  { %2045 = vmatpush2.msra.mxu0 %v1086_v57  ;;  %1654 = vmatmul.mubr.f32.gmra.mxu1 %v5254_v53  ;;  %v1073_v57 = vld [vmem:[%s7101_s5 + $0xb88] sm:$0xff] }
 0x25f   :  { %1815 = vmatmul.mubr.f32.gmra.mxu0 %v5260_v16  ;;  %1886 = vmatpush2.msra.mxu1 %v855_v25  ;;  %v1066_v25 = vld [vmem:[%s7101_s5 + $0xb50] sm:$0xff] }
 0x260   :  { %2046 = vmatprep.subr.mxu0 %v1080_v18  ;;  %1659 = vmatprep.mubr.f32.mxu1 %v5271_v5  ;;  %v841_v18 = vld [vmem:[%s7101_s5 + $0x448] sm:$0xff] }
 0x261   :  { %1820 = vmatprep.mubr.f32.mxu0 %v5282_v7  ;;  %1887 = vmatprep.subr.mxu1 %v849_v52  ;;  %v835_v52 = vld [vmem:[%s7101_s5 + $0x418] sm:$0xff] }
 0x262   :  { %2047 = vmatpush2.msra.mxu0 %v1079_v0  ;;  %1888 = vmatpush2.msra.mxu1 %v848_v31  ;;  %v1065_v0 = vld [vmem:[%s7101_s5 + $0xb48] sm:$0xff]  ;;  %v834_v31 = vld [vmem:[%s7101_s5 + $0x410] sm:$0xff] }
 0x263   :  { %2048 = vmatprep.subr.mxu0 %v1073_v57  ;;  %1889 = vmatprep.subr.mxu1 %v842_v27  ;;  %v1059_v57 = vld [vmem:[%s7101_s5 + $0xb18] sm:$0xff]  ;;  %v828_v27 = vld [vmem:[%s7101_s5 + $0x3e0] sm:$0xff] }
 0x264   :  { %2049 = vmatpush2.msra.mxu0 %v1072_v4  ;;  %1660 = vmatmul.mubr.f32.gmra.mxu1 %v5296_v50  ;;  %v1058_v4 = vld [vmem:[%s7101_s5 + $0xb10] sm:$0xff] }
 0x265   :  { %1821 = vmatmul.mubr.f32.gmra.mxu0 %v5302_v21  ;;  %1890 = vmatpush2.msra.mxu1 %v841_v18  ;;  %v827_v18 = vld [vmem:[%s7101_s5 + $0x3d8] sm:$0xff] }
 0x266   :  { %2050 = vmatprep.subr.mxu0 %v1066_v25  ;;  %1665 = vmatprep.mubr.f32.mxu1 %v5312_v32  ;;  %v1052_v25 = vld [vmem:[%s7101_s5 + $0xae0] sm:$0xff] }
 0x267   :  { %1826 = vmatprep.mubr.f32.mxu0 %v5322_v35  ;;  %1891 = vmatprep.subr.mxu1 %v835_v52  ;;  %v821_v52 = vld [vmem:[%s7101_s5 + $0x3a8] sm:$0xff] }
 0x268   :  { %2051 = vmatpush2.msra.mxu0 %v1065_v0  ;;  %1892 = vmatpush2.msra.mxu1 %v834_v31  ;;  %v1051_v0 = vld [vmem:[%s7101_s5 + $0xad8] sm:$0xff]  ;;  %v820_v31 = vld [vmem:[%s7101_s5 + $0x3a0] sm:$0xff] }
 0x269   :  { %2052 = vmatprep.subr.mxu0 %v1059_v57  ;;  %1893 = vmatprep.subr.mxu1 %v828_v27  ;;  %v5808_v57 = vld [vmem:[%s7104_s6] sm:$0xff]  ;;  %v1045_v27 = vld [vmem:[%s7101_s5 + $0xaa8] sm:$0xff] }
 0x26a   :  { %2053 = vmatpush2.msra.mxu0 %v1058_v4  ;;  %1666 = vmatmul.mubr.f32.gmra.mxu1 %v5334_v22  ;;  %7196 = vst [vmem:[#allocation6_spill] sm:$0xff] %v5808_v57  ;;  %v927_v4 = vld [vmem:[%s7101_s5 + $0x6f8] sm:$0xff] }
 0x26b   :  { %1827 = vmatmul.mubr.f32.gmra.mxu0 %v5340_v24  ;;  %1894 = vmatpush2.msra.mxu1 %v827_v18  ;;  %v1044_v18 = vld [vmem:[%s7101_s5 + $0xaa0] sm:$0xff] }
 0x26c   :  { %2054 = vmatprep.subr.mxu0 %v1052_v25  ;;  %1895 = vmatprep.subr.mxu1 %v821_v52  ;;  %v815_v25 = vld [vmem:[%s7101_s5 + $0x378] sm:$0xff]  ;;  %v7197_v52 = vld [vmem:[#allocation2_spill] sm:$0xff] }
 0x26d   :  { %1897 = vmatprep.mubr.f32.mxu1 %v4667_v43  ;;  %2055 = vmatpush2.msra.mxu0 %v1051_v0  ;;  %v7198_v24 = vsub.s32 0, %v7197_v52  ;;  %v1151_v0 = vld [vmem:[%s7101_s5 + $0xdf8] sm:$0xff] }
 0x26e   :  { %2058 = vmatprep.mubr.f32.mxu0 %v4669_v44  ;;  %1896 = vmatpush2.msra.mxu1 %v820_v31  ;;  %v920_v31 = vld [vmem:[%s7101_s5 + $0x6c0] sm:$0xff] }
 0x26f   :  { %v5827_v22 = vrot.slane %v5808_v57, %v7198_v24  ;;  %2056 = vmatprep.subr.mxu0 %v1045_v27  ;;  %3310 = vmatprep.subr.mxu1 %v927_v4  ;;  %v1039_v24 = vld [vmem:[%s7101_s5 + $0xa78] sm:$0xff] }
 0x270   :  { %2057 = vmatpush2.msra.mxu0 %v1044_v18  ;;  %1898 = vmatmul.mubr.f32.vlgmr.msra.gmra.mxu1 %v4671_v45  ;;  %v808_v18 = vld [vmem:[%s7101_s5 + $0x340] sm:$0xff] }
 0x271   :  { %2059 = vmatmul.mubr.f32.vlgmr.msra.gmra.mxu0 %v4673_v46  ;;  %3311 = vmatpush3.msra.mxu1 %v815_v25  ;;  %v1255_v27 = vpop.f32.mrf.mxu1  ;;  %v1416_v4 = vpop.f32.mrf.mxu0 }
 0x272   :  { %1903 = vmatprep.mubr.f32.mxu1 %v4698_v60  ;;  %2064 = vmatprep.mubr.f32.mxu0 %v4700_v61  ;;  %v1256_v57 = vadd.f32 %v1255_v27, %v5827_v22  ;;  %v1144_v60 = vld [vmem:[%s7101_s5 + $0xdc0] sm:$0xff]  ;;  %v913_v61 = vld [vmem:[%s7101_s5 + $0x688] sm:$0xff] }
 0x273   :  { %3390 = vmatprep.subr.mxu0 %v1151_v0  ;;  %3312 = vmatprep.subr.mxu1 %v920_v31  ;;  %v5846_v52 = vpop.f32.mrf.mxu1  ;;  %v5848_v25 = vpop.f32.mrf.mxu0  ;;  %v1032_v0 = vld [vmem:[%s7101_s5 + $0xa40] sm:$0xff]  ;;  %v801_v31 = vld [vmem:[%s7101_s5 + $0x308] sm:$0xff] }
 0x274   :  { %7199 = vst [vmem:[#allocation7_spill] sm:$0xff] %v5846_v52  ;;  %7200 = vst [vmem:[#allocation8_spill] sm:$0xff] %v5848_v25  ;;  %3391 = vmatpush3.msra.mxu0 %v1039_v24  ;;  %1904 = vmatmul.mubr.f32.gmra.mxu1 %v4708_v2  ;;  %v5857_v46 = vadd.f32 %v1416_v4, %v1256_v57  ;;  %v1137_v4 = vld [vmem:[%s7101_s5 + $0xd88] sm:$0xff]  ;;  %v892_v25 = vld [vmem:[%s7101_s5 + $0x5e0] sm:$0xff] }
 0x275   :  { %2065 = vmatmul.mubr.f32.gmra.mxu0 %v4716_v6  ;;  %3313 = vmatpush3.msra.mxu1 %v808_v18  ;;  %v906_v18 = vld [vmem:[%s7101_s5 + $0x650] sm:$0xff] }
 0x276   :  { %7201 = vst [vmem:[#allocation9_spill] sm:$0xff] %v5857_v46  ;;  %1909 = vmatprep.mubr.f32.mxu1 %v4726_v12  ;;  %2070 = vmatprep.mubr.f32.mxu0 %v4736_v36  ;;  %v1261_v24 = vpop.f32.mrf.mxu1  ;;  %v7220_v52 = vld [vmem:[#allocation12_spill] sm:$0xff] }
 0x277   :  { %3392 = vmatprep.subr.mxu0 %v1144_v60  ;;  %3314 = vmatprep.subr.mxu1 %v913_v61  ;;  %v1262_v57 = vadd.f32 %v1261_v24, %v5827_v22  ;;  %v1422_v27 = vpop.f32.mrf.mxu0  ;;  %v1025_v60 = vld [vmem:[%s7101_s5 + $0xa08] sm:$0xff]  ;;  %v794_v24 = vld [vmem:[%s7101_s5 + $0x2d0] sm:$0xff] }
 0x278   :  { %3393 = vmatpush3.msra.mxu0 %v1032_v0  ;;  %1910 = vmatmul.mubr.f32.gmra.mxu1 %v4750_v34  ;;  %v5876_v46 = vpop.f32.mrf.mxu1 }
 0x279   :  { %7202 = vst [vmem:[#allocation10_spill] sm:$0xff] %v5876_v46  ;;  %2071 = vmatmul.mubr.f32.gmra.mxu0 %v4756_v37  ;;  %3315 = vmatpush3.msra.mxu1 %v801_v31  ;;  %v5882_v61 = vadd.f32 %v1422_v27, %v1262_v57  ;;  %v5884_v0 = vpop.f32.mrf.mxu0  ;;  %v1130_v31 = vld [vmem:[%s7101_s5 + $0xd50] sm:$0xff]  ;;  %v899_v57 = vld [vmem:[%s7101_s5 + $0x618] sm:$0xff] }
 0x27a   :  { %7204 = vst [vmem:[#allocation18_spill] sm:$0xff] %v5884_v0  ;;  %1915 = vmatprep.mubr.f32.mxu1 %v4766_v47  ;;  %2076 = vmatprep.mubr.f32.mxu0 %v4776_v51 }
 0x27b   :  { %7203 = vst [vmem:[#allocation11_spill] sm:$0xff] %v5882_v61  ;;  %3394 = vmatprep.subr.mxu0 %v1137_v4  ;;  %3316 = vmatprep.subr.mxu1 %v906_v18  ;;  %v1018_v4 = vld [vmem:[%s7101_s5 + $0x9d0] sm:$0xff]  ;;  %v787_v61 = vld [vmem:[%s7101_s5 + $0x298] sm:$0xff] }
 0x27c   :  { %3395 = vmatpush3.msra.mxu0 %v1025_v60  ;;  %1916 = vmatmul.mubr.f32.gmra.mxu1 %v4790_v63  ;;  %v1267_v27 = vpop.f32.mrf.mxu1 }
 0x27d   :  { %2077 = vmatmul.mubr.f32.gmra.mxu0 %v4796_v1  ;;  %3317 = vmatpush3.msra.mxu1 %v794_v24  ;;  %v1268_v18 = vadd.f32 %v1267_v27, %v5827_v22  ;;  %v1428_v60 = vpop.f32.mrf.mxu0  ;;  %v1123_v27 = vld [vmem:[%s7101_s5 + $0xd18] sm:$0xff] }
 0x27e   :  { %1921 = vmatprep.mubr.f32.mxu1 %v4810_v9  ;;  %2082 = vmatprep.mubr.f32.mxu0 %v4820_v14  ;;  %v5908_v0 = vpop.f32.mrf.mxu1 }
 0x27f   :  { %7205 = vst [vmem:[#allocation25_spill] sm:$0xff] %v5908_v0  ;;  %3396 = vmatprep.subr.mxu0 %v1130_v31  ;;  %3318 = vmatprep.subr.mxu1 %v899_v57  ;;  %v5910_v24 = vadd.f32 %v1428_v60, %v1268_v18  ;;  %v5912_v46 = vpop.f32.mrf.mxu0  ;;  %v1011_v31 = vld [vmem:[%s7101_s5 + $0x998] sm:$0xff]  ;;  %v780_v57 = vld [vmem:[%s7101_s5 + $0x260] sm:$0xff] }
 0x280   :  { %7207 = vst [vmem:[#allocation27_spill] sm:$0xff] %v5912_v46  ;;  %3397 = vmatpush3.msra.mxu0 %v1018_v4  ;;  %1922 = vmatmul.mubr.f32.gmra.mxu1 %v4838_v33  ;;  %v871_v0 = vld [vmem:[%s7101_s5 + $0x538] sm:$0xff] }
 0x281   :  { %7206 = vst [vmem:[#allocation26_spill] sm:$0xff] %v5910_v24  ;;  %2083 = vmatmul.mubr.f32.gmra.mxu0 %v4844_v38  ;;  %3319 = vmatpush3.msra.mxu1 %v787_v61  ;;  %v1116_v61 = vld [vmem:[%s7101_s5 + $0xce0] sm:$0xff]  ;;  %v885_v24 = vld [vmem:[%s7101_s5 + $0x5a8] sm:$0xff] }
 0x282   :  { %1927 = vmatprep.mubr.f32.mxu1 %v4854_v49  ;;  %2088 = vmatprep.mubr.f32.mxu0 %v4864_v56  ;;  %v1273_v4 = vpop.f32.mrf.mxu1 }
 0x283   :  { %3398 = vmatprep.subr.mxu0 %v1123_v27  ;;  %3320 = vmatprep.subr.mxu1 %v892_v25  ;;  %v1274_v18 = vadd.f32 %v1273_v4, %v5827_v22  ;;  %v1434_v60 = vpop.f32.mrf.mxu0  ;;  %v1004_v25 = vld [vmem:[%s7101_s5 + $0x960] sm:$0xff]  ;;  %v773_v4 = vld [vmem:[%s7101_s5 + $0x228] sm:$0xff] }
 0x284   :  { %3399 = vmatpush3.msra.mxu0 %v1011_v31  ;;  %1928 = vmatmul.mubr.f32.gmra.mxu1 %v4882_v8  ;;  %v5938_v46 = vpop.f32.mrf.mxu1 }
 0x285   :  { %7208 = vst [vmem:[#allocation28_spill] sm:$0xff] %v5938_v46  ;;  %2089 = vmatmul.mubr.f32.gmra.mxu0 %v4888_v11  ;;  %3321 = vmatpush3.msra.mxu1 %v780_v57  ;;  %v5944_v27 = vadd.f32 %v1434_v60, %v1274_v18  ;;  %v5946_v31 = vpop.f32.mrf.mxu0  ;;  %v1109_v57 = vld [vmem:[%s7101_s5 + $0xca8] sm:$0xff]  ;;  %v878_v18 = vld [vmem:[%s7101_s5 + $0x570] sm:$0xff] }
 0x286   :  { %7210 = vst [vmem:[#allocation30_spill] sm:$0xff] %v5946_v31  ;;  %1933 = vmatprep.mubr.f32.mxu1 %v4903_v19  ;;  %2094 = vmatprep.mubr.f32.mxu0 %v4914_v39 }
 0x287   :  { %7209 = vst [vmem:[#allocation29_spill] sm:$0xff] %v5944_v27  ;;  %3400 = vmatprep.subr.mxu0 %v1116_v61  ;;  %3322 = vmatprep.subr.mxu1 %v885_v24  ;;  %v997_v61 = vld [vmem:[%s7101_s5 + $0x928] sm:$0xff]  ;;  %v766_v27 = vld [vmem:[%s7101_s5 + $0x1f0] sm:$0xff] }
 0x288   :  { %3401 = vmatpush3.msra.mxu0 %v1004_v25  ;;  %1934 = vmatmul.mubr.f32.gmra.mxu1 %v4934_v59  ;;  %v1279_v60 = vpop.f32.mrf.mxu1 }
 0x289   :  { %2095 = vmatmul.mubr.f32.gmra.mxu0 %v4942_v62  ;;  %3323 = vmatpush3.msra.mxu1 %v773_v4  ;;  %v1280_v24 = vadd.f32 %v1279_v60, %v5827_v22  ;;  %v1440_v25 = vpop.f32.mrf.mxu0  ;;  %v1102_v60 = vld [vmem:[%s7101_s5 + $0xc70] sm:$0xff] }
 0x28a   :  { %1939 = vmatprep.mubr.f32.mxu1 %v4953_v13  ;;  %2100 = vmatprep.mubr.f32.mxu0 %v4964_v20  ;;  %v5970_v31 = vpop.f32.mrf.mxu1 }
 0x28b   :  { %7211 = vst [vmem:[#allocation31_spill] sm:$0xff] %v5970_v31  ;;  %3402 = vmatprep.subr.mxu0 %v1109_v57  ;;  %3324 = vmatprep.subr.mxu1 %v878_v18  ;;  %v5972_v4 = vadd.f32 %v1440_v25, %v1280_v24  ;;  %v5974_v46 = vpop.f32.mrf.mxu0  ;;  %v990_v57 = vld [vmem:[%s7101_s5 + $0x8f0] sm:$0xff]  ;;  %v759_v18 = vld [vmem:[%s7101_s5 + $0x1b8] sm:$0xff] }
 0x28c   :  { %7213 = vst [vmem:[#allocation33_spill] sm:$0xff] %v5974_v46  ;;  %3403 = vmatpush3.msra.mxu0 %v997_v61  ;;  %1940 = vmatmul.mubr.f32.gmra.mxu1 %v4982_v55  ;;  %v850_v31 = vld [vmem:[%s7101_s5 + $0x490] sm:$0xff] }
 0x28d   :  { %7212 = vst [vmem:[#allocation32_spill] sm:$0xff] %v5972_v4  ;;  %2101 = vmatmul.mubr.f32.gmra.mxu0 %v4988_v41  ;;  %3325 = vmatpush3.msra.mxu1 %v766_v27  ;;  %v1095_v27 = vld [vmem:[%s7101_s5 + $0xc38] sm:$0xff]  ;;  %v864_v4 = vld [vmem:[%s7101_s5 + $0x500] sm:$0xff] }
 0x28e   :  { %1945 = vmatprep.mubr.f32.mxu1 %v5001_v15  ;;  %2106 = vmatprep.mubr.f32.mxu0 %v5014_v23  ;;  %v1285_v61 = vpop.f32.mrf.mxu1 }
 0x28f   :  { %3404 = vmatprep.subr.mxu0 %v1102_v60  ;;  %3326 = vmatprep.subr.mxu1 %v871_v0  ;;  %v1286_v24 = vadd.f32 %v1285_v61, %v5827_v22  ;;  %v1446_v25 = vpop.f32.mrf.mxu0  ;;  %v983_v0 = vld [vmem:[%s7101_s5 + $0x8b8] sm:$0xff]  ;;  %v752_v61 = vld [vmem:[%s7101_s5 + $0x180] sm:$0xff] }
 0x290   :  { %3405 = vmatpush3.msra.mxu0 %v990_v57  ;;  %1946 = vmatmul.mubr.f32.gmra.mxu1 %v5030_v26  ;;  %v6000_v46 = vpop.f32.mrf.mxu1 }
 0x291   :  { %7214 = vst [vmem:[#allocation34_spill] sm:$0xff] %v6000_v46  ;;  %2107 = vmatmul.mubr.f32.gmra.mxu0 %v5036_v42  ;;  %3327 = vmatpush3.msra.mxu1 %v759_v18  ;;  %v6006_v60 = vadd.f32 %v1446_v25, %v1286_v24  ;;  %v6008_v57 = vpop.f32.mrf.mxu0  ;;  %v1088_v18 = vld [vmem:[%s7101_s5 + $0xc00] sm:$0xff]  ;;  %v857_v24 = vld [vmem:[%s7101_s5 + $0x4c8] sm:$0xff] }
 0x292   :  { %7216 = vst [vmem:[#allocation36_spill] sm:$0xff] %v6008_v57  ;;  %1951 = vmatprep.mubr.f32.mxu1 %v7182_v10  ;;  %2112 = vmatprep.mubr.f32.mxu0 %v7183_v54 }
 0x293   :  { %7215 = vst [vmem:[#allocation35_spill] sm:$0xff] %v6006_v60  ;;  %3406 = vmatprep.subr.mxu0 %v1095_v27  ;;  %3328 = vmatprep.subr.mxu1 %v864_v4  ;;  %v976_v27 = vld [vmem:[%s7101_s5 + $0x880] sm:$0xff]  ;;  %v745_v60 = vld [vmem:[%s7101_s5 + $0x148] sm:$0xff] }
 0x294   :  { %3407 = vmatpush3.msra.mxu0 %v983_v0  ;;  %1952 = vmatmul.mubr.f32.gmra.mxu1 %v5078_v48  ;;  %v1291_v25 = vpop.f32.mrf.mxu1 }
 0x295   :  { %2113 = vmatmul.mubr.f32.gmra.mxu0 %v7184_v58  ;;  %3329 = vmatpush3.msra.mxu1 %v752_v61  ;;  %v1292_v4 = vadd.f32 %v1291_v25, %v5827_v22  ;;  %v1452_v0 = vpop.f32.mrf.mxu0  ;;  %v1081_v25 = vld [vmem:[%s7101_s5 + $0xbc8] sm:$0xff] }
 0x296   :  { %1957 = vmatprep.mubr.f32.mxu1 %v7185_v29  ;;  %2118 = vmatprep.mubr.f32.mxu0 %v7186_v17  ;;  %v6032_v57 = vpop.f32.mrf.mxu1 }
 0x297   :  { %7217 = vst [vmem:[#allocation37_spill] sm:$0xff] %v6032_v57  ;;  %3408 = vmatprep.subr.mxu0 %v1088_v18  ;;  %3330 = vmatprep.subr.mxu1 %v857_v24  ;;  %v6034_v61 = vadd.f32 %v1452_v0, %v1292_v4  ;;  %v6036_v46 = vpop.f32.mrf.mxu0  ;;  %v969_v18 = vld [vmem:[%s7101_s5 + $0x848] sm:$0xff]  ;;  %v7221_v24 = vld [vmem:[#allocation13_spill] sm:$0xff]  ;;  %v738_v4 = vld [vmem:[%s7101_s5 + $0x110] sm:$0xff] }
 0x298   :  { %7219 = vst [vmem:[#allocation39_spill] sm:$0xff] %v6036_v46  ;;  %3409 = vmatpush3.msra.mxu0 %v976_v27  ;;  %1958 = vmatmul.mubr.f32.gmra.mxu1 %v7187_v28  ;;  %v7222_v27 = vld [vmem:[#allocation14_spill] sm:$0xff]  ;;  %v1074_v57 = vld [vmem:[%s7101_s5 + $0xb90] sm:$0xff] }
 0x299   :  { %7218 = vst [vmem:[#allocation38_spill] sm:$0xff] %v6034_v61  ;;  %2119 = vmatmul.mubr.f32.gmra.mxu0 %v7220_v52  ;;  %3331 = vmatpush3.msra.mxu1 %v745_v60  ;;  %v7223_v60 = vld [vmem:[#allocation15_spill] sm:$0xff]  ;;  %v7225_v52 = vld [vmem:[#allocation16_spill] sm:$0xff] }
 0x29a   :  { %1963 = vmatprep.mubr.f32.mxu1 %v7221_v24  ;;  %2124 = vmatprep.mubr.f32.mxu0 %v7222_v27  ;;  %v1297_v0 = vpop.f32.mrf.mxu1  ;;  %v843_v27 = vld [vmem:[%s7101_s5 + $0x458] sm:$0xff] }
 0x29b   :  { %3410 = vmatprep.subr.mxu0 %v1081_v25  ;;  %3332 = vmatprep.subr.mxu1 %v850_v31  ;;  %v1298_v61 = vadd.f32 %v1297_v0, %v5827_v22  ;;  %v1458_v46 = vpop.f32.mrf.mxu0  ;;  %v962_v31 = vld [vmem:[%s7101_s5 + $0x810] sm:$0xff]  ;;  %v7228_v0 = vld [vmem:[#allocation17_spill] sm:$0xff] }
 0x29c   :  { %3411 = vmatpush3.msra.mxu0 %v969_v18  ;;  %1964 = vmatmul.mubr.f32.gmra.mxu1 %v7223_v60  ;;  %v6062_v24 = vpop.f32.mrf.mxu1  ;;  %v731_v60 = vld [vmem:[%s7101_s5 + $0xd8] sm:$0xff] }
 0x29d   :  { %7224 = vst [vmem:[#allocation40_spill] sm:$0xff] %v6062_v24  ;;  %2125 = vmatmul.mubr.f32.gmra.mxu0 %v7225_v52  ;;  %3333 = vmatpush3.msra.mxu1 %v738_v4  ;;  %v6068_v25 = vadd.f32 %v1458_v46, %v1298_v61  ;;  %v6070_v18 = vpop.f32.mrf.mxu0  ;;  %v1067_v46 = vld [vmem:[%s7101_s5 + $0xb58] sm:$0xff]  ;;  %v836_v61 = vld [vmem:[%s7101_s5 + $0x420] sm:$0xff] }
 0x29e   :  { %7227 = vst [vmem:[#allocation41_spill] sm:$0xff] %v6070_v18  ;;  %1969 = vmatprep.mubr.f32.mxu1 %v7228_v0  ;;  %2130 = vmatprep.mubr.f32.mxu0 %v7192_v40  ;;  %v7230_v18 = vld [vmem:[#allocation21_spill] sm:$0xff]  ;;  %v724_v24 = vld [vmem:[%s7101_s5 + $0xa0] sm:$0xff] }
 0x29f   :  { %7226 = vst [vmem:[#allocation16_spill] sm:$0xff] %v6068_v25  ;;  %3412 = vmatprep.subr.mxu0 %v1074_v57  ;;  %3334 = vmatprep.subr.mxu1 %v843_v27  ;;  %v7229_v25 = vld [vmem:[#allocation20_spill] sm:$0xff]  ;;  %v955_v57 = vld [vmem:[%s7101_s5 + $0x7d8] sm:$0xff] }
 0x2a0   :  { %3413 = vmatpush3.msra.mxu0 %v962_v31  ;;  %1970 = vmatmul.mubr.f32.gmra.mxu1 %v7193_v3  ;;  %v1303_v4 = vpop.f32.mrf.mxu1 }
 0x2a1   :  { %2131 = vmatmul.mubr.f32.gmra.mxu0 %v7229_v25  ;;  %3335 = vmatpush3.msra.mxu1 %v731_v60  ;;  %v1304_v27 = vadd.f32 %v1303_v4, %v5827_v22  ;;  %v1464_v31 = vpop.f32.mrf.mxu0  ;;  %v1060_v4 = vld [vmem:[%s7101_s5 + $0xb20] sm:$0xff] }
 0x2a2   :  { %1975 = vmatprep.mubr.f32.mxu1 %v7230_v18  ;;  %2136 = vmatprep.mubr.f32.mxu0 %v7195_v30  ;;  %v6094_v3 = vpop.f32.mrf.mxu1  ;;  %v829_v30 = vld [vmem:[%s7101_s5 + $0x3e8] sm:$0xff] }
 0x2a3   :  { %7231 = vst [vmem:[#allocation17_spill] sm:$0xff] %v6094_v3  ;;  %3414 = vmatprep.subr.mxu0 %v1067_v46  ;;  %3336 = vmatprep.subr.mxu1 %v836_v61  ;;  %v6096_v60 = vadd.f32 %v1464_v31, %v1304_v27  ;;  %v6098_v25 = vpop.f32.mrf.mxu0  ;;  %v948_v46 = vld [vmem:[%s7101_s5 + $0x7a0] sm:$0xff]  ;;  %v717_v61 = vld [vmem:[%s7101_s5 + $0x68] sm:$0xff]  ;;  %v2572_v3 = vld [vmem:[%s7105_s7 + $0x78] sm:$0xff] }
 0x2a4   :  { %7233 = vst [vmem:[#allocation42_spill] sm:$0xff] %v6098_v25  ;;  %3415 = vmatpush3.msra.mxu0 %v955_v57  ;;  %1976 = vmatmul.mubr.f32.gmra.mxu1 %v5254_v53 }
 0x2a5   :  { %7232 = vst [vmem:[#allocation21_spill] sm:$0xff] %v6096_v60  ;;  %2137 = vmatmul.mubr.f32.gmra.mxu0 %v5260_v16  ;;  %3337 = vmatpush3.msra.mxu1 %v724_v24  ;;  %v1053_v24 = vld [vmem:[%s7101_s5 + $0xae8] sm:$0xff]  ;;  %v822_v60 = vld [vmem:[%s7101_s5 + $0x3b0] sm:$0xff] }
 0x2a6   :  { %1981 = vmatprep.mubr.f32.mxu1 %v5271_v5  ;;  %2142 = vmatprep.mubr.f32.mxu0 %v5282_v7  ;;  %v1309_v57 = vpop.f32.mrf.mxu1 }
 0x2a7   :  { %3416 = vmatprep.subr.mxu0 %v1060_v4  ;;  %3338 = vmatprep.subr.mxu1 %v829_v30  ;;  %v1310_v27 = vadd.f32 %v1309_v57, %v5827_v22  ;;  %v1470_v31 = vpop.f32.mrf.mxu0  ;;  %v941_v30 = vld [vmem:[%s7101_s5 + $0x768] sm:$0xff]  ;;  %v710_v57 = vld [vmem:[%s7101_s5 + $0x30] sm:$0xff] }
 0x2a8   :  { %3417 = vmatpush3.msra.mxu0 %v948_v46  ;;  %1982 = vmatmul.mubr.f32.gmra.mxu1 %v5296_v50  ;;  %v6124_v25 = vpop.f32.mrf.mxu1 }
 0x2a9   :  { %7234 = vst [vmem:[#allocation43_spill] sm:$0xff] %v6124_v25  ;;  %2143 = vmatmul.mubr.f32.gmra.mxu0 %v5302_v21  ;;  %3339 = vmatpush3.msra.mxu1 %v717_v61  ;;  %v6130_v4 = vadd.f32 %v1470_v31, %v1310_v27  ;;  %v6132_v46 = vpop.f32.mrf.mxu0  ;;  %v1046_v61 = vld [vmem:[%s7101_s5 + $0xab0] sm:$0xff]  ;;  %v7237_v25 = vld [vmem:[#allocation23_spill] sm:$0xff] }
 0x2aa   :  { %7236 = vst [vmem:[#allocation45_spill] sm:$0xff] %v6132_v46  ;;  %1987 = vmatprep.mubr.f32.mxu1 %v5312_v32  ;;  %2148 = vmatprep.mubr.f32.mxu0 %v5322_v35  ;;  %v934_v27 = vld [vmem:[%s7101_s5 + $0x730] sm:$0xff] }
 0x2ab   :  { %7235 = vst [vmem:[#allocation44_spill] sm:$0xff] %v6130_v4  ;;  %3418 = vmatprep.subr.mxu0 %v1053_v24  ;;  %3340 = vmatprep.subr.mxu1 %v822_v60  ;;  %v7238_v4 = vld [vmem:[#allocation24_spill] sm:$0xff]  ;;  %v2588_v24 = vld [vmem:[%s7105_s7 + $0xf8] sm:$0xff] }
 0x2ac   :  { %3419 = vmatpush3.msra.mxu0 %v941_v30  ;;  %1988 = vmatmul.mubr.f32.gmra.mxu1 %v7237_v25  ;;  %v1315_v31 = vpop.f32.mrf.mxu1 }
 0x2ad   :  { %2149 = vmatmul.mubr.f32.gmra.mxu0 %v7238_v4  ;;  %3341 = vmatpush3.msra.mxu1 %v710_v57  ;;  %v1316_v60 = vadd.f32 %v1315_v31, %v5827_v22  ;;  %v1476_v46 = vpop.f32.mrf.mxu0  ;;  %v7242_v31 = vld [vmem:[#allocation5_spill] sm:$0xff] }
 0x2ae   :  { %2219 = vmatprep.mubr.f32.mxu1 %v4667_v43  ;;  %3420 = vmatprep.subr.mxu0 %v1046_v61  ;;  %v6152_v30 = vpop.f32.mrf.mxu1  ;;  %v2587_v43 = vld [vmem:[%s7105_s7 + $0xf0] sm:$0xff]  ;;  %v7240_v61 = vld [vmem:[#allocation3_spill] sm:$0xff] }
 0x2af   :  { %2364 = vmatprep.mubr.f32.mxu0 %v4669_v44  ;;  %3421 = vmatpush3.msra.mxu0 %v934_v27  ;;  %v6158_v57 = vadd.f32 %v1476_v46, %v1316_v60  ;;  %v6160_v4 = vpop.f32.mrf.mxu0  ;;  %v2620_v44 = vld [vmem:[%s7105_s7 + $0x1f8] sm:$0xff]  ;;  %v7241_v27 = vld [vmem:[#allocation4_spill] sm:$0xff] }
 0x2b0   :  { %2220 = vmatmul.mubr.f32.vlgmr.msra.gmra.mxu1 %v4671_v45  ;;  %3470 = vmatprep.subr.mxu1 %v2588_v24  ;;  %v2604_v46 = vld [vmem:[%s7105_s7 + $0x178] sm:$0xff]  ;;  %v2571_v24 = vld [vmem:[%s7105_s7 + $0x70] sm:$0xff] }
 0x2b1   :  { %7239 = vst [vmem:[#allocation23_spill] sm:$0xff] %v6158_v57  ;;  %2365 = vmatmul.mubr.f32.vlgmr.msra.gmra.mxu0 %v7240_v61  ;;  %2224 = vmatprep.mubr.f32.mxu1 %v7241_v27  ;;  %v2586_v61 = vld [vmem:[%s7105_s7 + $0xe8] sm:$0xff] }
 0x2b2   :  { %2369 = vmatprep.mubr.f32.mxu0 %v7242_v31  ;;  %3471 = vmatpush3.msra.mxu1 %v2572_v3  ;;  %v1321_v45 = vpop.f32.mrf.mxu1  ;;  %v2619_v3 = vld [vmem:[%s7105_s7 + $0x1f0] sm:$0xff] }
 0x2b3   :  { %3472 = vmatprep.subr.mxu1 %v2587_v43  ;;  %3550 = vmatprep.subr.mxu0 %v2620_v44  ;;  %v1322_v60 = vadd.f32 %v1321_v45, %v5827_v22  ;;  %v1482_v57 = vpop.f32.mrf.mxu0 }
 0x2b4   :  { %2225 = vmatmul.mubr.f32.gmra.mxu1 %v4708_v2  ;;  %3551 = vmatpush3.msra.mxu0 %v2604_v46  ;;  %v6186_v43 = vpop.f32.mrf.mxu1  ;;  %v2603_v2 = vld [vmem:[%s7105_s7 + $0x170] sm:$0xff]  ;;  %v2570_v46 = vld [vmem:[%s7105_s7 + $0x68] sm:$0xff] }
 0x2b5   :  { %2370 = vmatmul.mubr.f32.gmra.mxu0 %v4716_v6  ;;  %2229 = vmatprep.mubr.f32.mxu1 %v4726_v12  ;;  %v6190_v44 = vadd.f32 %v1482_v57, %v1322_v60  ;;  %v6195_v27 = vpop.f32.mrf.mxu0  ;;  %v2585_v6 = vld [vmem:[%s7105_s7 + $0xe0] sm:$0xff]  ;;  %v2618_v12 = vld [vmem:[%s7105_s7 + $0x1e8] sm:$0xff]  ;;  %v2584_v60 = vld [vmem:[%s7105_s7 + $0xd8] sm:$0xff] }
 0x2b6   :  { %2374 = vmatprep.mubr.f32.mxu0 %v4736_v36  ;;  %3473 = vmatpush3.msra.mxu1 %v2571_v24  ;;  %v2602_v36 = vld [vmem:[%s7105_s7 + $0x168] sm:$0xff]  ;;  %v2569_v24 = vld [vmem:[%s7105_s7 + $0x60] sm:$0xff] }
 0x2b7   :  { %3474 = vmatprep.subr.mxu1 %v2586_v61  ;;  %3552 = vmatprep.subr.mxu0 %v2619_v3  ;;  %v2601_v61 = vld [vmem:[%s7105_s7 + $0x160] sm:$0xff]  ;;  %v2568_v3 = vld [vmem:[%s7105_s7 + $0x58] sm:$0xff] }
 0x2b8   :  { %2230 = vmatmul.mubr.f32.gmra.mxu1 %v4750_v34  ;;  %3553 = vmatpush3.msra.mxu0 %v2603_v2  ;;  %v1327_v57 = vpop.f32.mrf.mxu1 }
 0x2b9   :  { %2375 = vmatmul.mubr.f32.gmra.mxu0 %v4756_v37  ;;  %2234 = vmatprep.mubr.f32.mxu1 %v4766_v47  ;;  %v1328_v34 = vadd.f32 %v1327_v57, %v5827_v22  ;;  %v1488_v31 = vpop.f32.mrf.mxu0  ;;  %v2567_v57 = vld [vmem:[%s7105_s7 + $0x50] sm:$0xff] }
 0x2ba   :  { %2379 = vmatprep.mubr.f32.mxu0 %v4776_v51  ;;  %3475 = vmatpush3.msra.mxu1 %v2570_v46  ;;  %v6215_v45 = vpop.f32.mrf.mxu1  ;;  %v2617_v51 = vld [vmem:[%s7105_s7 + $0x1e0] sm:$0xff] }
 0x2bb   :  { %3476 = vmatprep.subr.mxu1 %v2585_v6  ;;  %3554 = vmatprep.subr.mxu0 %v2618_v12  ;;  %v6220_v37 = vadd.f32 %v1488_v31, %v1328_v34  ;;  %v6222_v47 = vpop.f32.mrf.mxu0  ;;  %v2600_v6 = vld [vmem:[%s7105_s7 + $0x158] sm:$0xff] }
 0x2bc   :  { %2235 = vmatmul.mubr.f32.gmra.mxu1 %v4790_v63  ;;  %3555 = vmatpush3.msra.mxu0 %v2602_v36 }
 0x2bd   :  { %2380 = vmatmul.mubr.f32.gmra.mxu0 %v4796_v1  ;;  %2239 = vmatprep.mubr.f32.mxu1 %v4810_v9  ;;  %v2583_v1 = vld [vmem:[%s7105_s7 + $0xd0] sm:$0xff]  ;;  %v2616_v9 = vld [vmem:[%s7105_s7 + $0x1d8] sm:$0xff] }
 0x2be   :  { %2384 = vmatprep.mubr.f32.mxu0 %v4820_v14  ;;  %3477 = vmatpush3.msra.mxu1 %v2569_v24  ;;  %v1333_v63 = vpop.f32.mrf.mxu1  ;;  %v2566_v24 = vld [vmem:[%s7105_s7 + $0x48] sm:$0xff] }
 0x2bf   :  { %3478 = vmatprep.subr.mxu1 %v2584_v60  ;;  %3556 = vmatprep.subr.mxu0 %v2617_v51  ;;  %v1334_v2 = vadd.f32 %v1333_v63, %v5827_v22  ;;  %v1494_v46 = vpop.f32.mrf.mxu0  ;;  %v2581_v60 = vld [vmem:[%s7105_s7 + $0xc0] sm:$0xff]  ;;  %v2598_v51 = vld [vmem:[%s7105_s7 + $0x148] sm:$0xff] }
 0x2c0   :  { %2240 = vmatmul.mubr.f32.gmra.mxu1 %v4838_v33  ;;  %3557 = vmatpush3.msra.mxu0 %v2601_v61  ;;  %v6248_v14 = vpop.f32.mrf.mxu1  ;;  %v2565_v61 = vld [vmem:[%s7105_s7 + $0x40] sm:$0xff] }
 0x2c1   :  { %2385 = vmatmul.mubr.f32.gmra.mxu0 %v4844_v38  ;;  %2244 = vmatprep.mubr.f32.mxu1 %v4854_v49  ;;  %v6255_v33 = vadd.f32 %v1494_v46, %v1334_v2  ;;  %v6257_v12 = vpop.f32.mrf.mxu0  ;;  %v2582_v38 = vld [vmem:[%s7105_s7 + $0xc8] sm:$0xff]  ;;  %v2615_v49 = vld [vmem:[%s7105_s7 + $0x1d0] sm:$0xff]  ;;  %v2564_v46 = vld [vmem:[%s7105_s7 + $0x38] sm:$0xff] }
 0x2c2   :  { %2389 = vmatprep.mubr.f32.mxu0 %v4864_v56  ;;  %3479 = vmatpush3.msra.mxu1 %v2568_v3  ;;  %v2599_v56 = vld [vmem:[%s7105_s7 + $0x150] sm:$0xff] }
 0x2c3   :  { %3480 = vmatprep.subr.mxu1 %v2583_v1  ;;  %3558 = vmatprep.subr.mxu0 %v2616_v9 }
 0x2c4   :  { %2245 = vmatmul.mubr.f32.gmra.mxu1 %v4882_v8  ;;  %3559 = vmatpush3.msra.mxu0 %v2600_v6  ;;  %v1339_v36 = vpop.f32.mrf.mxu1  ;;  %v2563_v6 = vld [vmem:[%s7105_s7 + $0x30] sm:$0xff] }
 0x2c5   :  { %2390 = vmatmul.mubr.f32.gmra.mxu0 %v4888_v11  ;;  %2249 = vmatprep.mubr.f32.mxu1 %v4903_v19  ;;  %v1340_v8 = vadd.f32 %v1339_v36, %v5827_v22  ;;  %v1500_v34 = vpop.f32.mrf.mxu0  ;;  %v7243_v36 = vld [vmem:[#allocation12_spill] sm:$0xff] }
 0x2c6   :  { %2394 = vmatprep.mubr.f32.mxu0 %v4914_v39  ;;  %3481 = vmatpush3.msra.mxu1 %v2567_v57  ;;  %v6277_v31 = vpop.f32.mrf.mxu1  ;;  %v2614_v39 = vld [vmem:[%s7105_s7 + $0x1c8] sm:$0xff]  ;;  %v2595_v57 = vld [vmem:[%s7105_s7 + $0x130] sm:$0xff] }
 0x2c7   :  { %3482 = vmatprep.subr.mxu1 %v2582_v38  ;;  %3560 = vmatprep.subr.mxu0 %v2615_v49  ;;  %v6282_v11 = vadd.f32 %v1500_v34, %v1340_v8  ;;  %v6284_v19 = vpop.f32.mrf.mxu0  ;;  %v2562_v38 = vld [vmem:[%s7105_s7 + $0x28] sm:$0xff] }
 0x2c8   :  { %2250 = vmatmul.mubr.f32.gmra.mxu1 %v4934_v59  ;;  %3561 = vmatpush3.msra.mxu0 %v2599_v56  ;;  %v7244_v56 = vld [vmem:[#allocation13_spill] sm:$0xff]  ;;  %v2594_v8 = vld [vmem:[%s7105_s7 + $0x128] sm:$0xff] }
 0x2c9   :  { %2395 = vmatmul.mubr.f32.gmra.mxu0 %v4942_v62  ;;  %2254 = vmatprep.mubr.f32.mxu1 %v4953_v13  ;;  %v2580_v62 = vld [vmem:[%s7105_s7 + $0xb8] sm:$0xff]  ;;  %v2613_v13 = vld [vmem:[%s7105_s7 + $0x1c0] sm:$0xff] }
 0x2ca   :  { %2399 = vmatprep.mubr.f32.mxu0 %v4964_v20  ;;  %3483 = vmatpush3.msra.mxu1 %v2566_v24  ;;  %v1345_v59 = vpop.f32.mrf.mxu1  ;;  %v2561_v24 = vld [vmem:[%s7105_s7 + $0x20] sm:$0xff] }
 0x2cb   :  { %3484 = vmatprep.subr.mxu1 %v2581_v60  ;;  %3562 = vmatprep.subr.mxu0 %v2614_v39  ;;  %v1346_v63 = vadd.f32 %v1345_v59, %v5827_v22  ;;  %v1506_v3 = vpop.f32.mrf.mxu0  ;;  %v2597_v22 = vld [vmem:[%s7105_s7 + $0x140] sm:$0xff]  ;;  %v7246_v60 = vld [vmem:[#allocation15_spill] sm:$0xff]  ;;  %v2576_v39 = vld [vmem:[%s7105_s7 + $0x98] sm:$0xff] }
 0x2cc   :  { %2255 = vmatmul.mubr.f32.gmra.mxu1 %v4982_v55  ;;  %3563 = vmatpush3.msra.mxu0 %v2598_v51  ;;  %v6310_v20 = vpop.f32.mrf.mxu1  ;;  %v2609_v51 = vld [vmem:[%s7105_s7 + $0x1a0] sm:$0xff] }
 0x2cd   :  { %2400 = vmatmul.mubr.f32.gmra.mxu0 %v4988_v41  ;;  %2259 = vmatprep.mubr.f32.mxu1 %v5001_v15  ;;  %v6317_v55 = vadd.f32 %v1506_v3, %v1346_v63  ;;  %v6319_v2 = vpop.f32.mrf.mxu0  ;;  %v2579_v41 = vld [vmem:[%s7105_s7 + $0xb0] sm:$0xff]  ;;  %v2612_v15 = vld [vmem:[%s7105_s7 + $0x1b8] sm:$0xff]  ;;  %v7247_v3 = vld [vmem:[#allocation2_spill] sm:$0xff] }
 0x2ce   :  { %2404 = vmatprep.mubr.f32.mxu0 %v5014_v23  ;;  %3485 = vmatpush3.msra.mxu1 %v2565_v61  ;;  %v2596_v23 = vld [vmem:[%s7105_s7 + $0x138] sm:$0xff]  ;;  %v2593_v61 = vld [vmem:[%s7105_s7 + $0x120] sm:$0xff] }
 0x2cf   :  { %3486 = vmatprep.subr.mxu1 %v2580_v62  ;;  %3564 = vmatprep.subr.mxu0 %v2613_v13  ;;  %v7248_v62 = vsub.s32 1, %v7247_v3  ;;  %v7249_v13 = vld [vmem:[#allocation6_spill] sm:$0xff] }
 0x2d0   :  { %2260 = vmatmul.mubr.f32.gmra.mxu1 %v5030_v26  ;;  %3565 = vmatpush3.msra.mxu0 %v2597_v22  ;;  %v6332_v1 = vpop.f32.mrf.mxu1 }
 0x2d1   :  { %2405 = vmatmul.mubr.f32.gmra.mxu0 %v5036_v42  ;;  %2264 = vmatprep.mubr.f32.mxu1 %v7182_v10  ;;  %v6339_v26 = vpop.f32.mrf.mxu0  ;;  %v2578_v10 = vld [vmem:[%s7105_s7 + $0xa8] sm:$0xff]  ;;  %v6406_v22 = vrot.slane %v7249_v13, %v7248_v62  ;;  %v7257_v62 = vld [vmem:[#allocation10_spill] sm:$0xff] }
 0x2d2   :  { %2409 = vmatprep.mubr.f32.mxu0 %v7183_v54  ;;  %3487 = vmatpush3.msra.mxu1 %v2564_v46  ;;  %v6342_v9 = vpop.f32.mrf.mxu1  ;;  %v2611_v54 = vld [vmem:[%s7105_s7 + $0x1b0] sm:$0xff] }
 0x2d3   :  { %3488 = vmatprep.subr.mxu1 %v2579_v41  ;;  %3566 = vmatprep.subr.mxu0 %v2612_v15  ;;  %v6347_v42 = vpop.f32.mrf.mxu0 }
 0x2d4   :  { %2265 = vmatmul.mubr.f32.gmra.mxu1 %v5078_v48  ;;  %3567 = vmatpush3.msra.mxu0 %v2596_v23  ;;  %v7251_v23 = vld [vmem:[#allocation19_spill] sm:$0xff] }
 0x2d5   :  { %2410 = vmatmul.mubr.f32.gmra.mxu0 %v7184_v58  ;;  %2269 = vmatprep.mubr.f32.mxu1 %v7185_v29  ;;  %v2577_v58 = vld [vmem:[%s7105_s7 + $0xa0] sm:$0xff]  ;;  %v2610_v29 = vld [vmem:[%s7105_s7 + $0x1a8] sm:$0xff] }
 0x2d6   :  { %2414 = vmatprep.mubr.f32.mxu0 %v7186_v17  ;;  %3489 = vmatpush3.msra.mxu1 %v2563_v6  ;;  %v6362_v48 = vpop.f32.mrf.mxu1  ;;  %v2608_v6 = vld [vmem:[%s7105_s7 + $0x198] sm:$0xff] }
 0x2d7   :  { %3490 = vmatprep.subr.mxu1 %v2578_v10  ;;  %3568 = vmatprep.subr.mxu0 %v2611_v54  ;;  %v6367_v49 = vpop.f32.mrf.mxu0  ;;  %v7252_v10 = vld [vmem:[#allocation20_spill] sm:$0xff]  ;;  %v2592_v54 = vld [vmem:[%s7105_s7 + $0x118] sm:$0xff] }
 0x2d8   :  { %2270 = vmatmul.mubr.f32.gmra.mxu1 %v7187_v28  ;;  %3569 = vmatpush3.msra.mxu0 %v2595_v57  ;;  %v1585_v17 = vpop.f32.mrf.mxu1  ;;  %v7245_v28 = vld [vmem:[#allocation14_spill] sm:$0xff]  ;;  %v7253_v57 = vld [vmem:[#allocation7_spill] sm:$0xff] }
 0x2d9   :  { %2415 = vmatmul.mubr.f32.gmra.mxu0 %v7243_v36  ;;  %2274 = vmatprep.mubr.f32.mxu1 %v7244_v56  ;;  %v6381_v34 = vpop.f32.mrf.mxu0  ;;  %v2559_v36 = vld [vmem:[%s7105_s7 + $0x10] sm:$0xff]  ;;  %v7255_v56 = vsub.s32 2, %v7247_v3 }
 0x2da   :  { %2419 = vmatprep.mubr.f32.mxu0 %v7245_v28  ;;  %3491 = vmatpush3.msra.mxu1 %v2562_v38  ;;  %v1258_v38 = vadd.f32 %v7253_v57, %v6406_v22 }
 0x2db   :  { %3492 = vmatprep.subr.mxu1 %v2577_v58  ;;  %3570 = vmatprep.subr.mxu0 %v2610_v29  ;;  %v7254_v58 = vld [vmem:[#allocation22_spill] sm:$0xff] }
 0x2dc   :  { %2275 = vmatmul.mubr.f32.gmra.mxu1 %v7246_v60  ;;  %3571 = vmatpush3.msra.mxu0 %v2594_v8  ;;  %v6394_v59 = vpop.f32.mrf.mxu1  ;;  %v2607_v60 = vld [vmem:[%s7105_s7 + $0x190] sm:$0xff] }
 0x2dd   :  { %2420 = vmatmul.mubr.f32.gmra.mxu0 %v7225_v52  ;;  %2279 = vmatprep.mubr.f32.mxu1 %v7228_v0  ;;  %v6401_v63 = vpop.f32.mrf.mxu0  ;;  %v2560_v52 = vld [vmem:[%s7105_s7 + $0x18] sm:$0xff]  ;;  %v7250_v0 = vsub.s32 3, %v7247_v3 }
 0x2de   :  { %2424 = vmatprep.mubr.f32.mxu0 %v7192_v40  ;;  %3493 = vmatpush3.msra.mxu1 %v2561_v24  ;;  %v1591_v46 = vpop.f32.mrf.mxu1  ;;  %v2575_v40 = vld [vmem:[%s7105_s7 + $0x90] sm:$0xff]  ;;  %v2574_v24 = vld [vmem:[%s7105_s7 + $0x88] sm:$0xff] }
 0x2df   :  { %3494 = vmatprep.subr.mxu1 %v2576_v39  ;;  %3572 = vmatprep.subr.mxu0 %v2609_v51  ;;  %v6415_v41 = vrot.slane %v7249_v13, %v7250_v0  ;;  %v6417_v15 = vpop.f32.mrf.mxu0 }
 0x2e0   :  { %2280 = vmatmul.mubr.f32.gmra.mxu1 %v7251_v23  ;;  %3573 = vmatpush3.msra.mxu0 %v2593_v61 }
 0x2e1   :  { %2425 = vmatmul.mubr.f32.gmra.mxu0 %v7252_v10  ;;  %2284 = vmatprep.mubr.f32.mxu1 %v7230_v18  ;;  %v6442_v18 = vrot.slane %v7249_v13, %v7255_v56  ;;  %v1580_v8 = vadd.f32 %v6342_v9, %v6415_v41  ;;  %v2591_v9 = vld [vmem:[%s7105_s7 + $0x110] sm:$0xff]  ;;  %v1264_v13 = vadd.f32 %v7257_v62, %v6406_v22  ;;  %v2589_v56 = vld [vmem:[%s7105_s7 + $0x100] sm:$0xff] }
 0x2e2   :  { %2429 = vmatprep.mubr.f32.mxu0 %v7254_v58  ;;  %3495 = vmatpush3.msra.mxu1 %v2560_v52  ;;  %v6434_v29 = vpop.f32.mrf.mxu1  ;;  %v1586_v52 = vadd.f32 %v1585_v17, %v6415_v41  ;;  %v2606_v17 = vld [vmem:[%s7105_s7 + $0x188] sm:$0xff] }
 0x2e3   :  { %3496 = vmatprep.subr.mxu1 %v2575_v40  ;;  %3574 = vmatprep.subr.mxu0 %v2608_v6  ;;  %v6446_v28 = vpop.f32.mrf.mxu0  ;;  %v1741_v0 = vadd.f32 %v6347_v42, %v1580_v8  ;;  %v7258_v40 = vld [vmem:[#allocation18_spill] sm:$0xff]  ;;  %v7260_v8 = vld [vmem:[#allocation9_spill] sm:$0xff] }
 0x2e4   :  { %2285 = vmatmul.mubr.f32.gmra.mxu1 %v5254_v53  ;;  %3575 = vmatpush3.msra.mxu0 %v2592_v54  ;;  %v1597_v39 = vpop.f32.mrf.mxu1  ;;  %v7256_v53 = vld [vmem:[#allocation8_spill] sm:$0xff]  ;;  %v1425_v6 = vadd.f32 %v7258_v40, %v1264_v13  ;;  %v1747_v10 = vadd.f32 %v6381_v34, %v1586_v52  ;;  %v1592_v54 = vadd.f32 %v1591_v46, %v6415_v41  ;;  %v2605_v34 = vld [vmem:[%s7105_s7 + $0x180] sm:$0xff]  ;;  %v7263_v52 = vld [vmem:[#allocation27_spill] sm:$0xff] }
 0x2e5   :  { %2430 = vmatmul.mubr.f32.gmra.mxu0 %v5260_v16  ;;  %2289 = vmatprep.mubr.f32.mxu1 %v5271_v5  ;;  %v6460_v51 = vpop.f32.mrf.mxu0  ;;  %v1419_v61 = vadd.f32 %v7256_v53, %v1258_v38  ;;  %v2558_v16 = vld [vmem:[%s7105_s7 + $0x8] sm:$0xff]  ;;  %v1578_v5 = vadd.f32 %v6332_v1, %v6442_v18  ;;  %v2557_v38 = vld [vmem:[%s7105_s7] sm:$0xff]  ;;  %v1598_v62 = vadd.f32 %v1597_v39, %v6415_v41 }
 0x2e6   :  { %2434 = vmatprep.mubr.f32.mxu0 %v5282_v7  ;;  %3497 = vmatpush3.msra.mxu1 %v2559_v36  ;;  %v2573_v7 = vld [vmem:[%s7105_s7 + $0x80] sm:$0xff]  ;;  %v2590_v1 = vld [vmem:[%s7105_s7 + $0x108] sm:$0xff]  ;;  %v2448_v36 = vmax.f32 %v1741_v0, 0.0  ;;  %v2453_v53 = vmax.f32 %v1425_v6, 0.0 }
 0x2e7   :  { %3498 = vmatprep.subr.mxu1 %v2574_v24  ;;  %3576 = vmatprep.subr.mxu0 %v2607_v60  ;;  %v2446_v42 = vmax.f32 %v1419_v61, 0.0  ;;  %v1739_v58 = vadd.f32 %v6339_v26, %v1578_v5  ;;  %v2445_v24 = vmax.f32 %v7260_v8, 0.0  ;;  %v7261_v26 = vld [vmem:[#allocation28_spill] sm:$0xff]  ;;  %v1753_v61 = vadd.f32 %v6417_v15, %v1592_v54  ;;  %v2636_v15 = vld [vmem:[%s7105_s7 + $0x278] sm:$0xff]  ;;  %v7265_v40 = vld [vmem:[#allocation30_spill] sm:$0xff] }
 0x2e8   :  { %2290 = vmatmul.mubr.f32.gmra.mxu1 %v5296_v50  ;;  %3577 = vmatpush3.msra.mxu0 %v2591_v9  ;;  %v6480_v23 = vpop.f32.mrf.mxu1  ;;  %v1276_v60 = vadd.f32 %v7261_v26, %v6406_v22  ;;  %v7262_v9 = vld [vmem:[#allocation24_spill] sm:$0xff]  ;;  %v7266_v54 = vld [vmem:[#allocation31_spill] sm:$0xff] }
 0x2e9   :  { %2435 = vmatmul.mubr.f32.gmra.mxu0 %v5302_v21  ;;  %2294 = vmatprep.mubr.f32.mxu1 %v5312_v32  ;;  %v6487_v50 = vpop.f32.mrf.mxu0  ;;  %v7259_v21 = vld [vmem:[#allocation25_spill] sm:$0xff]  ;;  %v2447_v5 = vmax.f32 %v1739_v58, 0.0  ;;  %v2635_v8 = vld [vmem:[%s7105_s7 + $0x270] sm:$0xff] }
 0x2ea   :  { %2439 = vmatprep.mubr.f32.mxu0 %v5322_v35  ;;  %3499 = vmatpush3.msra.mxu1 %v2558_v16  ;;  %v1603_v57 = vpop.f32.mrf.mxu1  ;;  %v1270_v32 = vadd.f32 %v7259_v21, %v6406_v22  ;;  %v1584_v35 = vadd.f32 %v6362_v48, %v6442_v18  ;;  %v2652_v48 = vld [vmem:[%s7105_s7 + $0x2f8] sm:$0xff]  ;;  %v1437_v6 = vadd.f32 %v7265_v40, %v1276_v60 }
 0x2eb   :  { %3500 = vmatprep.subr.mxu1 %v2573_v7  ;;  %3578 = vmatprep.subr.mxu0 %v2606_v17  ;;  %v1764_v46 = vpop.f32.mrf.mxu0  ;;  %v1590_v7 = vadd.f32 %v6394_v59, %v6442_v18  ;;  %v7264_v59 = vld [vmem:[#allocation11_spill] sm:$0xff]  ;;  %v1282_v21 = vadd.f32 %v7266_v54, %v6406_v22  ;;  %v1604_v58 = vadd.f32 %v1603_v57, %v6415_v41  ;;  %v7267_v57 = vld [vmem:[#allocation26_spill] sm:$0xff] }
 0x2ec   :  { %2295 = vmatmul.mubr.f32.gmra.mxu1 %v7237_v25  ;;  %3579 = vmatpush3.msra.mxu0 %v2590_v1  ;;  %v2455_v25 = vmax.f32 %v1747_v10, 0.0  ;;  %v1431_v16 = vadd.f32 %v7263_v52, %v1270_v32  ;;  %v1745_v0 = vadd.f32 %v6367_v49, %v1584_v35  ;;  %v2651_v1 = vld [vmem:[%s7105_s7 + $0x2f0] sm:$0xff]  ;;  %v2668_v49 = vld [vmem:[%s7105_s7 + $0x378] sm:$0xff]  ;;  %v2462_v32 = vmax.f32 %v1753_v61, 0.0  ;;  %v7269_v52 = vld [vmem:[#allocation34_spill] sm:$0xff] }
 0x2ed   :  { %2440 = vmatmul.mubr.f32.gmra.mxu0 %v7262_v9  ;;  %2740 = vmatprep.mubr.f32.mxu1 %v2446_v42  ;;  %v2452_v42 = vmax.f32 %v7264_v59, 0.0  ;;  %v2467_v26 = vmax.f32 %v1437_v6, 0.0  ;;  %v7268_v9 = vld [vmem:[#allocation33_spill] sm:$0xff] }
 0x2ee   :  { %3501 = vmatpush3.msra.mxu1 %v2557_v38  ;;  %3580 = vmatprep.subr.mxu0 %v2605_v34  ;;  %v6517_v13 = vpop.f32.mrf.mxu1  ;;  %v1759_v38 = vadd.f32 %v6460_v51, %v1598_v62  ;;  %v2454_v35 = vmax.f32 %v1745_v0, 0.0  ;;  %v1751_v34 = vadd.f32 %v6401_v63, %v1590_v7  ;;  %v2650_v51 = vld [vmem:[%s7105_s7 + $0x2e8] sm:$0xff]  ;;  %v2667_v63 = vld [vmem:[%s7105_s7 + $0x370] sm:$0xff]  ;;  %v1602_v7 = vadd.f32 %v6480_v23, %v6442_v18  ;;  %v7271_v23 = vld [vmem:[#allocation37_spill] sm:$0xff] }
 0x2ef   :  { %3581 = vmatpush3.msra.mxu0 %v2589_v56  ;;  %2885 = vmatprep.mubr.f32.mxu0 %v2448_v36  ;;  %v6523_v17 = vpop.f32.mrf.mxu0  ;;  %v2460_v36 = vmax.f32 %v1431_v16, 0.0  ;;  %v1596_v56 = vadd.f32 %v6434_v29, %v6442_v18  ;;  %v2459_v29 = vmax.f32 %v7267_v57, 0.0  ;;  %v1288_v16 = vadd.f32 %v7269_v52, %v6406_v22 }
 0x2f0   :  { %2741 = vmatmul.mubr.f32.vlgmr.msra.gmra.mxu1 %v2445_v24  ;;  %v1609_v39 = vpop.f32.mrf.mxu1  ;;  %3630 = vmatprep.subr.mxu1 %v2652_v48  ;;  %v1443_v48 = vadd.f32 %v7268_v9, %v1282_v21  ;;  %v1294_v59 = vadd.f32 %v7271_v23, %v6406_v22 }
 0x2f1   :  { %2745 = vmatprep.mubr.f32.mxu1 %v2453_v53  ;;  %2886 = vmatmul.mubr.f32.vlgmr.msra.gmra.mxu0 %v2447_v5  ;;  %v1770_v10 = vpop.f32.mrf.mxu0  ;;  %v2469_v53 = vmax.f32 %v1759_v38, 0.0  ;;  %v1610_v61 = vadd.f32 %v1609_v39, %v6415_v41  ;;  %v2461_v5 = vmax.f32 %v1751_v34, 0.0  ;;  %v1757_v0 = vadd.f32 %v6446_v28, %v1596_v56  ;;  %v2666_v28 = vld [vmem:[%s7105_s7 + $0x368] sm:$0xff]  ;;  %v7270_v39 = vld [vmem:[#allocation29_spill] sm:$0xff]  ;;  %v2633_v56 = vld [vmem:[%s7105_s7 + $0x260] sm:$0xff] }
 0x2f2   :  { %2890 = vmatprep.mubr.f32.mxu0 %v2455_v25  ;;  %3631 = vmatpush3.msra.mxu1 %v2636_v15  ;;  %v1765_v25 = vadd.f32 %v1764_v46, %v1604_v58  ;;  %v2649_v46 = vld [vmem:[%s7105_s7 + $0x2e0] sm:$0xff] }
 0x2f3   :  { %3632 = vmatprep.subr.mxu1 %v2651_v1  ;;  %3798 = vmatprep.subr.mxu0 %v2668_v49  ;;  %v2634_v1 = vld [vmem:[%s7105_s7 + $0x268] sm:$0xff]  ;;  %v1771_v6 = vadd.f32 %v1770_v10, %v1610_v61  ;;  %v2468_v58 = vmax.f32 %v1757_v0, 0.0 }
 0x2f4   :  { %2746 = vmatmul.mubr.f32.gmra.mxu1 %v2452_v42  ;;  %v6546_v24 = vpop.f32.mrf.mxu1  ;;  %3799 = vmatpush3.msra.mxu0 %v2668_v49  ;;  %v2466_v49 = vmax.f32 %v7270_v39, 0.0  ;;  %v2474_v42 = vmax.f32 %v1443_v48, 0.0  ;;  %v2476_v40 = vmax.f32 %v1765_v25, 0.0 }
 0x2f5   :  { %2750 = vmatprep.mubr.f32.mxu1 %v2460_v36  ;;  %2891 = vmatmul.mubr.f32.gmra.mxu0 %v2454_v35  ;;  %v6555_v60 = vpop.f32.mrf.mxu0  ;;  %v1763_v36 = vadd.f32 %v6487_v50, %v1602_v7  ;;  %v1608_v35 = vadd.f32 %v6517_v13, %v6442_v18  ;;  %v2665_v50 = vld [vmem:[%s7105_s7 + $0x360] sm:$0xff]  ;;  %v7273_v13 = vld [vmem:[#allocation32_spill] sm:$0xff]  ;;  %v2483_v48 = vmax.f32 %v1771_v6, 0.0 }
 0x2f6   :  { %2895 = vmatprep.mubr.f32.mxu0 %v2462_v32  ;;  %v1615_v62 = vpop.f32.mrf.mxu1  ;;  %3633 = vmatpush3.msra.mxu1 %v2635_v8  ;;  %v7272_v32 = vld [vmem:[#allocation36_spill] sm:$0xff]  ;;  %v2648_v8 = vld [vmem:[%s7105_s7 + $0x2d8] sm:$0xff] }
 0x2f7   :  { %v1776_v15 = vpop.f32.mrf.mxu0  ;;  %3634 = vmatprep.subr.mxu1 %v2650_v51  ;;  %3800 = vmatprep.subr.mxu0 %v2667_v63  ;;  %v1616_v54 = vadd.f32 %v1615_v62, %v6415_v41  ;;  %v1449_v38 = vadd.f32 %v7272_v32, %v1288_v16  ;;  %v2473_v51 = vmax.f32 %v7273_v13, 0.0  ;;  %v2475_v62 = vmax.f32 %v1763_v36, 0.0  ;;  %v2647_v7 = vld [vmem:[%s7105_s7 + $0x2d0] sm:$0xff] }
 0x2f8   :  { %2751 = vmatmul.mubr.f32.gmra.mxu1 %v2459_v29  ;;  %3801 = vmatpush3.msra.mxu0 %v2667_v63  ;;  %v7274_v63 = vld [vmem:[#allocation39_spill] sm:$0xff]  ;;  %v1769_v52 = vadd.f32 %v6523_v17, %v1608_v35  ;;  %v1614_v16 = vadd.f32 %v6546_v24, %v6442_v18  ;;  %v2664_v17 = vld [vmem:[%s7105_s7 + $0x358] sm:$0xff]  ;;  %v2631_v36 = vld [vmem:[%s7105_s7 + $0x250] sm:$0xff] }
 0x2f9   :  { %2755 = vmatprep.mubr.f32.mxu1 %v2467_v26  ;;  %2896 = vmatmul.mubr.f32.gmra.mxu0 %v2461_v5  ;;  %v1455_v57 = vadd.f32 %v7274_v63, %v1294_v59  ;;  %v7275_v26 = vld [vmem:[#allocation40_spill] sm:$0xff]  ;;  %v2481_v61 = vmax.f32 %v1449_v38, 0.0  ;;  %v2632_v5 = vld [vmem:[%s7105_s7 + $0x258] sm:$0xff]  ;;  %v2646_v35 = vld [vmem:[%s7105_s7 + $0x2c8] sm:$0xff] }
 0x2fa   :  { %2900 = vmatprep.mubr.f32.mxu0 %v2469_v53  ;;  %v1619_v21 = vpop.f32.mrf.mxu1  ;;  %3635 = vmatpush3.msra.mxu1 %v2634_v1  ;;  %v1300_v9 = vadd.f32 %v7275_v26, %v6406_v22  ;;  %v1777_v53 = vadd.f32 %v1776_v15, %v1616_v54  ;;  %v7276_v15 = vld [vmem:[#allocation35_spill] sm:$0xff]  ;;  %v2482_v6 = vmax.f32 %v1769_v52, 0.0  ;;  %v1775_v54 = vadd.f32 %v6555_v60, %v1614_v16  ;;  %v2663_v60 = vld [vmem:[%s7105_s7 + $0x350] sm:$0xff] }
 0x2fb   :  { %v6581_v34 = vpop.f32.mrf.mxu0  ;;  %3636 = vmatprep.subr.mxu1 %v2649_v46  ;;  %3802 = vmatprep.subr.mxu0 %v2666_v28  ;;  %v2480_v1 = vmax.f32 %v7276_v15, 0.0  ;;  %v2488_v24 = vmax.f32 %v1455_v57, 0.0  ;;  %v1620_v32 = vadd.f32 %v1619_v21, %v6442_v18  ;;  %v7279_v21 = vld [vmem:[#allocation38_spill] sm:$0xff]  ;;  %v7282_v52 = vld [vmem:[#allocation16_spill] sm:$0xff] }
 0x2fc   :  { %2756 = vmatmul.mubr.f32.gmra.mxu1 %v2466_v49  ;;  %v1621_v10 = vpop.f32.mrf.mxu1  ;;  %3803 = vmatpush3.msra.mxu0 %v2666_v28  ;;  %v7277_v28 = vld [vmem:[#allocation41_spill] sm:$0xff]  ;;  %v2490_v59 = vmax.f32 %v1777_v53, 0.0  ;;  %v2489_v26 = vmax.f32 %v1775_v54, 0.0  ;;  %v2494_v16 = vmax.f32 %v7282_v52, 0.0  ;;  %v2659_v52 = vld [vmem:[%s7105_s7 + $0x330] sm:$0xff] }
 0x2fd   :  { %2760 = vmatprep.mubr.f32.mxu1 %v2474_v42  ;;  %2901 = vmatmul.mubr.f32.gmra.mxu0 %v2468_v58  ;;  %v1782_v29 = vpop.f32.mrf.mxu0  ;;  %v1622_v25 = vadd.f32 %v1621_v10, %v6415_v41  ;;  %v1461_v39 = vadd.f32 %v7277_v28, %v1300_v9  ;;  %v7278_v49 = vld [vmem:[#allocation17_spill] sm:$0xff]  ;;  %v7280_v10 = vld [vmem:[#allocation42_spill] sm:$0xff]  ;;  %v1781_v9 = vadd.f32 %v6581_v34, %v1620_v32  ;;  %v2662_v34 = vld [vmem:[%s7105_s7 + $0x348] sm:$0xff] }
 0x2fe   :  { %2905 = vmatprep.mubr.f32.mxu0 %v2476_v40  ;;  %3637 = vmatpush3.msra.mxu1 %v2633_v56  ;;  %v1306_v23 = vadd.f32 %v7278_v49, %v6406_v22  ;;  %v2487_v56 = vmax.f32 %v7279_v21, 0.0 }
 0x2ff   :  { %3638 = vmatprep.subr.mxu1 %v2648_v8  ;;  %3804 = vmatprep.subr.mxu0 %v2665_v50  ;;  %v1783_v42 = vadd.f32 %v1782_v29, %v1622_v25  ;;  %v2495_v29 = vmax.f32 %v1461_v39, 0.0  ;;  %v2630_v25 = vld [vmem:[%s7105_s7 + $0x248] sm:$0xff]  ;;  %v2496_v28 = vmax.f32 %v1781_v9, 0.0 }
 0x300   :  { %2761 = vmatmul.mubr.f32.gmra.mxu1 %v2473_v51  ;;  %v1625_v0 = vpop.f32.mrf.mxu1  ;;  %3805 = vmatpush3.msra.mxu0 %v2665_v50  ;;  %v1467_v8 = vadd.f32 %v7280_v10, %v1306_v23  ;;  %v7281_v50 = vld [vmem:[#allocation43_spill] sm:$0xff] }
 0x301   :  { %2765 = vmatprep.mubr.f32.mxu1 %v2481_v61  ;;  %2906 = vmatmul.mubr.f32.gmra.mxu0 %v2475_v62  ;;  %v1786_v46 = vpop.f32.mrf.mxu0  ;;  %v1312_v13 = vadd.f32 %v7281_v50, %v6406_v22  ;;  %v2497_v51 = vmax.f32 %v1783_v42, 0.0  ;;  %v2645_v62 = vld [vmem:[%s7105_s7 + $0x2c0] sm:$0xff]  ;;  %v2628_v50 = vld [vmem:[%s7105_s7 + $0x238] sm:$0xff] }
 0x302   :  { %2910 = vmatprep.mubr.f32.mxu0 %v2483_v48  ;;  %v1627_v40 = vpop.f32.mrf.mxu1  ;;  %3639 = vmatpush3.msra.mxu1 %v2632_v5  ;;  %v1626_v48 = vadd.f32 %v1625_v0, %v6442_v18 }
 0x303   :  { %v1628_v38 = vadd.f32 %v1627_v40, %v6415_v41  ;;  %v1788_v58 = vpop.f32.mrf.mxu0  ;;  %3640 = vmatprep.subr.mxu1 %v2647_v7  ;;  %3806 = vmatprep.subr.mxu0 %v2664_v17  ;;  %v2502_v7 = vmax.f32 %v1467_v8, 0.0  ;;  %v7284_v40 = vld [vmem:[#allocation21_spill] sm:$0xff] }
 0x304   :  { %2766 = vmatmul.mubr.f32.gmra.mxu1 %v2480_v1  ;;  %3807 = vmatpush3.msra.mxu0 %v2664_v17  ;;  %v7283_v17 = vld [vmem:[#allocation45_spill] sm:$0xff]  ;;  %v1318_v1 = vadd.f32 %v6152_v30, %v6406_v22  ;;  %v1787_v39 = vadd.f32 %v1786_v46, %v1626_v48  ;;  %v2661_v46 = vld [vmem:[%s7105_s7 + $0x340] sm:$0xff] }
 0x305   :  { %2770 = vmatprep.mubr.f32.mxu1 %v2488_v24  ;;  %2911 = vmatmul.mubr.f32.gmra.mxu0 %v2482_v6  ;;  %v1789_v63 = vadd.f32 %v1788_v58, %v1628_v38  ;;  %v1473_v15 = vadd.f32 %v7283_v17, %v1312_v13  ;;  %v2644_v30 = vld [vmem:[%s7105_s7 + $0x2b8] sm:$0xff]  ;;  %v2501_v6 = vmax.f32 %v7284_v40, 0.0  ;;  %v1324_v58 = vadd.f32 %v6186_v43, %v6406_v22 }
 0x306   :  { %2915 = vmatprep.mubr.f32.mxu0 %v2490_v59  ;;  %v1631_v57 = vpop.f32.mrf.mxu1  ;;  %3641 = vmatpush3.msra.mxu1 %v2631_v36  ;;  %v2629_v59 = vld [vmem:[%s7105_s7 + $0x240] sm:$0xff]  ;;  %v1479_v38 = vadd.f32 %v6160_v4, %v1318_v1  ;;  %v2643_v4 = vld [vmem:[%s7105_s7 + $0x2b0] sm:$0xff]  ;;  %v2660_v43 = vld [vmem:[%s7105_s7 + $0x338] sm:$0xff] }
 0x307   :  { %v1792_v53 = vpop.f32.mrf.mxu0  ;;  %3642 = vmatprep.subr.mxu1 %v2646_v35  ;;  %3808 = vmatprep.subr.mxu0 %v2663_v60  ;;  %v2504_v24 = vmax.f32 %v1789_v63, 0.0  ;;  %v1632_v49 = vadd.f32 %v1631_v57, %v6442_v18  ;;  %v2509_v32 = vmax.f32 %v1473_v15, 0.0  ;;  %v1336_v15 = vadd.f32 %v6248_v14, %v6406_v22  ;;  %v2641_v14 = vld [vmem:[%s7105_s7 + $0x2a0] sm:$0xff] }
 0x308   :  { %2771 = vmatmul.mubr.f32.gmra.mxu1 %v2487_v56  ;;  %v1633_v61 = vpop.f32.mrf.mxu1  ;;  %3809 = vmatpush3.msra.mxu0 %v2663_v60  ;;  %v2503_v60 = vmax.f32 %v1787_v39, 0.0  ;;  %v2516_v57 = vmax.f32 %v1479_v38, 0.0 }
 0x309   :  { %2775 = vmatprep.mubr.f32.mxu1 %v2495_v29  ;;  %2916 = vmatmul.mubr.f32.gmra.mxu0 %v2489_v26  ;;  %v1634_v5 = vadd.f32 %v1633_v61, %v6415_v41  ;;  %v1794_v0 = vpop.f32.mrf.mxu0  ;;  %v1793_v21 = vadd.f32 %v1792_v53, %v1632_v49  ;;  %v1485_v29 = vadd.f32 %v6195_v27, %v1324_v58  ;;  %v2626_v49 = vld [vmem:[%s7105_s7 + $0x228] sm:$0xff] }
 0x30a   :  { %2920 = vmatprep.mubr.f32.mxu0 %v2497_v51  ;;  %3643 = vmatpush3.msra.mxu1 %v2630_v25  ;;  %v7285_v51 = vld [vmem:[#allocation44_spill] sm:$0xff]  ;;  %v1330_v26 = vadd.f32 %v6215_v45, %v6406_v22  ;;  %v2642_v45 = vld [vmem:[%s7105_s7 + $0x2a8] sm:$0xff]  ;;  %v1497_v40 = vadd.f32 %v6257_v12, %v1336_v15 }
 0x30b   :  { %v1795_v23 = vadd.f32 %v1794_v0, %v1634_v5  ;;  %3644 = vmatprep.subr.mxu1 %v2645_v62  ;;  %3810 = vmatprep.subr.mxu0 %v2662_v34  ;;  %v2508_v63 = vmax.f32 %v7285_v51, 0.0  ;;  %v2510_v48 = vmax.f32 %v1793_v21, 0.0  ;;  %v7286_v0 = vld [vmem:[#allocation23_spill] sm:$0xff]  ;;  %v2523_v17 = vmax.f32 %v1485_v29, 0.0  ;;  %v2656_v21 = vld [vmem:[%s7105_s7 + $0x318] sm:$0xff]  ;;  %v2655_v29 = vld [vmem:[%s7105_s7 + $0x310] sm:$0xff] }
 0x30c   :  { %2776 = vmatmul.mubr.f32.gmra.mxu1 %v2494_v16  ;;  %v1637_v42 = vpop.f32.mrf.mxu1  ;;  %3811 = vmatpush3.msra.mxu0 %v2662_v34  ;;  %v2627_v34 = vld [vmem:[%s7105_s7 + $0x230] sm:$0xff]  ;;  %v1491_v1 = vadd.f32 %v6222_v47, %v1330_v26  ;;  %v2536_v26 = vmax.f32 %v6255_v33, 0.0  ;;  %v2622_v33 = vld [vmem:[%s7105_s7 + $0x208] sm:$0xff] }
 0x30d   :  { %2780 = vmatprep.mubr.f32.mxu1 %v2502_v7  ;;  %2921 = vmatmul.mubr.f32.gmra.mxu0 %v2496_v28  ;;  %v1798_v54 = vpop.f32.mrf.mxu0  ;;  %v2511_v36 = vmax.f32 %v1795_v23, 0.0  ;;  %v1638_v56 = vadd.f32 %v1637_v42, %v6442_v18  ;;  %v2515_v7 = vmax.f32 %v7286_v0, 0.0  ;;  %v2658_v23 = vld [vmem:[%s7105_s7 + $0x328] sm:$0xff]  ;;  %v2637_v0 = vld [vmem:[%s7105_s7 + $0x280] sm:$0xff] }
 0x30e   :  { %2925 = vmatprep.mubr.f32.mxu0 %v2504_v24  ;;  %v1639_v35 = vpop.f32.mrf.mxu1  ;;  %3645 = vmatpush3.msra.mxu1 %v2629_v59 }
 0x30f   :  { %v1640_v10 = vadd.f32 %v1639_v35, %v6415_v41  ;;  %v1800_v8 = vpop.f32.mrf.mxu0  ;;  %3646 = vmatprep.subr.mxu1 %v2644_v30  ;;  %3812 = vmatprep.subr.mxu0 %v2661_v46  ;;  %v1799_v53 = vadd.f32 %v1798_v54, %v1638_v56  ;;  %v2530_v54 = vmax.f32 %v1491_v1, 0.0  ;;  %v2625_v35 = vld [vmem:[%s7105_s7 + $0x220] sm:$0xff]  ;;  %v2529_v56 = vmax.f32 %v6220_v37, 0.0 }
 0x310   :  { %2781 = vmatmul.mubr.f32.gmra.mxu1 %v2501_v6  ;;  %3813 = vmatpush3.msra.mxu0 %v2661_v46  ;;  %v2522_v46 = vmax.f32 %v6190_v44, 0.0  ;;  %v2657_v44 = vld [vmem:[%s7105_s7 + $0x320] sm:$0xff] }
 0x311   :  { %2785 = vmatprep.mubr.f32.mxu1 %v2509_v32  ;;  %v1801_v13 = vadd.f32 %v1800_v8, %v1640_v10  ;;  %2926 = vmatmul.mubr.f32.gmra.mxu0 %v2503_v60  ;;  %v2517_v24 = vmax.f32 %v1799_v53, 0.0  ;;  %v1342_v32 = vadd.f32 %v6277_v31, %v6406_v22  ;;  %v2640_v31 = vld [vmem:[%s7105_s7 + $0x298] sm:$0xff]  ;;  %v2537_v10 = vmax.f32 %v1497_v40, 0.0  ;;  %v2621_v1 = vld [vmem:[%s7105_s7 + $0x200] sm:$0xff] }
 0x312   :  { %v1643_v9 = vpop.f32.mrf.mxu1  ;;  %2930 = vmatprep.mubr.f32.mxu0 %v2511_v36  ;;  %3647 = vmatpush3.msra.mxu1 %v2628_v50 }
 0x313   :  { %v2518_v25 = vmax.f32 %v1801_v13, 0.0  ;;  %v1644_v61 = vadd.f32 %v1643_v9, %v6442_v18  ;;  %v1804_v62 = vpop.f32.mrf.mxu0  ;;  %3648 = vmatprep.subr.mxu1 %v2643_v4  ;;  %3814 = vmatprep.subr.mxu0 %v2660_v43  ;;  %v1503_v50 = vadd.f32 %v6284_v19, %v1342_v32  ;;  %v1348_v4 = vadd.f32 %v6310_v20, %v6406_v22  ;;  %v2639_v19 = vld [vmem:[%s7105_s7 + $0x290] sm:$0xff] }
 0x314   :  { %2786 = vmatmul.mubr.f32.gmra.mxu1 %v2508_v63  ;;  %v1645_v27 = vpop.f32.mrf.mxu1  ;;  %3815 = vmatpush3.msra.mxu0 %v2660_v43  ;;  %v2624_v63 = vld [vmem:[%s7105_s7 + $0x218] sm:$0xff] }
 0x315   :  { %2790 = vmatprep.mubr.f32.mxu1 %v2516_v57  ;;  %v1646_v16 = vadd.f32 %v1645_v27, %v6415_v41  ;;  %v1806_v5 = vpop.f32.mrf.mxu0  ;;  %2931 = vmatmul.mubr.f32.gmra.mxu0 %v2510_v48  ;;  %v1805_v28 = vadd.f32 %v1804_v62, %v1644_v61  ;;  %v2623_v48 = vld [vmem:[%s7105_s7 + $0x210] sm:$0xff]  ;;  %v2544_v53 = vmax.f32 %v1503_v50, 0.0  ;;  %v2638_v62 = vld [vmem:[%s7105_s7 + $0x288] sm:$0xff] }
 0x316   :  { %2935 = vmatprep.mubr.f32.mxu0 %v2518_v25  ;;  %3649 = vmatpush3.msra.mxu1 %v2627_v34  ;;  %v1509_v25 = vadd.f32 %v6319_v2, %v1348_v4  ;;  %v2543_v2 = vmax.f32 %v6282_v11, 0.0  ;;  %v2654_v11 = vld [vmem:[%s7105_s7 + $0x308] sm:$0xff] }
 0x317   :  { %v1807_v39 = vadd.f32 %v1806_v5, %v1646_v16  ;;  %3650 = vmatprep.subr.mxu1 %v2642_v45  ;;  %3816 = vmatprep.subr.mxu0 %v2659_v52  ;;  %v2524_v38 = vmax.f32 %v1805_v28, 0.0 }
 0x318   :  { %2791 = vmatmul.mubr.f32.gmra.mxu1 %v2515_v7  ;;  %v1649_v59 = vpop.f32.mrf.mxu1  ;;  %3817 = vmatpush3.msra.mxu0 %v2659_v52  ;;  %v2551_v7 = vmax.f32 %v1509_v25, 0.0 }
 0x319   :  { %2795 = vmatprep.mubr.f32.mxu1 %v2523_v17  ;;  %v2525_v47 = vmax.f32 %v1807_v39, 0.0  ;;  %v1650_v42 = vadd.f32 %v1649_v59, %v6442_v18  ;;  %v1810_v30 = vpop.f32.mrf.mxu0  ;;  %2936 = vmatmul.mubr.f32.gmra.mxu0 %v2517_v24  ;;  %v1172_v39 = vsub.s32 4, %v7247_v3 }
 0x31a   :  { %v1651_v6 = vpop.f32.mrf.mxu1  ;;  %3651 = vmatpush3.msra.mxu1 %v2626_v49  ;;  %3818 = vmatprep.subr.mxu0 %v2658_v23  ;;  %v2653_v49 = vld [vmem:[%s7105_s7 + $0x300] sm:$0xff] }
 0x31b   :  { %v1652_v58 = vadd.f32 %v1651_v6, %v6415_v41  ;;  %v1812_v36 = vpop.f32.mrf.mxu0  ;;  %2940 = vmatprep.mubr.f32.mxu0 %v2525_v47  ;;  %3652 = vmatprep.subr.mxu1 %v2641_v14  ;;  %v1811_v12 = vadd.f32 %v1810_v30, %v1650_v42  ;;  %v1176_v30 = vsub.s32 5, %v7247_v3 }
 0x31c   :  { %2796 = vmatmul.mubr.f32.gmra.mxu1 %v2522_v46  ;;  %3819 = vmatpush3.msra.mxu0 %v2658_v23  ;;  %v2550_v23 = vmax.f32 %v6317_v55, 0.0  ;;  %v6765_v55 = vld [vmem:[%s7104_s6] sm:$0xff] }
 0x31d   :  { %2800 = vmatprep.mubr.f32.mxu1 %v2530_v54  ;;  %v1813_v60 = vadd.f32 %v1812_v36, %v1652_v58  ;;  %2941 = vmatmul.mubr.f32.gmra.mxu0 %v2524_v38  ;;  %v2531_v37 = vmax.f32 %v1811_v12, 0.0  ;;  %v6768_v32 = vrot.slane %v6765_v55, %v1172_v39  ;;  %v6771_v58 = vrot.slane %v6765_v55, %v1176_v30 }
 0x31e   :  { %v1655_v8 = vpop.f32.mrf.mxu1  ;;  %3653 = vmatpush3.msra.mxu1 %v2625_v35  ;;  %3820 = vmatprep.subr.mxu0 %v2657_v44 }
 0x31f   :  { %v2532_v43 = vmax.f32 %v1813_v60, 0.0  ;;  %v1656_v13 = vadd.f32 %v1655_v8, %v6442_v18  ;;  %v1816_v51 = vpop.f32.mrf.mxu0  ;;  %3654 = vmatprep.subr.mxu1 %v2640_v31  ;;  %3821 = vmatpush3.msra.mxu0 %v2657_v44 }
 0x320   :  { %2801 = vmatmul.mubr.f32.gmra.mxu1 %v2529_v56  ;;  %v1657_v57 = vpop.f32.mrf.mxu1  ;;  %3822 = vmatprep.subr.mxu0 %v2656_v21 }
 0x321   :  { %2805 = vmatprep.mubr.f32.mxu1 %v2537_v10  ;;  %v1658_v20 = vadd.f32 %v1657_v57, %v6415_v41  ;;  %v1818_v22 = vpop.f32.mrf.mxu0  ;;  %2945 = vmatprep.mubr.f32.mxu0 %v2532_v43  ;;  %v1817_v9 = vadd.f32 %v1816_v51, %v1656_v13 }
 0x322   :  { %2946 = vmatmul.mubr.f32.gmra.mxu0 %v2531_v37  ;;  %3655 = vmatpush3.msra.mxu1 %v2624_v63 }
 0x323   :  { %v1819_v61 = vadd.f32 %v1818_v22, %v1658_v20  ;;  %3656 = vmatprep.subr.mxu1 %v2639_v19  ;;  %3823 = vmatpush3.msra.mxu0 %v2656_v21  ;;  %v2538_v16 = vmax.f32 %v1817_v9, 0.0 }
 0x324   :  { %2806 = vmatmul.mubr.f32.gmra.mxu1 %v2536_v26  ;;  %v1661_v34 = vpop.f32.mrf.mxu1  ;;  %3824 = vmatprep.subr.mxu0 %v2655_v29 }
 0x325   :  { %2810 = vmatprep.mubr.f32.mxu1 %v2544_v53  ;;  %v2539_v27 = vmax.f32 %v1819_v61, 0.0  ;;  %v1662_v45 = vadd.f32 %v1661_v34, %v6442_v18  ;;  %v1822_v52 = vpop.f32.mrf.mxu0  ;;  %3657 = vmatpush3.msra.mxu1 %v2623_v48 }
 0x326   :  { %v1663_v5 = vpop.f32.mrf.mxu1  ;;  %3658 = vmatprep.subr.mxu1 %v2638_v62  ;;  %3825 = vmatpush3.msra.mxu0 %v2655_v29 }
 0x327   :  { %v1664_v17 = vadd.f32 %v1663_v5, %v6415_v41  ;;  %v1824_v15 = vpop.f32.mrf.mxu0  ;;  %2950 = vmatprep.mubr.f32.mxu0 %v2539_v27  ;;  %3659 = vmatpush3.msra.mxu1 %v2622_v33  ;;  %v1823_v24 = vadd.f32 %v1822_v52, %v1662_v45 }
 0x328   :  { %2811 = vmatmul.mubr.f32.gmra.mxu1 %v2543_v2  ;;  %2951 = vmatmul.mubr.f32.gmra.mxu0 %v2538_v16 }
 0x329   :  { %2815 = vmatprep.mubr.f32.mxu1 %v2551_v7  ;;  %v1825_v28 = vadd.f32 %v1824_v15, %v1664_v17  ;;  %3660 = vmatprep.subr.mxu1 %v2637_v0  ;;  %v2545_v46 = vmax.f32 %v1823_v24, 0.0 }
 0x32a   :  { %v1667_v59 = vpop.f32.mrf.mxu1  ;;  %3661 = vmatpush3.msra.mxu1 %v2621_v1  ;;  %3826 = vmatprep.subr.mxu0 %v2654_v11 }
 0x32b   :  { %v2546_v14 = vmax.f32 %v1825_v28, 0.0  ;;  %v1668_v47 = vadd.f32 %v1667_v59, %v6442_v18  ;;  %v1828_v42 = vpop.f32.mrf.mxu0  ;;  %3827 = vmatpush3.msra.mxu0 %v2654_v11 }
 0x32c   :  { %2816 = vmatmul.mubr.f32.gmra.mxu1 %v2550_v23  ;;  %v1669_v40 = vpop.f32.mrf.mxu1  ;;  %3828 = vmatprep.subr.mxu0 %v2653_v49 }
 0x32d   :  { %v1670_v6 = vadd.f32 %v1669_v40, %v6415_v41  ;;  %v1830_v54 = vpop.f32.mrf.mxu0  ;;  %2955 = vmatprep.mubr.f32.mxu0 %v2546_v14  ;;  %3829 = vmatpush3.msra.mxu0 %v2653_v49  ;;  %v1829_v18 = vadd.f32 %v1828_v42, %v1668_v47 }
 0x32e   :  { %2956 = vmatmul.mubr.f32.gmra.mxu0 %v2545_v46 }
 0x32f   :  { %v1831_v38 = vadd.f32 %v1830_v54, %v1670_v6  ;;  %v2552_v12 = vmax.f32 %v1829_v18, 0.0 }
 0x330   :  { %v1899_v36 = vpop.f32.mrf.mxu1 }
 0x331   :  { %v2553_v35 = vmax.f32 %v1831_v38, 0.0  ;;  %v1900_v41 = vadd.f32 %v1899_v36, %v6768_v32  ;;  %v2060_v44 = vpop.f32.mrf.mxu0 }
 0x332   :  { %v1901_v31 = vpop.f32.mrf.mxu1 }
 0x333   :  { %v1902_v60 = vadd.f32 %v1901_v31, %v6771_v58  ;;  %v2062_v21 = vpop.f32.mrf.mxu0  ;;  %2960 = vmatprep.mubr.f32.mxu0 %v2553_v35  ;;  %v2061_v56 = vadd.f32 %v2060_v44, %v1900_v41 }
 0x334   :  { %v1905_v10 = vpop.f32.mrf.mxu1  ;;  %2961 = vmatmul.mubr.f32.gmra.mxu0 %v2552_v12 }
 0x335   :  { %v2063_v8 = vadd.f32 %v2062_v21, %v1902_v60  ;;  %v1906_v50 = vadd.f32 %v1905_v10, %v6768_v32  ;;  %v2066_v4 = vpop.f32.mrf.mxu0  ;;  %v2449_v37 = vmax.f32 %v2061_v56, 0.0 }
 0x336   :  { %v1907_v43 = vpop.f32.mrf.mxu1 }
 0x337   :  { %v2450_v13 = vmax.f32 %v2063_v8, 0.0  ;;  %v1908_v51 = vadd.f32 %v1907_v43, %v6771_v58  ;;  %v2068_v63 = vpop.f32.mrf.mxu0  ;;  %v2067_v57 = vadd.f32 %v2066_v4, %v1906_v50 }
 0x338   :  { %v1911_v19 = vpop.f32.mrf.mxu1 }
 0x339   :  { %v2069_v20 = vadd.f32 %v2068_v63, %v1908_v51  ;;  %v1912_v22 = vadd.f32 %v1911_v19, %v6768_v32  ;;  %v2072_v29 = vpop.f32.mrf.mxu0  ;;  %3030 = vmatprep.mubr.f32.mxu1 %v2450_v13  ;;  %v2456_v25 = vmax.f32 %v2067_v57, 0.0 }
 0x33a   :  { %v1913_v26 = vpop.f32.mrf.mxu1  ;;  %3031 = vmatmul.mubr.f32.vlgmr.msra.gmra.mxu1 %v2449_v37 }
 0x33b   :  { %v2457_v9 = vmax.f32 %v2069_v20, 0.0  ;;  %v1914_v48 = vadd.f32 %v1913_v26, %v6771_v58  ;;  %v2074_v53 = vpop.f32.mrf.mxu0  ;;  %v2073_v61 = vadd.f32 %v2072_v29, %v1912_v22 }
 0x33c   :  { %v1917_v62 = vpop.f32.mrf.mxu1 }
 0x33d   :  { %v2075_v34 = vadd.f32 %v2074_v53, %v1914_v48  ;;  %v1918_v33 = vadd.f32 %v1917_v62, %v6768_v32  ;;  %v2078_v27 = vpop.f32.mrf.mxu0  ;;  %3035 = vmatprep.mubr.f32.mxu1 %v2457_v9  ;;  %v2463_v5 = vmax.f32 %v2073_v61, 0.0 }
 0x33e   :  { %v1919_v45 = vpop.f32.mrf.mxu1  ;;  %3036 = vmatmul.mubr.f32.gmra.mxu1 %v2456_v25 }
 0x33f   :  { %v2464_v52 = vmax.f32 %v2075_v34, 0.0  ;;  %v1920_v2 = vadd.f32 %v1919_v45, %v6771_v58  ;;  %v2080_v16 = vpop.f32.mrf.mxu0  ;;  %v2079_v0 = vadd.f32 %v2078_v27, %v1918_v33 }
 0x340   :  { %v1923_v7 = vpop.f32.mrf.mxu1 }
 0x341   :  { %v2081_v17 = vadd.f32 %v2080_v16, %v1920_v2  ;;  %v1924_v15 = vadd.f32 %v1923_v7, %v6768_v32  ;;  %v2084_v1 = vpop.f32.mrf.mxu0  ;;  %3040 = vmatprep.mubr.f32.mxu1 %v2464_v52  ;;  %v2470_v49 = vmax.f32 %v2079_v0, 0.0 }
 0x342   :  { %v1925_v11 = vpop.f32.mrf.mxu1  ;;  %3041 = vmatmul.mubr.f32.gmra.mxu1 %v2463_v5 }
 0x343   :  { %v2471_v24 = vmax.f32 %v2081_v17, 0.0  ;;  %v1926_v28 = vadd.f32 %v1925_v11, %v6771_v58  ;;  %v2086_v39 = vpop.f32.mrf.mxu0  ;;  %v2085_v23 = vadd.f32 %v2084_v1, %v1924_v15 }
 0x344   :  { %v1929_v59 = vpop.f32.mrf.mxu1 }
 0x345   :  { %v2087_v14 = vadd.f32 %v2086_v39, %v1926_v28  ;;  %v1930_v47 = vadd.f32 %v1929_v59, %v6768_v32  ;;  %v2090_v42 = vpop.f32.mrf.mxu0  ;;  %3045 = vmatprep.mubr.f32.mxu1 %v2471_v24  ;;  %v2477_v54 = vmax.f32 %v2085_v23, 0.0 }
 0x346   :  { %v1931_v30 = vpop.f32.mrf.mxu1  ;;  %3046 = vmatmul.mubr.f32.gmra.mxu1 %v2470_v49 }
 0x347   :  { %v2478_v46 = vmax.f32 %v2087_v14, 0.0  ;;  %v1932_v40 = vadd.f32 %v1931_v30, %v6771_v58  ;;  %v2092_v6 = vpop.f32.mrf.mxu0  ;;  %v2091_v18 = vadd.f32 %v2090_v42, %v1930_v47 }
 0x348   :  { %v1935_v38 = vpop.f32.mrf.mxu1 }
 0x349   :  { %v2093_v36 = vadd.f32 %v2092_v6, %v1932_v40  ;;  %v1936_v35 = vadd.f32 %v1935_v38, %v6768_v32  ;;  %v2096_v41 = vpop.f32.mrf.mxu0  ;;  %3050 = vmatprep.mubr.f32.mxu1 %v2478_v46  ;;  %v2484_v21 = vmax.f32 %v2091_v18, 0.0 }
 0x34a   :  { %v1937_v44 = vpop.f32.mrf.mxu1  ;;  %3051 = vmatmul.mubr.f32.gmra.mxu1 %v2477_v54 }
 0x34b   :  { %v2485_v12 = vmax.f32 %v2093_v36, 0.0  ;;  %v1938_v31 = vadd.f32 %v1937_v44, %v6771_v58  ;;  %v2098_v60 = vpop.f32.mrf.mxu0  ;;  %v2097_v56 = vadd.f32 %v2096_v41, %v1936_v35 }
 0x34c   :  { %v1941_v10 = vpop.f32.mrf.mxu1 }
 0x34d   :  { %v2099_v8 = vadd.f32 %v2098_v60, %v1938_v31  ;;  %v1942_v50 = vadd.f32 %v1941_v10, %v6768_v32  ;;  %v2102_v4 = vpop.f32.mrf.mxu0  ;;  %3055 = vmatprep.mubr.f32.mxu1 %v2485_v12  ;;  %v2491_v37 = vmax.f32 %v2097_v56, 0.0 }
 0x34e   :  { %v1943_v43 = vpop.f32.mrf.mxu1  ;;  %3056 = vmatmul.mubr.f32.gmra.mxu1 %v2484_v21 }
 0x34f   :  { %v2492_v13 = vmax.f32 %v2099_v8, 0.0  ;;  %v1944_v51 = vadd.f32 %v1943_v43, %v6771_v58  ;;  %v2104_v63 = vpop.f32.mrf.mxu0  ;;  %v2103_v57 = vadd.f32 %v2102_v4, %v1942_v50 }
 0x350   :  { %v1947_v19 = vpop.f32.mrf.mxu1 }
 0x351   :  { %v2105_v20 = vadd.f32 %v2104_v63, %v1944_v51  ;;  %v1948_v22 = vadd.f32 %v1947_v19, %v6768_v32  ;;  %v2108_v29 = vpop.f32.mrf.mxu0  ;;  %3060 = vmatprep.mubr.f32.mxu1 %v2492_v13  ;;  %v2498_v25 = vmax.f32 %v2103_v57, 0.0 }
 0x352   :  { %v1949_v26 = vpop.f32.mrf.mxu1  ;;  %3061 = vmatmul.mubr.f32.gmra.mxu1 %v2491_v37 }
 0x353   :  { %v2499_v9 = vmax.f32 %v2105_v20, 0.0  ;;  %v1950_v48 = vadd.f32 %v1949_v26, %v6771_v58  ;;  %v2110_v53 = vpop.f32.mrf.mxu0  ;;  %v2109_v61 = vadd.f32 %v2108_v29, %v1948_v22 }
 0x354   :  { %v1953_v62 = vpop.f32.mrf.mxu1 }
 0x355   :  { %v2111_v34 = vadd.f32 %v2110_v53, %v1950_v48  ;;  %v1954_v33 = vadd.f32 %v1953_v62, %v6768_v32  ;;  %v2114_v27 = vpop.f32.mrf.mxu0  ;;  %3065 = vmatprep.mubr.f32.mxu1 %v2499_v9  ;;  %v2505_v5 = vmax.f32 %v2109_v61, 0.0 }
 0x356   :  { %v1955_v45 = vpop.f32.mrf.mxu1  ;;  %3066 = vmatmul.mubr.f32.gmra.mxu1 %v2498_v25 }
 0x357   :  { %v2506_v52 = vmax.f32 %v2111_v34, 0.0  ;;  %v1956_v2 = vadd.f32 %v1955_v45, %v6771_v58  ;;  %v2116_v16 = vpop.f32.mrf.mxu0  ;;  %v2115_v0 = vadd.f32 %v2114_v27, %v1954_v33  ;;  %v1180_v45 = vsub.s32 6, %v7247_v3 }
 0x358   :  { %v1959_v7 = vpop.f32.mrf.mxu1 }
 0x359   :  { %v2117_v17 = vadd.f32 %v2116_v16, %v1956_v2  ;;  %v1960_v15 = vadd.f32 %v1959_v7, %v6768_v32  ;;  %v2120_v1 = vpop.f32.mrf.mxu0  ;;  %3070 = vmatprep.mubr.f32.mxu1 %v2506_v52  ;;  %v2512_v49 = vmax.f32 %v2115_v0, 0.0 }
 0x35a   :  { %v1961_v11 = vpop.f32.mrf.mxu1  ;;  %3071 = vmatmul.mubr.f32.gmra.mxu1 %v2505_v5 }
 0x35b   :  { %v2513_v24 = vmax.f32 %v2117_v17, 0.0  ;;  %v1962_v28 = vadd.f32 %v1961_v11, %v6771_v58  ;;  %v2122_v39 = vpop.f32.mrf.mxu0  ;;  %v2121_v23 = vadd.f32 %v2120_v1, %v1960_v15  ;;  %v6807_v11 = vrot.slane %v6765_v55, %v1180_v45 }
 0x35c   :  { %v1965_v59 = vpop.f32.mrf.mxu1 }
 0x35d   :  { %v2123_v14 = vadd.f32 %v2122_v39, %v1962_v28  ;;  %v1966_v47 = vadd.f32 %v1965_v59, %v6768_v32  ;;  %v2126_v42 = vpop.f32.mrf.mxu0  ;;  %3075 = vmatprep.mubr.f32.mxu1 %v2513_v24  ;;  %v2519_v54 = vmax.f32 %v2121_v23, 0.0 }
 0x35e   :  { %v1967_v30 = vpop.f32.mrf.mxu1  ;;  %3076 = vmatmul.mubr.f32.gmra.mxu1 %v2512_v49 }
 0x35f   :  { %v2520_v46 = vmax.f32 %v2123_v14, 0.0  ;;  %v1968_v40 = vadd.f32 %v1967_v30, %v6771_v58  ;;  %v2128_v6 = vpop.f32.mrf.mxu0  ;;  %v2127_v18 = vadd.f32 %v2126_v42, %v1966_v47 }
 0x360   :  { %v1971_v38 = vpop.f32.mrf.mxu1 }
 0x361   :  { %v2129_v36 = vadd.f32 %v2128_v6, %v1968_v40  ;;  %v1972_v35 = vadd.f32 %v1971_v38, %v6768_v32  ;;  %v2132_v41 = vpop.f32.mrf.mxu0  ;;  %3080 = vmatprep.mubr.f32.mxu1 %v2520_v46  ;;  %v2526_v21 = vmax.f32 %v2127_v18, 0.0 }
 0x362   :  { %v1973_v44 = vpop.f32.mrf.mxu1  ;;  %3081 = vmatmul.mubr.f32.gmra.mxu1 %v2519_v54 }
 0x363   :  { %v2527_v12 = vmax.f32 %v2129_v36, 0.0  ;;  %v1974_v31 = vadd.f32 %v1973_v44, %v6771_v58  ;;  %v2134_v60 = vpop.f32.mrf.mxu0  ;;  %v2133_v56 = vadd.f32 %v2132_v41, %v1972_v35 }
 0x364   :  { %v1977_v10 = vpop.f32.mrf.mxu1 }
 0x365   :  { %v2135_v8 = vadd.f32 %v2134_v60, %v1974_v31  ;;  %v1978_v50 = vadd.f32 %v1977_v10, %v6768_v32  ;;  %v2138_v4 = vpop.f32.mrf.mxu0  ;;  %3085 = vmatprep.mubr.f32.mxu1 %v2527_v12  ;;  %v2533_v37 = vmax.f32 %v2133_v56, 0.0 }
 0x366   :  { %v1979_v43 = vpop.f32.mrf.mxu1  ;;  %3086 = vmatmul.mubr.f32.gmra.mxu1 %v2526_v21 }
 0x367   :  { %v2534_v13 = vmax.f32 %v2135_v8, 0.0  ;;  %v1980_v51 = vadd.f32 %v1979_v43, %v6771_v58  ;;  %v2140_v63 = vpop.f32.mrf.mxu0  ;;  %v2139_v57 = vadd.f32 %v2138_v4, %v1978_v50 }
 0x368   :  { %v1983_v19 = vpop.f32.mrf.mxu1 }
 0x369   :  { %v2141_v20 = vadd.f32 %v2140_v63, %v1980_v51  ;;  %v1984_v22 = vadd.f32 %v1983_v19, %v6768_v32  ;;  %v2144_v29 = vpop.f32.mrf.mxu0  ;;  %3090 = vmatprep.mubr.f32.mxu1 %v2534_v13  ;;  %v2540_v25 = vmax.f32 %v2139_v57, 0.0 }
 0x36a   :  { %v1985_v26 = vpop.f32.mrf.mxu1  ;;  %3091 = vmatmul.mubr.f32.gmra.mxu1 %v2533_v37 }
 0x36b   :  { %v2541_v9 = vmax.f32 %v2141_v20, 0.0  ;;  %v1986_v48 = vadd.f32 %v1985_v26, %v6771_v58  ;;  %v2146_v53 = vpop.f32.mrf.mxu0  ;;  %v2145_v61 = vadd.f32 %v2144_v29, %v1984_v22 }
 0x36c   :  { %v1989_v62 = vpop.f32.mrf.mxu1 }
 0x36d   :  { %v2147_v34 = vadd.f32 %v2146_v53, %v1986_v48  ;;  %v1990_v33 = vadd.f32 %v1989_v62, %v6768_v32  ;;  %v2150_v27 = vpop.f32.mrf.mxu0  ;;  %3095 = vmatprep.mubr.f32.mxu1 %v2541_v9  ;;  %v2547_v0 = vmax.f32 %v2145_v61, 0.0 }
 0x36e   :  { %v1991_v52 = vpop.f32.mrf.mxu1  ;;  %3096 = vmatmul.mubr.f32.gmra.mxu1 %v2540_v25 }
 0x36f   :  { %v2548_v2 = vmax.f32 %v2147_v34, 0.0  ;;  %v1992_v16 = vadd.f32 %v1991_v52, %v6771_v58  ;;  %v2152_v5 = vpop.f32.mrf.mxu0  ;;  %v2151_v7 = vadd.f32 %v2150_v27, %v1990_v33 }
 0x370   :  { %v3342_v17 = vpop.f32.mrf.mxu1 }
 0x371   :  { %v2153_v15 = vadd.f32 %v2152_v5, %v1992_v16  ;;  %v3422_v1 = vpop.f32.mrf.mxu0  ;;  %3100 = vmatprep.mubr.f32.mxu1 %v2548_v2  ;;  %v2554_v39 = vmax.f32 %v2151_v7, 0.0 }
 0x372   :  { %v3343_v32 = vpop.f32.mrf.mxu1  ;;  %3101 = vmatmul.mubr.f32.gmra.mxu1 %v2547_v0 }
 0x373   :  { %v2555_v24 = vmax.f32 %v2153_v15, 0.0  ;;  %v3344_v28 = vadd.f32 %v3343_v32, %v3342_v17  ;;  %v3423_v3 = vpop.f32.mrf.mxu0 }
 0x374   :  { %v3345_v49 = vpop.f32.mrf.mxu1  ;;  %v3424_v58 = vadd.f32 %v3423_v3, %v3422_v1 }
 0x375   :  { %v2222_v23 = vadd.f32 %v3344_v28, %v6807_v11  ;;  %v3425_v59 = vpop.f32.mrf.mxu0  ;;  %3105 = vmatprep.mubr.f32.mxu1 %v2555_v24 }
 0x376   :  { %v3346_v14 = vpop.f32.mrf.mxu1  ;;  %3106 = vmatmul.mubr.f32.gmra.mxu1 %v2554_v39 }
 0x377   :  { %v2367_v47 = vadd.f32 %v3424_v58, %v2222_v23  ;;  %v3347_v42 = vadd.f32 %v3346_v14, %v3345_v49  ;;  %v3426_v30 = vpop.f32.mrf.mxu0 }
 0x378   :  { %v3348_v46 = vpop.f32.mrf.mxu1  ;;  %v3427_v6 = vadd.f32 %v3426_v30, %v3425_v59 }
 0x379   :  { %v2451_v55 = vmax.f32 %v2367_v47, 0.0  ;;  %v2227_v40 = vadd.f32 %v3347_v42, %v6807_v11  ;;  %v3428_v54 = vpop.f32.mrf.mxu0 }
 0x37a   :  { %v3349_v18 = vpop.f32.mrf.mxu1 }
 0x37b   :  { %v2372_v38 = vadd.f32 %v3427_v6, %v2227_v40  ;;  %v3350_v36 = vadd.f32 %v3349_v18, %v3348_v46  ;;  %v3429_v35 = vpop.f32.mrf.mxu0  ;;  %3830 = vmatprep.mubr.f32.mxu0 %v2451_v55 }
 0x37c   :  { %v3351_v41 = vpop.f32.mrf.mxu1  ;;  %v3430_v31 = vadd.f32 %v3429_v35, %v3428_v54 }
 0x37d   :  { %v2458_v44 = vmax.f32 %v2372_v38, 0.0  ;;  %v2232_v12 = vadd.f32 %v3350_v36, %v6807_v11  ;;  %v3431_v60 = vpop.f32.mrf.mxu0 }
 0x37e   :  { %v3352_v21 = vpop.f32.mrf.mxu1 }
 0x37f   :  { %v2377_v56 = vadd.f32 %v3430_v31, %v2232_v12  ;;  %v3353_v10 = vadd.f32 %v3352_v21, %v3351_v41  ;;  %v3432_v8 = vpop.f32.mrf.mxu0  ;;  %3831 = vmatmul.mubr.f32.vlgmr.msra.gmra.mxu0 %v2458_v44 }
 0x380   :  { %v3354_v50 = vpop.f32.mrf.mxu1  ;;  %v3433_v13 = vadd.f32 %v3432_v8, %v3431_v60 }
 0x381   :  { %v2465_v4 = vmax.f32 %v2377_v56, 0.0  ;;  %v2237_v43 = vadd.f32 %v3353_v10, %v6807_v11  ;;  %v3434_v51 = vpop.f32.mrf.mxu0 }
 0x382   :  { %v3355_v63 = vpop.f32.mrf.mxu1 }
 0x383   :  { %v2382_v37 = vadd.f32 %v3433_v13, %v2237_v43  ;;  %v3356_v57 = vadd.f32 %v3355_v63, %v3354_v50  ;;  %v3435_v19 = vpop.f32.mrf.mxu0  ;;  %3833 = vmatprep.mubr.f32.mxu0 %v2465_v4 }
 0x384   :  { %v3357_v20 = vpop.f32.mrf.mxu1  ;;  %v3436_v26 = vadd.f32 %v3435_v19, %v3434_v51 }
 0x385   :  { %v2472_v22 = vmax.f32 %v2382_v37, 0.0  ;;  %v2242_v29 = vadd.f32 %v3356_v57, %v6807_v11  ;;  %v3437_v9 = vpop.f32.mrf.mxu0 }
 0x386   :  { %v3358_v48 = vpop.f32.mrf.mxu1 }
 0x387   :  { %v2387_v53 = vadd.f32 %v3436_v26, %v2242_v29  ;;  %v3359_v25 = vadd.f32 %v3358_v48, %v3357_v20  ;;  %v3438_v61 = vpop.f32.mrf.mxu0  ;;  %3834 = vmatmul.mubr.f32.gmra.mxu0 %v2472_v22 }
 0x388   :  { %v3360_v62 = vpop.f32.mrf.mxu1  ;;  %v3439_v27 = vadd.f32 %v3438_v61, %v3437_v9 }
 0x389   :  { %v2479_v34 = vmax.f32 %v2387_v53, 0.0  ;;  %v2247_v33 = vadd.f32 %v3359_v25, %v6807_v11  ;;  %v3440_v45 = vpop.f32.mrf.mxu0 }
 0x38a   :  { %v3361_v52 = vpop.f32.mrf.mxu1 }
 0x38b   :  { %v2392_v2 = vadd.f32 %v3439_v27, %v2247_v33  ;;  %v3362_v16 = vadd.f32 %v3361_v52, %v3360_v62  ;;  %v3441_v5 = vpop.f32.mrf.mxu0  ;;  %3836 = vmatprep.mubr.f32.mxu0 %v2479_v34 }
 0x38c   :  { %v3363_v0 = vpop.f32.mrf.mxu1  ;;  %v3442_v15 = vadd.f32 %v3441_v5, %v3440_v45 }
 0x38d   :  { %v2486_v7 = vmax.f32 %v2392_v2, 0.0  ;;  %v2252_v17 = vadd.f32 %v3362_v16, %v6807_v11  ;;  %v3443_v1 = vpop.f32.mrf.mxu0 }
 0x38e   :  { %v3364_v32 = vpop.f32.mrf.mxu1 }
 0x38f   :  { %v2397_v24 = vadd.f32 %v3442_v15, %v2252_v17  ;;  %v3365_v28 = vadd.f32 %v3364_v32, %v3363_v0  ;;  %v3444_v3 = vpop.f32.mrf.mxu0  ;;  %3837 = vmatmul.mubr.f32.gmra.mxu0 %v2486_v7 }
 0x390   :  { %v3366_v39 = vpop.f32.mrf.mxu1  ;;  %v3445_v58 = vadd.f32 %v3444_v3, %v3443_v1 }
 0x391   :  { %v2493_v49 = vmax.f32 %v2397_v24, 0.0  ;;  %v2257_v23 = vadd.f32 %v3365_v28, %v6807_v11  ;;  %v3446_v59 = vpop.f32.mrf.mxu0 }
 0x392   :  { %v3367_v14 = vpop.f32.mrf.mxu1 }
 0x393   :  { %v2402_v47 = vadd.f32 %v3445_v58, %v2257_v23  ;;  %v3368_v42 = vadd.f32 %v3367_v14, %v3366_v39  ;;  %v3447_v30 = vpop.f32.mrf.mxu0  ;;  %3839 = vmatprep.mubr.f32.mxu0 %v2493_v49 }
 0x394   :  { %v3369_v46 = vpop.f32.mrf.mxu1  ;;  %v3448_v6 = vadd.f32 %v3447_v30, %v3446_v59 }
 0x395   :  { %v2500_v55 = vmax.f32 %v2402_v47, 0.0  ;;  %v2262_v40 = vadd.f32 %v3368_v42, %v6807_v11  ;;  %v3449_v54 = vpop.f32.mrf.mxu0 }
 0x396   :  { %v3370_v18 = vpop.f32.mrf.mxu1 }
 0x397   :  { %v2407_v38 = vadd.f32 %v3448_v6, %v2262_v40  ;;  %v3371_v36 = vadd.f32 %v3370_v18, %v3369_v46  ;;  %v3450_v35 = vpop.f32.mrf.mxu0  ;;  %3840 = vmatmul.mubr.f32.gmra.mxu0 %v2500_v55 }
 0x398   :  { %v3372_v41 = vpop.f32.mrf.mxu1  ;;  %v3451_v31 = vadd.f32 %v3450_v35, %v3449_v54 }
 0x399   :  { %v2507_v44 = vmax.f32 %v2407_v38, 0.0  ;;  %v2267_v12 = vadd.f32 %v3371_v36, %v6807_v11  ;;  %v3452_v60 = vpop.f32.mrf.mxu0 }
 0x39a   :  { %v3373_v21 = vpop.f32.mrf.mxu1 }
 0x39b   :  { %v2412_v56 = vadd.f32 %v3451_v31, %v2267_v12  ;;  %v3374_v10 = vadd.f32 %v3373_v21, %v3372_v41  ;;  %v3453_v8 = vpop.f32.mrf.mxu0  ;;  %3842 = vmatprep.mubr.f32.mxu0 %v2507_v44 }
 0x39c   :  { %v3375_v50 = vpop.f32.mrf.mxu1  ;;  %v3454_v13 = vadd.f32 %v3453_v8, %v3452_v60 }
 0x39d   :  { %v2514_v4 = vmax.f32 %v2412_v56, 0.0  ;;  %v2272_v43 = vadd.f32 %v3374_v10, %v6807_v11  ;;  %v3455_v51 = vpop.f32.mrf.mxu0 }
 0x39e   :  { %v3376_v63 = vpop.f32.mrf.mxu1 }
 0x39f   :  { %v2417_v37 = vadd.f32 %v3454_v13, %v2272_v43  ;;  %v3377_v57 = vadd.f32 %v3376_v63, %v3375_v50  ;;  %v3456_v19 = vpop.f32.mrf.mxu0  ;;  %3843 = vmatmul.mubr.f32.gmra.mxu0 %v2514_v4 }
 0x3a0   :  { %v3378_v20 = vpop.f32.mrf.mxu1  ;;  %v3457_v26 = vadd.f32 %v3456_v19, %v3455_v51 }
 0x3a1   :  { %v2521_v22 = vmax.f32 %v2417_v37, 0.0  ;;  %v2277_v29 = vadd.f32 %v3377_v57, %v6807_v11  ;;  %v3458_v9 = vpop.f32.mrf.mxu0 }
 0x3a2   :  { %v3379_v48 = vpop.f32.mrf.mxu1 }
 0x3a3   :  { %v2422_v53 = vadd.f32 %v3457_v26, %v2277_v29  ;;  %v3380_v25 = vadd.f32 %v3379_v48, %v3378_v20  ;;  %v3459_v61 = vpop.f32.mrf.mxu0  ;;  %3845 = vmatprep.mubr.f32.mxu0 %v2521_v22 }
 0x3a4   :  { %v3381_v62 = vpop.f32.mrf.mxu1  ;;  %v3460_v27 = vadd.f32 %v3459_v61, %v3458_v9 }
 0x3a5   :  { %v2528_v34 = vmax.f32 %v2422_v53, 0.0  ;;  %v2282_v33 = vadd.f32 %v3380_v25, %v6807_v11  ;;  %v3461_v45 = vpop.f32.mrf.mxu0 }
 0x3a6   :  { %v3382_v52 = vpop.f32.mrf.mxu1 }
 0x3a7   :  { %v2427_v2 = vadd.f32 %v3460_v27, %v2282_v33  ;;  %v3383_v16 = vadd.f32 %v3382_v52, %v3381_v62  ;;  %v3462_v5 = vpop.f32.mrf.mxu0  ;;  %3846 = vmatmul.mubr.f32.gmra.mxu0 %v2528_v34 }
 0x3a8   :  { %v3384_v0 = vpop.f32.mrf.mxu1  ;;  %v3463_v15 = vadd.f32 %v3462_v5, %v3461_v45 }
 0x3a9   :  { %v2535_v7 = vmax.f32 %v2427_v2, 0.0  ;;  %v2287_v17 = vadd.f32 %v3383_v16, %v6807_v11  ;;  %v3464_v1 = vpop.f32.mrf.mxu0 }
 0x3aa   :  { %v3385_v32 = vpop.f32.mrf.mxu1 }
 0x3ab   :  { %v2432_v24 = vadd.f32 %v3463_v15, %v2287_v17  ;;  %v3386_v28 = vadd.f32 %v3385_v32, %v3384_v0  ;;  %v3465_v3 = vpop.f32.mrf.mxu0  ;;  %3848 = vmatprep.mubr.f32.mxu0 %v2535_v7 }
 0x3ac   :  { %v3387_v39 = vpop.f32.mrf.mxu1  ;;  %v3466_v58 = vadd.f32 %v3465_v3, %v3464_v1 }
 0x3ad   :  { %v2542_v49 = vmax.f32 %v2432_v24, 0.0  ;;  %v2292_v23 = vadd.f32 %v3386_v28, %v6807_v11  ;;  %v3467_v59 = vpop.f32.mrf.mxu0 }
 0x3ae   :  { %v3388_v14 = vpop.f32.mrf.mxu1 }
 0x3af   :  { %v2437_v47 = vadd.f32 %v3466_v58, %v2292_v23  ;;  %v3389_v42 = vadd.f32 %v3388_v14, %v3387_v39  ;;  %v3468_v30 = vpop.f32.mrf.mxu0  ;;  %3849 = vmatmul.mubr.f32.gmra.mxu0 %v2542_v49 }
 0x3b0   :  { %v3502_v46 = vpop.f32.mrf.mxu1  ;;  %v3469_v6 = vadd.f32 %v3468_v30, %v3467_v59 }
 0x3b1   :  { %v2549_v55 = vmax.f32 %v2437_v47, 0.0  ;;  %v2297_v40 = vadd.f32 %v3389_v42, %v6807_v11  ;;  %v6837_v56 = vpop.f32.mrf.mxu0 }
 0x3b2   :  { %v3503_v54 = vpop.f32.mrf.mxu1 }
 0x3b3   :  { %v2442_v18 = vadd.f32 %v3469_v6, %v2297_v40  ;;  %v6825_v38 = vadd.f32 %v3503_v54, %v3502_v46  ;;  %3851 = vmatprep.mubr.f32.mxu0 %v2549_v55  ;;  %v6843_v4 = vpop.f32.mrf.mxu0 }
 0x3b4   :  { %v6827_v36 = vpop.f32.mrf.mxu1 }
 0x3b5   :  { %v2556_v35 = vmax.f32 %v2442_v18, 0.0  ;;  %v6847_v51 = vpop.f32.mrf.mxu0 }
 0x3b6   :  { %v6829_v41 = vpop.f32.mrf.mxu1 }
 0x3b7   :  { %3852 = vmatmul.mubr.f32.gmra.mxu0 %v2556_v35  ;;  %v6853_v19 = vpop.f32.mrf.mxu0 }
 0x3b8   :  { %v3508_v44 = vpop.f32.mrf.mxu1 }
 0x3b9   :  { %v6857_v29 = vpop.f32.mrf.mxu0 }
 0x3ba   :  { %v3509_v12 = vpop.f32.mrf.mxu1 }
 0x3bb   :  { %v6831_v31 = vadd.f32 %v3509_v12, %v3508_v44  ;;  %v6863_v53 = vpop.f32.mrf.mxu0 }
 0x3bc   :  { %v6833_v60 = vpop.f32.mrf.mxu1 }
 0x3bd   :  { %v6867_v62 = vpop.f32.mrf.mxu0 }
 0x3be   :  { %v6835_v21 = vpop.f32.mrf.mxu1 }
 0x3bf   :  { %v6873_v45 = vpop.f32.mrf.mxu0 }
 0x3c0   :  { %v3514_v11 = vpop.f32.mrf.mxu1 }
 0x3c1   :  { %v6877_v16 = vpop.f32.mrf.mxu0 }
 0x3c2   :  { %v3515_v10 = vpop.f32.mrf.mxu1 }
 0x3c3   :  { %v6839_v8 = vadd.f32 %v3515_v10, %v3514_v11  ;;  %v6883_v17 = vpop.f32.mrf.mxu0 }
 0x3c4   :  { %v6841_v50 = vpop.f32.mrf.mxu1 }
 0x3c5   :  { %v6887_v32 = vpop.f32.mrf.mxu0 }
 0x3c6   :  { %v6845_v43 = vpop.f32.mrf.mxu1 }
 0x3c7   :  { %v6891_v3 = vpop.f32.mrf.mxu0 }
 0x3c8   :  { %v3520_v13 = vpop.f32.mrf.mxu1 }
 0x3c9   :  { %v6893_v39 = vpop.f32.mrf.mxu0 }
 0x3ca   :  { %v3521_v63 = vpop.f32.mrf.mxu1 }
 0x3cb   :  { %v6849_v37 = vadd.f32 %v3521_v63, %v3520_v13  ;;  %v6897_v23 = vpop.f32.mrf.mxu0 }
 0x3cc   :  { %v6851_v57 = vpop.f32.mrf.mxu1 }
 0x3cd   :  { %v6901_v59 = vpop.f32.mrf.mxu0 }
 0x3ce   :  { %v6855_v20 = vpop.f32.mrf.mxu1 }
 0x3cf   :  { %v6903_v42 = vpop.f32.mrf.mxu0 }
 0x3d0   :  { %v3526_v22 = vpop.f32.mrf.mxu1 }
 0x3d1   :  { %v6905_v55 = vpop.f32.mrf.mxu0 }
 0x3d2   :  { %v3527_v26 = vpop.f32.mrf.mxu1 }
 0x3d3   :  { %v6859_v9 = vadd.f32 %v3527_v26, %v3526_v22  ;;  %v6907_v6 = vpop.f32.mrf.mxu0 }
 0x3d4   :  { %v6861_v48 = vpop.f32.mrf.mxu1 }
 0x3d5   :  { %v6909_v18 = vpop.f32.mrf.mxu0 }
 0x3d6   :  { %v6865_v25 = vpop.f32.mrf.mxu1 }
 0x3d7   :  { %v6911_v44 = vpop.f32.mrf.mxu0 }
 0x3d8   :  { %v3532_v61 = vpop.f32.mrf.mxu1 }
 0x3d9   :  { %v6913_v11 = vpop.f32.mrf.mxu0 }
 0x3da   :  { %v3533_v34 = vpop.f32.mrf.mxu1  ;;  %7296 = vst [vmem:[#allocation19_spill] sm:$0xff] %v6913_v11 }
 0x3db   :  { %v6869_v33 = vadd.f32 %v3533_v34, %v3532_v61  ;;  %v6917_v13 = vpop.f32.mrf.mxu0 }
 0x3dc   :  { %v6871_v27 = vpop.f32.mrf.mxu1  ;;  %7297 = vst [vmem:[#allocation20_spill] sm:$0xff] %v6917_v13 }
 0x3dd   :  { %7287 = vst [vmem:[#allocation3_spill] sm:$0xff] %v6869_v33  ;;  %7288 = vst [vmem:[#allocation4_spill] sm:$0xff] %v6871_v27  ;;  %v6921_v22 = vpop.f32.mrf.mxu0 }
 0x3de   :  { %v6875_v52 = vpop.f32.mrf.mxu1  ;;  %7298 = vst [vmem:[#allocation7_spill] sm:$0xff] %v6921_v22 }
 0x3df   :  { %7289 = vst [vmem:[#allocation5_spill] sm:$0xff] %v6875_v52  ;;  %v6923_v61 = vpop.f32.mrf.mxu0  ;;  %v3513_v52 = vadd.f32 %v6835_v21, %v6833_v60 }
 0x3e0   :  { %v3538_v2 = vpop.f32.mrf.mxu1  ;;  %7299 = vst [vmem:[#allocation22_spill] sm:$0xff] %v6923_v61 }
 0x3e2   :  { %v3539_v5 = vpop.f32.mrf.mxu1 }
 0x3e3   :  { %v6879_v0 = vadd.f32 %v3539_v5, %v3538_v2  ;;  %v6925_v2 = vpop.f32.mrf.mxu0 }
 0x3e4   :  { %v6881_v7 = vpop.f32.mrf.mxu1  ;;  %7300 = vst [vmem:[#allocation8_spill] sm:$0xff] %v6925_v2  ;;  %v3507_v2 = vadd.f32 %v6829_v41, %v6827_v36 }
 0x3e5   :  { %7290 = vst [vmem:[#allocation12_spill] sm:$0xff] %v6879_v0  ;;  %7291 = vst [vmem:[#allocation13_spill] sm:$0xff] %v6881_v7 }
 0x3e6   :  { %v6885_v15 = vpop.f32.mrf.mxu1 }
 0x3e7   :  { %7292 = vst [vmem:[#allocation14_spill] sm:$0xff] %v6885_v15 }
 0x3e8   :  { %v3544_v1 = vpop.f32.mrf.mxu1 }
 0x3ea   :  { %v3545_v24 = vpop.f32.mrf.mxu1 }
 0x3eb   :  { %v6889_v28 = vadd.f32 %v3545_v24, %v3544_v1  ;;  %v6929_v1 = vpop.f32.mrf.mxu0 }
 0x3ec   :  { %v6895_v49 = vpop.f32.mrf.mxu1  ;;  %7301 = vst [vmem:[#allocation10_spill] sm:$0xff] %v6929_v1 }
 0x3ed   :  { %7293 = vst [vmem:[#allocation15_spill] sm:$0xff] %v6889_v28  ;;  %7294 = vst [vmem:[#allocation2_spill] sm:$0xff] %v6895_v49  ;;  %v6933_v28 = vpop.f32.mrf.mxu0 }
 0x3ee   :  { %v6899_v58 = vpop.f32.mrf.mxu1  ;;  %7302 = vst [vmem:[#allocation18_spill] sm:$0xff] %v6933_v28  ;;  %v3587_v28 = vadd.f32 %v6853_v19, %v6847_v51 }
 0x3ef   :  { %7295 = vst [vmem:[#allocation6_spill] sm:$0xff] %v6899_v58  ;;  %v6937_v49 = vpop.f32.mrf.mxu0 }
 0x3f0   :  { %7303 = vst [vmem:[#allocation25_spill] sm:$0xff] %v6937_v49  ;;  %v6956_v49 = vld [vmem:[%s7106_s8] ss:$0 sm:$0xff] }
 0x3f1   :  { %v6941_v15 = vpop.f32.mrf.mxu0  ;;  %v2743_v36 = vadd.f32 %v6825_v38, %v6956_v49  ;;  %v2758_v38 = vadd.f32 %v3513_v52, %v6956_v49 }
 0x3f2   :  { %7304 = vst [vmem:[#allocation9_spill] sm:$0xff] %v6941_v15  ;;  %v2748_v15 = vadd.f32 %v3507_v2, %v6956_v49 }
 0x3f3   :  { %v6945_v33 = vpop.f32.mrf.mxu0 }
 0x3f4   :  { %7305 = vst [vmem:[#allocation28_spill] sm:$0xff] %v6945_v33  ;;  %v3584_v33 = vadd.f32 %v6843_v4, %v6837_v56  ;;  %v2893_v41 = vadd.f32 %v3587_v28, %v2748_v15  ;;  %v3593_v56 = vadd.f32 %v6873_v45, %v6867_v62  ;;  %v3590_v15 = vadd.f32 %v6863_v53, %v6857_v29 }
 0x3f5   :  { %v6958_v13 = vpop.f32.mrf.mxu0  ;;  %v3519_v29 = vadd.f32 %v6845_v43, %v6841_v50 }
 0x3f6   :  { %7306 = vst [vmem:[#allocation24_spill] sm:$0xff] %v6958_v13  ;;  %v2888_v22 = vadd.f32 %v3584_v33, %v2743_v36  ;;  %v2753_v33 = vadd.f32 %v6831_v31, %v6956_v49  ;;  %v2903_v62 = vadd.f32 %v3593_v56, %v2758_v38 }
 0x3f7   :  { %v6967_v19 = vpop.f32.mrf.mxu0 }
 0x3f8   :  { %v2898_v52 = vadd.f32 %v3590_v15, %v2753_v33 }
 0x3fa   :  { %v3662_v14 = vpop.f32.mrf.mxu1 }
 0x3fc   :  { %v3663_v47 = vpop.f32.mrf.mxu1 }
 0x3fd   :  { %v3664_v51 = vadd.f32 %v3663_v47, %v3662_v14 }
 0x3fe   :  { %v3665_v30 = vpop.f32.mrf.mxu1 }
 0x400   :  { %v3666_v46 = vpop.f32.mrf.mxu1 }
 0x401   :  { %v3667_v11 = vadd.f32 %v3666_v46, %v3665_v30  ;;  %v3033_v30 = vadd.f32 %v3664_v51, %v2888_v22  ;;  %v2763_v22 = vadd.f32 %v6839_v8, %v6956_v49 }
 0x402   :  { %v3668_v40 = vpop.f32.mrf.mxu1 }
 0x403   :  { %v3038_v13 = vadd.f32 %v3667_v11, %v2893_v41  ;;  %v3605_v41 = vadd.f32 %v6903_v42, %v6901_v59  ;;  %v2773_v59 = vadd.f32 %v6849_v37, %v6956_v49 }
 0x404   :  { %v3669_v54 = vpop.f32.mrf.mxu1 }
 0x405   :  { %v3670_v45 = vadd.f32 %v3669_v54, %v3668_v40  ;;  %v2768_v40 = vadd.f32 %v3519_v29, %v6956_v49  ;;  %v3596_v54 = vadd.f32 %v6883_v17, %v6877_v16  ;;  %v3525_v16 = vadd.f32 %v6855_v20, %v6851_v57  ;;  %v7310_v29 = vld [vmem:[#allocation22_spill] sm:$0xff] }
 0x406   :  { %v3671_v35 = vpop.f32.mrf.mxu1 }
 0x407   :  { %v3043_v11 = vadd.f32 %v3670_v45, %v2898_v52  ;;  %v2778_v56 = vadd.f32 %v3525_v16, %v6956_v49  ;;  %v7309_v52 = vld [vmem:[#allocation7_spill] sm:$0xff] }
 0x408   :  { %v3672_v12 = vpop.f32.mrf.mxu1 }
 0x409   :  { %v3673_v28 = vadd.f32 %v3672_v12, %v3671_v35  ;;  %v3599_v35 = vadd.f32 %v6891_v3, %v6887_v32  ;;  %v2908_v3 = vadd.f32 %v3596_v54, %v2763_v22  ;;  %v2923_v42 = vadd.f32 %v3605_v41, %v2778_v56  ;;  %v7316_v41 = vld [vmem:[#allocation18_spill] sm:$0xff] }
 0x40a   :  { %v6915_v10 = vpop.f32.mrf.mxu1 }
 0x40b   :  { %v3048_v53 = vadd.f32 %v3673_v28, %v2903_v62  ;;  %v2913_v36 = vadd.f32 %v3599_v35, %v2768_v40 }
 0x40c   :  { %v6919_v63 = vpop.f32.mrf.mxu1 }
 0x40d   :  { %v3676_v32 = vadd.f32 %v6919_v63, %v6915_v10  ;;  %v3602_v10 = vadd.f32 %v6897_v23, %v6893_v39 }
 0x40e   :  { %v3677_v26 = vpop.f32.mrf.mxu1 }
 0x40f   :  { %v3053_v8 = vadd.f32 %v3676_v32, %v2908_v3  ;;  %v2918_v39 = vadd.f32 %v3602_v10, %v2773_v59  ;;  %v7314_v3 = vld [vmem:[#allocation13_spill] sm:$0xff] }
 0x410   :  { %v3678_v34 = vpop.f32.mrf.mxu1 }
 0x412   :  { %v6927_v5 = vpop.f32.mrf.mxu1 }
 0x414   :  { %v6931_v24 = vpop.f32.mrf.mxu1 }
 0x416   :  { %v6935_v58 = vpop.f32.mrf.mxu1 }
 0x418   :  { %v6939_v0 = vpop.f32.mrf.mxu1 }
 0x419   :  { %v3685_v63 = vadd.f32 %v6939_v0, %v6935_v58  ;;  %v3531_v0 = vadd.f32 %v6865_v25, %v6861_v48 }
 0x41a   :  { %v6943_v7 = vpop.f32.mrf.mxu1 }
 0x41b   :  { %v3068_v23 = vadd.f32 %v3685_v63, %v2923_v42  ;;  %v2788_v28 = vadd.f32 %v3531_v0, %v6956_v49 }
 0x41c   :  { %v6949_v1 = vpop.f32.mrf.mxu1 }
 0x41e   :  { %v6963_v61 = vpop.f32.mrf.mxu1 }
 0x420   :  { %v6971_v27 = vpop.f32.mrf.mxu1 }
 0x422   :  { %v6981_v21 = vpop.f32.mrf.mxu1 }
 0x424   :  { %v6990_v14 = vpop.f32.mrf.mxu1 }
 0x426   :  { %v3695_v43 = vpop.f32.mrf.mxu1 }
 0x43f   :  { %v3832_v2 = vpop.f32.mrf.mxu0 }
 0x440   :  { %v3183_v4 = vadd.f32 %v3832_v2, %v3038_v13  ;;  %v3679_v13 = vadd.f32 %v3678_v34, %v3677_v26  ;;  %v3696_v26 = vpop.f32.mrf.mxu1 }
 0x441   :  { %v3177_v46 = vpop.f32.mrf.mxu0 }
 0x442   :  { %3257 = vst [vmem:[%s7107_s9 + $0x8] sm:$0xff] %v3183_v4  ;;  %v3178_v60 = vadd.f32 %v3177_v46, %v3033_v30  ;;  %v3058_v17 = vadd.f32 %v3679_v13, %v2913_v36  ;;  %v3698_v20 = vpop.f32.mrf.mxu1  ;;  %v3682_v4 = vadd.f32 %v6931_v24, %v6927_v5  ;;  %v3611_v46 = vadd.f32 %v6911_v44, %v6909_v18  ;;  %v7313_v13 = vld [vmem:[#allocation3_spill] sm:$0xff] }
 0x443   :  { %v3608_v5 = vadd.f32 %v6907_v6, %v6905_v55  ;;  %v3691_v24 = vadd.f32 %v6971_v27, %v6963_v61  ;;  %v2783_v18 = vadd.f32 %v6859_v9, %v6956_v49  ;;  %v7307_v6 = vld [vmem:[#allocation4_spill] sm:$0xff]  ;;  %v7308_v27 = vld [vmem:[#allocation5_spill] sm:$0xff]  ;;  %v3694_v36 = vadd.f32 %v6990_v14, %v6981_v21  ;;  %v7319_v14 = vld [vmem:[#allocation10_spill] sm:$0xff] }
 0x444   :  { %3256 = vst [vmem:[%s7107_s9] sm:$0xff] %v3178_v60  ;;  %v3699_v58 = vpop.f32.mrf.mxu1  ;;  %v3063_v37 = vadd.f32 %v3682_v4, %v2918_v39  ;;  %v2933_v44 = vadd.f32 %v3611_v46, %v2788_v28  ;;  %v3688_v60 = vadd.f32 %v6949_v1, %v6943_v7  ;;  %v3537_v61 = vadd.f32 %v7308_v27, %v7307_v6  ;;  %v7311_v7 = vld [vmem:[#allocation19_spill] sm:$0xff]  ;;  %v7312_v1 = vld [vmem:[#allocation20_spill] sm:$0xff] }
 0x445   :  { %v2928_v55 = vadd.f32 %v3608_v5, %v2783_v18  ;;  %v7318_v21 = vld [vmem:[#allocation8_spill] sm:$0xff] }
 0x446   :  { %v3701_v25 = vpop.f32.mrf.mxu1  ;;  %v3078_v33 = vadd.f32 %v3691_v24, %v2933_v44  ;;  %v7320_v39 = vld [vmem:[#allocation12_spill] sm:$0xff] }
 0x447   :  { %v3835_v47 = vpop.f32.mrf.mxu0  ;;  %v3073_v9 = vadd.f32 %v3688_v60, %v2928_v55  ;;  %v2803_v0 = vadd.f32 %v7320_v39, %v6956_v49 }
 0x448   :  { %v3193_v12 = vadd.f32 %v3835_v47, %v3048_v53  ;;  %v3702_v62 = vpop.f32.mrf.mxu1  ;;  %v3617_v53 = vadd.f32 %v7310_v29, %v7309_v52 }
 0x449   :  { %v3187_v31 = vpop.f32.mrf.mxu0  ;;  %v3703_v59 = vadd.f32 %v3702_v62, %v3701_v25 }
 0x44a   :  { %3259 = vst [vmem:[%s7107_s9 + $0x18] sm:$0xff] %v3193_v12  ;;  %v3188_v50 = vadd.f32 %v3187_v31, %v3043_v11  ;;  %v2798_v12 = vadd.f32 %v3537_v61, %v6956_v49  ;;  %v3614_v11 = vadd.f32 %v7312_v1, %v7311_v7  ;;  %v3697_v31 = vadd.f32 %v3696_v26, %v3695_v43  ;;  %v3704_v54 = vpop.f32.mrf.mxu1  ;;  %v7315_v43 = vld [vmem:[#allocation14_spill] sm:$0xff] }
 0x44b   :  { %v3543_v16 = vadd.f32 %v7315_v43, %v7314_v3 }
 0x44c   :  { %3258 = vst [vmem:[%s7107_s9 + $0x10] sm:$0xff] %v3188_v50  ;;  %v2793_v50 = vadd.f32 %v7313_v13, %v6956_v49  ;;  %v2943_v22 = vadd.f32 %v3617_v53, %v2798_v12  ;;  %v3705_v26 = vpop.f32.mrf.mxu1 }
 0x44d   :  { %v2808_v63 = vadd.f32 %v3543_v16, %v6956_v49  ;;  %v3706_v52 = vadd.f32 %v3705_v26, %v3704_v54 }
 0x44e   :  { %v2938_v32 = vadd.f32 %v3614_v11, %v2793_v50  ;;  %v3707_v4 = vpop.f32.mrf.mxu1 }
 0x44f   :  { %v3838_v34 = vpop.f32.mrf.mxu0 }
 0x450   :  { %v3203_v51 = vadd.f32 %v3838_v34, %v3058_v17  ;;  %v3088_v17 = vadd.f32 %v3697_v31, %v2943_v22  ;;  %v3083_v56 = vadd.f32 %v3694_v36, %v2938_v32  ;;  %v3708_v5 = vpop.f32.mrf.mxu1 }
 0x451   :  { %v3197_v2 = vpop.f32.mrf.mxu0  ;;  %v3709_v27 = vadd.f32 %v3708_v5, %v3707_v4 }
 0x452   :  { %3261 = vst [vmem:[%s7107_s9 + $0x28] sm:$0xff] %v3203_v51  ;;  %v3198_v57 = vadd.f32 %v3197_v2, %v3053_v8  ;;  %v7317_v51 = vld [vmem:[#allocation25_spill] sm:$0xff] }
 0x453   :  { %v3623_v8 = vadd.f32 %v7317_v51, %v7316_v41 }
 0x454   :  { %3260 = vst [vmem:[%s7107_s9 + $0x20] sm:$0xff] %v3198_v57  ;;  %v3620_v57 = vadd.f32 %v7319_v14, %v7318_v21 }
 0x456   :  { %v2948_v46 = vadd.f32 %v3620_v57, %v2803_v0 }
 0x457   :  { %v3841_v30 = vpop.f32.mrf.mxu0 }
 0x458   :  { %v3213_v38 = vadd.f32 %v3841_v30, %v3068_v23  ;;  %v2953_v23 = vadd.f32 %v3623_v8, %v2808_v63  ;;  %v3700_v30 = vadd.f32 %v3699_v58, %v3698_v20  ;;  %v7324_v20 = vld [vmem:[#allocation9_spill] sm:$0xff]  ;;  %v7325_v58 = vld [vmem:[#allocation28_spill] sm:$0xff] }
 0x459   :  { %v3207_v15 = vpop.f32.mrf.mxu0  ;;  %v3626_v6 = vadd.f32 %v7325_v58, %v7324_v20 }
 0x45a   :  { %3263 = vst [vmem:[%s7107_s9 + $0x38] sm:$0xff] %v3213_v38  ;;  %v3208_v48 = vadd.f32 %v3207_v15, %v3063_v37  ;;  %v7321_v38 = vld [vmem:[#allocation2_spill] sm:$0xff]  ;;  %v3098_v28 = vadd.f32 %v3703_v59, %v2953_v23  ;;  %v3093_v44 = vadd.f32 %v3700_v30, %v2948_v46 }
 0x45b   :  { %v7322_v37 = vld [vmem:[#allocation6_spill] sm:$0xff] }
 0x45c   :  { %3262 = vst [vmem:[%s7107_s9 + $0x30] sm:$0xff] %v3208_v48  ;;  %v3549_v15 = vadd.f32 %v7322_v37, %v7321_v38  ;;  %v7323_v48 = vld [vmem:[#allocation24_spill] sm:$0xff] }
 0x45d   :  { %v3629_v25 = vadd.f32 %v6967_v19, %v7323_v48 }
 0x45e   :  { %v2818_v55 = vadd.f32 %v3549_v15, %v6956_v49 }
 0x45f   :  { %v3844_v45 = vpop.f32.mrf.mxu0 }
 0x460   :  { %v3223_v47 = vadd.f32 %v3844_v45, %v3078_v33  ;;  %v7326_v33 = vld [vmem:[#allocation15_spill] sm:$0xff]  ;;  %v2963_v45 = vadd.f32 %v3629_v25, %v2818_v55 }
 0x461   :  { %v3217_v35 = vpop.f32.mrf.mxu0  ;;  %v2813_v62 = vadd.f32 %v7326_v33, %v6956_v49 }
 0x462   :  { %3265 = vst [vmem:[%s7107_s9 + $0x48] sm:$0xff] %v3223_v47  ;;  %v3218_v40 = vadd.f32 %v3217_v35, %v3073_v9  ;;  %v3108_v29 = vadd.f32 %v3709_v27, %v2963_v45 }
 0x463   :  { %v2958_v19 = vadd.f32 %v3626_v6, %v2813_v62 }
 0x464   :  { %3264 = vst [vmem:[%s7107_s9 + $0x40] sm:$0xff] %v3218_v40 }
 0x465   :  { %v3103_v9 = vadd.f32 %v3706_v52, %v2958_v19 }
 0x467   :  { %v3847_v34 = vpop.f32.mrf.mxu0 }
 0x468   :  { %v3233_v2 = vadd.f32 %v3847_v34, %v3088_v17 }
 0x469   :  { %v3227_v10 = vpop.f32.mrf.mxu0 }
 0x46a   :  { %3267 = vst [vmem:[%s7107_s9 + $0x58] sm:$0xff] %v3233_v2  ;;  %v3228_v42 = vadd.f32 %v3227_v10, %v3083_v56 }
 0x46c   :  { %3266 = vst [vmem:[%s7107_s9 + $0x50] sm:$0xff] %v3228_v42 }
 0x46f   :  { %v3850_v24 = vpop.f32.mrf.mxu0 }
 0x470   :  { %v3243_v18 = vadd.f32 %v3850_v24, %v3098_v28 }
 0x471   :  { %v3237_v60 = vpop.f32.mrf.mxu0 }
 0x472   :  { %3269 = vst [vmem:[%s7107_s9 + $0x68] sm:$0xff] %v3243_v18  ;;  %v3238_v61 = vadd.f32 %v3237_v60, %v3093_v44 }
 0x474   :  { %3268 = vst [vmem:[%s7107_s9 + $0x60] sm:$0xff] %v3238_v61 }
 0x477   :  { %v3853_v53 = vpop.f32.mrf.mxu0 }
 0x478   :  { %v3253_v47 = vadd.f32 %v3853_v53, %v3108_v29 }
 0x479   :  { %v3247_v35 = vpop.f32.mrf.mxu0 }
 0x47a   :  { %3271 = vst [vmem:[%s7107_s9 + $0x78] sm:$0xff] %v3253_v47  ;;  %v3248_v12 = vadd.f32 %v3247_v35, %v3103_v9 }
 0x47c   :  { %3270 = vst [vmem:[%s7107_s9 + $0x70] sm:$0xff] %v3248_v12 }

</bundles_post_ra>
